<compile_context>
chip_gen: v5e
topology: v5e:2x2
jax: 0.10.0
libtpu: 0.0.40
codegen_flags: <defaults>
</compile_context>

<pallas_src>
import functools

import jax
import jax.numpy as jnp
from jax.experimental import pallas as pl
from jax.experimental.pallas import tpu as pltpu


def _round_up(x, m):
    return ((x + m - 1) // m) * m


# ------------------------------ Pallas kernel ------------------------------ #

def _fused_decoder_kernel(x_ref, w1_ref, b1_ref, w2_ref, b2_ref, w3_ref, b3_ref, o_ref):
    """Fused decoder for one block of bm encoder pixels.

    x : (bm, chan_enc)
    w1: (chan_enc, 128)       b1: (1, 128)        -> y1 (bm, 128)        cols = (p1,q1,d1)
    w2: (128, 2048) blk-diag  b2: (1, 2048)       -> y2 (bm, 2048)       cols = (p1,q1,p2,q2,d2)
    w3: (2048, 64*ci) blk-diag b3: (1, 64*ci)     -> out (bm, 64*ci)     cols = (p1,q1,p2,q2,o)
    """
    cdt = w2_ref.dtype  # MXU compute dtype (f32 or bf16); accumulation is always f32.

    # stage 1: ConvTranspose2d(chan_enc->32, k=2, s=2), BN folded, ReLU
    y1 = jnp.dot(x_ref[...], w1_ref[...], preferred_element_type=jnp.float32)
    y1 = jnp.maximum(y1 + b1_ref[...], 0.0)

    # stage 2: ConvTranspose2d(32->32, k=4, s=4) + bias, Sigmoid (block-diagonal weight)
    y2 = jnp.dot(y1.astype(cdt), w2_ref[...], preferred_element_type=jnp.float32)
    y2 = jax.nn.sigmoid(y2 + b2_ref[...])          # f32 sigmoid (works on all generations)

    # stage 3: Conv2d 1x1 (32->chan_in) + bias, linear (block-diagonal weight)
    y3 = jnp.dot(y2.astype(cdt), w3_ref[...], preferred_element_type=jnp.float32)
    o_ref[...] = (y3 + b3_ref[...]).astype(o_ref.dtype)


def _fused_decoder_call(xmat, w1, b1, w2bd, b2bd, w3bd, b3bd, *, block_m):
    Mp, chan_enc = xmat.shape
    n_out = w3bd.shape[1]
    grid = (Mp // block_m,)
    return pl.pallas_call(
        _fused_decoder_kernel,
        out_shape=jax.ShapeDtypeStruct((Mp, n_out), jnp.float32),
        grid=grid,
        in_specs=[
            pl.BlockSpec((block_m, chan_enc), lambda i: (i, 0)),
            # Weights / biases: constant block index -> fetched once, stay VMEM-resident
            # across grid steps (no per-step re-DMA).
            pl.BlockSpec(w1.shape, lambda i: (0, 0)),
            pl.BlockSpec(b1.shape, lambda i: (0, 0)),
            pl.BlockSpec(w2bd.shape, lambda i: (0, 0)),
            pl.BlockSpec(b2bd.shape, lambda i: (0, 0)),
            pl.BlockSpec(w3bd.shape, lambda i: (0, 0)),
            pl.BlockSpec(b3bd.shape, lambda i: (0, 0)),
        ],
        out_specs=pl.BlockSpec((block_m, n_out), lambda i: (i, 0)),
        compiler_params=pltpu.CompilerParams(
            dimension_semantics=("parallel",),
        ),
    )(xmat, w1, b1, w2bd, b2bd, w3bd, b3bd)


# --------------------------------- wrapper --------------------------------- #

def init_decoder_params(key, chan_in, chan_enc):
    k1, k2, k3, k4, k5 = jax.random.split(key, 5)
    return {
        # ConvTranspose2d weight layout: (in, out, kh, kw)
        "w1": 0.1 * jax.random.normal(k1, (chan_enc, 32, 2, 2), jnp.float32),
        "bn_gamma": jnp.ones((32,), jnp.float32),
        "bn_beta": jnp.zeros((32,), jnp.float32),
        "bn_mean": jnp.zeros((32,), jnp.float32),
        "bn_var": jnp.ones((32,), jnp.float32),
        "w2": 0.1 * jax.random.normal(k2, (32, 32, 4, 4), jnp.float32),
        "b2": 0.1 * jax.random.normal(k3, (32,), jnp.float32),
        # Conv2d weight layout: (out, in, 1, 1)
        "w3": 0.1 * jax.random.normal(k4, (chan_in, 32, 1, 1), jnp.float32),
        "b3": 0.1 * jax.random.normal(k5, (chan_in,), jnp.float32),
    }


@functools.partial(
    jax.jit,
    static_argnames=("chan_in", "chan_enc", "enc_hw", "block_m", "compute_dtype"),
)
def decoder_forward(params, encs, *, chan_in, chan_enc, enc_hw, block_m=256,
                    compute_dtype=jnp.float32):
    B = encs.shape[0]
    H, W = enc_hw
    M = B * H * W
    eps = 1e-5
    cdt = compute_dtype

    # ---- fold eval-mode BatchNorm into the deconv-1 weight / bias ----
    bn_scale = params["bn_gamma"] / jnp.sqrt(params["bn_var"] + eps)
    bn_shift = params["bn_beta"] - params["bn_mean"] * bn_scale

    # ---- pack weights for the fused kernel (tiny, done once per call) ----
    # Stage 1: columns ordered (p1, q1, d1)
    w1f = params["w1"] * bn_scale[None, :, None, None]                    # (ce, 32, 2, 2)
    w1m = jnp.transpose(w1f, (0, 2, 3, 1)).reshape(chan_enc, 4 * 32)      # (ce, 128)
    b1m = jnp.tile(bn_shift, 4).reshape(1, 4 * 32)

    # Stage 2: per 32-channel group, columns ordered (p2, q2, d2); block-diag over (p1,q1)
    w2m = jnp.transpose(params["w2"], (0, 2, 3, 1)).reshape(32, 16 * 32)  # (32, 512)
    w2bd = jnp.kron(jnp.eye(4, dtype=w2m.dtype), w2m)                     # (128, 2048)
    b2bd = jnp.tile(params["b2"], 64).reshape(1, 4 * 16 * 32)

    # Stage 3: block-diag over the 64 sub-pixels; output columns (p1,q1,p2,q2,o)
    w3m = params["w3"].reshape(chan_in, 32).T                             # (32, chan_in)
    w3bd = jnp.kron(jnp.eye(64, dtype=w3m.dtype), w3m)                    # (2048, 64*ci)
    b3bd = jnp.tile(params["b3"], 64).reshape(1, 64 * chan_in)

    # ---- input: NCHW encoding -> pixel-major (B*H*W, chan_enc) matrix (tiny) ----
    x = encs.reshape(B, chan_enc, H, W)
    xmat = jnp.transpose(x, (0, 2, 3, 1)).reshape(M, chan_enc)

    # ---- blocked grid: fixed block_m, pad M up; never a full-M fallback ----
    block_m = _round_up(block_m, 16)
    block_m = max(16, min(block_m, _round_up(M, 16)))
    Mp = _round_up(M, block_m)
    if Mp != M:
        xmat = jnp.pad(xmat, ((0, Mp - M), (0, 0)))

    ymat = _fused_decoder_call(
        xmat.astype(cdt),
        w1m.astype(cdt), b1m.astype(jnp.float32),
        w2bd.astype(cdt), b2bd.astype(jnp.float32),
        w3bd.astype(cdt), b3bd.astype(jnp.float32),
        block_m=block_m,
    )
    ymat = ymat[:M]

    # ---- single depth-to-space + NCHW rearrange of the final output (JAX glue) ----
    y = ymat.reshape(B, H, W, 2, 2, 4, 4, chan_in)       # (b, i, j, p1, q1, p2, q2, o)
    y = jnp.transpose(y, (0, 7, 1, 3, 5, 2, 4, 6))        # (b, o, i, p1, p2, j, q1, q2)
    return y.reshape(B, chan_in, 8 * H, 8 * W)


# ------------------------------- reference --------------------------------- #

def decoder_reference(params, encs, chan_in, chan_enc, enc_hw):
    """Pure-JAX reference (direct transposed-conv einsums)."""
    B = encs.shape[0]
    H, W = enc_hw
    x = encs.reshape(B, chan_enc, H, W)
    eps = 1e-5
    # deconv 1 + BN + ReLU
    y = jnp.einsum("bcij,cdpq->bdipjq", x, params["w1"]).reshape(B, 32, 2 * H, 2 * W)
    scale = params["bn_gamma"] / jnp.sqrt(params["bn_var"] + eps)
    shift = params["bn_beta"] - params["bn_mean"] * scale
    y = y * scale[None, :, None, None] + shift[None, :, None, None]
    y = jnp.maximum(y, 0.0)
    # deconv 2 + bias + Sigmoid
    y = jnp.einsum("bcij,cdpq->bdipjq", y, params["w2"]).reshape(B, 32, 8 * H, 8 * W)
    y = jax.nn.sigmoid(y + params["b2"][None, :, None, None])
    # 1x1 conv + bias (linear)
    y = jnp.einsum("bcij,dc->bdij", y, params["w3"][:, :, 0, 0]) + params["b3"][None, :, None, None]
    return y


if __name__ == "__main__":
    chan_in = 3
    chan_enc = 4
    enc_hw = (4, 4)
    batch = 2

    key = jax.random.PRNGKey(0)
    pkey, xkey = jax.random.split(key)
    params = init_decoder_params(pkey, chan_in, chan_enc)
    encs = jax.random.normal(xkey, (batch, chan_enc * enc_hw[0] * enc_hw[1]), jnp.float32)

    ref = jax.block_until_ready(decoder_reference(params, encs, chan_in, chan_enc, enc_hw))

    # f32 path (exact eval-mode semantics)
    out = decoder_forward(params, encs, chan_in=chan_in, chan_enc=chan_enc, enc_hw=enc_hw)
    out = jax.block_until_ready(out)
    assert out.shape == (batch, chan_in, 8 * enc_hw[0], 8 * enc_hw[1]), out.shape
    assert jnp.allclose(out, ref, rtol=1e-4, atol=1e-4), float(jnp.max(jnp.abs(out - ref)))

    # bf16 compute path (v6e/v7x): bf16 weights/activations on the MXU, f32 accumulation.
    out_bf16 = decoder_forward(params, encs, chan_in=chan_in, chan_enc=chan_enc,
                               enc_hw=enc_hw, compute_dtype=jnp.bfloat16)
    out_bf16 = jax.block_until_ready(out_bf16)
    assert jnp.allclose(out_bf16, ref, rtol=5e-2, atol=5e-2), \
        float(jnp.max(jnp.abs(out_bf16 - ref)))

    print("KERNEL_OK")
</pallas_src>

<mosaic_0001>
module attributes {stable_mosaic.version = 11 : i64} {
  func.func @_fused_decoder_kernel(%arg0: i32, %arg1: memref<32x4xf32, #tpu.memory_space<vmem>>, %arg2: memref<4x128xf32, #tpu.memory_space<vmem>>, %arg3: memref<1x128xf32, #tpu.memory_space<vmem>>, %arg4: memref<128x2048xf32, #tpu.memory_space<vmem>>, %arg5: memref<1x2048xf32, #tpu.memory_space<vmem>>, %arg6: memref<2048x192xf32, #tpu.memory_space<vmem>>, %arg7: memref<1x192xf32, #tpu.memory_space<vmem>>, %arg8: memref<32x192xf32, #tpu.memory_space<vmem>>) attributes {dimension_semantics = [#tpu.dimension_semantics<parallel>], iteration_bounds = array<i64: 1>, scalar_prefetch = 0 : i64, scratch_operands = 0 : i64, tpu.core_type = #tpu.core_type<tc>, window_params = [{transform_indices = @transform_0, window_bounds = array<i64: 32, 4>}, {pipeline_mode = #tpu.pipeline_mode<synchronous>, transform_indices = @transform_1, window_bounds = array<i64: 4, 128>}, {pipeline_mode = #tpu.pipeline_mode<synchronous>, transform_indices = @transform_2, window_bounds = array<i64: 1, 128>}, {pipeline_mode = #tpu.pipeline_mode<synchronous>, transform_indices = @transform_3, window_bounds = array<i64: 128, 2048>}, {pipeline_mode = #tpu.pipeline_mode<synchronous>, transform_indices = @transform_4, window_bounds = array<i64: 1, 2048>}, {pipeline_mode = #tpu.pipeline_mode<synchronous>, transform_indices = @transform_5, window_bounds = array<i64: 2048, 192>}, {pipeline_mode = #tpu.pipeline_mode<synchronous>, transform_indices = @transform_6, window_bounds = array<i64: 1, 192>}, {transform_indices = @transform_7, window_bounds = array<i64: 32, 192>}]} {
    %c0 = arith.constant 0 : index
    %c0_0 = arith.constant 0 : index
    %0 = vector.load %arg1[%c0, %c0_0] : memref<32x4xf32, #tpu.memory_space<vmem>>, vector<32x4xf32>
    %c0_1 = arith.constant 0 : index
    %c0_2 = arith.constant 0 : index
    %1 = vector.load %arg2[%c0_1, %c0_2] : memref<4x128xf32, #tpu.memory_space<vmem>>, vector<4x128xf32>
    %cst = arith.constant dense<0.000000e+00> : vector<32x128xf32>
    %2 = tpu.matmul %0, %1, %cst {dimension_numbers = #tpu.dot_dimension_numbers<[1], [0], [0], [1], [0, 0, 1, 1], [], []>} : vector<32x4xf32>, vector<4x128xf32>, vector<32x128xf32> -> vector<32x128xf32>
    %c0_3 = arith.constant 0 : index
    %c0_4 = arith.constant 0 : index
    %3 = vector.load %arg3[%c0_3, %c0_4] : memref<1x128xf32, #tpu.memory_space<vmem>>, vector<1x128xf32>
    %4 = vector.broadcast %3 : vector<1x128xf32> to vector<32x128xf32>
    %5 = arith.addf %2, %4 : vector<32x128xf32>
    %cst_5 = arith.constant 0.000000e+00 : f32
    %6 = vector.broadcast %cst_5 : f32 to vector<32x128xf32>
    %7 = arith.maximumf %5, %6 : vector<32x128xf32>
    %c0_6 = arith.constant 0 : index
    %c0_7 = arith.constant 0 : index
    %8 = vector.load %arg4[%c0_6, %c0_7] : memref<128x2048xf32, #tpu.memory_space<vmem>>, vector<128x2048xf32>
    %cst_8 = arith.constant dense<0.000000e+00> : vector<32x2048xf32>
    %9 = tpu.matmul %7, %8, %cst_8 {dimension_numbers = #tpu.dot_dimension_numbers<[1], [0], [0], [1], [0, 0, 1, 1], [], []>} : vector<32x128xf32>, vector<128x2048xf32>, vector<32x2048xf32> -> vector<32x2048xf32>
    %c0_9 = arith.constant 0 : index
    %c0_10 = arith.constant 0 : index
    %10 = vector.load %arg5[%c0_9, %c0_10] : memref<1x2048xf32, #tpu.memory_space<vmem>>, vector<1x2048xf32>
    %11 = vector.broadcast %10 : vector<1x2048xf32> to vector<32x2048xf32>
    %12 = arith.addf %9, %11 : vector<32x2048xf32>
    %13 = arith.negf %12 : vector<32x2048xf32>
    %14 = math.exp %13 : vector<32x2048xf32>
    %cst_11 = arith.constant 1.000000e+00 : f32
    %15 = vector.broadcast %cst_11 : f32 to vector<32x2048xf32>
    %16 = arith.addf %15, %14 : vector<32x2048xf32>
    %17 = arith.divf %15, %16 : vector<32x2048xf32>
    %c0_12 = arith.constant 0 : index
    %c0_13 = arith.constant 0 : index
    %18 = vector.load %arg6[%c0_12, %c0_13] : memref<2048x192xf32, #tpu.memory_space<vmem>>, vector<2048x192xf32>
    %cst_14 = arith.constant dense<0.000000e+00> : vector<32x192xf32>
    %19 = tpu.matmul %17, %18, %cst_14 {dimension_numbers = #tpu.dot_dimension_numbers<[1], [0], [0], [1], [0, 0, 1, 1], [], []>} : vector<32x2048xf32>, vector<2048x192xf32>, vector<32x192xf32> -> vector<32x192xf32>
    %c0_15 = arith.constant 0 : index
    %c0_16 = arith.constant 0 : index
    %20 = vector.load %arg7[%c0_15, %c0_16] : memref<1x192xf32, #tpu.memory_space<vmem>>, vector<1x192xf32>
    %21 = vector.broadcast %20 : vector<1x192xf32> to vector<32x192xf32>
    %22 = arith.addf %19, %21 : vector<32x192xf32>
    %c0_17 = arith.constant 0 : index
    %c0_18 = arith.constant 0 : index
    %23 = vector.load %arg8[%c0_17, %c0_18] : memref<32x192xf32, #tpu.memory_space<vmem>>, vector<32x192xf32>
    tpu.vector_store %arg8[%c0_17, %c0_18], %22 {strides = array<i32>} : memref<32x192xf32, #tpu.memory_space<vmem>>, vector<32x192xf32>,
    return
  }
  func.func @transform_0(%arg0: i32) -> (i32, i32) {
    %c0_i32 = arith.constant 0 : i32
    %c0_i32_0 = arith.constant 0 : i32
    return %arg0, %c0_i32 : i32, i32
  }
  func.func @transform_1(%arg0: i32) -> (i32, i32) {
    %c0_i32 = arith.constant 0 : i32
    %c0_i32_0 = arith.constant 0 : i32
    %c0_i32_1 = arith.constant 0 : i32
    return %c0_i32, %c0_i32_0 : i32, i32
  }
  func.func @transform_2(%arg0: i32) -> (i32, i32) {
    %c0_i32 = arith.constant 0 : i32
    %c0_i32_0 = arith.constant 0 : i32
    %c0_i32_1 = arith.constant 0 : i32
    return %c0_i32, %c0_i32_0 : i32, i32
  }
  func.func @transform_3(%arg0: i32) -> (i32, i32) {
    %c0_i32 = arith.constant 0 : i32
    %c0_i32_0 = arith.constant 0 : i32
    %c0_i32_1 = arith.constant 0 : i32
    return %c0_i32, %c0_i32_0 : i32, i32
  }
  func.func @transform_4(%arg0: i32) -> (i32, i32) {
    %c0_i32 = arith.constant 0 : i32
    %c0_i32_0 = arith.constant 0 : i32
    %c0_i32_1 = arith.constant 0 : i32
    return %c0_i32, %c0_i32_0 : i32, i32
  }
  func.func @transform_5(%arg0: i32) -> (i32, i32) {
    %c0_i32 = arith.constant 0 : i32
    %c0_i32_0 = arith.constant 0 : i32
    %c0_i32_1 = arith.constant 0 : i32
    return %c0_i32, %c0_i32_0 : i32, i32
  }
  func.func @transform_6(%arg0: i32) -> (i32, i32) {
    %c0_i32 = arith.constant 0 : i32
    %c0_i32_0 = arith.constant 0 : i32
    %c0_i32_1 = arith.constant 0 : i32
    return %c0_i32, %c0_i32_0 : i32, i32
  }
  func.func @transform_7(%arg0: i32) -> (i32, i32) {
    %c0_i32 = arith.constant 0 : i32
    %c0_i32_0 = arith.constant 0 : i32
    return %arg0, %c0_i32 : i32, i32
  }
}

</mosaic_0001>

<bundles_post_ra>
// kernel: tile.18
= control target key start
LH: loop header
LB: loop body
LE: loop exit
PB: predicated region body
PF: predicated region fallthrough
CT: control target
= control target key end

     0   :  { %s22_s0 = inlined_call_operand.vmem [shape: f32[32], index: 0, kind: input, shape index: {}]   ;;  %s23_s1 = inlined_call_operand.vmem [shape: f32[4,32], index: 1, kind: output, shape index: {}]  }
   0x1   :  { %v4_v0 = vld [vmem:[%s22_s0] ss:$0 sm:$0xff] }
   0x2   :  { %5 = vst [vmem:[%s23_s1] sm:$0xf] %v4_v0 }

// kernel: tile.19
= control target key start
LH: loop header
LB: loop body
LE: loop exit
PB: predicated region body
PF: predicated region fallthrough
CT: control target
= control target key end

     0   :  { %s37_s8 = smov 32   ;;  %s38_s9 = smov 64   ;;  %vm7_vm0 = vcmask 261120   ;;  %vm13_vm1 = vcmask 1048320   ;;  %vm19_vm2 = vcmask 785920   ;;  %vm25_vm3 = vcmask 523520   ;;  %s55_s0 = inlined_call_operand.vmem [shape: f32[4,32], index: 0, kind: input, shape index: {}]   ;;  %s56_s1 = inlined_call_operand.vmem [shape: f32[1,128], index: 1, kind: output, shape index: {}]  }
   0x1   :  { %v4_v0 = vld [vmem:[%s55_s0] sm:$0xf]  ;;  %s36_s0 = smov 96  }
   0x2   :  { %5 = vst [vmem:[#allocation1] sm:$0xf] %v4_v0 }
   0x9   :  { %v10_v1 = vld [vmem:[#allocation1 + $0x3] sm:$0x1]   ;;  %v22_v2 = vld [vmem:[#allocation1 + $0x1] sm:$0x1]   ;;  %v16_v3 = vld [vmem:[#allocation1 + $0x2] sm:$0x1]  }
   0xa   :  { %11 = vrot.lane.b32.xlu0 %v10_v1, %s36_s0  ;;  %23 = vrot.lane.b32.xlu1 %v22_v2, %s37_s8  ;;  %v6_v4 = vld [vmem:[#allocation1] sm:$0x1]  }
   0xb   :  { %8 = vst.msk [vmem:[#allocation0] sm:$0x1] %vm7_vm0, %v6_v4  }
  0x12   :  { %17 = vrot.lane.b32.xlu0 %v16_v3, %s38_s9 }
  0x7c   :  { %v12_v5 = vpop.permute.xlu0 %11   ;;  %v24_v6 = vpop.permute.xlu1 %23  }
  0x7d   :  { %14 = vst.msk [vmem:[#allocation0] sm:$0x1] %vm13_vm1, %v12_v5  }
  0x84   :  { %v18_v7 = vpop.permute.xlu0 %17  }
  0x85   :  { %20 = vst.msk [vmem:[#allocation0] sm:$0x1] %vm19_vm2, %v18_v7  }
  0x86   :  { %26 = vst.msk [vmem:[#allocation0] sm:$0x1] %vm25_vm3, %v24_v6  }
  0x8d   :  { %v29_v8 = vld [vmem:[#allocation0] sm:$0x1] }
  0x8e   :  { %32 = vst [vmem:[%s56_s1] sm:$0x1] %v29_v8 }

// kernel: mul.4
= control target key start
LH: loop header
LB: loop body
LE: loop exit
PB: predicated region body
PF: predicated region fallthrough
CT: control target
= control target key end

     0   :  { %vm691_vm0 = vcmask 1041409   ;;  %vm695_vm1 = vcmask 1042434   ;;  %vm699_vm2 = vcmask 1043459   ;;  %vm703_vm3 = vcmask 1044484   ;;  %s2570_s27 = smov 96   ;;  %s2571_s11 = smov 64   ;;  %s3723_s0 = inlined_call_operand.vmem [shape: f32[32,4,4,32], index: 0, kind: input, shape index: {}]   ;;  %s3724_s1 = inlined_call_operand.vmem [shape: f32[32,512], index: 1, kind: output, shape index: {}]  }
   0x1   :  { %v2463_v0 = vld [vmem:[%s3723_s0 + $0x70] sm:$0xf]  ;;  %v2467_v1 = vld [vmem:[%s3723_s0 + $0x60] sm:$0xf]  ;;  %v2460_v8 = vld [vmem:[%s3723_s0 + $0x7c] sm:$0xf] }
   0x2   :  { %v2471_v2 = vld [vmem:[%s3723_s0 + $0x50] sm:$0xf]  ;;  %403 = vst [vmem:[#allocation0 + $0xe0] sm:$0xf] %v2463_v0  ;;  %v2475_v3 = vld [vmem:[%s3723_s0 + $0x40] sm:$0xf] }
   0x3   :  { %419 = vst [vmem:[#allocation0 + $0xc0] sm:$0xf] %v2467_v1  ;;  %v2479_v4 = vld [vmem:[%s3723_s0 + $0x30] sm:$0xf]  ;;  %v2483_v5 = vld [vmem:[%s3723_s0 + $0x20] sm:$0xf] }
   0x4   :  { %435 = vst [vmem:[#allocation0 + $0xa0] sm:$0xf] %v2471_v2  ;;  %v2487_v6 = vld [vmem:[%s3723_s0 + $0x10] sm:$0xf]  ;;  %v512_v7 = vld [vmem:[%s3723_s0] sm:$0xf] }
   0x5   :  { %451 = vst [vmem:[#allocation0 + $0x80] sm:$0xf] %v2475_v3  ;;  %v2461_v9 = vld [vmem:[%s3723_s0 + $0x78] sm:$0xf]  ;;  %v2462_v10 = vld [vmem:[%s3723_s0 + $0x74] sm:$0xf] }
   0x6   :  { %467 = vst [vmem:[#allocation0 + $0x60] sm:$0xf] %v2479_v4  ;;  %v2399_v11 = vld [vmem:[%s3723_s0 + $0x170] sm:$0xf]  ;;  %vm707_vm4 = vcmask 1045509   ;;  %vm711_vm5 = vcmask 1046534  }
   0x7   :  { %483 = vst [vmem:[#allocation0 + $0x40] sm:$0xf] %v2483_v5  ;;  %v2403_v12 = vld [vmem:[%s3723_s0 + $0x160] sm:$0xf]  ;;  %vm715_vm6 = vcmask 1047559   ;;  %vm516_vm7 = vcmask 1047556  }
   0x8   :  { %499 = vst [vmem:[#allocation0 + $0x20] sm:$0xf] %v2487_v6  ;;  %v2407_v13 = vld [vmem:[%s3723_s0 + $0x150] sm:$0xf]  ;;  %v2411_v14 = vld [vmem:[%s3723_s0 + $0x140] sm:$0xf] }
   0x9   :  { %513 = vst [vmem:[#allocation0] sm:$0xf] %v512_v7  ;;  %v2415_v15 = vld [vmem:[%s3723_s0 + $0x130] sm:$0xf]  ;;  %v2419_v17 = vld [vmem:[%s3723_s0 + $0x120] sm:$0xf] }
   0xa   :  { %391 = vst [vmem:[#allocation0 + $0xf8] sm:$0xf] %v2460_v8  ;;  %v2423_v21 = vld [vmem:[%s3723_s0 + $0x110] sm:$0xf]  ;;  %v2427_v24 = vld [vmem:[%s3723_s0 + $0x100] sm:$0xf] }
   0xb   :  { %395 = vst [vmem:[#allocation0 + $0xf0] sm:$0xf] %v2461_v9  ;;  %v706_v26 = vld [vmem:[#allocation0 + $0x9e] sm:$0x20]   ;;  %v2396_v27 = vld [vmem:[%s3723_s0 + $0x17c] sm:$0xf] }
   0xc   :  { %399 = vst [vmem:[#allocation0 + $0xe8] sm:$0xf] %v2462_v10  ;;  %v702_v23 = vld [vmem:[#allocation0 + $0x7f] sm:$0x10]   ;;  %v2397_v30 = vld [vmem:[%s3723_s0 + $0x178] sm:$0xf] }
   0xd   :  { %147 = vst [vmem:[#allocation0 + $0x2e0] sm:$0xf] %v2399_v11  ;;  %v698_v16 = vld [vmem:[#allocation0 + $0x60] sm:$0x8]   ;;  %v2398_v33 = vld [vmem:[%s3723_s0 + $0x174] sm:$0xf] }
   0xe   :  { %163 = vst [vmem:[#allocation0 + $0x2c0] sm:$0xf] %v2403_v12  ;;  %v694_v19 = vld [vmem:[#allocation0 + $0x41] sm:$0x4]   ;;  %v2431_v35 = vld [vmem:[%s3723_s0 + $0xf0] sm:$0xf] }
   0xf   :  { %v690_v18 = vld [vmem:[#allocation0 + $0x22] sm:$0x2]   ;;  %179 = vst [vmem:[#allocation0 + $0x2a0] sm:$0xf] %v2407_v13  ;;  %v2439_v39 = vld [vmem:[%s3723_s0 + $0xd0] sm:$0xf] }
  0x10   :  { %v688_v20 = vld [vmem:[#allocation0 + $0x3] sm:$0x1]   ;;  %195 = vst [vmem:[#allocation0 + $0x280] sm:$0xf] %v2411_v14  ;;  %v2447_v41 = vld [vmem:[%s3723_s0 + $0xb0] sm:$0xf] }
  0x11   :  { %v692_v22 = vsel %vm691_vm0, %v690_v18, %v688_v20  ;;  %211 = vst [vmem:[#allocation0 + $0x260] sm:$0xf] %v2415_v15  ;;  %v710_v29 = vld [vmem:[#allocation0 + $0xbd] sm:$0x40]   ;;  %v2455_v43 = vld [vmem:[%s3723_s0 + $0x90] sm:$0xf] }
  0x12   :  { %v696_v25 = vsel %vm695_vm1, %v694_v19, %v692_v22  ;;  %227 = vst [vmem:[#allocation0 + $0x240] sm:$0xf] %v2419_v17  ;;  %v714_v32 = vld [vmem:[#allocation0 + $0xdc] sm:$0x80]   ;;  %v2367_v53 = vld [vmem:[%s3723_s0 + $0x1f0] sm:$0xf] }
  0x13   :  { %v700_v28 = vsel %vm699_vm2, %v698_v16, %v696_v25  ;;  %243 = vst [vmem:[#allocation0 + $0x220] sm:$0xf] %v2423_v21  ;;  %v2435_v37 = vld [vmem:[%s3723_s0 + $0xe0] sm:$0xf]  ;;  %v2375_v59 = vld [vmem:[%s3723_s0 + $0x1d0] sm:$0xf] }
  0x14   :  { %v704_v31 = vsel %vm703_vm3, %v702_v23, %v700_v28  ;;  %259 = vst [vmem:[#allocation0 + $0x200] sm:$0xf] %v2427_v24  ;;  %v2443_v40 = vld [vmem:[%s3723_s0 + $0xc0] sm:$0xf]  ;;  %v2383_v63 = vld [vmem:[%s3723_s0 + $0x1b0] sm:$0xf] }
  0x15   :  { %v708_v34 = vsel %vm707_vm4, %v706_v26, %v704_v31  ;;  %135 = vst [vmem:[#allocation0 + $0x2f8] sm:$0xf] %v2396_v27  ;;  %v2451_v42 = vld [vmem:[%s3723_s0 + $0xa0] sm:$0xf]  ;;  %v2391_v2 = vld [vmem:[%s3723_s0 + $0x190] sm:$0xf] }
  0x16   :  { %v712_v36 = vsel %vm711_vm5, %v710_v29, %v708_v34  ;;  %139 = vst [vmem:[#allocation0 + $0x2f0] sm:$0xf] %v2397_v30  ;;  %v2459_v50 = vld [vmem:[%s3723_s0 + $0x80] sm:$0xf]  ;;  %v2402_v4 = vld [vmem:[%s3723_s0 + $0x164] sm:$0xf] }
  0x17   :  { %v716_v38 = vsel %vm715_vm6, %v714_v32, %v712_v36  ;;  %143 = vst [vmem:[#allocation0 + $0x2e8] sm:$0xf] %v2398_v33  ;;  %v771_v49 = vld [vmem:[#allocation0 + $0x27f] sm:$0x10]   ;;  %v2406_v5 = vld [vmem:[%s3723_s0 + $0x154] sm:$0xf] }
  0x18   :  { %717 = vrot.lane.b32.xlu0 %v716_v38, %s2570_s27  ;;  %275 = vst [vmem:[#allocation0 + $0x1e0] sm:$0xf] %v2431_v35  ;;  %v767_v47 = vld [vmem:[#allocation0 + $0x260] sm:$0x8]   ;;  %v2410_v12 = vld [vmem:[%s3723_s0 + $0x144] sm:$0xf] }
  0x19   :  { %291 = vst [vmem:[#allocation0 + $0x1c0] sm:$0xf] %v2435_v37  ;;  %v763_v45 = vld [vmem:[#allocation0 + $0x241] sm:$0x4]   ;;  %v2414_v15 = vld [vmem:[%s3723_s0 + $0x134] sm:$0xf] }
  0x1a   :  { %v759_v44 = vld [vmem:[#allocation0 + $0x222] sm:$0x2]   ;;  %307 = vst [vmem:[#allocation0 + $0x1a0] sm:$0xf] %v2439_v39  ;;  %v2418_v18 = vld [vmem:[%s3723_s0 + $0x124] sm:$0xf] }
  0x1b   :  { %v757_v46 = vld [vmem:[#allocation0 + $0x203] sm:$0x1]   ;;  %323 = vst [vmem:[#allocation0 + $0x180] sm:$0xf] %v2443_v40  ;;  %v2422_v21 = vld [vmem:[%s3723_s0 + $0x114] sm:$0xf] }
  0x1c   :  { %v761_v48 = vsel %vm691_vm0, %v759_v44, %v757_v46  ;;  %339 = vst [vmem:[#allocation0 + $0x160] sm:$0xf] %v2447_v41  ;;  %v775_v52 = vld [vmem:[#allocation0 + $0x29e] sm:$0x20]   ;;  %v2426_v23 = vld [vmem:[%s3723_s0 + $0x104] sm:$0xf] }
  0x1d   :  { %v765_v51 = vsel %vm695_vm1, %v763_v45, %v761_v48  ;;  %355 = vst [vmem:[#allocation0 + $0x140] sm:$0xf] %v2451_v42  ;;  %v779_v55 = vld [vmem:[#allocation0 + $0x2bd] sm:$0x40]   ;;  %v2366_v24 = vld [vmem:[%s3723_s0 + $0x1f4] sm:$0xf] }
  0x1e   :  { %v769_v54 = vsel %vm699_vm2, %v767_v47, %v765_v51  ;;  %371 = vst [vmem:[#allocation0 + $0x120] sm:$0xf] %v2455_v43  ;;  %v2371_v56 = vld [vmem:[%s3723_s0 + $0x1e0] sm:$0xf]  ;;  %v2370_v26 = vld [vmem:[%s3723_s0 + $0x1e4] sm:$0xf] }
  0x1f   :  { %v773_v57 = vsel %vm703_vm3, %v771_v49, %v769_v54  ;;  %v783_v58 = vld [vmem:[#allocation0 + $0x2dc] sm:$0x80]   ;;  %387 = vst [vmem:[#allocation0 + $0x100] sm:$0xf] %v2459_v50  ;;  %v2374_v27 = vld [vmem:[%s3723_s0 + $0x1d4] sm:$0xf] }
  0x20   :  { %v777_v60 = vsel %vm707_vm4, %v775_v52, %v773_v57  ;;  %19 = vst [vmem:[#allocation0 + $0x3e0] sm:$0xf] %v2367_v53  ;;  %v2379_v61 = vld [vmem:[%s3723_s0 + $0x1c0] sm:$0xf]  ;;  %v2378_v35 = vld [vmem:[%s3723_s0 + $0x1c4] sm:$0xf] }
  0x21   :  { %v781_v62 = vsel %vm711_vm5, %v779_v55, %v777_v60  ;;  %35 = vst [vmem:[#allocation0 + $0x3c0] sm:$0xf] %v2371_v56  ;;  %v2387_v1 = vld [vmem:[%s3723_s0 + $0x1a0] sm:$0xf]  ;;  %v2382_v39 = vld [vmem:[%s3723_s0 + $0x1b4] sm:$0xf] }
  0x22   :  { %v785_v0 = vsel %vm715_vm6, %v783_v58, %v781_v62  ;;  %51 = vst [vmem:[#allocation0 + $0x3a0] sm:$0xf] %v2375_v59  ;;  %v2395_v3 = vld [vmem:[%s3723_s0 + $0x180] sm:$0xf]  ;;  %v2386_v42 = vld [vmem:[%s3723_s0 + $0x1a4] sm:$0xf] }
  0x23   :  { %786 = vrot.lane.b32.xlu1 %v785_v0, %s2570_s27  ;;  %67 = vst [vmem:[#allocation0 + $0x380] sm:$0xf] %v2379_v61  ;;  %v732_v9 = vld [vmem:[#allocation0 + $0x160] sm:$0x8]   ;;  %v2390_v44 = vld [vmem:[%s3723_s0 + $0x194] sm:$0xf] }
  0x24   :  { %83 = vst [vmem:[#allocation0 + $0x360] sm:$0xf] %v2383_v63  ;;  %v728_v7 = vld [vmem:[#allocation0 + $0x141] sm:$0x4]   ;;  %v2394_v45 = vld [vmem:[%s3723_s0 + $0x184] sm:$0xf] }
  0x25   :  { %v724_v6 = vld [vmem:[#allocation0 + $0x122] sm:$0x2]   ;;  %99 = vst [vmem:[#allocation0 + $0x340] sm:$0xf] %v2387_v1  ;;  %v2466_v47 = vld [vmem:[%s3723_s0 + $0x64] sm:$0xf] }
  0x26   :  { %v722_v8 = vld [vmem:[#allocation0 + $0x103] sm:$0x1]   ;;  %115 = vst [vmem:[#allocation0 + $0x320] sm:$0xf] %v2391_v2  ;;  %v2470_v48 = vld [vmem:[%s3723_s0 + $0x54] sm:$0xf] }
  0x27   :  { %v726_v10 = vsel %vm691_vm0, %v724_v6, %v722_v8  ;;  %v736_v11 = vld [vmem:[#allocation0 + $0x17f] sm:$0x10]   ;;  %131 = vst [vmem:[#allocation0 + $0x300] sm:$0xf] %v2395_v3  ;;  %v2474_v57 = vld [vmem:[%s3723_s0 + $0x44] sm:$0xf] }
  0x28   :  { %v730_v13 = vsel %vm695_vm1, %v728_v7, %v726_v10  ;;  %v740_v14 = vld [vmem:[#allocation0 + $0x19e] sm:$0x20]   ;;  %159 = vst [vmem:[#allocation0 + $0x2c8] sm:$0xf] %v2402_v4  ;;  %v2478_v60 = vld [vmem:[%s3723_s0 + $0x34] sm:$0xf] }
  0x29   :  { %v734_v16 = vsel %vm699_vm2, %v732_v9, %v730_v13  ;;  %v744_v17 = vld [vmem:[#allocation0 + $0x1bd] sm:$0x40]   ;;  %175 = vst [vmem:[#allocation0 + $0x2a8] sm:$0xf] %v2406_v5  ;;  %v2482_v63 = vld [vmem:[%s3723_s0 + $0x24] sm:$0xf] }
  0x2a   :  { %v738_v19 = vsel %vm703_vm3, %v736_v11, %v734_v16  ;;  %v748_v20 = vld [vmem:[#allocation0 + $0x1dc] sm:$0x80]   ;;  %191 = vst [vmem:[#allocation0 + $0x288] sm:$0xf] %v2410_v12  ;;  %v923_v1 = vld [vmem:[#allocation0 + $0x2e4] sm:$0x80]  }
  0x2b   :  { %v742_v22 = vsel %vm707_vm4, %v740_v14, %v738_v19  ;;  %207 = vst [vmem:[#allocation0 + $0x268] sm:$0xf] %v2414_v15  ;;  %v802_v32 = vld [vmem:[#allocation0 + $0x360] sm:$0x8]   ;;  %v2486_v2 = vld [vmem:[%s3723_s0 + $0x14] sm:$0xf] }
  0x2c   :  { %v746_v25 = vsel %vm711_vm5, %v744_v17, %v742_v22  ;;  %223 = vst [vmem:[#allocation0 + $0x248] sm:$0xf] %v2418_v18  ;;  %v798_v30 = vld [vmem:[#allocation0 + $0x341] sm:$0x4]   ;;  %v2490_v4 = vld [vmem:[%s3723_s0 + $0x4] sm:$0xf] }
  0x2d   :  { %v750_v28 = vsel %vm715_vm6, %v748_v20, %v746_v25  ;;  %v794_v29 = vld [vmem:[#allocation0 + $0x322] sm:$0x2]   ;;  %239 = vst [vmem:[#allocation0 + $0x228] sm:$0xf] %v2422_v21  ;;  %v2429_v5 = vld [vmem:[%s3723_s0 + $0xf8] sm:$0xf] }
  0x2e   :  { %751 = vrot.lane.b32.xlu0 %v750_v28, %s2570_s27  ;;  %v792_v31 = vld [vmem:[#allocation0 + $0x303] sm:$0x1]   ;;  %255 = vst [vmem:[#allocation0 + $0x208] sm:$0xf] %v2426_v23  ;;  %v2433_v8 = vld [vmem:[%s3723_s0 + $0xe8] sm:$0xf] }
  0x2f   :  { %v796_v33 = vsel %vm691_vm0, %v794_v29, %v792_v31  ;;  %v806_v34 = vld [vmem:[#allocation0 + $0x37f] sm:$0x10]   ;;  %15 = vst [vmem:[#allocation0 + $0x3e8] sm:$0xf] %v2366_v24  ;;  %v919_v62 = vld [vmem:[#allocation0 + $0x2c5] sm:$0x40]  }
  0x30   :  { %v800_v36 = vsel %vm695_vm1, %v798_v30, %v796_v33  ;;  %v810_v37 = vld [vmem:[#allocation0 + $0x39e] sm:$0x20]   ;;  %31 = vst [vmem:[#allocation0 + $0x3c8] sm:$0xf] %v2370_v26  ;;  %v915_v59 = vld [vmem:[#allocation0 + $0x2a6] sm:$0x20]  }
  0x31   :  { %v818_v38 = vld [vmem:[#allocation0 + $0x3dc] sm:$0x80]   ;;  %v804_v40 = vsel %vm699_vm2, %v802_v32, %v800_v36  ;;  %47 = vst [vmem:[#allocation0 + $0x3a8] sm:$0xf] %v2374_v27  ;;  %v911_v56 = vld [vmem:[#allocation0 + $0x287] sm:$0x10]  }
  0x32   :  { %v814_v41 = vld [vmem:[#allocation0 + $0x3bd] sm:$0x40]   ;;  %v808_v43 = vsel %vm703_vm3, %v806_v34, %v804_v40  ;;  %63 = vst [vmem:[#allocation0 + $0x388] sm:$0xf] %v2378_v35  ;;  %v907_v54 = vld [vmem:[#allocation0 + $0x268] sm:$0x8]  }
  0x33   :  { %v812_v46 = vsel %vm707_vm4, %v810_v37, %v808_v43  ;;  %79 = vst [vmem:[#allocation0 + $0x368] sm:$0xf] %v2382_v39  ;;  %v903_v51 = vld [vmem:[#allocation0 + $0x249] sm:$0x4]   ;;  %v2437_v13 = vld [vmem:[%s3723_s0 + $0xd8] sm:$0xf] }
  0x34   :  { %v816_v49 = vsel %vm711_vm5, %v814_v41, %v812_v46  ;;  %v899_v50 = vld [vmem:[#allocation0 + $0x22a] sm:$0x2]   ;;  %95 = vst [vmem:[#allocation0 + $0x348] sm:$0xf] %v2386_v42  ;;  %v2445_v20 = vld [vmem:[%s3723_s0 + $0xb8] sm:$0xf] }
  0x35   :  { %v820_v52 = vsel %vm715_vm6, %v818_v38, %v816_v49  ;;  %v897_v53 = vld [vmem:[#allocation0 + $0x20b] sm:$0x1]   ;;  %111 = vst [vmem:[#allocation0 + $0x328] sm:$0xf] %v2390_v44  ;;  %v2453_v25 = vld [vmem:[%s3723_s0 + $0x98] sm:$0xf] }
  0x36   :  { %821 = vrot.lane.b32.xlu1 %v820_v52, %s2570_s27  ;;  %v901_v55 = vsel %vm691_vm0, %v899_v50, %v897_v53  ;;  %127 = vst [vmem:[#allocation0 + $0x308] sm:$0xf] %v2394_v45  ;;  %v2441_v16 = vld [vmem:[%s3723_s0 + $0xc8] sm:$0xf]  ;;  %v2405_v35 = vld [vmem:[%s3723_s0 + $0x158] sm:$0xf] }
  0x37   :  { %v905_v58 = vsel %vm695_vm1, %v903_v51, %v901_v55  ;;  %415 = vst [vmem:[#allocation0 + $0xc8] sm:$0xf] %v2466_v47  ;;  %v958_v19 = vld [vmem:[#allocation0 + $0x3e4] sm:$0x80]   ;;  %v2413_v41 = vld [vmem:[%s3723_s0 + $0x138] sm:$0xf] }
  0x38   :  { %v909_v61 = vsel %vm699_vm2, %v907_v54, %v905_v58  ;;  %431 = vst [vmem:[#allocation0 + $0xa8] sm:$0xf] %v2470_v48  ;;  %v950_v18 = vld [vmem:[#allocation0 + $0x3a6] sm:$0x20]   ;;  %v2421_v47 = vld [vmem:[%s3723_s0 + $0x118] sm:$0xf] }
  0x39   :  { %v913_v0 = vsel %vm703_vm3, %v911_v56, %v909_v61  ;;  %447 = vst [vmem:[#allocation0 + $0x88] sm:$0xf] %v2474_v57  ;;  %v946_v15 = vld [vmem:[#allocation0 + $0x387] sm:$0x10]   ;;  %v2430_v50 = vld [vmem:[%s3723_s0 + $0xf4] sm:$0xf] }
  0x3a   :  { %v917_v3 = vsel %vm707_vm4, %v915_v59, %v913_v0  ;;  %463 = vst [vmem:[#allocation0 + $0x68] sm:$0xf] %v2478_v60  ;;  %v942_v7 = vld [vmem:[#allocation0 + $0x368] sm:$0x8]   ;;  %v2434_v53 = vld [vmem:[%s3723_s0 + $0xe4] sm:$0xf] }
  0x3b   :  { %v921_v6 = vsel %vm711_vm5, %v919_v62, %v917_v3  ;;  %479 = vst [vmem:[#allocation0 + $0x48] sm:$0xf] %v2482_v63  ;;  %v938_v11 = vld [vmem:[#allocation0 + $0x349] sm:$0x4]   ;;  %v2438_v58 = vld [vmem:[%s3723_s0 + $0xd4] sm:$0xf] }
  0x3c   :  { %v925_v9 = vsel %vm715_vm6, %v923_v1, %v921_v6  ;;  %v934_v10 = vld [vmem:[#allocation0 + $0x32a] sm:$0x2]   ;;  %495 = vst [vmem:[#allocation0 + $0x28] sm:$0xf] %v2486_v2  ;;  %v2442_v61 = vld [vmem:[%s3723_s0 + $0xc4] sm:$0xf] }
  0x3d   :  { %926 = vrot.lane.b32.xlu0 %v925_v9, %s2570_s27  ;;  %v932_v12 = vld [vmem:[#allocation0 + $0x30b] sm:$0x1]   ;;  %511 = vst [vmem:[#allocation0 + $0x8] sm:$0xf] %v2490_v4  ;;  %v2446_v1 = vld [vmem:[%s3723_s0 + $0xb4] sm:$0xf] }
  0x3e   :  { %v936_v14 = vsel %vm691_vm0, %v934_v10, %v932_v12  ;;  %267 = vst [vmem:[#allocation0 + $0x1f0] sm:$0xf] %v2429_v5  ;;  %v954_v22 = vld [vmem:[#allocation0 + $0x3c5] sm:$0x40]   ;;  %v2450_v4 = vld [vmem:[%s3723_s0 + $0xa4] sm:$0xf] }
  0x3f   :  { %v940_v17 = vsel %vm695_vm1, %v938_v11, %v936_v14  ;;  %283 = vst [vmem:[#allocation0 + $0x1d0] sm:$0xf] %v2433_v8  ;;  %v2449_v23 = vld [vmem:[%s3723_s0 + $0xa8] sm:$0xf]  ;;  %v2454_v6 = vld [vmem:[%s3723_s0 + $0x94] sm:$0xf] }
  0x40   :  { %v944_v21 = vsel %vm699_vm2, %v942_v7, %v940_v17  ;;  %299 = vst [vmem:[#allocation0 + $0x1b0] sm:$0xf] %v2437_v13  ;;  %v2457_v26 = vld [vmem:[%s3723_s0 + $0x88] sm:$0xf]  ;;  %v2458_v7 = vld [vmem:[%s3723_s0 + $0x84] sm:$0xf] }
  0x41   :  { %v948_v24 = vsel %vm703_vm3, %v946_v15, %v944_v21  ;;  %315 = vst [vmem:[#allocation0 + $0x190] sm:$0xf] %v2441_v16  ;;  %v837_v28 = vld [vmem:[#allocation0 + $0x68] sm:$0x8]   ;;  %v2464_v10 = vld [vmem:[%s3723_s0 + $0x6c] sm:$0xf] }
  0x42   :  { %v952_v27 = vsel %vm707_vm4, %v950_v18, %v948_v24  ;;  %331 = vst [vmem:[#allocation0 + $0x170] sm:$0xf] %v2445_v20  ;;  %v2401_v29 = vld [vmem:[%s3723_s0 + $0x168] sm:$0xf]  ;;  %v2468_v16 = vld [vmem:[%s3723_s0 + $0x5c] sm:$0xf] }
  0x43   :  { %v956_v30 = vsel %vm711_vm5, %v954_v22, %v952_v27  ;;  %v829_v31 = vld [vmem:[#allocation0 + $0x2a] sm:$0x2]   ;;  %347 = vst [vmem:[#allocation0 + $0x150] sm:$0xf] %v2449_v23  ;;  %v2476_v22 = vld [vmem:[%s3723_s0 + $0x3c] sm:$0xf] }
  0x44   :  { %v833_v32 = vld [vmem:[#allocation0 + $0x49] sm:$0x4]   ;;  %v960_v33 = vsel %vm715_vm6, %v958_v19, %v956_v30  ;;  %363 = vst [vmem:[#allocation0 + $0x130] sm:$0xf] %v2453_v25  ;;  %v2472_v19 = vld [vmem:[%s3723_s0 + $0x4c] sm:$0xf] }
  0x45   :  { %v827_v34 = vld [vmem:[#allocation0 + $0xb] sm:$0x1]   ;;  %961 = vrot.lane.b32.xlu1 %v960_v33, %s2570_s27  ;;  %379 = vst [vmem:[#allocation0 + $0x110] sm:$0xf] %v2457_v26  ;;  %v1028_v0 = vld [vmem:[#allocation0 + $0x1ec] sm:$0x80]  }
  0x46   :  { %v831_v36 = vsel %vm691_vm0, %v829_v31, %v827_v34  ;;  %v841_v37 = vld [vmem:[#allocation0 + $0x87] sm:$0x10]   ;;  %155 = vst [vmem:[#allocation0 + $0x2d0] sm:$0xf] %v2401_v29  ;;  %v1024_v3 = vld [vmem:[#allocation0 + $0x1cd] sm:$0x40]  }
  0x47   :  { %v2409_v38 = vld [vmem:[%s3723_s0 + $0x148] sm:$0xf]  ;;  %v835_v39 = vsel %vm695_vm1, %v833_v32, %v831_v36  ;;  %171 = vst [vmem:[#allocation0 + $0x2b0] sm:$0xf] %v2405_v35  ;;  %v1020_v63 = vld [vmem:[#allocation0 + $0x1ae] sm:$0x20]  }
  0x48   :  { %v845_v40 = vld [vmem:[#allocation0 + $0xa6] sm:$0x20]   ;;  %v839_v42 = vsel %vm699_vm2, %v837_v28, %v835_v39  ;;  %187 = vst [vmem:[#allocation0 + $0x290] sm:$0xf] %v2409_v38  ;;  %v1016_v60 = vld [vmem:[#allocation0 + $0x18f] sm:$0x10]  }
  0x49   :  { %v849_v43 = vld [vmem:[#allocation0 + $0xc5] sm:$0x40]   ;;  %v843_v45 = vsel %vm703_vm3, %v841_v37, %v839_v42  ;;  %203 = vst [vmem:[#allocation0 + $0x270] sm:$0xf] %v2413_v41  ;;  %v1012_v52 = vld [vmem:[#allocation0 + $0x170] sm:$0x8]  }
  0x4a   :  { %v2417_v44 = vld [vmem:[%s3723_s0 + $0x128] sm:$0xf]  ;;  %v847_v48 = vsel %vm707_vm4, %v845_v40, %v843_v45  ;;  %v1008_v56 = vld [vmem:[#allocation0 + $0x151] sm:$0x4]   ;;  %235 = vst [vmem:[#allocation0 + $0x230] sm:$0xf] %v2421_v47 }
  0x4b   :  { %v853_v46 = vld [vmem:[#allocation0 + $0xe4] sm:$0x80]   ;;  %v851_v51 = vsel %vm711_vm5, %v849_v43, %v847_v48  ;;  %219 = vst [vmem:[#allocation0 + $0x250] sm:$0xf] %v2417_v44  ;;  %v1004_v55 = vld [vmem:[#allocation0 + $0x132] sm:$0x2]  }
  0x4c   :  { %v2425_v49 = vld [vmem:[%s3723_s0 + $0x108] sm:$0xf]  ;;  %v855_v54 = vsel %vm715_vm6, %v853_v46, %v851_v51  ;;  %v1002_v57 = vld [vmem:[#allocation0 + $0x113] sm:$0x1]   ;;  %271 = vst [vmem:[#allocation0 + $0x1e8] sm:$0xf] %v2430_v50 }
  0x4d   :  { %856 = vrot.lane.b32.xlu2 %v855_v54, %s2570_s27  ;;  %251 = vst [vmem:[#allocation0 + $0x210] sm:$0xf] %v2425_v49  ;;  %v1006_v59 = vsel %vm691_vm0, %v1004_v55, %v1002_v57  ;;  %v1059_v24 = vld [vmem:[#allocation0 + $0x2cd] sm:$0x40]   ;;  %v2480_v25 = vld [vmem:[%s3723_s0 + $0x2c] sm:$0xf] }
  0x4e   :  { %v1010_v62 = vsel %vm695_vm1, %v1008_v56, %v1006_v59  ;;  %287 = vst [vmem:[#allocation0 + $0x1c8] sm:$0xf] %v2434_v53  ;;  %v1055_v21 = vld [vmem:[#allocation0 + $0x2ae] sm:$0x20]   ;;  %v2484_v28 = vld [vmem:[%s3723_s0 + $0x1c] sm:$0xf] }
  0x4f   :  { %v1014_v2 = vsel %vm699_vm2, %v1012_v52, %v1010_v62  ;;  %303 = vst [vmem:[#allocation0 + $0x1a8] sm:$0xf] %v2438_v58  ;;  %v1051_v18 = vld [vmem:[#allocation0 + $0x28f] sm:$0x10]   ;;  %v2488_v30 = vld [vmem:[%s3723_s0 + $0xc] sm:$0xf] }
  0x50   :  { %v1018_v5 = vsel %vm703_vm3, %v1016_v60, %v1014_v2  ;;  %319 = vst [vmem:[#allocation0 + $0x188] sm:$0xf] %v2442_v61  ;;  %v1047_v9 = vld [vmem:[#allocation0 + $0x270] sm:$0x8]   ;;  %v2428_v34 = vld [vmem:[%s3723_s0 + $0xfc] sm:$0xf] }
  0x51   :  { %v1022_v8 = vsel %vm707_vm4, %v1020_v63, %v1018_v5  ;;  %335 = vst [vmem:[#allocation0 + $0x168] sm:$0xf] %v2446_v1  ;;  %v1039_v12 = vld [vmem:[#allocation0 + $0x232] sm:$0x2]   ;;  %v2432_v37 = vld [vmem:[%s3723_s0 + $0xec] sm:$0xf] }
  0x52   :  { %v1026_v11 = vsel %vm711_vm5, %v1024_v3, %v1022_v8  ;;  %v1043_v13 = vld [vmem:[#allocation0 + $0x251] sm:$0x4]   ;;  %351 = vst [vmem:[#allocation0 + $0x148] sm:$0xf] %v2450_v4  ;;  %v2436_v39 = vld [vmem:[%s3723_s0 + $0xdc] sm:$0xf] }
  0x53   :  { %v1030_v14 = vsel %vm715_vm6, %v1028_v0, %v1026_v11  ;;  %367 = vst [vmem:[#allocation0 + $0x128] sm:$0xf] %v2454_v6  ;;  %v1063_v27 = vld [vmem:[#allocation0 + $0x2ec] sm:$0x80]   ;;  %v2440_v42 = vld [vmem:[%s3723_s0 + $0xcc] sm:$0xf] }
  0x54   :  { %v1037_v15 = vld [vmem:[#allocation0 + $0x213] sm:$0x1]   ;;  %1031 = vrot.lane.b32.xlu0 %v1030_v14, %s2570_s27  ;;  %383 = vst [vmem:[#allocation0 + $0x108] sm:$0xf] %v2458_v7  ;;  %v2444_v45 = vld [vmem:[%s3723_s0 + $0xbc] sm:$0xf] }
  0x55   :  { %v1041_v17 = vsel %vm691_vm0, %v1039_v12, %v1037_v15  ;;  %407 = vst [vmem:[#allocation0 + $0xd8] sm:$0xf] %v2464_v10  ;;  %v884_v47 = vld [vmem:[#allocation0 + $0x1c5] sm:$0x40]   ;;  %v2448_v48 = vld [vmem:[%s3723_s0 + $0xac] sm:$0xf] }
  0x56   :  { %v1045_v20 = vsel %vm695_vm1, %v1043_v13, %v1041_v17  ;;  %423 = vst [vmem:[#allocation0 + $0xb8] sm:$0xf] %v2468_v16  ;;  %v880_v44 = vld [vmem:[#allocation0 + $0x1a6] sm:$0x20]   ;;  %v2452_v51 = vld [vmem:[%s3723_s0 + $0x9c] sm:$0xf] }
  0x57   :  { %v1049_v23 = vsel %vm699_vm2, %v1047_v9, %v1045_v20  ;;  %439 = vst [vmem:[#allocation0 + $0x98] sm:$0xf] %v2472_v19  ;;  %v876_v41 = vld [vmem:[#allocation0 + $0x187] sm:$0x10]   ;;  %v2456_v55 = vld [vmem:[%s3723_s0 + $0x8c] sm:$0xf] }
  0x58   :  { %v1053_v26 = vsel %vm703_vm3, %v1051_v18, %v1049_v23  ;;  %455 = vst [vmem:[#allocation0 + $0x78] sm:$0xf] %v2476_v22  ;;  %v872_v33 = vld [vmem:[#allocation0 + $0x168] sm:$0x8]   ;;  %v2469_v61 = vld [vmem:[%s3723_s0 + $0x58] sm:$0xf] }
  0x59   :  { %v1057_v29 = vsel %vm707_vm4, %v1055_v21, %v1053_v26  ;;  %v868_v32 = vld [vmem:[#allocation0 + $0x149] sm:$0x4]   ;;  %471 = vst [vmem:[#allocation0 + $0x58] sm:$0xf] %v2480_v25  ;;  %v2477_v3 = vld [vmem:[%s3723_s0 + $0x38] sm:$0xf] }
  0x5a   :  { %v1061_v31 = vsel %vm711_vm5, %v1059_v24, %v1057_v29  ;;  %v864_v36 = vld [vmem:[#allocation0 + $0x12a] sm:$0x2]   ;;  %487 = vst [vmem:[#allocation0 + $0x38] sm:$0xf] %v2484_v28  ;;  %v1133_v8 = vld [vmem:[#allocation0 + $0xf4] sm:$0x80]  }
  0x5b   :  { %v1065_v35 = vsel %vm715_vm6, %v1063_v27, %v1061_v31  ;;  %v862_v38 = vld [vmem:[#allocation0 + $0x10b] sm:$0x1]   ;;  %503 = vst [vmem:[#allocation0 + $0x18] sm:$0xf] %v2488_v30  ;;  %v2485_v9 = vld [vmem:[%s3723_s0 + $0x18] sm:$0xf] }
  0x5c   :  { %1066 = vrot.lane.b32.xlu1 %v1065_v35, %s2570_s27  ;;  %v866_v40 = vsel %vm691_vm0, %v864_v36, %v862_v38  ;;  %263 = vst [vmem:[#allocation0 + $0x1f8] sm:$0xf] %v2428_v34  ;;  %v888_v50 = vld [vmem:[#allocation0 + $0x1e4] sm:$0x80]   ;;  %v1129_v5 = vld [vmem:[#allocation0 + $0xd5] sm:$0x40]  }
  0x5d   :  { %v870_v43 = vsel %vm695_vm1, %v868_v32, %v866_v40  ;;  %279 = vst [vmem:[#allocation0 + $0x1d8] sm:$0xf] %v2432_v37  ;;  %v2465_v58 = vld [vmem:[%s3723_s0 + $0x68] sm:$0xf]  ;;  %v1125_v2 = vld [vmem:[#allocation0 + $0xb6] sm:$0x20]  }
  0x5e   :  { %v874_v46 = vsel %vm699_vm2, %v872_v33, %v870_v43  ;;  %295 = vst [vmem:[#allocation0 + $0x1b8] sm:$0xf] %v2436_v39  ;;  %v1121_v63 = vld [vmem:[#allocation0 + $0x97] sm:$0x10]   ;;  %v2473_v0 = vld [vmem:[%s3723_s0 + $0x48] sm:$0xf] }
  0x5f   :  { %v878_v49 = vsel %vm703_vm3, %v876_v41, %v874_v46  ;;  %311 = vst [vmem:[#allocation0 + $0x198] sm:$0xf] %v2440_v42  ;;  %v1117_v54 = vld [vmem:[#allocation0 + $0x78] sm:$0x8]   ;;  %v2481_v6 = vld [vmem:[%s3723_s0 + $0x28] sm:$0xf] }
  0x60   :  { %v882_v52 = vsel %vm707_vm4, %v880_v44, %v878_v49  ;;  %v1113_v53 = vld [vmem:[#allocation0 + $0x59] sm:$0x4]   ;;  %327 = vst [vmem:[#allocation0 + $0x178] sm:$0xf] %v2444_v45  ;;  %v2489_v11 = vld [vmem:[%s3723_s0 + $0x8] sm:$0xf] }
  0x61   :  { %v886_v56 = vsel %vm711_vm5, %v884_v47, %v882_v52  ;;  %v1109_v57 = vld [vmem:[#allocation0 + $0x3a] sm:$0x2]   ;;  %343 = vst [vmem:[#allocation0 + $0x158] sm:$0xf] %v2448_v48  ;;  %v1247_v15 = vld [vmem:[#allocation0 + $0x2] sm:$0x1]  }
  0x62   :  { %v890_v59 = vsel %vm715_vm6, %v888_v50, %v886_v56  ;;  %v1107_v60 = vld [vmem:[#allocation0 + $0x1b] sm:$0x1]   ;;  %359 = vst [vmem:[#allocation0 + $0x138] sm:$0xf] %v2452_v51  ;;  %v1249_v18 = vld [vmem:[#allocation0 + $0x21] sm:$0x2]  }
  0x63   :  { %891 = vrot.lane.b32.xlu2 %v890_v59, %s2570_s27  ;;  %v1111_v62 = vsel %vm691_vm0, %v1109_v57, %v1107_v60  ;;  %375 = vst [vmem:[#allocation0 + $0x118] sm:$0xf] %v2456_v55  ;;  %v1251_v20 = vsel %vm691_vm0, %v1249_v18, %v1247_v15  ;;  %v1253_v21 = vld [vmem:[#allocation0 + $0x40] sm:$0x4]   ;;  %v1168_v32 = vld [vmem:[#allocation0 + $0x1f4] sm:$0x80]  }
  0x64   :  { %v1115_v1 = vsel %vm695_vm1, %v1113_v53, %v1111_v62  ;;  %411 = vst [vmem:[#allocation0 + $0xd0] sm:$0xf] %v2465_v58  ;;  %v1255_v24 = vsel %vm695_vm1, %v1253_v21, %v1251_v20  ;;  %v1257_v25 = vld [vmem:[#allocation0 + $0x5f] sm:$0x8]   ;;  %v1164_v31 = vld [vmem:[#allocation0 + $0x1d5] sm:$0x40]  }
  0x65   :  { %v1119_v4 = vsel %vm699_vm2, %v1117_v54, %v1115_v1  ;;  %427 = vst [vmem:[#allocation0 + $0xb0] sm:$0xf] %v2469_v61  ;;  %v1261_v26 = vld [vmem:[#allocation0 + $0x7e] sm:$0x10]   ;;  %v1160_v28 = vld [vmem:[#allocation0 + $0x1b6] sm:$0x20]   ;;  %v1259_v29 = vsel %vm699_vm2, %v1257_v25, %v1255_v24 }
  0x66   :  { %v1123_v7 = vsel %vm703_vm3, %v1121_v63, %v1119_v4  ;;  %443 = vst [vmem:[#allocation0 + $0x90] sm:$0xf] %v2473_v0  ;;  %v1156_v23 = vld [vmem:[#allocation0 + $0x197] sm:$0x10]   ;;  %v2364_v33 = vld [vmem:[%s3723_s0 + $0x1fc] sm:$0xf]  ;;  %v1263_v35 = vsel %vm703_vm3, %v1261_v26, %v1259_v29 }
  0x67   :  { %v1127_v10 = vsel %vm707_vm4, %v1125_v2, %v1123_v7  ;;  %459 = vst [vmem:[#allocation0 + $0x70] sm:$0xf] %v2477_v3  ;;  %v1152_v14 = vld [vmem:[#allocation0 + $0x178] sm:$0x8]   ;;  %v1265_v36 = vld [vmem:[#allocation0 + $0x9d] sm:$0x20]  }
  0x68   :  { %v1131_v12 = vsel %vm711_vm5, %v1129_v5, %v1127_v10  ;;  %v1148_v13 = vld [vmem:[#allocation0 + $0x159] sm:$0x4]   ;;  %475 = vst [vmem:[#allocation0 + $0x50] sm:$0xf] %v2481_v6  ;;  %v1269_v41 = vld [vmem:[#allocation0 + $0xbc] sm:$0x40]   ;;  %v1267_v50 = vsel %vm707_vm4, %v1265_v36, %v1263_v35 }
  0x69   :  { %v1135_v16 = vsel %vm715_vm6, %v1133_v8, %v1131_v12  ;;  %v1144_v17 = vld [vmem:[#allocation0 + $0x13a] sm:$0x2]   ;;  %491 = vst [vmem:[#allocation0 + $0x30] sm:$0xf] %v2485_v9  ;;  %v2368_v42 = vld [vmem:[%s3723_s0 + $0x1ec] sm:$0xf]  ;;  %v1271_v61 = vsel %vm711_vm5, %v1269_v41, %v1267_v50 }
  0x6a   :  { %1136 = vrot.lane.b32.xlu0 %v1135_v16, %s2570_s27  ;;  %v1142_v19 = vld [vmem:[#allocation0 + $0x11b] sm:$0x1]   ;;  %507 = vst [vmem:[#allocation0 + $0x10] sm:$0xf] %v2489_v11  ;;  %v2372_v46 = vld [vmem:[%s3723_s0 + $0x1dc] sm:$0xf] }
  0x6b   :  { %v1146_v22 = vsel %vm691_vm0, %v1144_v17, %v1142_v19  ;;  %7 = vst [vmem:[#allocation0 + $0x3f8] sm:$0xf] %v2364_v33  ;;  %v2365_v37 = vld [vmem:[%s3723_s0 + $0x1f8] sm:$0xf]  ;;  %v2376_v51 = vld [vmem:[%s3723_s0 + $0x1cc] sm:$0xf] }
  0x6c   :  { %v1150_v27 = vsel %vm695_vm1, %v1148_v13, %v1146_v22  ;;  %11 = vst [vmem:[#allocation0 + $0x3f0] sm:$0xf] %v2365_v37  ;;  %v985_v49 = vld [vmem:[#allocation0 + $0xae] sm:$0x20]   ;;  %v1273_v54 = vld [vmem:[#allocation0 + $0xdb] sm:$0x80]  }
  0x6d   :  { %v1154_v30 = vsel %vm699_vm2, %v1152_v14, %v1150_v27  ;;  %v981_v45 = vld [vmem:[#allocation0 + $0x8f] sm:$0x10]   ;;  %23 = vst [vmem:[#allocation0 + $0x3d8] sm:$0xf] %v2368_v42  ;;  %v2380_v55 = vld [vmem:[%s3723_s0 + $0x1bc] sm:$0xf]  ;;  %v1275_v7 = vsel %vm715_vm6, %v1273_v54, %v1271_v61 }
  0x6e   :  { %v1158_v34 = vsel %vm703_vm3, %v1156_v23, %v1154_v30  ;;  %v977_v40 = vld [vmem:[#allocation0 + $0x70] sm:$0x8]   ;;  %39 = vst [vmem:[#allocation0 + $0x3b8] sm:$0xf] %v2372_v46  ;;  %v2384_v56 = vld [vmem:[%s3723_s0 + $0x1ac] sm:$0xf] }
  0x6f   :  { %v1162_v38 = vsel %vm707_vm4, %v1160_v28, %v1158_v34  ;;  %v973_v39 = vld [vmem:[#allocation0 + $0x51] sm:$0x4]   ;;  %55 = vst [vmem:[#allocation0 + $0x398] sm:$0xf] %v2376_v51  ;;  %v2388_v58 = vld [vmem:[%s3723_s0 + $0x19c] sm:$0xf] }
  0x70   :  { %v1166_v43 = vsel %vm711_vm5, %v1164_v31, %v1162_v38  ;;  %v969_v44 = vld [vmem:[#allocation0 + $0x32] sm:$0x2]   ;;  %71 = vst [vmem:[#allocation0 + $0x378] sm:$0xf] %v2380_v55  ;;  %v2392_v59 = vld [vmem:[%s3723_s0 + $0x18c] sm:$0xf] }
  0x71   :  { %v1170_v47 = vsel %vm715_vm6, %v1168_v32, %v1166_v43  ;;  %v967_v48 = vld [vmem:[#allocation0 + $0x13] sm:$0x1]   ;;  %87 = vst [vmem:[#allocation0 + $0x358] sm:$0xf] %v2384_v56  ;;  %v1351_v62 = vld [vmem:[#allocation0 + $0x302] sm:$0x1]  }
  0x72   :  { %1171 = vrot.lane.b32.xlu1 %v1170_v47, %s2570_s27  ;;  %v971_v52 = vsel %vm691_vm0, %v969_v44, %v967_v48  ;;  %v989_v53 = vld [vmem:[#allocation0 + $0xcd] sm:$0x40]   ;;  %v1353_v63 = vld [vmem:[#allocation0 + $0x321] sm:$0x2]   ;;  %103 = vst [vmem:[#allocation0 + $0x338] sm:$0xf] %v2388_v58 }
  0x73   :  { %v975_v57 = vsel %vm695_vm1, %v973_v39, %v971_v52  ;;  %v993_v1 = vld [vmem:[#allocation0 + $0xec] sm:$0x80]   ;;  %v1355_v2 = vsel %vm691_vm0, %v1353_v63, %v1351_v62  ;;  %v1357_v3 = vld [vmem:[#allocation0 + $0x340] sm:$0x4]   ;;  %119 = vst [vmem:[#allocation0 + $0x318] sm:$0xf] %v2392_v59 }
  0x74   :  { %v979_v60 = vsel %vm699_vm2, %v977_v40, %v975_v57  ;;  %v1359_v5 = vsel %vm695_vm1, %v1357_v3, %v1355_v2  ;;  %v1361_v8 = vld [vmem:[#allocation0 + $0x35f] sm:$0x8]   ;;  %v2369_v15 = vld [vmem:[%s3723_s0 + $0x1e8] sm:$0xf]  ;;  %v2373_v18 = vld [vmem:[%s3723_s0 + $0x1d8] sm:$0xf] }
  0x75   :  { %v983_v0 = vsel %vm703_vm3, %v981_v45, %v979_v60  ;;  %v1365_v9 = vld [vmem:[#allocation0 + $0x37e] sm:$0x10]   ;;  %v1363_v11 = vsel %vm699_vm2, %v1361_v8, %v1359_v5  ;;  %27 = vst [vmem:[#allocation0 + $0x3d0] sm:$0xf] %v2369_v15  ;;  %v2377_v21 = vld [vmem:[%s3723_s0 + $0x1c8] sm:$0xf] }
  0x76   :  { %v987_v4 = vsel %vm707_vm4, %v985_v49, %v983_v0  ;;  %v1369_v12 = vld [vmem:[#allocation0 + $0x39d] sm:$0x20]   ;;  %v1367_v13 = vsel %vm703_vm3, %v1365_v9, %v1363_v11  ;;  %43 = vst [vmem:[#allocation0 + $0x3b0] sm:$0xf] %v2373_v18  ;;  %v1226_v23 = vld [vmem:[#allocation0 + $0x397] sm:$0x10]  }
  0x77   :  { %v991_v6 = vsel %vm711_vm5, %v989_v53, %v987_v4  ;;  %v1373_v14 = vld [vmem:[#allocation0 + $0x3bc] sm:$0x40]   ;;  %v1371_v16 = vsel %vm707_vm4, %v1369_v12, %v1367_v13  ;;  %v1222_v20 = vld [vmem:[#allocation0 + $0x378] sm:$0x8]   ;;  %59 = vst [vmem:[#allocation0 + $0x390] sm:$0xf] %v2377_v21 }
  0x78   :  { %v995_v10 = vsel %vm715_vm6, %v993_v1, %v991_v6  ;;  %v1377_v17 = vld [vmem:[#allocation0 + $0x3db] sm:$0x80]   ;;  %v1218_v19 = vld [vmem:[#allocation0 + $0x359] sm:$0x4]   ;;  %v1375_v24 = vsel %vm711_vm5, %v1373_v14, %v1371_v16  ;;  %v2385_v27 = vld [vmem:[%s3723_s0 + $0x1a8] sm:$0xf] }
  0x79   :  { %996 = vrot.lane.b32.xlu2 %v995_v10, %s2570_s27  ;;  %v1214_v22 = vld [vmem:[#allocation0 + $0x33a] sm:$0x2]   ;;  %91 = vst [vmem:[#allocation0 + $0x350] sm:$0xf] %v2385_v27  ;;  %v2393_v31 = vld [vmem:[%s3723_s0 + $0x188] sm:$0xf]  ;;  %v1379_v34 = vsel %vm715_vm6, %v1377_v17, %v1375_v24 }
  0x7a   :  { %1276 = vrot.lane.b32.xlu1 %v1275_v7, %s2571_s11  ;;  %v2381_v25 = vld [vmem:[%s3723_s0 + $0x1b8] sm:$0xf]  ;;  %v1316_v35 = vld [vmem:[#allocation0 + $0x202] sm:$0x1]   ;;  %123 = vst [vmem:[#allocation0 + $0x310] sm:$0xf] %v2393_v31 }
  0x7b   :  { %v1212_v26 = vld [vmem:[#allocation0 + $0x31b] sm:$0x1]   ;;  %75 = vst [vmem:[#allocation0 + $0x370] sm:$0xf] %v2381_v25  ;;  %v1318_v37 = vld [vmem:[#allocation0 + $0x221] sm:$0x2]  }
  0x7c   :  { %v1216_v28 = vsel %vm691_vm0, %v1214_v22, %v1212_v26  ;;  %v1234_v29 = vld [vmem:[#allocation0 + $0x3d5] sm:$0x40]   ;;  %v1322_v38 = vld [vmem:[#allocation0 + $0x240] sm:$0x4]   ;;  %v1320_v41 = vsel %vm691_vm0, %v1318_v37, %v1316_v35  ;;  %v1456_v49 = vld [vmem:[#allocation0 + $0x20a] sm:$0x1]  }
  0x7d   :  { %v2389_v30 = vld [vmem:[%s3723_s0 + $0x198] sm:$0xf]  ;;  %v1220_v32 = vsel %vm695_vm1, %v1218_v19, %v1216_v28  ;;  %v1326_v42 = vld [vmem:[#allocation0 + $0x25f] sm:$0x8]   ;;  %v1324_v45 = vsel %vm695_vm1, %v1322_v38, %v1320_v41  ;;  %v1458_v53 = vld [vmem:[#allocation0 + $0x229] sm:$0x2]  }
  0x7e   :  { %v1230_v33 = vld [vmem:[#allocation0 + $0x3b6] sm:$0x20]   ;;  %107 = vst [vmem:[#allocation0 + $0x330] sm:$0xf] %v2389_v30  ;;  %v1224_v36 = vsel %vm699_vm2, %v1222_v20, %v1220_v32  ;;  %v1330_v43 = vld [vmem:[#allocation0 + $0x27e] sm:$0x10]   ;;  %v1328_v48 = vsel %vm699_vm2, %v1326_v42, %v1324_v45  ;;  %v1460_v59 = vsel %vm691_vm0, %v1458_v53, %v1456_v49 }
  0x7f   :  { %v1228_v39 = vsel %vm703_vm3, %v1226_v23, %v1224_v36  ;;  %v1238_v40 = vld [vmem:[#allocation0 + $0x3f4] sm:$0x80]   ;;  %v1334_v46 = vld [vmem:[#allocation0 + $0x29d] sm:$0x20]   ;;  %v1332_v51 = vsel %vm703_vm3, %v1330_v43, %v1328_v48  ;;  %v1462_v54 = vld [vmem:[#allocation0 + $0x248] sm:$0x4]  }
  0x80   :  { %v1232_v44 = vsel %vm707_vm4, %v1230_v33, %v1228_v39  ;;  %v1338_v52 = vld [vmem:[#allocation0 + $0x2bc] sm:$0x40]   ;;  %v1078_v55 = vld [vmem:[#allocation0 + $0x351] sm:$0x4]   ;;  %v1336_v57 = vsel %vm707_vm4, %v1334_v46, %v1332_v51  ;;  %v1466_v60 = vld [vmem:[#allocation0 + $0x267] sm:$0x8]   ;;  %v1464_v0 = vsel %vm695_vm1, %v1462_v54, %v1460_v59 }
  0x81   :  { %v1236_v47 = vsel %vm711_vm5, %v1234_v29, %v1232_v44  ;;  %v1342_v58 = vld [vmem:[#allocation0 + $0x2db] sm:$0x80]   ;;  %v1470_v61 = vld [vmem:[#allocation0 + $0x286] sm:$0x10]   ;;  %v1086_v63 = vld [vmem:[#allocation0 + $0x38f] sm:$0x10]   ;;  %v1340_v5 = vsel %vm711_vm5, %v1338_v52, %v1336_v57  ;;  %v1468_v6 = vsel %vm699_vm2, %v1466_v60, %v1464_v0 }
  0x82   :  { %1380 = vrot.lane.b32.xlu1 %v1379_v34, %s2571_s11  ;;  %v1240_v50 = vsel %vm715_vm6, %v1238_v40, %v1236_v47  ;;  %v1082_v56 = vld [vmem:[#allocation0 + $0x370] sm:$0x8]   ;;  %v1474_v1 = vld [vmem:[#allocation0 + $0x2a5] sm:$0x20]   ;;  %v2400_v8 = vld [vmem:[%s3723_s0 + $0x16c] sm:$0xf]  ;;  %v1472_v10 = vsel %vm703_vm3, %v1470_v61, %v1468_v6  ;;  %v1344_v20 = vsel %vm715_vm6, %v1342_v58, %v1340_v5 }
  0x83   :  { %1241 = vrot.lane.b32.xlu0 %v1240_v50, %s2570_s27  ;;  %v1478_v2 = vld [vmem:[#allocation0 + $0x2c4] sm:$0x40]   ;;  %v1072_v3 = vld [vmem:[#allocation0 + $0x313] sm:$0x1]   ;;  %151 = vst [vmem:[#allocation0 + $0x2d8] sm:$0xf] %v2400_v8  ;;  %v1476_v15 = vsel %vm707_vm4, %v1474_v1, %v1472_v10 }
  0x84   :  { %v1090_v4 = vld [vmem:[#allocation0 + $0x3ae] sm:$0x20]   ;;  %v1482_v7 = vld [vmem:[#allocation0 + $0x2e3] sm:$0x80]   ;;  %v2404_v11 = vld [vmem:[%s3723_s0 + $0x15c] sm:$0xf]  ;;  %v1480_v21 = vsel %vm711_vm5, %v1478_v2, %v1476_v15 }
  0x85   :  { %v1074_v62 = vld [vmem:[#allocation0 + $0x332] sm:$0x2]   ;;  %v2408_v12 = vld [vmem:[%s3723_s0 + $0x14c] sm:$0xf]  ;;  %167 = vst [vmem:[#allocation0 + $0x2b8] sm:$0xf] %v2404_v11  ;;  %v1484_v24 = vsel %vm715_vm6, %v1482_v7, %v1480_v21 }
  0x86   :  { %v1076_v9 = vsel %vm691_vm0, %v1074_v62, %v1072_v3  ;;  %v1098_v14 = vld [vmem:[#allocation0 + $0x3ec] sm:$0x80]   ;;  %v2412_v16 = vld [vmem:[%s3723_s0 + $0x13c] sm:$0xf]  ;;  %v2416_v17 = vld [vmem:[%s3723_s0 + $0x12c] sm:$0xf] }
  0x87   :  { %v1080_v13 = vsel %vm695_vm1, %v1078_v55, %v1076_v9  ;;  %v1094_v19 = vld [vmem:[#allocation0 + $0x3cd] sm:$0x40]   ;;  %183 = vst [vmem:[#allocation0 + $0x298] sm:$0xf] %v2408_v12  ;;  %v2420_v22 = vld [vmem:[%s3723_s0 + $0x11c] sm:$0xf] }
  0x88   :  { %v1084_v18 = vsel %vm699_vm2, %v1082_v56, %v1080_v13  ;;  %199 = vst [vmem:[#allocation0 + $0x278] sm:$0xf] %v2412_v16  ;;  %v2424_v25 = vld [vmem:[%s3723_s0 + $0x10c] sm:$0xf]  ;;  %v1421_v26 = vld [vmem:[#allocation0 + $0x10a] sm:$0x1]  }
  0x89   :  { %v1088_v23 = vsel %vm703_vm3, %v1086_v63, %v1084_v18  ;;  %215 = vst [vmem:[#allocation0 + $0x258] sm:$0xf] %v2416_v17  ;;  %v1423_v29 = vld [vmem:[#allocation0 + $0x129] sm:$0x2]   ;;  %v1561_v39 = vld [vmem:[#allocation0 + $0x112] sm:$0x1]  }
  0x8a   :  { %v1092_v27 = vsel %vm707_vm4, %v1090_v4, %v1088_v23  ;;  %1485 = vrot.lane.b32.xlu1 %v1484_v24, %s2571_s11  ;;  %231 = vst [vmem:[#allocation0 + $0x238] sm:$0xf] %v2420_v22  ;;  %v1427_v30 = vld [vmem:[#allocation0 + $0x148] sm:$0x4]   ;;  %v1425_v32 = vsel %vm691_vm0, %v1423_v29, %v1421_v26  ;;  %v1563_v42 = vld [vmem:[#allocation0 + $0x131] sm:$0x2]  }
  0x8b   :  { %v1096_v28 = vsel %vm711_vm5, %v1094_v19, %v1092_v27  ;;  %1345 = vrot.lane.b32.xlu0 %v1344_v20, %s2571_s11  ;;  %247 = vst [vmem:[#allocation0 + $0x218] sm:$0xf] %v2424_v25  ;;  %v1431_v33 = vld [vmem:[#allocation0 + $0x167] sm:$0x8]   ;;  %v1429_v35 = vsel %vm695_vm1, %v1427_v30, %v1425_v32  ;;  %v1567_v43 = vld [vmem:[#allocation0 + $0x150] sm:$0x4]   ;;  %v1565_v45 = vsel %vm691_vm0, %v1563_v42, %v1561_v39 }
  0x8c   :  { %v1100_v31 = vsel %vm715_vm6, %v1098_v14, %v1096_v28  ;;  %v1435_v34 = vld [vmem:[#allocation0 + $0x186] sm:$0x10]   ;;  %v1433_v37 = vsel %vm699_vm2, %v1431_v33, %v1429_v35  ;;  %v1571_v46 = vld [vmem:[#allocation0 + $0x16f] sm:$0x8]   ;;  %v1569_v51 = vsel %vm695_vm1, %v1567_v43, %v1565_v45  ;;  %v1281_v58 = vld [vmem:[#allocation0 + $0x102] sm:$0x1]  }
  0x8d   :  { %1101 = vrot.lane.b32.xlu2 %v1100_v31, %s2570_s27  ;;  %v1439_v36 = vld [vmem:[#allocation0 + $0x1a5] sm:$0x20]   ;;  %v1437_v40 = vsel %vm703_vm3, %v1435_v34, %v1433_v37  ;;  %v1575_v47 = vld [vmem:[#allocation0 + $0x18e] sm:$0x10]   ;;  %v1573_v56 = vsel %vm699_vm2, %v1571_v46, %v1569_v51  ;;  %v1283_v61 = vld [vmem:[#allocation0 + $0x121] sm:$0x2]  }
  0x8e   :  { %v1443_v38 = vld [vmem:[#allocation0 + $0x1c4] sm:$0x40]   ;;  %v1441_v44 = vsel %vm707_vm4, %v1439_v36, %v1437_v40  ;;  %v1579_v52 = vld [vmem:[#allocation0 + $0x1ad] sm:$0x20]   ;;  %v1577_v60 = vsel %vm703_vm3, %v1575_v47, %v1573_v56  ;;  %v1287_v62 = vld [vmem:[#allocation0 + $0x140] sm:$0x4]   ;;  %v1285_v2 = vsel %vm691_vm0, %v1283_v61, %v1281_v58 }
  0x8f   :  { %v1447_v41 = vld [vmem:[#allocation0 + $0x1e3] sm:$0x80]   ;;  %v1187_v49 = vld [vmem:[#allocation0 + $0x278] sm:$0x8]   ;;  %v1445_v50 = vsel %vm711_vm5, %v1443_v38, %v1441_v44  ;;  %v1583_v53 = vld [vmem:[#allocation0 + $0x1cc] sm:$0x40]   ;;  %v1581_v1 = vsel %vm707_vm4, %v1579_v52, %v1577_v60  ;;  %v1289_v10 = vsel %vm695_vm1, %v1287_v62, %v1285_v2 }
  0x90   :  { %v1183_v48 = vld [vmem:[#allocation0 + $0x259] sm:$0x4]   ;;  %v1449_v55 = vsel %vm715_vm6, %v1447_v41, %v1445_v50  ;;  %v1587_v57 = vld [vmem:[#allocation0 + $0x1eb] sm:$0x80]   ;;  %v1291_v3 = vld [vmem:[#allocation0 + $0x15f] sm:$0x8]   ;;  %v1585_v9 = vsel %vm711_vm5, %v1583_v53, %v1581_v1 }
  0x91   :  { %v1179_v54 = vld [vmem:[#allocation0 + $0x23a] sm:$0x2]   ;;  %v1295_v4 = vld [vmem:[#allocation0 + $0x17e] sm:$0x10]   ;;  %v1526_v11 = vld [vmem:[#allocation0 + $0x12] sm:$0x1]   ;;  %v1589_v13 = vsel %vm715_vm6, %v1587_v57, %v1585_v9  ;;  %v1293_v14 = vsel %vm699_vm2, %v1291_v3, %v1289_v10 }
  0x92   :  { %v1177_v59 = vld [vmem:[#allocation0 + $0x21b] sm:$0x1]   ;;  %v1528_v15 = vld [vmem:[#allocation0 + $0x31] sm:$0x2]   ;;  %1590 = vrot.lane.b32.xlu1 %v1589_v13, %s2571_s11  ;;  %v1297_v19 = vsel %vm703_vm3, %v1295_v4, %v1293_v14  ;;  %v1299_v20 = vld [vmem:[#allocation0 + $0x19d] sm:$0x20]  }
  0x93   :  { %1450 = vrot.lane.b32.xlu0 %v1449_v55, %s2571_s11  ;;  %v1181_v63 = vsel %vm691_vm0, %v1179_v54, %v1177_v59  ;;  %v1191_v0 = vld [vmem:[#allocation0 + $0x297] sm:$0x10]   ;;  %v1532_v16 = vld [vmem:[#allocation0 + $0x50] sm:$0x4]   ;;  %v1530_v21 = vsel %vm691_vm0, %v1528_v15, %v1526_v11  ;;  %v1303_v25 = vld [vmem:[#allocation0 + $0x1bc] sm:$0x40]   ;;  %v1301_v37 = vsel %vm707_vm4, %v1299_v20, %v1297_v19 }
  0x94   :  { %v1185_v5 = vsel %vm695_vm1, %v1183_v48, %v1181_v63  ;;  %v1195_v6 = vld [vmem:[#allocation0 + $0x2b6] sm:$0x20]   ;;  %v1536_v17 = vld [vmem:[#allocation0 + $0x6f] sm:$0x8]   ;;  %v1534_v26 = vsel %vm695_vm1, %v1532_v16, %v1530_v21  ;;  %v1666_v28 = vld [vmem:[#allocation0 + $0x1a] sm:$0x1]   ;;  %v1305_v54 = vsel %vm711_vm5, %v1303_v25, %v1301_v37 }
  0x95   :  { %v1199_v7 = vld [vmem:[#allocation0 + $0x2d5] sm:$0x40]   ;;  %v1189_v12 = vsel %vm699_vm2, %v1187_v49, %v1185_v5  ;;  %v1540_v22 = vld [vmem:[#allocation0 + $0x8e] sm:$0x10]   ;;  %v1668_v29 = vld [vmem:[#allocation0 + $0x39] sm:$0x2]   ;;  %v1538_v31 = vsel %vm699_vm2, %v1536_v17, %v1534_v26 }
  0x96   :  { %v1203_v8 = vld [vmem:[#allocation0 + $0x2f4] sm:$0x80]   ;;  %v1193_v18 = vsel %vm703_vm3, %v1191_v0, %v1189_v12  ;;  %v1544_v23 = vld [vmem:[#allocation0 + $0xad] sm:$0x20]   ;;  %v1670_v32 = vsel %vm691_vm0, %v1668_v29, %v1666_v28  ;;  %v1672_v33 = vld [vmem:[#allocation0 + $0x58] sm:$0x4]   ;;  %v1542_v38 = vsel %vm703_vm3, %v1540_v22, %v1538_v31 }
  0x97   :  { %v1197_v24 = vsel %vm707_vm4, %v1195_v6, %v1193_v18  ;;  %v1548_v27 = vld [vmem:[#allocation0 + $0xcc] sm:$0x40]   ;;  %v1676_v34 = vld [vmem:[#allocation0 + $0x77] sm:$0x8]   ;;  %v1674_v40 = vsel %vm695_vm1, %v1672_v33, %v1670_v32  ;;  %v1546_v43 = vsel %vm707_vm4, %v1544_v23, %v1542_v38  ;;  %v1386_v45 = vld [vmem:[#allocation0 + $0xa] sm:$0x1]  }
  0x98   :  { %v1201_v30 = vsel %vm711_vm5, %v1199_v7, %v1197_v24  ;;  %v1680_v35 = vld [vmem:[#allocation0 + $0x96] sm:$0x10]   ;;  %v1552_v39 = vld [vmem:[#allocation0 + $0xeb] sm:$0x80]   ;;  %v1678_v44 = vsel %vm699_vm2, %v1676_v34, %v1674_v40  ;;  %v1388_v46 = vld [vmem:[#allocation0 + $0x29] sm:$0x2]   ;;  %v1550_v48 = vsel %vm711_vm5, %v1548_v27, %v1546_v43 }
  0x99   :  { %v1205_v36 = vsel %vm715_vm6, %v1203_v8, %v1201_v30  ;;  %v1684_v41 = vld [vmem:[#allocation0 + $0xb5] sm:$0x20]   ;;  %v1392_v47 = vld [vmem:[#allocation0 + $0x48] sm:$0x4]   ;;  %v1682_v49 = vsel %vm703_vm3, %v1680_v35, %v1678_v44  ;;  %v1390_v51 = vsel %vm691_vm0, %v1388_v46, %v1386_v45  ;;  %v1307_v55 = vld [vmem:[#allocation0 + $0x1db] sm:$0x80]   ;;  %v1554_v56 = vsel %vm715_vm6, %v1552_v39, %v1550_v48 }
  0x9a   :  { %v1688_v42 = vld [vmem:[#allocation0 + $0xd4] sm:$0x40]   ;;  %1206 = vrot.lane.b32.xlu2 %v1205_v36, %s2570_s27  ;;  %v1396_v52 = vld [vmem:[#allocation0 + $0x67] sm:$0x8]   ;;  %v1686_v57 = vsel %vm707_vm4, %v1684_v41, %v1682_v49  ;;  %v1394_v58 = vsel %vm695_vm1, %v1392_v47, %v1390_v51  ;;  %v1631_v59 = vld [vmem:[#allocation0 + $0x312] sm:$0x1]   ;;  %v1309_v6 = vsel %vm715_vm6, %v1307_v55, %v1305_v54 }
  0x9b   :  { %v1692_v50 = vld [vmem:[#allocation0 + $0xf3] sm:$0x80]   ;;  %v1400_v53 = vld [vmem:[#allocation0 + $0x86] sm:$0x10]   ;;  %1555 = vrot.lane.b32.xlu0 %v1554_v56, %s2571_s11  ;;  %v1690_v60 = vsel %vm711_vm5, %v1688_v42, %v1686_v57  ;;  %v1398_v61 = vsel %vm699_vm2, %v1396_v52, %v1394_v58  ;;  %v1633_v62 = vld [vmem:[#allocation0 + $0x331] sm:$0x2]  }
  0x9c   :  { %v1637_v63 = vld [vmem:[#allocation0 + $0x350] sm:$0x4]   ;;  %v1694_v1 = vsel %vm715_vm6, %v1692_v50, %v1690_v60  ;;  %v1402_v2 = vsel %vm703_vm3, %v1400_v53, %v1398_v61  ;;  %v1404_v3 = vld [vmem:[#allocation0 + $0xa5] sm:$0x20]   ;;  %v1635_v4 = vsel %vm691_vm0, %v1633_v62, %v1631_v59  ;;  %v1771_v23 = vld [vmem:[#allocation0 + $0x31a] sm:$0x1]  }
  0x9d   :  { %v1641_v0 = vld [vmem:[#allocation0 + $0x36f] sm:$0x8]   ;;  %1695 = vrot.lane.b32.xlu1 %v1694_v1, %s2571_s11  ;;  %v1639_v7 = vsel %vm695_vm1, %v1637_v63, %v1635_v4  ;;  %v1491_v9 = vld [vmem:[#allocation0 + $0x30a] sm:$0x1]   ;;  %v1406_v16 = vsel %vm707_vm4, %v1404_v3, %v1402_v2  ;;  %v1773_v24 = vld [vmem:[#allocation0 + $0x339] sm:$0x2]  }
  0x9e   :  { %v1645_v5 = vld [vmem:[#allocation0 + $0x38e] sm:$0x10]   ;;  %v1493_v10 = vld [vmem:[#allocation0 + $0x329] sm:$0x2]   ;;  %v1643_v11 = vsel %vm699_vm2, %v1641_v0, %v1639_v7  ;;  %v1777_v25 = vld [vmem:[#allocation0 + $0x358] sm:$0x4]   ;;  %v1775_v29 = vsel %vm691_vm0, %v1773_v24, %v1771_v23 }
  0x9f   :  { %v1649_v8 = vld [vmem:[#allocation0 + $0x3ad] sm:$0x20]   ;;  %v1495_v13 = vsel %vm691_vm0, %v1493_v10, %v1491_v9  ;;  %v1497_v14 = vld [vmem:[#allocation0 + $0x348] sm:$0x4]   ;;  %v1647_v18 = vsel %vm703_vm3, %v1645_v5, %v1643_v11  ;;  %v1781_v30 = vld [vmem:[#allocation0 + $0x377] sm:$0x8]   ;;  %v1779_v34 = vsel %vm695_vm1, %v1777_v25, %v1775_v29 }
  0xa0   :  { %v1653_v12 = vld [vmem:[#allocation0 + $0x3cc] sm:$0x40]   ;;  %v1501_v15 = vld [vmem:[#allocation0 + $0x367] sm:$0x8]   ;;  %v1499_v20 = vsel %vm695_vm1, %v1497_v14, %v1495_v13  ;;  %v1651_v22 = vsel %vm707_vm4, %v1649_v8, %v1647_v18  ;;  %v1785_v31 = vld [vmem:[#allocation0 + $0x396] sm:$0x10]   ;;  %v1783_v38 = vsel %vm699_vm2, %v1781_v30, %v1779_v34 }
  0xa1   :  { %v1408_v17 = vld [vmem:[#allocation0 + $0xc4] sm:$0x40]   ;;  %v1657_v19 = vld [vmem:[#allocation0 + $0x3eb] sm:$0x80]   ;;  %v1655_v26 = vsel %vm711_vm5, %v1653_v12, %v1651_v22  ;;  %v1503_v27 = vsel %vm699_vm2, %v1501_v15, %v1499_v20  ;;  %v1789_v35 = vld [vmem:[#allocation0 + $0x3b5] sm:$0x20]   ;;  %v1787_v44 = vsel %vm703_vm3, %v1785_v31, %v1783_v38 }
  0xa2   :  { %1310 = vrot.lane.b32.xlu2 %v1309_v6, %s2571_s11  ;;  %v1412_v21 = vld [vmem:[#allocation0 + $0xe3] sm:$0x80]   ;;  %v1410_v32 = vsel %vm711_vm5, %v1408_v17, %v1406_v16  ;;  %v1659_v33 = vsel %vm715_vm6, %v1657_v19, %v1655_v26  ;;  %v1793_v36 = vld [vmem:[#allocation0 + $0x3d4] sm:$0x40]   ;;  %v1791_v49 = vsel %vm707_vm4, %v1789_v35, %v1787_v44  ;;  %v1596_v52 = vld [vmem:[#allocation0 + $0x212] sm:$0x1]  }
  0xa3   :  { %v1505_v28 = vld [vmem:[#allocation0 + $0x386] sm:$0x10]   ;;  %v1736_v37 = vld [vmem:[#allocation0 + $0x21a] sm:$0x1]   ;;  %1660 = vrot.lane.b32.xlu0 %v1659_v33, %s2571_s11  ;;  %v1414_v48 = vsel %vm715_vm6, %v1412_v21, %v1410_v32  ;;  %v1598_v53 = vld [vmem:[#allocation0 + $0x231] sm:$0x2]   ;;  %v1795_v54 = vsel %vm711_vm5, %v1793_v36, %v1791_v49 }
  0xa4   :  { %v1738_v39 = vld [vmem:[#allocation0 + $0x239] sm:$0x2]   ;;  %v1507_v42 = vsel %vm703_vm3, %v1505_v28, %v1503_v27  ;;  %v1509_v43 = vld [vmem:[#allocation0 + $0x3a5] sm:$0x20]   ;;  %v1600_v57 = vsel %vm691_vm0, %v1598_v53, %v1596_v52  ;;  %v1602_v58 = vld [vmem:[#allocation0 + $0x250] sm:$0x4]   ;;  %v3227_v52 = vpop.permute.xlu0 %717  }
  0xa5   :  { %v1742_v40 = vld [vmem:[#allocation0 + $0x258] sm:$0x4]   ;;  %v1740_v46 = vsel %vm691_vm0, %v1738_v39, %v1736_v37  ;;  %v1606_v59 = vld [vmem:[#allocation0 + $0x26f] sm:$0x8]   ;;  %v1511_v60 = vsel %vm707_vm4, %v1509_v43, %v1507_v42  ;;  %v1513_v61 = vld [vmem:[#allocation0 + $0x3c4] sm:$0x40]   ;;  %v1604_v1 = vsel %vm695_vm1, %v1602_v58, %v1600_v57 }
  0xa6   :  { %v1746_v41 = vld [vmem:[#allocation0 + $0x277] sm:$0x8]   ;;  %v1744_v50 = vsel %vm695_vm1, %v1742_v40, %v1740_v46  ;;  %v1517_v2 = vld [vmem:[#allocation0 + $0x3e3] sm:$0x80]   ;;  %v1875_v4 = vld [vmem:[#allocation0 + $0x201] sm:$0x1]   ;;  %v1608_v8 = vsel %vm699_vm2, %v1606_v59, %v1604_v1  ;;  %v1515_v13 = vsel %vm711_vm5, %v1513_v61, %v1511_v60  ;;  %v3234_v60 = vpop.permute.xlu1 %786  }
  0xa7   :  { %v1797_v45 = vld [vmem:[#allocation0 + $0x3f3] sm:$0x80]   ;;  %v1748_v55 = vsel %vm699_vm2, %v1746_v41, %v1744_v50  ;;  %v1877_v5 = vld [vmem:[#allocation0 + $0x220] sm:$0x2]   ;;  %v1610_v9 = vld [vmem:[#allocation0 + $0x28e] sm:$0x10]   ;;  %v1519_v29 = vsel %vm715_vm6, %v1517_v2, %v1515_v13  ;;  %v3229_v53 = vpop.permute.xlu2 %856  }
  0xa8   :  { %v1750_v47 = vld [vmem:[#allocation0 + $0x296] sm:$0x10]   ;;  %v1799_v62 = vsel %vm715_vm6, %v1797_v45, %v1795_v54  ;;  %v1881_v6 = vld [vmem:[#allocation0 + $0x23f] sm:$0x4]   ;;  %v1879_v10 = vsel %vm691_vm0, %v1877_v5, %v1875_v4  ;;  %v1612_v23 = vsel %vm703_vm3, %v1610_v9, %v1608_v8  ;;  %v1614_v24 = vld [vmem:[#allocation0 + $0x2ad] sm:$0x20]  }
  0xa9   :  { %v1754_v51 = vld [vmem:[#allocation0 + $0x2b5] sm:$0x20]   ;;  %v1752_v63 = vsel %vm703_vm3, %v1750_v47, %v1748_v55  ;;  %1800 = vrot.lane.b32.xlu1 %v1799_v62, %s2571_s11  ;;  %v1885_v11 = vld [vmem:[#allocation0 + $0x25e] sm:$0x8]   ;;  %v1883_v15 = vsel %vm695_vm1, %v1881_v6, %v1879_v10  ;;  %v1616_v41 = vsel %vm707_vm4, %v1614_v24, %v1612_v23  ;;  %v1618_v42 = vld [vmem:[#allocation0 + $0x2cc] sm:$0x40]  }
  0xaa   :  { %v1758_v56 = vld [vmem:[#allocation0 + $0x2d4] sm:$0x40]   ;;  %1415 = vrot.lane.b32.xlu2 %v1414_v48, %s2571_s11  ;;  %v1756_v3 = vsel %vm707_vm4, %v1754_v51, %v1752_v63  ;;  %v1889_v12 = vld [vmem:[#allocation0 + $0x27d] sm:$0x10]   ;;  %v1887_v19 = vsel %vm699_vm2, %v1885_v11, %v1883_v15  ;;  %v1622_v47 = vld [vmem:[#allocation0 + $0x2eb] sm:$0x80]   ;;  %v1620_v61 = vsel %vm711_vm5, %v1618_v42, %v1616_v41 }
  0xab   :  { %v1762_v0 = vld [vmem:[#allocation0 + $0x2f3] sm:$0x80]   ;;  %v1760_v7 = vsel %vm711_vm5, %v1758_v56, %v1756_v3  ;;  %v1893_v16 = vld [vmem:[#allocation0 + $0x29c] sm:$0x20]   ;;  %v1891_v25 = vsel %vm703_vm3, %v1889_v12, %v1887_v19  ;;  %s2572_s0 = smov 32   ;;  %v1624_v13 = vsel %vm715_vm6, %v1622_v47, %v1620_v61  ;;  %vm518_vm8 = vcmask 261120  }
  0xac   :  { %v1764_v14 = vsel %vm715_vm6, %v1762_v0, %v1760_v7  ;;  %v1897_v17 = vld [vmem:[#allocation0 + $0x2bb] sm:$0x40]   ;;  %v1895_v30 = vsel %vm707_vm4, %v1893_v16, %v1891_v25  ;;  %v1701_v33 = vld [vmem:[#allocation0 + $0x11a] sm:$0x1]   ;;  %v1980_v49 = vld [vmem:[#allocation0 + $0x109] sm:$0x1]  }
  0xad   :  { %v1840_v18 = vld [vmem:[#allocation0 + $0x101] sm:$0x1]   ;;  %1765 = vrot.lane.b32.xlu0 %v1764_v14, %s2571_s11  ;;  %v1703_v34 = vld [vmem:[#allocation0 + $0x139] sm:$0x2]   ;;  %v1899_v35 = vsel %vm711_vm5, %v1897_v17, %v1895_v30  ;;  %v1982_v50 = vld [vmem:[#allocation0 + $0x128] sm:$0x2]  }
  0xae   :  { %v1842_v20 = vld [vmem:[#allocation0 + $0x120] sm:$0x2]   ;;  %v1705_v38 = vsel %vm691_vm0, %v1703_v34, %v1701_v33  ;;  %v1707_v39 = vld [vmem:[#allocation0 + $0x158] sm:$0x4]   ;;  %v1986_v51 = vld [vmem:[#allocation0 + $0x147] sm:$0x4]   ;;  %v1984_v57 = vsel %vm691_vm0, %v1982_v50, %v1980_v49 }
  0xaf   :  { %v1846_v21 = vld [vmem:[#allocation0 + $0x13f] sm:$0x4]   ;;  %v1844_v27 = vsel %vm691_vm0, %v1842_v20, %v1840_v18  ;;  %v1711_v40 = vld [vmem:[#allocation0 + $0x177] sm:$0x8]   ;;  %v1709_v46 = vsel %vm695_vm1, %v1707_v39, %v1705_v38  ;;  %v1990_v58 = vld [vmem:[#allocation0 + $0x166] sm:$0x8]   ;;  %v1988_v63 = vsel %vm695_vm1, %v1986_v51, %v1984_v57 }
  0xb0   :  { %v1850_v22 = vld [vmem:[#allocation0 + $0x15e] sm:$0x8]   ;;  %v1848_v31 = vsel %vm695_vm1, %v1846_v21, %v1844_v27  ;;  %v1713_v55 = vsel %vm699_vm2, %v1711_v40, %v1709_v46  ;;  %v1715_v56 = vld [vmem:[#allocation0 + $0x196] sm:$0x10]   ;;  %v1994_v59 = vld [vmem:[#allocation0 + $0x185] sm:$0x10]   ;;  %v1992_v3 = vsel %vm699_vm2, %v1990_v58, %v1988_v63 }
  0xb1   :  { %v1901_v26 = vld [vmem:[#allocation0 + $0x2da] sm:$0x80]   ;;  %v1852_v36 = vsel %vm699_vm2, %v1850_v22, %v1848_v31  ;;  %v1998_v0 = vld [vmem:[#allocation0 + $0x1a4] sm:$0x20]   ;;  %v1717_v7 = vsel %vm703_vm3, %v1715_v56, %v1713_v55  ;;  %v1719_v8 = vld [vmem:[#allocation0 + $0x1b5] sm:$0x20]   ;;  %v1996_v9 = vsel %vm703_vm3, %v1994_v59, %v1992_v3 }
  0xb2   :  { %v1854_v28 = vld [vmem:[#allocation0 + $0x17d] sm:$0x10]   ;;  %v1903_v43 = vsel %vm715_vm6, %v1901_v26, %v1899_v35  ;;  %1520 = vrot.lane.b32.xlu2 %v1519_v29, %s2571_s11  ;;  %v2002_v1 = vld [vmem:[#allocation0 + $0x1c3] sm:$0x40]   ;;  %v2000_v14 = vsel %vm707_vm4, %v1998_v0, %v1996_v9  ;;  %v1721_v25 = vsel %vm707_vm4, %v1719_v8, %v1717_v7  ;;  %v1723_v26 = vld [vmem:[#allocation0 + $0x1d4] sm:$0x40]  }
  0xb3   :  { %v1858_v32 = vld [vmem:[#allocation0 + $0x19c] sm:$0x20]   ;;  %v1856_v44 = vsel %vm703_vm3, %v1854_v28, %v1852_v36  ;;  %1904 = vrot.lane.b32.xlu1 %v1903_v43, %s2572_s0  ;;  %v1945_v2 = vld [vmem:[#allocation0 + $0x9] sm:$0x1]   ;;  %v2004_v19 = vsel %vm711_vm5, %v2002_v1, %v2000_v14  ;;  %v1727_v31 = vld [vmem:[#allocation0 + $0x1f3] sm:$0x80]   ;;  %v3257_v36 = vpop.permute.xlu0 %751  }
  0xb4   :  { %v1862_v37 = vld [vmem:[#allocation0 + $0x1bb] sm:$0x40]   ;;  %v1860_v48 = vsel %vm707_vm4, %v1858_v32, %v1856_v44  ;;  %v1947_v4 = vld [vmem:[#allocation0 + $0x28] sm:$0x2]   ;;  %v2085_v33 = vld [vmem:[#allocation0 + $0x11] sm:$0x1]   ;;  %v3264_v44 = vpop.permute.xlu1 %821  }
  0xb5   :  { %v1866_v45 = vld [vmem:[#allocation0 + $0x1da] sm:$0x80]   ;;  %v1864_v54 = vsel %vm711_vm5, %v1862_v37, %v1860_v48  ;;  %v1951_v5 = vld [vmem:[#allocation0 + $0x47] sm:$0x4]   ;;  %v1949_v11 = vsel %vm691_vm0, %v1947_v4, %v1945_v2  ;;  %v2087_v34 = vld [vmem:[#allocation0 + $0x30] sm:$0x2]  }
  0xb6   :  { %v1868_v62 = vsel %vm715_vm6, %v1866_v45, %v1864_v54  ;;  %v1955_v6 = vld [vmem:[#allocation0 + $0x66] sm:$0x8]   ;;  %v1953_v15 = vsel %vm695_vm1, %v1951_v5, %v1949_v11  ;;  %v1806_v17 = vld [vmem:[#allocation0 + $0x1] sm:$0x1]   ;;  %v2091_v35 = vld [vmem:[#allocation0 + $0x4f] sm:$0x4]   ;;  %v2089_v41 = vsel %vm691_vm0, %v2087_v34, %v2085_v33  ;;  %v1725_v45 = vsel %vm711_vm5, %v1723_v26, %v1721_v25 }
  0xb7   :  { %1869 = vrot.lane.b32.xlu0 %v1868_v62, %s2572_s0  ;;  %v2006_v10 = vld [vmem:[#allocation0 + $0x1e2] sm:$0x80]   ;;  %v1808_v18 = vld [vmem:[#allocation0 + $0x20] sm:$0x2]   ;;  %v1957_v20 = vsel %vm699_vm2, %v1955_v6, %v1953_v15  ;;  %v2095_v42 = vld [vmem:[#allocation0 + $0x6e] sm:$0x8]   ;;  %v2093_v47 = vsel %vm695_vm1, %v2091_v35, %v2089_v41  ;;  %v1729_v0 = vsel %vm715_vm6, %v1727_v31, %v1725_v45 }
  0xb8   :  { %v1959_v12 = vld [vmem:[#allocation0 + $0x85] sm:$0x10]   ;;  %v1810_v22 = vsel %vm691_vm0, %v1808_v18, %v1806_v17  ;;  %v1812_v23 = vld [vmem:[#allocation0 + $0x3f] sm:$0x4]   ;;  %v2008_v27 = vsel %vm715_vm6, %v2006_v10, %v2004_v19  ;;  %v2099_v43 = vld [vmem:[#allocation0 + $0x8d] sm:$0x10]   ;;  %v2097_v51 = vsel %vm699_vm2, %v2095_v42, %v2093_v47 }
  0xb9   :  { %v1963_v16 = vld [vmem:[#allocation0 + $0xa4] sm:$0x20]   ;;  %v1816_v24 = vld [vmem:[#allocation0 + $0x5e] sm:$0x8]   ;;  %v1961_v28 = vsel %vm703_vm3, %v1959_v12, %v1957_v20  ;;  %v1814_v30 = vsel %vm695_vm1, %v1812_v23, %v1810_v22  ;;  %v2103_v48 = vld [vmem:[#allocation0 + $0xac] sm:$0x20]   ;;  %v2101_v59 = vsel %vm703_vm3, %v2099_v43, %v2097_v51 }
  0xba   :  { %v1967_v21 = vld [vmem:[#allocation0 + $0xc3] sm:$0x40]   ;;  %1625 = vrot.lane.b32.xlu2 %v1624_v13, %s2571_s11  ;;  %v1965_v32 = vsel %vm707_vm4, %v1963_v16, %v1961_v28  ;;  %v1818_v39 = vsel %vm699_vm2, %v1816_v24, %v1814_v30  ;;  %v1820_v40 = vld [vmem:[#allocation0 + $0x7d] sm:$0x10]   ;;  %v2107_v49 = vld [vmem:[#allocation0 + $0xcb] sm:$0x40]   ;;  %v2105_v1 = vsel %vm707_vm4, %v2103_v48, %v2101_v59 }
  0xbb   :  { %v1971_v29 = vld [vmem:[#allocation0 + $0xe2] sm:$0x80]   ;;  %2009 = vrot.lane.b32.xlu1 %v2008_v27, %s2572_s0  ;;  %v1969_v38 = vsel %vm711_vm5, %v1967_v21, %v1965_v32  ;;  %v1822_v57 = vsel %vm703_vm3, %v1820_v40, %v1818_v39  ;;  %v1824_v58 = vld [vmem:[#allocation0 + $0x9c] sm:$0x20]   ;;  %v2111_v61 = vld [vmem:[#allocation0 + $0xea] sm:$0x80]   ;;  %v2109_v6 = vsel %vm711_vm5, %v2107_v49, %v2105_v1  ;;  %v3287_v23 = vpop.permute.xlu0 %926  }
  0xbc   :  { %v1973_v46 = vsel %vm715_vm6, %v1971_v29, %v1969_v38  ;;  %v2050_v50 = vld [vmem:[#allocation0 + $0x309] sm:$0x1]   ;;  %v1910_v4 = vld [vmem:[#allocation0 + $0x301] sm:$0x1]   ;;  %v1826_v12 = vsel %vm707_vm4, %v1824_v58, %v1822_v57  ;;  %v2113_v14 = vsel %vm715_vm6, %v2111_v61, %v2109_v6  ;;  %v2190_v20 = vld [vmem:[#allocation0 + $0x311] sm:$0x1]   ;;  %v3292_v30 = vpop.permute.xlu1 %961  }
  0xbd   :  { %v3259_v37 = vpop.permute.xlu2 %891   ;;  %v2052_v54 = vld [vmem:[#allocation0 + $0x328] sm:$0x2]   ;;  %v1912_v5 = vld [vmem:[#allocation0 + $0x320] sm:$0x2]   ;;  %v2192_v21 = vld [vmem:[#allocation0 + $0x330] sm:$0x2]  }
  0xbe   :  { %v2056_v55 = vld [vmem:[#allocation0 + $0x347] sm:$0x4]   ;;  %v2054_v62 = vsel %vm691_vm0, %v2052_v54, %v2050_v50  ;;  %v1914_v9 = vsel %vm691_vm0, %v1912_v5, %v1910_v4  ;;  %v1916_v10 = vld [vmem:[#allocation0 + $0x33f] sm:$0x4]   ;;  %v2196_v22 = vld [vmem:[#allocation0 + $0x34f] sm:$0x4]   ;;  %v2194_v27 = vsel %vm691_vm0, %v2192_v21, %v2190_v20 }
  0xbf   :  { %1974 = vrot.lane.b32.xlu0 %v1973_v46, %s2572_s0  ;;  %v2060_v56 = vld [vmem:[#allocation0 + $0x366] sm:$0x8]   ;;  %v2058_v2 = vsel %vm695_vm1, %v2056_v55, %v2054_v62  ;;  %v1920_v11 = vld [vmem:[#allocation0 + $0x35e] sm:$0x8]   ;;  %v1918_v17 = vsel %vm695_vm1, %v1916_v10, %v1914_v9  ;;  %v2200_v28 = vld [vmem:[#allocation0 + $0x36e] sm:$0x8]   ;;  %v2198_v33 = vsel %vm695_vm1, %v2196_v22, %v2194_v27 }
  0xc0   :  { %v2064_v63 = vld [vmem:[#allocation0 + $0x385] sm:$0x10]   ;;  %v2062_v7 = vsel %vm699_vm2, %v2060_v56, %v2058_v2  ;;  %v1828_v13 = vld [vmem:[#allocation0 + $0xbb] sm:$0x40]   ;;  %v1922_v25 = vsel %vm699_vm2, %v1920_v11, %v1918_v17  ;;  %v2204_v29 = vld [vmem:[#allocation0 + $0x38d] sm:$0x10]   ;;  %v2202_v39 = vsel %vm699_vm2, %v2200_v28, %v2198_v33 }
  0xc1   :  { %v2068_v3 = vld [vmem:[#allocation0 + $0x3a4] sm:$0x20]   ;;  %v2066_v15 = vsel %vm703_vm3, %v2064_v63, %v2062_v7  ;;  %v1832_v18 = vld [vmem:[#allocation0 + $0xda] sm:$0x80]   ;;  %v1830_v31 = vsel %vm711_vm5, %v1828_v13, %v1826_v12  ;;  %v2208_v34 = vld [vmem:[#allocation0 + $0x3ac] sm:$0x20]   ;;  %v2206_v46 = vsel %vm703_vm3, %v2204_v29, %v2202_v39 }
  0xc2   :  { %v2072_v8 = vld [vmem:[#allocation0 + $0x3c3] sm:$0x40]   ;;  %1730 = vrot.lane.b32.xlu2 %v1729_v0, %s2571_s11  ;;  %v2070_v19 = vsel %vm707_vm4, %v2068_v3, %v2066_v15  ;;  %v1924_v26 = vld [vmem:[#allocation0 + $0x37d] sm:$0x10]   ;;  %v2212_v35 = vld [vmem:[#allocation0 + $0x3cb] sm:$0x40]   ;;  %v1834_v50 = vsel %vm715_vm6, %v1832_v18, %v1830_v31  ;;  %v2210_v51 = vsel %vm707_vm4, %v2208_v34, %v2206_v46 }
  0xc3   :  { %v2076_v16 = vld [vmem:[#allocation0 + $0x3e2] sm:$0x80]   ;;  %2114 = vrot.lane.b32.xlu1 %v2113_v14, %s2572_s0  ;;  %v2074_v24 = vsel %vm711_vm5, %v2072_v8, %v2070_v19  ;;  %v2155_v38 = vld [vmem:[#allocation0 + $0x211] sm:$0x1]   ;;  %v1926_v43 = vsel %vm703_vm3, %v1924_v26, %v1922_v25  ;;  %v1928_v45 = vld [vmem:[#allocation0 + $0x39c] sm:$0x20]   ;;  %v2214_v58 = vsel %vm711_vm5, %v2212_v35, %v2210_v51 }
  0xc4   :  { %v2078_v32 = vsel %vm715_vm6, %v2076_v16, %v2074_v24  ;;  %v2157_v40 = vld [vmem:[#allocation0 + $0x230] sm:$0x2]   ;;  %v2015_v56 = vld [vmem:[#allocation0 + $0x209] sm:$0x1]   ;;  %v1930_v1 = vsel %vm707_vm4, %v1928_v45, %v1926_v43  ;;  %v1932_v2 = vld [vmem:[#allocation0 + $0x3bb] sm:$0x40]  }
  0xc5   :  { %v2161_v41 = vld [vmem:[#allocation0 + $0x24f] sm:$0x4]   ;;  %v2159_v48 = vsel %vm691_vm0, %v2157_v40, %v2155_v38  ;;  %v2017_v57 = vld [vmem:[#allocation0 + $0x228] sm:$0x2]   ;;  %v1936_v7 = vld [vmem:[#allocation0 + $0x3da] sm:$0x80]   ;;  %v1934_v20 = vsel %vm711_vm5, %v1932_v2, %v1930_v1 }
  0xc6   :  { %v2165_v42 = vld [vmem:[#allocation0 + $0x26e] sm:$0x8]   ;;  %v2163_v54 = vsel %vm695_vm1, %v2161_v41, %v2159_v48  ;;  %v2019_v62 = vsel %vm691_vm0, %v2017_v57, %v2015_v56  ;;  %v2021_v63 = vld [vmem:[#allocation0 + $0x247] sm:$0x4]   ;;  %v2295_v9 = vld [vmem:[#allocation0 + $0x219] sm:$0x1]   ;;  %v3315_v12 = vpop.permute.xlu0 %1031   ;;  %v1938_v40 = vsel %vm715_vm6, %v1936_v7, %v1934_v20 }
  0xc7   :  { %2079 = vrot.lane.b32.xlu0 %v2078_v32, %s2572_s0  ;;  %v2216_v47 = vld [vmem:[#allocation0 + $0x3ea] sm:$0x80]   ;;  %v2167_v59 = vsel %vm699_vm2, %v2165_v42, %v2163_v54  ;;  %v2025_v0 = vld [vmem:[#allocation0 + $0x266] sm:$0x8]   ;;  %v2023_v6 = vsel %vm695_vm1, %v2021_v63, %v2019_v62  ;;  %v2297_v10 = vld [vmem:[#allocation0 + $0x238] sm:$0x2]  }
  0xc8   :  { %v2169_v49 = vld [vmem:[#allocation0 + $0x28d] sm:$0x10]   ;;  %v2218_v3 = vsel %vm715_vm6, %v2216_v47, %v2214_v58  ;;  %v2301_v11 = vld [vmem:[#allocation0 + $0x257] sm:$0x4]   ;;  %v2027_v14 = vsel %vm699_vm2, %v2025_v0, %v2023_v6  ;;  %v2029_v15 = vld [vmem:[#allocation0 + $0x285] sm:$0x10]   ;;  %v2299_v16 = vsel %vm691_vm0, %v2297_v10, %v2295_v9 }
  0xc9   :  { %v2173_v55 = vld [vmem:[#allocation0 + $0x2ac] sm:$0x20]   ;;  %v2171_v4 = vsel %vm703_vm3, %v2169_v49, %v2167_v59  ;;  %v2305_v17 = vld [vmem:[#allocation0 + $0x276] sm:$0x8]   ;;  %v2303_v22 = vsel %vm695_vm1, %v2301_v11, %v2299_v16  ;;  %v2031_v32 = vsel %vm703_vm3, %v2029_v15, %v2027_v14  ;;  %v2033_v33 = vld [vmem:[#allocation0 + $0x2a4] sm:$0x20]  }
  0xca   :  { %v2177_v61 = vld [vmem:[#allocation0 + $0x2cb] sm:$0x40]   ;;  %1835 = vrot.lane.b32.xlu2 %v1834_v50, %s2572_s0  ;;  %v2175_v8 = vsel %vm707_vm4, %v2173_v55, %v2171_v4  ;;  %v2309_v18 = vld [vmem:[#allocation0 + $0x295] sm:$0x10]   ;;  %v2307_v27 = vsel %vm699_vm2, %v2305_v17, %v2303_v22  ;;  %v2035_v56 = vsel %vm707_vm4, %v2033_v33, %v2031_v32  ;;  %v2037_v57 = vld [vmem:[#allocation0 + $0x2c3] sm:$0x40]  }
  0xcb   :  { %v2181_v5 = vld [vmem:[#allocation0 + $0x2ea] sm:$0x80]   ;;  %2219 = vrot.lane.b32.xlu1 %v2218_v3, %s2572_s0  ;;  %v2179_v13 = vsel %vm711_vm5, %v2177_v61, %v2175_v8  ;;  %v2313_v24 = vld [vmem:[#allocation0 + $0x2b4] sm:$0x20]   ;;  %v2311_v34 = vsel %vm703_vm3, %v2309_v18, %v2307_v27  ;;  %v2041_v6 = vld [vmem:[#allocation0 + $0x2e2] sm:$0x80]  }
  0xcc   :  { %v2183_v21 = vsel %vm715_vm6, %v2181_v5, %v2179_v13  ;;  %v2317_v25 = vld [vmem:[#allocation0 + $0x2d3] sm:$0x40]   ;;  %v2315_v41 = vsel %vm707_vm4, %v2313_v24, %v2311_v34  ;;  %v2120_v45 = vld [vmem:[#allocation0 + $0x111] sm:$0x1]   ;;  %v2039_v5 = vsel %vm711_vm5, %v2037_v57, %v2035_v56  ;;  %vm719_vm9 = vcmask 1048320  }
  0xcd   :  { %v2260_v26 = vld [vmem:[#allocation0 + $0x119] sm:$0x1]   ;;  %v2122_v46 = vld [vmem:[#allocation0 + $0x130] sm:$0x2]   ;;  %v2319_v47 = vsel %vm711_vm5, %v2317_v25, %v2315_v41  ;;  %v2043_v13 = vsel %vm715_vm6, %v2041_v6, %v2039_v5  ;;  %vm1278_vm10 = vcmask 785920   ;;  %vm1837_vm11 = vcmask 523520  }
  0xce   :  { %v3320_v19 = vpop.permute.xlu1 %1066   ;;  %v2262_v28 = vld [vmem:[#allocation0 + $0x138] sm:$0x2]   ;;  %v2124_v50 = vsel %vm691_vm0, %v2122_v46, %v2120_v45  ;;  %v2126_v51 = vld [vmem:[#allocation0 + $0x14f] sm:$0x4]  }
  0xcf   :  { %2184 = vrot.lane.b32.xlu0 %v2183_v21, %s2572_s0  ;;  %v2266_v29 = vld [vmem:[#allocation0 + $0x157] sm:$0x4]   ;;  %v2264_v38 = vsel %vm691_vm0, %v2262_v28, %v2260_v26  ;;  %v2130_v54 = vld [vmem:[#allocation0 + $0x16e] sm:$0x8]   ;;  %v2128_v62 = vsel %vm695_vm1, %v2126_v51, %v2124_v50 }
  0xd0   :  { %v2270_v31 = vld [vmem:[#allocation0 + $0x176] sm:$0x8]   ;;  %v2268_v42 = vsel %vm695_vm1, %v2266_v29, %v2264_v38  ;;  %v2132_v3 = vsel %vm699_vm2, %v2130_v54, %v2128_v62  ;;  %v2134_v4 = vld [vmem:[#allocation0 + $0x18d] sm:$0x10]  }
  0xd1   :  { %v2321_v35 = vld [vmem:[#allocation0 + $0x2f2] sm:$0x80]   ;;  %v2272_v48 = vsel %vm699_vm2, %v2270_v31, %v2268_v42  ;;  %v2136_v10 = vsel %vm703_vm3, %v2134_v4, %v2132_v3  ;;  %v2138_v11 = vld [vmem:[#allocation0 + $0x1ac] sm:$0x20]  }
  0xd2   :  { %v2274_v39 = vld [vmem:[#allocation0 + $0x195] sm:$0x10]   ;;  %v2323_v58 = vsel %vm715_vm6, %v2321_v35, %v2319_v47  ;;  %1939 = vrot.lane.b32.xlu2 %v1938_v40, %s2572_s0  ;;  %v2142_v14 = vld [vmem:[#allocation0 + $0x1cb] sm:$0x40]   ;;  %v2140_v24 = vsel %vm707_vm4, %v2138_v11, %v2136_v10 }
  0xd3   :  { %v2278_v43 = vld [vmem:[#allocation0 + $0x1b4] sm:$0x20]   ;;  %v3336_v55 = vpop.permute.xlu2 %996   ;;  %v2276_v59 = vsel %vm703_vm3, %v2274_v39, %v2272_v48  ;;  %2324 = vrot.lane.b32.xlu1 %v2323_v58, %s2572_s0  ;;  %v514_v16 = vld [vmem:[#allocation0] ss:$8 sm:$0xf]   ;;  %v2144_v38 = vsel %vm711_vm5, %v2142_v14, %v2140_v24 }
  0xd4   :  { %v2282_v49 = vld [vmem:[#allocation0 + $0x1d3] sm:$0x40]   ;;  %v2280_v63 = vsel %vm707_vm4, %v2278_v43, %v2276_v59  ;;  %v547_v17 = vld [vmem:[#allocation0 + $0xc0] ss:$8 sm:$0xf0]  }
  0xd5   :  { %v2286_v61 = vld [vmem:[#allocation0 + $0x1f2] sm:$0x80]   ;;  %v2284_v2 = vsel %vm711_vm5, %v2282_v49, %v2280_v63  ;;  %v515_v22 = vld [vmem:[#allocation0] ss:$8 sm:$0xf0]  }
  0xd6   :  { %v2225_v0 = vld [vmem:[#allocation0 + $0x19] sm:$0x1]   ;;  %v2288_v7 = vsel %vm715_vm6, %v2286_v61, %v2284_v2  ;;  %v517_v27 = vsel %vm516_vm7, %v515_v22, %v514_v16  ;;  %v523_v28 = vld [vmem:[#allocation0 + $0x40] ss:$8 sm:$0xf]  }
  0xd7   :  { %v2227_v1 = vld [vmem:[#allocation0 + $0x38] sm:$0x2]   ;;  %2289 = vrot.lane.b32.xlu0 %v2288_v7, %s2572_s0  ;;  %v525_v29 = vld [vmem:[#allocation0 + $0x40] ss:$8 sm:$0xf0]  }
  0xd8   :  { %v2229_v8 = vsel %vm691_vm0, %v2227_v1, %v2225_v0  ;;  %v2231_v9 = vld [vmem:[#allocation0 + $0x57] sm:$0x4]   ;;  %v2146_v31 = vld [vmem:[#allocation0 + $0x1ea] sm:$0x80]   ;;  %v527_v32 = vsel %vm516_vm7, %v525_v29, %v523_v28 }
  0xd9   :  { %v2235_v15 = vld [vmem:[#allocation0 + $0x76] sm:$0x8]   ;;  %v2233_v18 = vsel %vm695_vm1, %v2231_v9, %v2229_v8  ;;  %519 = vst.msk [vmem:[%s3724_s1] ss:$8 sm:$0xf] %vm518_vm8, %v517_v27   ;;  %v2148_v48 = vsel %vm715_vm6, %v2146_v31, %v2144_v38 }
  0xda   :  { %v2330_v20 = vld [vmem:[#allocation0 + $0x319] sm:$0x1]   ;;  %2044 = vrot.lane.b32.xlu2 %v2043_v13, %s2572_s0  ;;  %v534_v33 = vld [vmem:[#allocation0 + $0x80] ss:$8 sm:$0xf]   ;;  %v2237_v34 = vsel %vm699_vm2, %v2235_v15, %v2233_v18 }
  0xdb   :  { %v2332_v21 = vld [vmem:[#allocation0 + $0x338] sm:$0x2]   ;;  %2491 = vst.msk [vmem:[%s3724_s1 - $0x1f] ss:$8 sm:$0xf0] %vm518_vm8, %v517_v27  }
  0xdc   :  { %v2239_v25 = vld [vmem:[#allocation0 + $0x95] sm:$0x10]   ;;  %v1137_v26 = vpop.permute.xlu0 %1136   ;;  %v536_v35 = vld [vmem:[#allocation0 + $0x80] ss:$8 sm:$0xf0]   ;;  %v2334_v42 = vsel %vm691_vm0, %v2332_v21, %v2330_v20 }
  0xdd   :  { %v2243_v39 = vld [vmem:[#allocation0 + $0xb4] sm:$0x20]   ;;  %2492 = vst.msk [vmem:[%s3724_s1 + $0x2] ss:$8 sm:$0xf] %vm518_vm8, %v527_v32   ;;  %v538_v40 = vsel %vm516_vm7, %v536_v35, %v534_v33  ;;  %v2241_v46 = vsel %vm703_vm3, %v2239_v25, %v2237_v34 }
  0xde   :  { %v545_v41 = vld [vmem:[#allocation0 + $0xc0] ss:$8 sm:$0xf]   ;;  %v2336_v43 = vld [vmem:[#allocation0 + $0x357] sm:$0x4]   ;;  %v2245_v56 = vsel %vm707_vm4, %v2243_v39, %v2241_v46 }
  0xdf   :  { %2493 = vst.msk [vmem:[%s3724_s1 - $0x1d] ss:$8 sm:$0xf0] %vm518_vm8, %v527_v32   ;;  %v549_v45 = vsel %vm516_vm7, %v547_v17, %v545_v41  ;;  %v2340_v47 = vld [vmem:[#allocation0 + $0x376] sm:$0x8]   ;;  %v2338_v51 = vsel %vm695_vm1, %v2336_v43, %v2334_v42 }
  0xe0   :  { %2494 = vst.msk [vmem:[%s3724_s1 + $0x4] ss:$8 sm:$0xf] %vm518_vm8, %v538_v40   ;;  %v2247_v49 = vld [vmem:[#allocation0 + $0xd3] sm:$0x40]   ;;  %v2342_v59 = vsel %vm699_vm2, %v2340_v47, %v2338_v51 }
  0xe1   :  { %2495 = vst.msk [vmem:[%s3724_s1 - $0x1b] ss:$8 sm:$0xf0] %vm518_vm8, %v538_v40   ;;  %v556_v50 = vld [vmem:[#allocation0 + $0x100] ss:$8 sm:$0xf]   ;;  %v2249_v62 = vsel %vm711_vm5, %v2247_v49, %v2245_v56 }
  0xe2   :  { %2496 = vst.msk [vmem:[%s3724_s1 + $0x6] ss:$8 sm:$0xf] %vm518_vm8, %v549_v45   ;;  %v558_v54 = vld [vmem:[#allocation0 + $0x100] ss:$8 sm:$0xf0]   ;;  %2149 = vrot.lane.b32.xlu2 %v2148_v48, %s2572_s0 }
  0xe3   :  { %2497 = vst.msk [vmem:[%s3724_s1 - $0x19] ss:$8 sm:$0xf0] %vm518_vm8, %v549_v45   ;;  %v567_v58 = vld [vmem:[#allocation0 + $0x140] ss:$8 sm:$0xf]  }
  0xe4   :  { %v1172_v57 = vpop.permute.xlu1 %1171   ;;  %720 = vst.msk [vmem:[%s3724_s1] sm:$0xff] %vm719_vm9, %v3227_v52   ;;  %v569_v52 = vld [vmem:[#allocation0 + $0x140] ss:$8 sm:$0xf0]   ;;  %v2344_v61 = vld [vmem:[#allocation0 + $0x395] sm:$0x10]  }
  0xe5   :  { %2525 = vst.msk [vmem:[%s3724_s1 + $0x8] sm:$0xff] %vm719_vm9, %v3229_v53   ;;  %v560_v53 = vsel %vm516_vm7, %v558_v54, %v556_v50  ;;  %v2251_v63 = vld [vmem:[#allocation0 + $0xf2] sm:$0x80]   ;;  %v591_v0 = vld [vmem:[#allocation0 + $0x1c0] ss:$8 sm:$0xf0]   ;;  %v571_v1 = vsel %vm516_vm7, %v569_v52, %v567_v58  ;;  %v2346_v4 = vsel %vm703_vm3, %v2344_v61, %v2342_v59 }
  0xe6   :  { %2529 = vst.msk [vmem:[%s3724_s1 + $0x10] sm:$0xff] %vm719_vm9, %v3336_v55   ;;  %v578_v55 = vld [vmem:[#allocation0 + $0x180] ss:$8 sm:$0xf]   ;;  %v2348_v5 = vld [vmem:[#allocation0 + $0x3b4] sm:$0x20]   ;;  %v2253_v6 = vsel %vm715_vm6, %v2251_v63, %v2249_v62 }
  0xe7   :  { %2533 = vst.msk [vmem:[%s3724_s1 + $0x18] sm:$0xff] %vm719_vm9, %v1137_v26   ;;  %v580_v2 = vld [vmem:[#allocation0 + $0x180] ss:$8 sm:$0xf0]   ;;  %v3423_v3 = vpop.permute.xlu2 %1101   ;;  %v2350_v9 = vsel %vm707_vm4, %v2348_v5, %v2346_v4  ;;  %v2352_v10 = vld [vmem:[#allocation0 + $0x3d3] sm:$0x40]  }
  0xe8   :  { %2498 = vst.msk [vmem:[%s3724_s1 + $0x20] ss:$8 sm:$0xf] %vm518_vm8, %v560_v53   ;;  %v589_v7 = vld [vmem:[#allocation0 + $0x1c0] ss:$8 sm:$0xf]   ;;  %v582_v8 = vsel %vm516_vm7, %v580_v2, %v578_v55  ;;  %v2354_v15 = vsel %vm711_vm5, %v2352_v10, %v2350_v9 }
  0xe9   :  { %2499 = vst.msk [vmem:[%s3724_s1 + $0x1] ss:$8 sm:$0xf0] %vm518_vm8, %v560_v53   ;;  %v593_v13 = vsel %vm516_vm7, %v591_v0, %v589_v7  ;;  %v2356_v14 = vld [vmem:[#allocation0 + $0x3f2] sm:$0x80]  }
  0xea   :  { %2500 = vst.msk [vmem:[%s3724_s1 + $0x22] ss:$8 sm:$0xf] %vm518_vm8, %v571_v1   ;;  %2254 = vrot.lane.b32.xlu2 %v2253_v6, %s2572_s0  ;;  %v644_v16 = vld [vmem:[#allocation0 + $0x300] ss:$8 sm:$0xf]   ;;  %v2358_v20 = vsel %vm715_vm6, %v2356_v14, %v2354_v15 }
  0xeb   :  { %2501 = vst.msk [vmem:[%s3724_s1 + $0x3] ss:$8 sm:$0xf0] %vm518_vm8, %v571_v1   ;;  %v646_v17 = vld [vmem:[#allocation0 + $0x300] ss:$8 sm:$0xf0]  }
  0xec   :  { %v1277_v11 = vpop.permute.xlu1 %1276   ;;  %2502 = vst.msk [vmem:[%s3724_s1 + $0x24] ss:$8 sm:$0xf] %vm518_vm8, %v582_v8   ;;  %v655_v18 = vld [vmem:[#allocation0 + $0x340] ss:$8 sm:$0xf]  }
  0xed   :  { %1279 = vst.msk [vmem:[%s3724_s1] sm:$0xff] %vm1278_vm10, %v1277_v11   ;;  %v666_v21 = vld [vmem:[#allocation0 + $0x380] ss:$8 sm:$0xf]  }
  0xee   :  { %2503 = vst.msk [vmem:[%s3724_s1 + $0x5] ss:$8 sm:$0xf0] %vm518_vm8, %v582_v8   ;;  %v679_v24 = vld [vmem:[#allocation0 + $0x3c0] ss:$8 sm:$0xf0]  }
  0xef   :  { %2504 = vst.msk [vmem:[%s3724_s1 + $0x26] ss:$8 sm:$0xf] %vm518_vm8, %v593_v13   ;;  %v677_v26 = vld [vmem:[#allocation0 + $0x3c0] ss:$8 sm:$0xf]  }
  0xf0   :  { %2505 = vst.msk [vmem:[%s3724_s1 + $0x7] ss:$8 sm:$0xf0] %vm518_vm8, %v593_v13   ;;  %v681_v31 = vsel %vm516_vm7, %v679_v24, %v677_v26  ;;  %v600_v32 = vld [vmem:[#allocation0 + $0x200] ss:$8 sm:$0xf]  }
  0xf1   :  { %2522 = vst.msk [vmem:[%s3724_s1 + $0x20] sm:$0xff] %vm719_vm9, %v3257_v36   ;;  %v657_v36 = vld [vmem:[#allocation0 + $0x340] ss:$8 sm:$0xf0]  }
  0xf2   :  { %2526 = vst.msk [vmem:[%s3724_s1 + $0x28] sm:$0xff] %vm719_vm9, %v3259_v37   ;;  %v648_v37 = vsel %vm516_vm7, %v646_v17, %v644_v16  ;;  %2359 = vrot.lane.b32.xlu2 %v2358_v20, %s2572_s0  ;;  %v659_v25 = vsel %vm516_vm7, %v657_v36, %v655_v18  ;;  %v611_v35 = vld [vmem:[#allocation0 + $0x240] ss:$8 sm:$0xf]  }
  0xf3   :  { %2530 = vst.msk [vmem:[%s3724_s1 + $0x30] sm:$0xff] %vm719_vm9, %v3315_v12   ;;  %v668_v12 = vld [vmem:[#allocation0 + $0x380] ss:$8 sm:$0xf0]  }
  0xf4   :  { %v1381_v22 = vpop.permute.xlu1 %1380   ;;  %2534 = vst.msk [vmem:[%s3724_s1 + $0x38] sm:$0xff] %vm719_vm9, %v1172_v57   ;;  %v1207_v27 = vpop.permute.xlu2 %1206   ;;  %v670_v29 = vsel %vm516_vm7, %v668_v12, %v666_v21  ;;  %v613_v39 = vld [vmem:[#allocation0 + $0x240] ss:$8 sm:$0xf0]  }
  0xf5   :  { %2514 = vst.msk [vmem:[%s3724_s1 + $0x60] ss:$8 sm:$0xf] %vm518_vm8, %v648_v37   ;;  %v1242_v28 = vpop.permute.xlu0 %1241   ;;  %v622_v40 = vld [vmem:[#allocation0 + $0x280] ss:$8 sm:$0xf]   ;;  %v615_v41 = vsel %vm516_vm7, %v613_v39, %v611_v35 }
  0xf6   :  { %2515 = vst.msk [vmem:[%s3724_s1 + $0x41] ss:$8 sm:$0xf0] %vm518_vm8, %v648_v37   ;;  %v624_v42 = vld [vmem:[#allocation0 + $0x280] ss:$8 sm:$0xf0]  }
  0xf7   :  { %2516 = vst.msk [vmem:[%s3724_s1 + $0x62] ss:$8 sm:$0xf] %vm518_vm8, %v659_v25   ;;  %v635_v43 = vld [vmem:[#allocation0 + $0x2c0] ss:$8 sm:$0xf0]   ;;  %v626_v46 = vsel %vm516_vm7, %v624_v42, %v622_v40 }
  0xf8   :  { %2517 = vst.msk [vmem:[%s3724_s1 + $0x43] ss:$8 sm:$0xf0] %vm518_vm8, %v659_v25   ;;  %v633_v45 = vld [vmem:[#allocation0 + $0x2c0] ss:$8 sm:$0xf]  }
  0xf9   :  { %2518 = vst.msk [vmem:[%s3724_s1 + $0x64] ss:$8 sm:$0xf] %vm518_vm8, %v670_v29   ;;  %v637_v49 = vsel %vm516_vm7, %v635_v43, %v633_v45 }
  0xfa   :  { %2519 = vst.msk [vmem:[%s3724_s1 + $0x45] ss:$8 sm:$0xf0] %vm518_vm8, %v670_v29  }
  0xfb   :  { %2520 = vst.msk [vmem:[%s3724_s1 + $0x66] ss:$8 sm:$0xf] %vm518_vm8, %v681_v31  }
  0xfc   :  { %2521 = vst.msk [vmem:[%s3724_s1 + $0x47] ss:$8 sm:$0xf0] %vm518_vm8, %v681_v31   ;;  %v1486_v33 = vpop.permute.xlu1 %1485   ;;  %v1311_v34 = vpop.permute.xlu2 %1310  }
  0xfd   :  { %2524 = vst.msk [vmem:[%s3724_s1 + $0x60] sm:$0xff] %vm719_vm9, %v3264_v44   ;;  %v602_v44 = vld [vmem:[#allocation0 + $0x200] ss:$8 sm:$0xf0]   ;;  %v1346_v38 = vpop.permute.xlu0 %1345  }
  0xfe   :  { %2539 = vst.msk [vmem:[%s3724_s1 + $0x60] sm:$0xff] %vm1278_vm10, %v1381_v22  }
  0xff   :  { %2537 = vst.msk [vmem:[%s3724_s1 + $0x20] sm:$0xff] %vm1278_vm10, %v1311_v34  }
 0x100   :  { %2528 = vst.msk [vmem:[%s3724_s1 + $0x68] sm:$0xff] %vm719_vm9, %v3292_v30   ;;  %v604_v30 = vsel %vm516_vm7, %v602_v44, %v600_v32 }
 0x101   :  { %2532 = vst.msk [vmem:[%s3724_s1 + $0x70] sm:$0xff] %vm719_vm9, %v3423_v3  }
 0x102   :  { %2536 = vst.msk [vmem:[%s3724_s1 + $0x78] sm:$0xff] %vm719_vm9, %v1242_v28  }
 0x103   :  { %2506 = vst.msk [vmem:[%s3724_s1 + $0x40] ss:$8 sm:$0xf] %vm518_vm8, %v604_v30  }
 0x104   :  { %2507 = vst.msk [vmem:[%s3724_s1 + $0x21] ss:$8 sm:$0xf0] %vm518_vm8, %v604_v30   ;;  %v1416_v47 = vpop.permute.xlu2 %1415   ;;  %v1591_v50 = vpop.permute.xlu1 %1590  }
 0x105   :  { %2508 = vst.msk [vmem:[%s3724_s1 + $0x42] ss:$8 sm:$0xf] %vm518_vm8, %v615_v41   ;;  %v1451_v48 = vpop.permute.xlu0 %1450  }
 0x106   :  { %2509 = vst.msk [vmem:[%s3724_s1 + $0x23] ss:$8 sm:$0xf0] %vm518_vm8, %v615_v41  }
 0x107   :  { %2540 = vst.msk [vmem:[%s3724_s1 + $0x8] sm:$0xff] %vm1278_vm10, %v1416_v47  }
 0x108   :  { %2510 = vst.msk [vmem:[%s3724_s1 + $0x44] ss:$8 sm:$0xf] %vm518_vm8, %v626_v46  }
 0x109   :  { %2511 = vst.msk [vmem:[%s3724_s1 + $0x25] ss:$8 sm:$0xf0] %vm518_vm8, %v626_v46  }
 0x10a   :  { %2512 = vst.msk [vmem:[%s3724_s1 + $0x46] ss:$8 sm:$0xf] %vm518_vm8, %v637_v49  }
 0x10b   :  { %2513 = vst.msk [vmem:[%s3724_s1 + $0x27] ss:$8 sm:$0xf0] %vm518_vm8, %v637_v49  }
 0x10c   :  { %2523 = vst.msk [vmem:[%s3724_s1 + $0x40] sm:$0xff] %vm719_vm9, %v3234_v60   ;;  %v1521_v60 = vpop.permute.xlu2 %1520  }
 0x10d   :  { %2538 = vst.msk [vmem:[%s3724_s1 + $0x40] sm:$0xff] %vm1278_vm10, %v1346_v38  }
 0x10e   :  { %2527 = vst.msk [vmem:[%s3724_s1 + $0x48] sm:$0xff] %vm719_vm9, %v3287_v23   ;;  %v1556_v23 = vpop.permute.xlu0 %1555  }
 0x10f   :  { %2531 = vst.msk [vmem:[%s3724_s1 + $0x50] sm:$0xff] %vm719_vm9, %v3320_v19   ;;  %v1696_v19 = vpop.permute.xlu1 %1695  }
 0x110   :  { %2535 = vst.msk [vmem:[%s3724_s1 + $0x58] sm:$0xff] %vm719_vm9, %v1207_v27  }
 0x111   :  { %2542 = vst.msk [vmem:[%s3724_s1 + $0x48] sm:$0xff] %vm1278_vm10, %v1486_v33  }
 0x112   :  { %2543 = vst.msk [vmem:[%s3724_s1 + $0x68] sm:$0xff] %vm1278_vm10, %v1521_v60  }
 0x113   :  { %2541 = vst.msk [vmem:[%s3724_s1 + $0x28] sm:$0xff] %vm1278_vm10, %v1451_v48  }
 0x114   :  { %2545 = vst.msk [vmem:[%s3724_s1 + $0x30] sm:$0xff] %vm1278_vm10, %v1591_v50   ;;  %v1626_v51 = vpop.permute.xlu2 %1625  }
 0x115   :  { %2544 = vst.msk [vmem:[%s3724_s1 + $0x10] sm:$0xff] %vm1278_vm10, %v1556_v23  }
 0x116   :  { %2548 = vst.msk [vmem:[%s3724_s1 + $0x18] sm:$0xff] %vm1278_vm10, %v1696_v19   ;;  %v1661_v54 = vpop.permute.xlu0 %1660  }
 0x117   :  { %2546 = vst.msk [vmem:[%s3724_s1 + $0x50] sm:$0xff] %vm1278_vm10, %v1626_v51  }
 0x118   :  { %2547 = vst.msk [vmem:[%s3724_s1 + $0x70] sm:$0xff] %vm1278_vm10, %v1661_v54  }
 0x11b   :  { %v1801_v57 = vpop.permute.xlu1 %1800  }
 0x11c   :  { %v1731_v56 = vpop.permute.xlu2 %1730   ;;  %2551 = vst.msk [vmem:[%s3724_s1 + $0x78] sm:$0xff] %vm1278_vm10, %v1801_v57  }
 0x11d   :  { %2549 = vst.msk [vmem:[%s3724_s1 + $0x38] sm:$0xff] %vm1278_vm10, %v1731_v56  }
 0x11f   :  { %v1766_v58 = vpop.permute.xlu0 %1765  }
 0x120   :  { %2550 = vst.msk [vmem:[%s3724_s1 + $0x58] sm:$0xff] %vm1278_vm10, %v1766_v58  }
 0x124   :  { %v1836_v52 = vpop.permute.xlu2 %1835  }
 0x125   :  { %v1905_v59 = vpop.permute.xlu1 %1904   ;;  %1838 = vst.msk [vmem:[%s3724_s1] sm:$0xff] %vm1837_vm11, %v1836_v52  }
 0x126   :  { %2553 = vst.msk [vmem:[%s3724_s1 + $0x40] sm:$0xff] %vm1837_vm11, %v1905_v59  }
 0x129   :  { %v1870_v61 = vpop.permute.xlu0 %1869  }
 0x12a   :  { %2552 = vst.msk [vmem:[%s3724_s1 + $0x20] sm:$0xff] %vm1837_vm11, %v1870_v61  }
 0x12c   :  { %v1940_v53 = vpop.permute.xlu2 %1939  }
 0x12d   :  { %v2010_v62 = vpop.permute.xlu1 %2009   ;;  %2554 = vst.msk [vmem:[%s3724_s1 + $0x60] sm:$0xff] %vm1837_vm11, %v1940_v53  }
 0x12e   :  { %2556 = vst.msk [vmem:[%s3724_s1 + $0x28] sm:$0xff] %vm1837_vm11, %v2010_v62  }
 0x131   :  { %v1975_v63 = vpop.permute.xlu0 %1974  }
 0x132   :  { %2555 = vst.msk [vmem:[%s3724_s1 + $0x8] sm:$0xff] %vm1837_vm11, %v1975_v63  }
 0x134   :  { %v2045_v55 = vpop.permute.xlu2 %2044  }
 0x135   :  { %v2115_v0 = vpop.permute.xlu1 %2114   ;;  %2557 = vst.msk [vmem:[%s3724_s1 + $0x48] sm:$0xff] %vm1837_vm11, %v2045_v55  }
 0x136   :  { %2559 = vst.msk [vmem:[%s3724_s1 + $0x10] sm:$0xff] %vm1837_vm11, %v2115_v0  }
 0x139   :  { %v2080_v1 = vpop.permute.xlu0 %2079  }
 0x13a   :  { %2558 = vst.msk [vmem:[%s3724_s1 + $0x68] sm:$0xff] %vm1837_vm11, %v2080_v1  }
 0x13c   :  { %v2150_v2 = vpop.permute.xlu2 %2149  }
 0x13d   :  { %v2220_v3 = vpop.permute.xlu1 %2219   ;;  %2560 = vst.msk [vmem:[%s3724_s1 + $0x30] sm:$0xff] %vm1837_vm11, %v2150_v2  }
 0x13e   :  { %2562 = vst.msk [vmem:[%s3724_s1 + $0x70] sm:$0xff] %vm1837_vm11, %v2220_v3  }
 0x141   :  { %v2185_v4 = vpop.permute.xlu0 %2184  }
 0x142   :  { %2561 = vst.msk [vmem:[%s3724_s1 + $0x50] sm:$0xff] %vm1837_vm11, %v2185_v4  }
 0x144   :  { %v2255_v5 = vpop.permute.xlu2 %2254  }
 0x145   :  { %v2325_v6 = vpop.permute.xlu1 %2324   ;;  %2563 = vst.msk [vmem:[%s3724_s1 + $0x18] sm:$0xff] %vm1837_vm11, %v2255_v5  }
 0x146   :  { %2565 = vst.msk [vmem:[%s3724_s1 + $0x58] sm:$0xff] %vm1837_vm11, %v2325_v6  }
 0x149   :  { %v2290_v7 = vpop.permute.xlu0 %2289  }
 0x14a   :  { %2564 = vst.msk [vmem:[%s3724_s1 + $0x38] sm:$0xff] %vm1837_vm11, %v2290_v7  }
 0x14c   :  { %v2360_v8 = vpop.permute.xlu2 %2359  }
 0x14d   :  { %2566 = vst.msk [vmem:[%s3724_s1 + $0x78] sm:$0xff] %vm1837_vm11, %v2360_v8  }

// kernel: tile.23
= control target key start
LH: loop header
LB: loop body
LE: loop exit
PB: predicated region body
PF: predicated region fallthrough
CT: control target
= control target key end

     0   :  { %s64_s0 = inlined_call_operand.vmem [shape: f32[32], index: 0, kind: input, shape index: {}]   ;;  %s65_s1 = inlined_call_operand.vmem [shape: f32[64,32], index: 1, kind: output, shape index: {}]  }
   0x1   :  { %v4_v0 = vld [vmem:[%s64_s0] ss:$0 sm:$0xff] }
   0x2   :  { %5 = vst [vmem:[%s65_s1] sm:$0xff] %v4_v0 }
   0x3   :  { %20 = vst [vmem:[%s65_s1 + $0x8] sm:$0xff] %v4_v0 }
   0x4   :  { %21 = vst [vmem:[%s65_s1 + $0x10] sm:$0xff] %v4_v0 }
   0x5   :  { %22 = vst [vmem:[%s65_s1 + $0x18] sm:$0xff] %v4_v0 }
   0x6   :  { %23 = vst [vmem:[%s65_s1 + $0x20] sm:$0xff] %v4_v0 }
   0x7   :  { %24 = vst [vmem:[%s65_s1 + $0x28] sm:$0xff] %v4_v0 }
   0x8   :  { %25 = vst [vmem:[%s65_s1 + $0x30] sm:$0xff] %v4_v0 }
   0x9   :  { %26 = vst [vmem:[%s65_s1 + $0x38] sm:$0xff] %v4_v0 }

// kernel: tile.24
= control target key start
LH: loop header
LB: loop body
LE: loop exit
PB: predicated region body
PF: predicated region fallthrough
CT: control target
= control target key end

     0   :  { %s182_s10 = smov 96   ;;  %s183_s11 = smov 64   ;;  %vm3_vm0 = vcmask 261120   ;;  %vm17_vm1 = vcmask 1048320   ;;  %vm33_vm2 = vcmask 785920   ;;  %vm49_vm3 = vcmask 523520   ;;  %s275_s0 = inlined_call_operand.vmem [shape: f32[64,32], index: 0, kind: input, shape index: {}]   ;;  %s276_s1 = inlined_call_operand.vmem [shape: f32[1,2048], index: 1, kind: output, shape index: {}]  }
   0x1   :  { %v158_v0 = vld [vmem:[%s275_s0 + $0x3] ss:$4 sm:$0xff]   ;;  %v160_v1 = vld [vmem:[%s275_s0 + $0x2] ss:$4 sm:$0xff]   ;;  %v162_v2 = vld [vmem:[%s275_s0 + $0x1] ss:$4 sm:$0xff]  }
   0x2   :  { %15 = vrot.lane.b32.xlu0 %v158_v0, %s182_s10  ;;  %31 = vrot.lane.b32.xlu1 %v160_v1, %s183_s11  ;;  %s184_s14 = smov 32   ;;  %v159_v3 = vld [vmem:[%s275_s0 + $0x23] ss:$4 sm:$0xff]   ;;  %v161_v4 = vld [vmem:[%s275_s0 + $0x22] ss:$4 sm:$0xff]  }
   0x3   :  { %47 = vrot.lane.b32.xlu2 %v162_v2, %s184_s14  ;;  %v163_v5 = vld [vmem:[%s275_s0 + $0x21] ss:$4 sm:$0xff]   ;;  %v2_v6 = vld [vmem:[%s275_s0] ss:$4 sm:$0xff]  }
   0x4   :  { %4 = vst.msk [vmem:[#allocation0] ss:$8 sm:$0xf] %vm3_vm0, %v2_v6   ;;  %v157_v8 = vld [vmem:[%s275_s0 + $0x20] ss:$4 sm:$0xff]  }
   0x5   :  { %5 = vst.msk [vmem:[#allocation0] ss:$8 sm:$0xf0] %vm3_vm0, %v2_v6  }
   0x6   :  { %10 = vst.msk [vmem:[#allocation0 + $0x40] ss:$8 sm:$0xf] %vm3_vm0, %v157_v8  }
   0x7   :  { %12 = vst.msk [vmem:[#allocation0 + $0x40] ss:$8 sm:$0xf0] %vm3_vm0, %v157_v8  }
   0xa   :  { %22 = vrot.lane.b32.xlu0 %v159_v3, %s182_s10  ;;  %38 = vrot.lane.b32.xlu1 %v161_v4, %s183_s11 }
   0xb   :  { %54 = vrot.lane.b32.xlu2 %v163_v5, %s184_s14 }
  0x5d   :  { %v48_v7 = vpop.permute.xlu2 %47  }
  0x65   :  { %v55_v9 = vpop.permute.xlu2 %54  }
  0x74   :  { %v16_v10 = vpop.permute.xlu0 %15   ;;  %v32_v11 = vpop.permute.xlu1 %31  }
  0x75   :  { %18 = vst.msk [vmem:[#allocation0] ss:$8 sm:$0xf] %vm17_vm1, %v16_v10  }
  0x76   :  { %19 = vst.msk [vmem:[#allocation0] ss:$8 sm:$0xf0] %vm17_vm1, %v16_v10  }
  0x77   :  { %34 = vst.msk [vmem:[#allocation0] ss:$8 sm:$0xf] %vm33_vm2, %v32_v11  }
  0x78   :  { %35 = vst.msk [vmem:[#allocation0] ss:$8 sm:$0xf0] %vm33_vm2, %v32_v11  }
  0x79   :  { %50 = vst.msk [vmem:[#allocation0] ss:$8 sm:$0xf] %vm49_vm3, %v48_v7  }
  0x7a   :  { %51 = vst.msk [vmem:[#allocation0] ss:$8 sm:$0xf0] %vm49_vm3, %v48_v7  }
  0x7c   :  { %v23_v12 = vpop.permute.xlu0 %22   ;;  %v39_v13 = vpop.permute.xlu1 %38  }
  0x7d   :  { %26 = vst.msk [vmem:[#allocation0 + $0x40] ss:$8 sm:$0xf] %vm17_vm1, %v23_v12  }
  0x7e   :  { %28 = vst.msk [vmem:[#allocation0 + $0x40] ss:$8 sm:$0xf0] %vm17_vm1, %v23_v12  }
  0x7f   :  { %42 = vst.msk [vmem:[#allocation0 + $0x40] ss:$8 sm:$0xf] %vm33_vm2, %v39_v13  }
  0x80   :  { %v63_v14 = vld [vmem:[#allocation0] sm:$0x1]  ;;  %v68_v15 = vld [vmem:[#allocation0 + $0x8] sm:$0x1]  ;;  %v74_v16 = vld [vmem:[#allocation0 + $0x10] sm:$0x1] }
  0x81   :  { %66 = vst [vmem:[%s276_s1] sm:$0x1] %v63_v14  ;;  %v80_v17 = vld [vmem:[#allocation0 + $0x18] sm:$0x1]  ;;  %v86_v18 = vld [vmem:[#allocation0 + $0x20] sm:$0x1] }
  0x82   :  { %164 = vst [vmem:[%s276_s1 + $0x1] sm:$0x1] %v68_v15  ;;  %v92_v19 = vld [vmem:[#allocation0 + $0x28] sm:$0x1]  ;;  %v98_v20 = vld [vmem:[#allocation0 + $0x30] sm:$0x1] }
  0x83   :  { %165 = vst [vmem:[%s276_s1 + $0x2] sm:$0x1] %v74_v16  ;;  %v104_v21 = vld [vmem:[#allocation0 + $0x38] sm:$0x1] }
  0x84   :  { %166 = vst [vmem:[%s276_s1 + $0x3] sm:$0x1] %v80_v17 }
  0x85   :  { %167 = vst [vmem:[%s276_s1 + $0x4] sm:$0x1] %v86_v18 }
  0x86   :  { %168 = vst [vmem:[%s276_s1 + $0x5] sm:$0x1] %v92_v19 }
  0x87   :  { %169 = vst [vmem:[%s276_s1 + $0x6] sm:$0x1] %v98_v20 }
  0x88   :  { %170 = vst [vmem:[%s276_s1 + $0x7] sm:$0x1] %v104_v21 }
  0x89   :  { %44 = vst.msk [vmem:[#allocation0 + $0x40] ss:$8 sm:$0xf0] %vm33_vm2, %v39_v13  }
  0x8a   :  { %58 = vst.msk [vmem:[#allocation0 + $0x40] ss:$8 sm:$0xf] %vm49_vm3, %v55_v9  }
  0x8b   :  { %60 = vst.msk [vmem:[#allocation0 + $0x40] ss:$8 sm:$0xf0] %vm49_vm3, %v55_v9  }
  0x91   :  { %v110_v22 = vld [vmem:[#allocation0 + $0x40] sm:$0x1]  ;;  %v116_v23 = vld [vmem:[#allocation0 + $0x48] sm:$0x1]  ;;  %v122_v24 = vld [vmem:[#allocation0 + $0x50] sm:$0x1] }
  0x92   :  { %171 = vst [vmem:[%s276_s1 + $0x8] sm:$0x1] %v110_v22  ;;  %v128_v25 = vld [vmem:[#allocation0 + $0x58] sm:$0x1]  ;;  %v134_v26 = vld [vmem:[#allocation0 + $0x60] sm:$0x1] }
  0x93   :  { %172 = vst [vmem:[%s276_s1 + $0x9] sm:$0x1] %v116_v23  ;;  %v140_v27 = vld [vmem:[#allocation0 + $0x68] sm:$0x1]  ;;  %v146_v28 = vld [vmem:[#allocation0 + $0x70] sm:$0x1] }
  0x94   :  { %173 = vst [vmem:[%s276_s1 + $0xa] sm:$0x1] %v122_v24  ;;  %v152_v29 = vld [vmem:[#allocation0 + $0x78] sm:$0x1] }
  0x95   :  { %174 = vst [vmem:[%s276_s1 + $0xb] sm:$0x1] %v128_v25 }
  0x96   :  { %175 = vst [vmem:[%s276_s1 + $0xc] sm:$0x1] %v134_v26 }
  0x97   :  { %176 = vst [vmem:[%s276_s1 + $0xd] sm:$0x1] %v140_v27 }
  0x98   :  { %177 = vst [vmem:[%s276_s1 + $0xe] sm:$0x1] %v146_v28 }
  0x99   :  { %178 = vst [vmem:[%s276_s1 + $0xf] sm:$0x1] %v152_v29 }

// kernel: tile.28
= control target key start
LH: loop header
LB: loop body
LE: loop exit
PB: predicated region body
PF: predicated region fallthrough
CT: control target
= control target key end

     0   :  { %s64_s0 = inlined_call_operand.vmem [shape: f32[3], index: 0, kind: input, shape index: {}]   ;;  %s65_s1 = inlined_call_operand.vmem [shape: f32[64,3], index: 1, kind: output, shape index: {}]  }
   0x1   :  { %v4_v0 = vld [vmem:[%s64_s0] ss:$0 sm:$0xff] }
   0x2   :  { %5 = vst [vmem:[%s65_s1] sm:$0xff] %v4_v0 }
   0x3   :  { %20 = vst [vmem:[%s65_s1 + $0x8] sm:$0xff] %v4_v0 }
   0x4   :  { %21 = vst [vmem:[%s65_s1 + $0x10] sm:$0xff] %v4_v0 }
   0x5   :  { %22 = vst [vmem:[%s65_s1 + $0x18] sm:$0xff] %v4_v0 }
   0x6   :  { %23 = vst [vmem:[%s65_s1 + $0x20] sm:$0xff] %v4_v0 }
   0x7   :  { %24 = vst [vmem:[%s65_s1 + $0x28] sm:$0xff] %v4_v0 }
   0x8   :  { %25 = vst [vmem:[%s65_s1 + $0x30] sm:$0xff] %v4_v0 }
   0x9   :  { %26 = vst [vmem:[%s65_s1 + $0x38] sm:$0xff] %v4_v0 }

// kernel: tile.29
= control target key start
LH: loop header
LB: loop body
LE: loop exit
PB: predicated region body
PF: predicated region fallthrough
CT: control target
= control target key end

     0   :  { %vm9_vm0 = vcmask 15360   ;;  %s551_s12 = smov 126   ;;  %s552_s13 = smov 120   ;;  %vm3_vm1 = vcmask 23552   ;;  %vm13_vm2 = vcmask 7168   ;;  %vm16_vm3 = vcmask 1048560   ;;  %s825_s0 = inlined_call_operand.vmem [shape: f32[64,3], index: 0, kind: input, shape index: {}]   ;;  %s826_s1 = inlined_call_operand.vmem [shape: f32[1,192], index: 1, kind: output, shape index: {}]  }
   0x1   :  { %v423_v0 = vld [vmem:[%s825_s0 + $0x2a] sm:$0x1]   ;;  %v426_v3 = vld [vmem:[%s825_s0 + $0x28] sm:$0x1]   ;;  %v428_v4 = vld [vmem:[%s825_s0 + $0x26] sm:$0x1]  }
   0x2   :  { %v424_v1 = vld [vmem:[%s825_s0 + $0x2a] sm:$0x1]   ;;  %26 = vrot.lane.b32.xlu1 %v426_v3, %s552_s13  ;;  %s553_s16 = smov 114   ;;  %v425_v5 = vld [vmem:[%s825_s0 + $0x29] sm:$0x1]   ;;  %s554_s21 = smov 123  }
   0x3   :  { %v10_v2 = vsel %vm9_vm0, %v424_v1, %v423_v0  ;;  %38 = vrot.lane.b32.xlu2 %v428_v4, %s553_s16  ;;  %v427_v6 = vld [vmem:[%s825_s0 + $0x27] sm:$0x1]   ;;  %s555_s22 = smov 117   ;;  %v429_v7 = vld [vmem:[%s825_s0 + $0x25] sm:$0x1]   ;;  %s556_s25 = smov 111  }
   0x4   :  { %11 = vrot.lane.b32.xlu0 %v10_v2, %s551_s12  ;;  %v430_v8 = vld [vmem:[%s825_s0 + $0x24] sm:$0x1]   ;;  %v431_v9 = vld [vmem:[%s825_s0 + $0x23] sm:$0x1]   ;;  %s557_s30 = smov 108   ;;  %s558_s2 = smov 105  }
   0x5   :  { %v432_v10 = vld [vmem:[%s825_s0 + $0x22] sm:$0x1]   ;;  %s559_s5 = smov 102   ;;  %v433_v11 = vld [vmem:[%s825_s0 + $0x21] sm:$0x1]   ;;  %s560_s10 = smov 99  }
   0x6   :  { %v434_v12 = vld [vmem:[%s825_s0 + $0x20] sm:$0x1]   ;;  %s561_s11 = smov 96   ;;  %v435_v13 = vld [vmem:[%s825_s0 + $0x1f] sm:$0x1]   ;;  %s562_s14 = smov 93  }
   0x7   :  { %v436_v14 = vld [vmem:[%s825_s0 + $0x1e] sm:$0x1]   ;;  %v437_v15 = vld [vmem:[%s825_s0 + $0x1d] sm:$0x1]   ;;  %s563_s19 = smov 90   ;;  %s564_s20 = smov 87  }
   0x8   :  { %v438_v16 = vld [vmem:[%s825_s0 + $0x1c] sm:$0x1]   ;;  %s565_s23 = smov 84   ;;  %v439_v17 = vld [vmem:[%s825_s0 + $0x1b] sm:$0x1]   ;;  %s566_s28 = smov 81  }
   0x9   :  { %v440_v18 = vld [vmem:[%s825_s0 + $0x1a] sm:$0x1]   ;;  %s567_s29 = smov 78   ;;  %v441_v19 = vld [vmem:[%s825_s0 + $0x19] sm:$0x1]   ;;  %s568_s3 = smov 75  }
   0xa   :  { %32 = vrot.lane.b32.xlu1 %v427_v6, %s555_s22  ;;  %v442_v20 = vld [vmem:[%s825_s0 + $0x18] sm:$0x1]   ;;  %v443_v21 = vld [vmem:[%s825_s0 + $0x17] sm:$0x1]   ;;  %s569_s8 = smov 72   ;;  %s570_s9 = smov 69  }
   0xb   :  { %44 = vrot.lane.b32.xlu2 %v429_v7, %s556_s25  ;;  %v444_v22 = vld [vmem:[%s825_s0 + $0x16] sm:$0x1]   ;;  %s571_s12 = smov 66   ;;  %v445_v23 = vld [vmem:[%s825_s0 + $0x15] sm:$0x1]   ;;  %s572_s17 = smov 63  }
   0xc   :  { %20 = vrot.lane.b32.xlu0 %v425_v5, %s554_s21  ;;  %v446_v24 = vld [vmem:[%s825_s0 + $0x3f] sm:$0x1]   ;;  %s573_s18 = smov 61   ;;  %v447_v25 = vld [vmem:[%s825_s0 + $0x14] sm:$0x1]   ;;  %s574_s21 = smov 60  }
   0xd   :  { %v448_v26 = vld [vmem:[%s825_s0 + $0x3e] sm:$0x1]   ;;  %v449_v27 = vld [vmem:[%s825_s0 + $0x13] sm:$0x1]   ;;  %s575_s26 = smov 58   ;;  %s576_s27 = smov 57  }
   0xe   :  { %v450_v28 = vld [vmem:[%s825_s0 + $0x3d] sm:$0x1]   ;;  %v451_v29 = vld [vmem:[%s825_s0 + $0x12] sm:$0x1]   ;;  %v452_v30 = vld [vmem:[%s825_s0 + $0x3c] sm:$0x1]  }
   0xf   :  { %s578_s6 = smov 54   ;;  %s579_s7 = smov 52   ;;  %v453_v31 = vld [vmem:[%s825_s0 + $0x11] sm:$0x1]   ;;  %v454_v32 = vld [vmem:[%s825_s0 + $0x3b] sm:$0x1]  }
  0x10   :  { %v455_v33 = vld [vmem:[%s825_s0 + $0x10] sm:$0x1]   ;;  %s581_s15 = smov 49   ;;  %s582_s16 = smov 48   ;;  %v456_v34 = vld [vmem:[%s825_s0 + $0x3a] sm:$0x1]  }
  0x11   :  { %v2_v35 = vld [vmem:[%s825_s0] sm:$0x1]   ;;  %v457_v36 = vld [vmem:[%s825_s0 + $0xf] sm:$0x1]   ;;  %v458_v37 = vld [vmem:[%s825_s0 + $0x39] sm:$0x1]  }
  0x12   :  { %56 = vrot.lane.b32.xlu1 %v431_v9, %s558_s2  ;;  %4 = vst.msk [vmem:[#allocation0] sm:$0x1] %vm3_vm1, %v2_v35   ;;  %v459_v38 = vld [vmem:[%s825_s0 + $0xe] sm:$0x1]   ;;  %v460_v39 = vld [vmem:[%s825_s0 + $0x38] sm:$0x1]  }
  0x13   :  { %62 = vrot.lane.b32.xlu2 %v432_v10, %s559_s5  ;;  %v461_v40 = vld [vmem:[%s825_s0 + $0xd] sm:$0x1]   ;;  %v462_v42 = vld [vmem:[%s825_s0 + $0x37] sm:$0x1]   ;;  %v463_v43 = vld [vmem:[%s825_s0 + $0xc] sm:$0x1]  }
  0x14   :  { %50 = vrot.lane.b32.xlu0 %v430_v8, %s557_s30  ;;  %s577_s30 = smov 55   ;;  %v464_v44 = vld [vmem:[%s825_s0 + $0x36] sm:$0x1]   ;;  %v465_v46 = vld [vmem:[%s825_s0 + $0xb] sm:$0x1]   ;;  %s593_s24 = smov 31  }
  0x15   :  { %v466_v47 = vld [vmem:[%s825_s0 + $0x35] sm:$0x1]   ;;  %v467_v48 = vld [vmem:[%s825_s0 + $0xa] sm:$0x1]   ;;  %s594_s25 = smov 30   ;;  %s596_s4 = smov 27  }
  0x16   :  { %v468_v50 = vld [vmem:[%s825_s0 + $0x34] sm:$0x1]   ;;  %v469_v53 = vld [vmem:[%s825_s0 + $0x9] sm:$0x1]   ;;  %v470_v54 = vld [vmem:[%s825_s0 + $0x33] sm:$0x1]  }
  0x17   :  { %s597_s5 = smov 25   ;;  %vm22_vm4 = vcmask 1032152   ;;  %v471_v56 = vld [vmem:[%s825_s0 + $0x8] sm:$0x1]   ;;  %vm28_vm5 = vcmask 1007552   ;;  %vm34_vm6 = vcmask 982952  }
  0x18   :  { %vm40_vm7 = vcmask 958352   ;;  %vm46_vm8 = vcmask 933752   ;;  %v472_v59 = vld [vmem:[%s825_s0 + $0x32] sm:$0x1]   ;;  %v473_v60 = vld [vmem:[%s825_s0 + $0x7] sm:$0x1]  }
  0x19   :  { %s599_s13 = smov 22   ;;  %vm52_vm9 = vcmask 909152   ;;  %v474_v62 = vld [vmem:[%s825_s0 + $0x31] sm:$0x1]   ;;  %vm58_vm10 = vcmask 884552   ;;  %vm64_vm11 = vcmask 859952  }
  0x1a   :  { %74 = vrot.lane.b32.xlu1 %v434_v12, %s561_s11  ;;  %v475_v1 = vld [vmem:[%s825_s0 + $0x6] sm:$0x1]   ;;  %v476_v2 = vld [vmem:[%s825_s0 + $0x30] sm:$0x1]   ;;  %s602_s22 = smov 18   ;;  %vm70_vm12 = vcmask 835352  }
  0x1b   :  { %80 = vrot.lane.b32.xlu2 %v435_v13, %s562_s14  ;;  %s600_s14 = smov 21   ;;  %v477_v4 = vld [vmem:[%s825_s0 + $0x5] sm:$0x1]   ;;  %vm76_vm13 = vcmask 810752   ;;  %vm82_vm14 = vcmask 786152   ;;  %s605_s2 = smov 13  }
  0x1c   :  { %68 = vrot.lane.b32.xlu0 %v433_v11, %s560_s10  ;;  %s580_s10 = smov 51   ;;  %v478_v7 = vld [vmem:[%s825_s0 + $0x2f] sm:$0x1]   ;;  %v479_v8 = vld [vmem:[%s825_s0 + $0x4] sm:$0x1]   ;;  %vm88_vm15 = vcmask 761552  }
  0x1d   :  { %v480_v10 = vld [vmem:[%s825_s0 + $0x2e] sm:$0x1]   ;;  %vm94_vm0 = vcmask 736952   ;;  %vm100_vm1 = vcmask 712352   ;;  %v481_v13 = vld [vmem:[%s825_s0 + $0x3] sm:$0x1]  }
  0x1e   :  { %s608_s11 = smov 9  }
  0x22   :  { %92 = vrot.lane.b32.xlu1 %v437_v15, %s564_s20  ;;  %s611_s20 = smov 4  }
  0x23   :  { %98 = vrot.lane.b32.xlu2 %v438_v16, %s565_s23  ;;  %s603_s23 = smov 16   ;;  %v483_v16 = vld [vmem:[%s825_s0 + $0x2] sm:$0x1]  }
  0x24   :  { %86 = vrot.lane.b32.xlu0 %v436_v14, %s563_s19  ;;  %s592_s19 = smov 33   ;;  %v482_v14 = vld [vmem:[%s825_s0 + $0x2d] sm:$0x1]  }
  0x2a   :  { %110 = vrot.lane.b32.xlu1 %v440_v18, %s567_s29 }
  0x2b   :  { %116 = vrot.lane.b32.xlu2 %v441_v19, %s568_s3  ;;  %s606_s3 = smov 12   ;;  %v484_v19 = vld [vmem:[%s825_s0 + $0x2c] sm:$0x1]  }
  0x2c   :  { %104 = vrot.lane.b32.xlu0 %v439_v17, %s566_s28  ;;  %s595_s28 = smov 28  }
  0x32   :  { %128 = vrot.lane.b32.xlu1 %v443_v21, %s570_s9 }
  0x33   :  { %134 = vrot.lane.b32.xlu2 %v444_v22, %s571_s12  ;;  %s609_s12 = smov 7   ;;  %v486_v22 = vld [vmem:[%s825_s0 + $0x2b] sm:$0x1]  }
  0x34   :  { %122 = vrot.lane.b32.xlu0 %v442_v20, %s569_s8  ;;  %s598_s8 = smov 24   ;;  %v485_v20 = vld [vmem:[%s825_s0 + $0x1] sm:$0x1]   ;;  %s613_s0 = smov 1  }
  0x3a   :  { %146 = vrot.lane.b32.xlu1 %v446_v24, %s573_s18 }
  0x3b   :  { %153 = vrot.lane.b32.xlu2 %v447_v25, %s574_s21  ;;  %s583_s21 = smov 46  }
  0x3c   :  { %140 = vrot.lane.b32.xlu0 %v445_v23, %s572_s17  ;;  %s601_s17 = smov 19  }
  0x42   :  { %166 = vrot.lane.b32.xlu1 %v449_v27, %s576_s27  ;;  %s585_s27 = smov 43  }
  0x43   :  { %172 = vrot.lane.b32.xlu2 %v450_v28, %s577_s30  ;;  %s586_s30 = smov 42  }
  0x44   :  { %159 = vrot.lane.b32.xlu0 %v448_v26, %s575_s26  ;;  %s584_s26 = smov 45  }
  0x4a   :  { %185 = vrot.lane.b32.xlu1 %v452_v30, %s579_s7  ;;  %s588_s7 = smov 39  }
  0x4b   :  { %192 = vrot.lane.b32.xlu2 %v453_v31, %s580_s10  ;;  %s589_s10 = smov 37  }
  0x4c   :  { %179 = vrot.lane.b32.xlu0 %v451_v29, %s578_s6  ;;  %s587_s6 = smov 40  }
  0x52   :  { %205 = vrot.lane.b32.xlu1 %v455_v33, %s582_s16  ;;  %s591_s16 = smov 34  }
  0x53   :  { %211 = vrot.lane.b32.xlu2 %v456_v34, %s583_s21  ;;  %s612_s21 = smov 3  }
  0x54   :  { %198 = vrot.lane.b32.xlu0 %v454_v32, %s581_s15  ;;  %s590_s15 = smov 36  }
  0x5a   :  { %224 = vrot.lane.b32.xlu1 %v458_v37, %s585_s27 }
  0x5b   :  { %231 = vrot.lane.b32.xlu2 %v459_v38, %s586_s30 }
  0x5c   :  { %218 = vrot.lane.b32.xlu0 %v457_v36, %s584_s26  ;;  %s604_s26 = smov 15  }
  0x5d   :  { %v39_v41 = vpop.permute.xlu2 %38  }
  0x62   :  { %244 = vrot.lane.b32.xlu1 %v461_v40, %s588_s7 }
  0x63   :  { %250 = vrot.lane.b32.xlu2 %v462_v42, %s589_s10 }
  0x64   :  { %237 = vrot.lane.b32.xlu0 %v460_v39, %s587_s6  ;;  %s607_s6 = smov 10  }
  0x65   :  { %v45_v45 = vpop.permute.xlu2 %44  }
  0x6a   :  { %263 = vrot.lane.b32.xlu1 %v464_v44, %s591_s16 }
  0x6b   :  { %270 = vrot.lane.b32.xlu2 %v465_v46, %s592_s19 }
  0x6c   :  { %257 = vrot.lane.b32.xlu0 %v463_v43, %s590_s15  ;;  %s610_s15 = smov 6  }
  0x6d   :  { %v63_v49 = vpop.permute.xlu2 %62  }
  0x72   :  { %283 = vrot.lane.b32.xlu1 %v467_v48, %s594_s25 }
  0x73   :  { %289 = vrot.lane.b32.xlu2 %v468_v50, %s595_s28 }
  0x74   :  { %276 = vrot.lane.b32.xlu0 %v466_v47, %s593_s24  ;;  %v27_v52 = vpop.permute.xlu1 %26  }
  0x75   :  { %v81_v55 = vpop.permute.xlu2 %80  }
  0x76   :  { %v12_v51 = vpop.permute.xlu0 %11  }
  0x77   :  { %15 = vst.msk [vmem:[#allocation0 + $0x8] sm:$0x1] %vm13_vm2, %v12_v51   ;;  %vm106_vm2 = vcmask 687752  }
  0x78   :  { %17 = vst.msk [vmem:[#allocation0] sm:$0x1] %vm16_vm3, %v12_v51   ;;  %vm112_vm3 = vcmask 663152  }
  0x7a   :  { %302 = vrot.lane.b32.xlu1 %v470_v54, %s597_s5 }
  0x7b   :  { %309 = vrot.lane.b32.xlu2 %v471_v56, %s598_s8 }
  0x7c   :  { %296 = vrot.lane.b32.xlu0 %v469_v53, %s596_s4  ;;  %v33_v58 = vpop.permute.xlu1 %32  }
  0x7d   :  { %v99_v61 = vpop.permute.xlu2 %98  }
  0x7e   :  { %v21_v57 = vpop.permute.xlu0 %20  }
  0x7f   :  { %23 = vst.msk [vmem:[#allocation0] sm:$0x1] %vm22_vm4, %v21_v57   ;;  %vm118_vm4 = vcmask 638552  }
  0x80   :  { %29 = vst.msk [vmem:[#allocation0] sm:$0x1] %vm28_vm5, %v27_v52   ;;  %vm124_vm5 = vcmask 613952  }
  0x81   :  { %35 = vst.msk [vmem:[#allocation0] sm:$0x1] %vm34_vm6, %v33_v58   ;;  %vm130_vm6 = vcmask 589352  }
  0x82   :  { %41 = vst.msk [vmem:[#allocation0] sm:$0x1] %vm40_vm7, %v39_v41   ;;  %322 = vrot.lane.b32.xlu1 %v473_v60, %s600_s14  ;;  %vm136_vm7 = vcmask 564752  }
  0x83   :  { %47 = vst.msk [vmem:[#allocation0] sm:$0x1] %vm46_vm8, %v45_v45   ;;  %328 = vrot.lane.b32.xlu2 %v474_v62, %s601_s17  ;;  %vm142_vm8 = vcmask 540152  }
  0x84   :  { %315 = vrot.lane.b32.xlu0 %v472_v59, %s599_s13  ;;  %v57_v0 = vpop.permute.xlu1 %56  }
  0x85   :  { %v117_v3 = vpop.permute.xlu2 %116  }
  0x86   :  { %v51_v63 = vpop.permute.xlu0 %50  }
  0x87   :  { %53 = vst.msk [vmem:[#allocation0] sm:$0x1] %vm52_vm9, %v51_v63   ;;  %vm155_vm9 = vcmask 515552  }
  0x88   :  { %59 = vst.msk [vmem:[#allocation0] sm:$0x1] %vm58_vm10, %v57_v0   ;;  %vm148_vm10 = vcmask 523752  }
  0x89   :  { %65 = vst.msk [vmem:[#allocation0] sm:$0x1] %vm64_vm11, %v63_v49   ;;  %vm161_vm11 = vcmask 499152  }
  0x8a   :  { %341 = vrot.lane.b32.xlu1 %v476_v2, %s603_s23 }
  0x8b   :  { %348 = vrot.lane.b32.xlu2 %v477_v4, %s604_s26 }
  0x8c   :  { %335 = vrot.lane.b32.xlu0 %v475_v1, %s602_s22  ;;  %v75_v6 = vpop.permute.xlu1 %74  }
  0x8d   :  { %v135_v9 = vpop.permute.xlu2 %134  }
  0x8e   :  { %v69_v5 = vpop.permute.xlu0 %68  }
  0x8f   :  { %71 = vst.msk [vmem:[#allocation0] sm:$0x1] %vm70_vm12, %v69_v5   ;;  %vm174_vm12 = vcmask 474552  }
  0x90   :  { %77 = vst.msk [vmem:[#allocation0] sm:$0x1] %vm76_vm13, %v75_v6   ;;  %vm168_vm13 = vcmask 490952  }
  0x91   :  { %83 = vst.msk [vmem:[#allocation0] sm:$0x1] %vm82_vm14, %v81_v55   ;;  %vm181_vm14 = vcmask 466352  }
  0x92   :  { %361 = vrot.lane.b32.xlu1 %v479_v8, %s606_s3 }
  0x93   :  { %367 = vrot.lane.b32.xlu2 %v480_v10, %s607_s6 }
  0x94   :  { %354 = vrot.lane.b32.xlu0 %v478_v7, %s605_s2  ;;  %v93_v12 = vpop.permute.xlu1 %92  }
  0x95   :  { %v154_v15 = vpop.permute.xlu2 %153  }
  0x96   :  { %v87_v11 = vpop.permute.xlu0 %86  }
  0x97   :  { %89 = vst.msk [vmem:[#allocation0] sm:$0x1] %vm88_vm15, %v87_v11   ;;  %vm194_vm15 = vcmask 441752  }
  0x98   :  { %95 = vst.msk [vmem:[#allocation0] sm:$0x1] %vm94_vm0, %v93_v12   ;;  %vm187_vm0 = vcmask 449952  }
  0x99   :  { %101 = vst.msk [vmem:[#allocation0] sm:$0x1] %vm100_vm1, %v99_v61   ;;  %vm200_vm1 = vcmask 425352  }
  0x9a   :  { %380 = vrot.lane.b32.xlu1 %v482_v14, %s609_s12 }
  0x9b   :  { %387 = vrot.lane.b32.xlu2 %v483_v16, %s610_s15 }
  0x9c   :  { %374 = vrot.lane.b32.xlu0 %v481_v13, %s608_s11  ;;  %v111_v18 = vpop.permute.xlu1 %110  }
  0x9d   :  { %v173_v21 = vpop.permute.xlu2 %172  }
  0x9e   :  { %v105_v17 = vpop.permute.xlu0 %104  }
  0x9f   :  { %107 = vst.msk [vmem:[#allocation0] sm:$0x1] %vm106_vm2, %v105_v17   ;;  %vm213_vm2 = vcmask 400752  }
  0xa0   :  { %113 = vst.msk [vmem:[#allocation0] sm:$0x1] %vm112_vm3, %v111_v18   ;;  %vm207_vm3 = vcmask 417152  }
  0xa1   :  { %119 = vst.msk [vmem:[#allocation0] sm:$0x1] %vm118_vm4, %v117_v3   ;;  %vm220_vm4 = vcmask 392552  }
  0xa2   :  { %400 = vrot.lane.b32.xlu1 %v485_v20, %s612_s21 }
  0xa3   :  { %406 = vrot.lane.b32.xlu2 %v486_v22, %s613_s0 }
  0xa4   :  { %393 = vrot.lane.b32.xlu0 %v484_v19, %s611_s20  ;;  %v129_v24 = vpop.permute.xlu1 %128  }
  0xa5   :  { %v193_v25 = vpop.permute.xlu2 %192  }
  0xa6   :  { %v123_v23 = vpop.permute.xlu0 %122  }
  0xa7   :  { %125 = vst.msk [vmem:[#allocation0] sm:$0x1] %vm124_vm5, %v123_v23   ;;  %vm233_vm5 = vcmask 367952  }
  0xa8   :  { %131 = vst.msk [vmem:[#allocation0] sm:$0x1] %vm130_vm6, %v129_v24   ;;  %vm226_vm6 = vcmask 376152  }
  0xa9   :  { %137 = vst.msk [vmem:[#allocation0] sm:$0x1] %vm136_vm7, %v135_v9   ;;  %vm239_vm7 = vcmask 351552  }
  0xac   :  { %v147_v27 = vpop.permute.xlu1 %146  }
  0xad   :  { %150 = vst.msk [vmem:[#allocation0 + $0x8] sm:$0x1] %vm148_vm10, %v147_v27   ;;  %v212_v28 = vpop.permute.xlu2 %211   ;;  %vm259_vm10 = vcmask 318752  }
  0xae   :  { %v141_v26 = vpop.permute.xlu0 %140  }
  0xaf   :  { %143 = vst.msk [vmem:[#allocation0] sm:$0x1] %vm142_vm8, %v141_v26   ;;  %vm252_vm8 = vcmask 326952  }
  0xb0   :  { %156 = vst.msk [vmem:[#allocation0] sm:$0x1] %vm155_vm9, %v154_v15   ;;  %vm246_vm9 = vcmask 343352  }
  0xb4   :  { %v167_v30 = vpop.permute.xlu1 %166  }
  0xb5   :  { %169 = vst.msk [vmem:[#allocation0] sm:$0x1] %vm168_vm13, %v167_v30   ;;  %v232_v31 = vpop.permute.xlu2 %231   ;;  %vm278_vm13 = vcmask 277752  }
  0xb6   :  { %v160_v29 = vpop.permute.xlu0 %159  }
  0xb7   :  { %163 = vst.msk [vmem:[#allocation0 + $0x8] sm:$0x1] %vm161_vm11, %v160_v29   ;;  %vm272_vm11 = vcmask 294152  }
  0xb8   :  { %176 = vst.msk [vmem:[#allocation0 + $0x8] sm:$0x1] %vm174_vm12, %v173_v21   ;;  %vm265_vm12 = vcmask 302352  }
  0xbc   :  { %v186_v33 = vpop.permute.xlu1 %185  }
  0xbd   :  { %189 = vst.msk [vmem:[#allocation0 + $0x8] sm:$0x1] %vm187_vm0, %v186_v33   ;;  %v251_v34 = vpop.permute.xlu2 %250   ;;  %vm298_vm0 = vcmask 244952  }
  0xbe   :  { %v180_v32 = vpop.permute.xlu0 %179  }
  0xbf   :  { %182 = vst.msk [vmem:[#allocation0] sm:$0x1] %vm181_vm14, %v180_v32   ;;  %vm291_vm14 = vcmask 253152  }
  0xc0   :  { %195 = vst.msk [vmem:[#allocation0] sm:$0x1] %vm194_vm15, %v193_v25   ;;  %vm285_vm15 = vcmask 269552  }
  0xc4   :  { %v206_v36 = vpop.permute.xlu1 %205  }
  0xc5   :  { %208 = vst.msk [vmem:[#allocation0] sm:$0x1] %vm207_vm3, %v206_v36   ;;  %v271_v37 = vpop.permute.xlu2 %270   ;;  %vm317_vm3 = vcmask 203952  }
  0xc6   :  { %v199_v35 = vpop.permute.xlu0 %198  }
  0xc7   :  { %202 = vst.msk [vmem:[#allocation0 + $0x8] sm:$0x1] %vm200_vm1, %v199_v35   ;;  %vm311_vm1 = vcmask 220352  }
  0xc8   :  { %215 = vst.msk [vmem:[#allocation0 + $0x8] sm:$0x1] %vm213_vm2, %v212_v28   ;;  %vm304_vm2 = vcmask 228552  }
  0xcc   :  { %v225_v39 = vpop.permute.xlu1 %224  }
  0xcd   :  { %228 = vst.msk [vmem:[#allocation0 + $0x8] sm:$0x1] %vm226_vm6, %v225_v39   ;;  %v290_v40 = vpop.permute.xlu2 %289   ;;  %vm337_vm6 = vcmask 171152  }
  0xce   :  { %v219_v38 = vpop.permute.xlu0 %218  }
  0xcf   :  { %221 = vst.msk [vmem:[#allocation0] sm:$0x1] %vm220_vm4, %v219_v38   ;;  %vm330_vm4 = vcmask 179352  }
  0xd0   :  { %234 = vst.msk [vmem:[#allocation0] sm:$0x1] %vm233_vm5, %v232_v31   ;;  %vm324_vm5 = vcmask 195752  }
  0xd4   :  { %v245_v42 = vpop.permute.xlu1 %244  }
  0xd5   :  { %247 = vst.msk [vmem:[#allocation0] sm:$0x1] %vm246_vm9, %v245_v42   ;;  %v310_v43 = vpop.permute.xlu2 %309   ;;  %vm356_vm9 = vcmask 130152  }
  0xd6   :  { %v238_v41 = vpop.permute.xlu0 %237  }
  0xd7   :  { %241 = vst.msk [vmem:[#allocation0 + $0x8] sm:$0x1] %vm239_vm7, %v238_v41   ;;  %vm350_vm7 = vcmask 146552  }
  0xd8   :  { %254 = vst.msk [vmem:[#allocation0 + $0x8] sm:$0x1] %vm252_vm8, %v251_v34   ;;  %vm343_vm8 = vcmask 154752  }
  0xdc   :  { %v264_v45 = vpop.permute.xlu1 %263  }
  0xdd   :  { %267 = vst.msk [vmem:[#allocation0 + $0x8] sm:$0x1] %vm265_vm12, %v264_v45   ;;  %v329_v46 = vpop.permute.xlu2 %328   ;;  %vm376_vm12 = vcmask 97352  }
  0xde   :  { %v258_v44 = vpop.permute.xlu0 %257  }
  0xdf   :  { %260 = vst.msk [vmem:[#allocation0] sm:$0x1] %vm259_vm10, %v258_v44   ;;  %vm369_vm10 = vcmask 105552  }
  0xe0   :  { %273 = vst.msk [vmem:[#allocation0] sm:$0x1] %vm272_vm11, %v271_v37   ;;  %vm363_vm11 = vcmask 121952  }
  0xe4   :  { %v284_v48 = vpop.permute.xlu1 %283  }
  0xe5   :  { %286 = vst.msk [vmem:[#allocation0] sm:$0x1] %vm285_vm15, %v284_v48   ;;  %v349_v49 = vpop.permute.xlu2 %348   ;;  %vm395_vm15 = vcmask 56352  }
  0xe6   :  { %v277_v47 = vpop.permute.xlu0 %276  }
  0xe7   :  { %280 = vst.msk [vmem:[#allocation0 + $0x8] sm:$0x1] %vm278_vm13, %v277_v47   ;;  %vm389_vm13 = vcmask 72752  }
  0xe8   :  { %293 = vst.msk [vmem:[#allocation0 + $0x8] sm:$0x1] %vm291_vm14, %v290_v40   ;;  %vm382_vm14 = vcmask 80952  }
  0xec   :  { %v303_v51 = vpop.permute.xlu1 %302  }
  0xed   :  { %306 = vst.msk [vmem:[#allocation0 + $0x8] sm:$0x1] %vm304_vm2, %v303_v51   ;;  %v368_v52 = vpop.permute.xlu2 %367  }
  0xee   :  { %v297_v50 = vpop.permute.xlu0 %296  }
  0xef   :  { %299 = vst.msk [vmem:[#allocation0] sm:$0x1] %vm298_vm0, %v297_v50   ;;  %vm408_vm0 = vcmask 31752  }
  0xf0   :  { %312 = vst.msk [vmem:[#allocation0] sm:$0x1] %vm311_vm1, %v310_v43   ;;  %vm402_vm1 = vcmask 48152  }
  0xf4   :  { %v323_v54 = vpop.permute.xlu1 %322  }
  0xf5   :  { %325 = vst.msk [vmem:[#allocation0] sm:$0x1] %vm324_vm5, %v323_v54   ;;  %v388_v55 = vpop.permute.xlu2 %387  }
  0xf6   :  { %v316_v53 = vpop.permute.xlu0 %315  }
  0xf7   :  { %319 = vst.msk [vmem:[#allocation0 + $0x8] sm:$0x1] %vm317_vm3, %v316_v53  }
  0xf8   :  { %332 = vst.msk [vmem:[#allocation0 + $0x8] sm:$0x1] %vm330_vm4, %v329_v46  }
  0xfc   :  { %v342_v57 = vpop.permute.xlu1 %341  }
  0xfd   :  { %345 = vst.msk [vmem:[#allocation0 + $0x8] sm:$0x1] %vm343_vm8, %v342_v57   ;;  %v407_v58 = vpop.permute.xlu2 %406  }
  0xfe   :  { %v336_v56 = vpop.permute.xlu0 %335  }
  0xff   :  { %338 = vst.msk [vmem:[#allocation0] sm:$0x1] %vm337_vm6, %v336_v56  }
 0x100   :  { %351 = vst.msk [vmem:[#allocation0] sm:$0x1] %vm350_vm7, %v349_v49  }
 0x104   :  { %v362_v60 = vpop.permute.xlu1 %361  }
 0x105   :  { %364 = vst.msk [vmem:[#allocation0] sm:$0x1] %vm363_vm11, %v362_v60  }
 0x106   :  { %v355_v59 = vpop.permute.xlu0 %354  }
 0x107   :  { %358 = vst.msk [vmem:[#allocation0 + $0x8] sm:$0x1] %vm356_vm9, %v355_v59  }
 0x108   :  { %371 = vst.msk [vmem:[#allocation0 + $0x8] sm:$0x1] %vm369_vm10, %v368_v52  }
 0x10c   :  { %v381_v62 = vpop.permute.xlu1 %380  }
 0x10d   :  { %384 = vst.msk [vmem:[#allocation0 + $0x8] sm:$0x1] %vm382_vm14, %v381_v62  }
 0x10e   :  { %v375_v61 = vpop.permute.xlu0 %374  }
 0x10f   :  { %377 = vst.msk [vmem:[#allocation0] sm:$0x1] %vm376_vm12, %v375_v61  }
 0x110   :  { %390 = vst.msk [vmem:[#allocation0] sm:$0x1] %vm389_vm13, %v388_v55  }
 0x114   :  { %v401_v0 = vpop.permute.xlu1 %400  }
 0x115   :  { %403 = vst.msk [vmem:[#allocation0] sm:$0x1] %vm402_vm1, %v401_v0  }
 0x116   :  { %v394_v63 = vpop.permute.xlu0 %393  }
 0x117   :  { %397 = vst.msk [vmem:[#allocation0 + $0x8] sm:$0x1] %vm395_vm15, %v394_v63  }
 0x118   :  { %410 = vst.msk [vmem:[#allocation0 + $0x8] sm:$0x1] %vm408_vm0, %v407_v58  }
 0x11c   :  { %v413_v2 = vld [vmem:[#allocation0] sm:$0x1] }
 0x11d   :  { %416 = vst [vmem:[%s826_s1] sm:$0x1] %v413_v2 }
 0x11f   :  { %v418_v1 = vld [vmem:[#allocation0 + $0x8] sm:$0x1] }
 0x120   :  { %487 = vst [vmem:[%s826_s1 + $0x1] sm:$0x1] %v418_v1 }

// kernel: decoder_forward.1
= control target key start
LH: loop header
LB: loop body
LE: loop exit
PB: predicated region body
PF: predicated region fallthrough
CT: control target
= control target key end

     0   :  { %vm48_vm0 = vcmask 1043456   ;;  %vm35_vm1 = vcmask 31744   ;;  %s8432_s1 = inlined_call_operand.vmem [shape: f32[4,128], index: 1, kind: input, shape index: {}]   ;;  %s8433_s0 = inlined_call_operand.vmem [shape: f32[32,4], index: 0, kind: input, shape index: {}]   ;;  %s8434_s3 = inlined_call_operand.vmem [shape: f32[128,2048], index: 3, kind: input, shape index: {}]   ;;  %s8435_s2 = inlined_call_operand.vmem [shape: f32[1,128], index: 2, kind: input, shape index: {}]   ;;  %s8436_s5 = inlined_call_operand.vmem [shape: f32[2048,192], index: 5, kind: input, shape index: {}]   ;;  %s8437_s4 = inlined_call_operand.vmem [shape: f32[1,2048], index: 4, kind: input, shape index: {}]   ;;  %s8438_s6 = inlined_call_operand.vmem [shape: f32[1,192], index: 6, kind: input, shape index: {}]   ;;  %s8439_s7 = inlined_call_operand.vmem [shape: f32[32,192], index: 7, kind: output, shape index: {}]  }
   0x1   :  { %v30_v0 = vld [vmem:[%s8432_s1] sm:$0xf]  ;;  %v326_v3 = vld [vmem:[%s8434_s3 + $0x788] sm:$0xff]  ;;  %v327_v4 = vld [vmem:[%s8434_s3 + $0x790] sm:$0xff] }
   0x2   :  { %v26_v1 = vld [vmem:[%s8433_s0] sm:$0xff]  ;;  %3516 = vmatpush.msk.msra.mxu0 %vm48_vm0, %v30_v0  ;;  %v328_v5 = vld [vmem:[%s8434_s3 + $0x798] sm:$0xff]  ;;  %406 = vmatpush.msra.mxu2 %v326_v3  ;;  %v310_v7 = vld [vmem:[%s8434_s3 + $0x708] sm:$0xff] }
   0x3   :  { %v325_v2 = vld [vmem:[%s8434_s3 + $0x780] sm:$0xff]  ;;  %3517 = vmatmul.msk.f32.vlgmr.msra.gmra.mxu0 %vm35_vm1, %v26_v1  ;;  %435 = vmatpush.msra.mxu3 %v327_v4  ;;  %v311_v8 = vld [vmem:[%s8434_s3 + $0x710] sm:$0xff]  ;;  %v312_v9 = vld [vmem:[%s8434_s3 + $0x718] sm:$0xff] }
   0x4   :  { %377 = vmatpush.msra.mxu1 %v325_v2  ;;  %v309_v6 = vld [vmem:[%s8434_s3 + $0x700] sm:$0xff]  ;;  %464 = vmatpush.msrb.mxu0 %v328_v5  ;;  %v294_v11 = vld [vmem:[%s8434_s3 + $0x688] sm:$0xff]  ;;  %v295_v12 = vld [vmem:[%s8434_s3 + $0x690] sm:$0xff] }
   0x5   :  { %v293_v10 = vld [vmem:[%s8434_s3 + $0x680] sm:$0xff]  ;;  %407 = vmatpush.msra.mxu2 %v310_v7  ;;  %436 = vmatpush.msra.mxu3 %v311_v8  ;;  %v296_v13 = vld [vmem:[%s8434_s3 + $0x698] sm:$0xff]  ;;  %v278_v15 = vld [vmem:[%s8434_s3 + $0x608] sm:$0xff] }
   0x6   :  { %378 = vmatpush.msra.mxu1 %v309_v6  ;;  %v277_v14 = vld [vmem:[%s8434_s3 + $0x600] sm:$0xff]  ;;  %465 = vmatpush.msrb.mxu0 %v312_v9  ;;  %v279_v16 = vld [vmem:[%s8434_s3 + $0x610] sm:$0xff]  ;;  %v27_v17 = vld [vmem:[%s8433_s0 + $0x8] sm:$0xff] }
   0x7   :  { %408 = vmatpush.msra.mxu2 %v294_v11  ;;  %437 = vmatpush.msra.mxu3 %v295_v12  ;;  %v261_v18 = vld [vmem:[%s8434_s3 + $0x580] sm:$0xff]  ;;  %v280_v19 = vld [vmem:[%s8434_s3 + $0x618] sm:$0xff]  ;;  %v262_v20 = vld [vmem:[%s8434_s3 + $0x588] sm:$0xff] }
   0x8   :  { %379 = vmatpush.msra.mxu1 %v293_v10  ;;  %466 = vmatpush.msrb.mxu0 %v296_v13  ;;  %v263_v21 = vld [vmem:[%s8434_s3 + $0x590] sm:$0xff]  ;;  %v245_v22 = vld [vmem:[%s8434_s3 + $0x500] sm:$0xff]  ;;  %v264_v23 = vld [vmem:[%s8434_s3 + $0x598] sm:$0xff] }
   0x9   :  { %409 = vmatpush.msra.mxu2 %v278_v15  ;;  %438 = vmatpush.msra.mxu3 %v279_v16  ;;  %v246_v24 = vld [vmem:[%s8434_s3 + $0x508] sm:$0xff]  ;;  %v247_v25 = vld [vmem:[%s8434_s3 + $0x510] sm:$0xff]  ;;  %v229_v26 = vld [vmem:[%s8434_s3 + $0x480] sm:$0xff] }
   0xa   :  { %380 = vmatpush.msra.mxu1 %v277_v14  ;;  %467 = vmatpush.msrb.mxu0 %v280_v19  ;;  %v248_v27 = vld [vmem:[%s8434_s3 + $0x518] sm:$0xff]  ;;  %v230_v28 = vld [vmem:[%s8434_s3 + $0x488] sm:$0xff]  ;;  %v231_v29 = vld [vmem:[%s8434_s3 + $0x490] sm:$0xff] }
   0xb   :  { %3518 = vmatmul.msk.f32.gmra.mxu0 %vm35_vm1, %v27_v17  ;;  %410 = vmatpush.msra.mxu2 %v262_v20  ;;  %v213_v30 = vld [vmem:[%s8434_s3 + $0x400] sm:$0xff]  ;;  %v232_v31 = vld [vmem:[%s8434_s3 + $0x498] sm:$0xff]  ;;  %v214_v32 = vld [vmem:[%s8434_s3 + $0x408] sm:$0xff] }
   0xc   :  { %381 = vmatpush.msra.mxu1 %v261_v18  ;;  %439 = vmatpush.msra.mxu3 %v263_v21  ;;  %v28_v33 = vld [vmem:[%s8433_s0 + $0x10] sm:$0xff]  ;;  %v216_v35 = vld [vmem:[%s8434_s3 + $0x418] sm:$0xff]  ;;  %v197_v36 = vld [vmem:[%s8434_s3 + $0x380] sm:$0xff] }
   0xd   :  { %468 = vmatpush.msrb.mxu0 %v264_v23  ;;  %411 = vmatpush.msra.mxu2 %v246_v24  ;;  %v215_v34 = vld [vmem:[%s8434_s3 + $0x410] sm:$0xff]  ;;  %v198_v37 = vld [vmem:[%s8434_s3 + $0x388] sm:$0xff]  ;;  %v200_v39 = vld [vmem:[%s8434_s3 + $0x398] sm:$0xff] }
   0xe   :  { %382 = vmatpush.msra.mxu1 %v245_v22  ;;  %440 = vmatpush.msra.mxu3 %v247_v25  ;;  %v199_v38 = vld [vmem:[%s8434_s3 + $0x390] sm:$0xff]  ;;  %v181_v40 = vld [vmem:[%s8434_s3 + $0x300] sm:$0xff]  ;;  %v182_v41 = vld [vmem:[%s8434_s3 + $0x308] sm:$0xff] }
   0xf   :  { %469 = vmatpush.msrb.mxu0 %v248_v27  ;;  %412 = vmatpush.msra.mxu2 %v230_v28  ;;  %v183_v42 = vld [vmem:[%s8434_s3 + $0x310] sm:$0xff]  ;;  %v184_v43 = vld [vmem:[%s8434_s3 + $0x318] sm:$0xff]  ;;  %v165_v44 = vld [vmem:[%s8434_s3 + $0x280] sm:$0xff] }
  0x10   :  { %383 = vmatpush.msra.mxu1 %v229_v26  ;;  %441 = vmatpush.msra.mxu3 %v231_v29  ;;  %v166_v45 = vld [vmem:[%s8434_s3 + $0x288] sm:$0xff]  ;;  %v167_v46 = vld [vmem:[%s8434_s3 + $0x290] sm:$0xff]  ;;  %v168_v47 = vld [vmem:[%s8434_s3 + $0x298] sm:$0xff] }
  0x11   :  { %470 = vmatpush.msrb.mxu0 %v232_v31  ;;  %413 = vmatpush.msra.mxu2 %v214_v32  ;;  %v149_v48 = vld [vmem:[%s8434_s3 + $0x200] sm:$0xff]  ;;  %v29_v49 = vld [vmem:[%s8433_s0 + $0x18] sm:$0xff]  ;;  %v150_v50 = vld [vmem:[%s8434_s3 + $0x208] sm:$0xff] }
  0x12   :  { %384 = vmatpush.msra.mxu1 %v213_v30  ;;  %442 = vmatpush.msra.mxu3 %v215_v34  ;;  %v151_v51 = vld [vmem:[%s8434_s3 + $0x210] sm:$0xff]  ;;  %v152_v52 = vld [vmem:[%s8434_s3 + $0x218] sm:$0xff]  ;;  %v133_v53 = vld [vmem:[%s8434_s3 + $0x180] sm:$0xff] }
  0x13   :  { %3519 = vmatmul.msk.f32.gmra.mxu0 %vm35_vm1, %v28_v33  ;;  %414 = vmatpush.msra.mxu2 %v198_v37  ;;  %v134_v54 = vld [vmem:[%s8434_s3 + $0x188] sm:$0xff]  ;;  %v135_v55 = vld [vmem:[%s8434_s3 + $0x190] sm:$0xff]  ;;  %v136_v56 = vld [vmem:[%s8434_s3 + $0x198] sm:$0xff] }
  0x14   :  { %471 = vmatpush.msrb.mxu0 %v216_v35  ;;  %385 = vmatpush.msra.mxu1 %v197_v36  ;;  %v117_v57 = vld [vmem:[%s8434_s3 + $0x100] sm:$0xff]  ;;  %v118_v58 = vld [vmem:[%s8434_s3 + $0x108] sm:$0xff]  ;;  %v119_v59 = vld [vmem:[%s8434_s3 + $0x110] sm:$0xff] }
  0x15   :  { %443 = vmatpush.msra.mxu3 %v199_v38  ;;  %415 = vmatpush.msra.mxu2 %v182_v41  ;;  %v120_v60 = vld [vmem:[%s8434_s3 + $0x118] sm:$0xff]  ;;  %v101_v61 = vld [vmem:[%s8434_s3 + $0x80] sm:$0xff]  ;;  %v102_v62 = vld [vmem:[%s8434_s3 + $0x88] sm:$0xff] }
  0x16   :  { %472 = vmatpush.msrb.mxu0 %v200_v39  ;;  %386 = vmatpush.msra.mxu1 %v181_v40  ;;  %v103_v63 = vld [vmem:[%s8434_s3 + $0x90] sm:$0xff]  ;;  %v104_v0 = vld [vmem:[%s8434_s3 + $0x98] sm:$0xff]  ;;  %v85_v1 = vld [vmem:[%s8434_s3] sm:$0xff] }
  0x17   :  { %444 = vmatpush.msra.mxu3 %v183_v42  ;;  %416 = vmatpush.msra.mxu2 %v166_v45  ;;  %v86_v2 = vld [vmem:[%s8434_s3 + $0x8] sm:$0xff]  ;;  %v87_v3 = vld [vmem:[%s8434_s3 + $0x10] sm:$0xff]  ;;  %v88_v4 = vld [vmem:[%s8434_s3 + $0x18] sm:$0xff] }
  0x18   :  { %473 = vmatpush.msrb.mxu0 %v184_v43  ;;  %387 = vmatpush.msra.mxu1 %v165_v44  ;;  %v330_v5 = vld [vmem:[%s8434_s3 + $0x7a8] sm:$0xff]  ;;  %v329_v6 = vld [vmem:[%s8434_s3 + $0x7a0] sm:$0xff]  ;;  %v331_v7 = vld [vmem:[%s8434_s3 + $0x7b0] sm:$0xff] }
  0x19   :  { %445 = vmatpush.msra.mxu3 %v167_v46  ;;  %417 = vmatpush.msra.mxu2 %v150_v50  ;;  %v332_v8 = vld [vmem:[%s8434_s3 + $0x7b8] sm:$0xff]  ;;  %v314_v9 = vld [vmem:[%s8434_s3 + $0x728] sm:$0xff]  ;;  %v313_v10 = vld [vmem:[%s8434_s3 + $0x720] sm:$0xff] }
  0x1a   :  { %474 = vmatpush.msrb.mxu0 %v168_v47  ;;  %388 = vmatpush.msra.mxu1 %v149_v48  ;;  %v315_v11 = vld [vmem:[%s8434_s3 + $0x730] sm:$0xff]  ;;  %v316_v12 = vld [vmem:[%s8434_s3 + $0x738] sm:$0xff]  ;;  %v298_v13 = vld [vmem:[%s8434_s3 + $0x6a8] sm:$0xff] }
  0x1b   :  { %3520 = vmatmul.msk.f32.gmra.mxu0 %vm35_vm1, %v29_v49  ;;  %446 = vmatpush.msra.mxu3 %v151_v51  ;;  %v297_v14 = vld [vmem:[%s8434_s3 + $0x6a0] sm:$0xff]  ;;  %v299_v15 = vld [vmem:[%s8434_s3 + $0x6b0] sm:$0xff]  ;;  %v300_v16 = vld [vmem:[%s8434_s3 + $0x6b8] sm:$0xff] }
  0x1c   :  { %475 = vmatpush.msrb.mxu0 %v152_v52  ;;  %389 = vmatpush.msra.mxu1 %v133_v53  ;;  %v282_v17 = vld [vmem:[%s8434_s3 + $0x628] sm:$0xff]  ;;  %v281_v18 = vld [vmem:[%s8434_s3 + $0x620] sm:$0xff]  ;;  %v283_v19 = vld [vmem:[%s8434_s3 + $0x630] sm:$0xff] }
  0x1d   :  { %418 = vmatpush.msra.mxu2 %v134_v54  ;;  %447 = vmatpush.msra.mxu3 %v135_v55  ;;  %v284_v20 = vld [vmem:[%s8434_s3 + $0x638] sm:$0xff]  ;;  %v266_v21 = vld [vmem:[%s8434_s3 + $0x5a8] sm:$0xff]  ;;  %v265_v22 = vld [vmem:[%s8434_s3 + $0x5a0] sm:$0xff] }
  0x1e   :  { %476 = vmatpush.msrb.mxu0 %v136_v56  ;;  %390 = vmatpush.msra.mxu1 %v117_v57  ;;  %v267_v23 = vld [vmem:[%s8434_s3 + $0x5b0] sm:$0xff]  ;;  %v268_v24 = vld [vmem:[%s8434_s3 + $0x5b8] sm:$0xff]  ;;  %v250_v25 = vld [vmem:[%s8434_s3 + $0x528] sm:$0xff] }
  0x1f   :  { %419 = vmatpush.msra.mxu2 %v118_v58  ;;  %448 = vmatpush.msra.mxu3 %v119_v59  ;;  %v249_v26 = vld [vmem:[%s8434_s3 + $0x520] sm:$0xff]  ;;  %v251_v27 = vld [vmem:[%s8434_s3 + $0x530] sm:$0xff]  ;;  %v252_v28 = vld [vmem:[%s8434_s3 + $0x538] sm:$0xff] }
  0x20   :  { %477 = vmatpush.msrb.mxu0 %v120_v60  ;;  %391 = vmatpush.msra.mxu1 %v101_v61  ;;  %v234_v29 = vld [vmem:[%s8434_s3 + $0x4a8] sm:$0xff]  ;;  %v233_v30 = vld [vmem:[%s8434_s3 + $0x4a0] sm:$0xff]  ;;  %v235_v31 = vld [vmem:[%s8434_s3 + $0x4b0] sm:$0xff] }
  0x21   :  { %420 = vmatpush.msra.mxu2 %v102_v62  ;;  %449 = vmatpush.msra.mxu3 %v103_v63  ;;  %v236_v32 = vld [vmem:[%s8434_s3 + $0x4b8] sm:$0xff]  ;;  %v218_v33 = vld [vmem:[%s8434_s3 + $0x428] sm:$0xff]  ;;  %v217_v34 = vld [vmem:[%s8434_s3 + $0x420] sm:$0xff] }
  0x22   :  { %478 = vmatpush.msrb.mxu0 %v104_v0  ;;  %392 = vmatpush.msra.mxu1 %v85_v1  ;;  %v219_v35 = vld [vmem:[%s8434_s3 + $0x430] sm:$0xff]  ;;  %v220_v36 = vld [vmem:[%s8434_s3 + $0x438] sm:$0xff]  ;;  %v202_v37 = vld [vmem:[%s8434_s3 + $0x3a8] sm:$0xff] }
  0x23   :  { %421 = vmatpush.msra.mxu2 %v86_v2  ;;  %450 = vmatpush.msra.mxu3 %v87_v3  ;;  %v201_v38 = vld [vmem:[%s8434_s3 + $0x3a0] sm:$0xff]  ;;  %v203_v39 = vld [vmem:[%s8434_s3 + $0x3b0] sm:$0xff]  ;;  %v204_v40 = vld [vmem:[%s8434_s3 + $0x3b8] sm:$0xff] }
  0x24   :  { %479 = vmatpush.msrb.mxu0 %v88_v4  ;;  %493 = vmatpush.msrb.mxu1 %v329_v6  ;;  %v186_v41 = vld [vmem:[%s8434_s3 + $0x328] sm:$0xff]  ;;  %v185_v42 = vld [vmem:[%s8434_s3 + $0x320] sm:$0xff]  ;;  %v187_v43 = vld [vmem:[%s8434_s3 + $0x330] sm:$0xff] }
  0x25   :  { %522 = vmatpush.msrb.mxu2 %v330_v5  ;;  %551 = vmatpush.msrb.mxu3 %v331_v7  ;;  %v188_v44 = vld [vmem:[%s8434_s3 + $0x338] sm:$0xff]  ;;  %v170_v45 = vld [vmem:[%s8434_s3 + $0x2a8] sm:$0xff]  ;;  %v169_v46 = vld [vmem:[%s8434_s3 + $0x2a0] sm:$0xff] }
  0x26   :  { %580 = vmatpush.msra.mxu0 %v332_v8  ;;  %494 = vmatpush.msrb.mxu1 %v313_v10  ;;  %v171_v47 = vld [vmem:[%s8434_s3 + $0x2b0] sm:$0xff]  ;;  %v172_v48 = vld [vmem:[%s8434_s3 + $0x2b8] sm:$0xff]  ;;  %v154_v49 = vld [vmem:[%s8434_s3 + $0x228] sm:$0xff] }
  0x27   :  { %523 = vmatpush.msrb.mxu2 %v314_v9  ;;  %552 = vmatpush.msrb.mxu3 %v315_v11  ;;  %v153_v50 = vld [vmem:[%s8434_s3 + $0x220] sm:$0xff]  ;;  %v155_v51 = vld [vmem:[%s8434_s3 + $0x230] sm:$0xff]  ;;  %v156_v52 = vld [vmem:[%s8434_s3 + $0x238] sm:$0xff] }
  0x28   :  { %581 = vmatpush.msra.mxu0 %v316_v12  ;;  %495 = vmatpush.msrb.mxu1 %v297_v14  ;;  %v4241_v53 = vld [vmem:[%s8435_s2] ss:$0 sm:$0xff]  ;;  %v138_v54 = vld [vmem:[%s8434_s3 + $0x1a8] sm:$0xff]  ;;  %v139_v56 = vld [vmem:[%s8434_s3 + $0x1b0] sm:$0xff] }
  0x29   :  { %524 = vmatpush.msrb.mxu2 %v298_v13  ;;  %553 = vmatpush.msrb.mxu3 %v299_v15  ;;  %v137_v55 = vld [vmem:[%s8434_s3 + $0x1a0] sm:$0xff]  ;;  %v140_v57 = vld [vmem:[%s8434_s3 + $0x1b8] sm:$0xff]  ;;  %v122_v58 = vld [vmem:[%s8434_s3 + $0x128] sm:$0xff] }
  0x2a   :  { %582 = vmatpush.msra.mxu0 %v300_v16  ;;  %496 = vmatpush.msrb.mxu1 %v281_v18  ;;  %v121_v59 = vld [vmem:[%s8434_s3 + $0x120] sm:$0xff]  ;;  %v123_v61 = vld [vmem:[%s8434_s3 + $0x130] sm:$0xff]  ;;  %v124_v62 = vld [vmem:[%s8434_s3 + $0x138] sm:$0xff] }
  0x2b   :  { %525 = vmatpush.msrb.mxu2 %v282_v17  ;;  %554 = vmatpush.msrb.mxu3 %v283_v19  ;;  %v106_v63 = vld [vmem:[%s8434_s3 + $0xa8] sm:$0xff]  ;;  %v105_v1 = vld [vmem:[%s8434_s3 + $0xa0] sm:$0xff]  ;;  %v107_v2 = vld [vmem:[%s8434_s3 + $0xb0] sm:$0xff] }
  0x2c   :  { %583 = vmatpush.msra.mxu0 %v284_v20  ;;  %497 = vmatpush.msrb.mxu1 %v265_v22  ;;  %v108_v3 = vld [vmem:[%s8434_s3 + $0xb8] sm:$0xff]  ;;  %v90_v5 = vld [vmem:[%s8434_s3 + $0x28] sm:$0xff]  ;;  %v89_v6 = vld [vmem:[%s8434_s3 + $0x20] sm:$0xff] }
  0x2d   :  { %526 = vmatpush.msrb.mxu2 %v266_v21  ;;  %555 = vmatpush.msrb.mxu3 %v267_v23  ;;  %v91_v7 = vld [vmem:[%s8434_s3 + $0x30] sm:$0xff]  ;;  %v92_v8 = vld [vmem:[%s8434_s3 + $0x38] sm:$0xff]  ;;  %v334_v9 = vld [vmem:[%s8434_s3 + $0x7c8] sm:$0xff] }
  0x2e   :  { %584 = vmatpush.msra.mxu0 %v268_v24  ;;  %498 = vmatpush.msrb.mxu1 %v249_v26  ;;  %v333_v10 = vld [vmem:[%s8434_s3 + $0x7c0] sm:$0xff]  ;;  %v335_v11 = vld [vmem:[%s8434_s3 + $0x7d0] sm:$0xff]  ;;  %v336_v12 = vld [vmem:[%s8434_s3 + $0x7d8] sm:$0xff] }
  0x2f   :  { %527 = vmatpush.msrb.mxu2 %v250_v25  ;;  %556 = vmatpush.msrb.mxu3 %v251_v27  ;;  %v318_v14 = vld [vmem:[%s8434_s3 + $0x748] sm:$0xff]  ;;  %v317_v15 = vld [vmem:[%s8434_s3 + $0x740] sm:$0xff]  ;;  %v319_v17 = vld [vmem:[%s8434_s3 + $0x750] sm:$0xff] }
  0x30   :  { %585 = vmatpush.msra.mxu0 %v252_v28  ;;  %499 = vmatpush.msrb.mxu1 %v233_v30  ;;  %v320_v18 = vld [vmem:[%s8434_s3 + $0x758] sm:$0xff]  ;;  %v302_v20 = vld [vmem:[%s8434_s3 + $0x6c8] sm:$0xff]  ;;  %v301_v21 = vld [vmem:[%s8434_s3 + $0x6c0] sm:$0xff] }
  0x31   :  { %528 = vmatpush.msrb.mxu2 %v234_v29  ;;  %557 = vmatpush.msrb.mxu3 %v235_v31  ;;  %v303_v22 = vld [vmem:[%s8434_s3 + $0x6d0] sm:$0xff]  ;;  %v304_v23 = vld [vmem:[%s8434_s3 + $0x6d8] sm:$0xff]  ;;  %v286_v24 = vld [vmem:[%s8434_s3 + $0x648] sm:$0xff] }
  0x32   :  { %586 = vmatpush.msra.mxu0 %v236_v32  ;;  %500 = vmatpush.msrb.mxu1 %v217_v34  ;;  %v285_v25 = vld [vmem:[%s8434_s3 + $0x640] sm:$0xff]  ;;  %v287_v26 = vld [vmem:[%s8434_s3 + $0x650] sm:$0xff]  ;;  %v288_v27 = vld [vmem:[%s8434_s3 + $0x658] sm:$0xff] }
  0x33   :  { %529 = vmatpush.msrb.mxu2 %v218_v33  ;;  %558 = vmatpush.msrb.mxu3 %v219_v35  ;;  %v270_v29 = vld [vmem:[%s8434_s3 + $0x5c8] sm:$0xff]  ;;  %v269_v30 = vld [vmem:[%s8434_s3 + $0x5c0] sm:$0xff]  ;;  %v271_v32 = vld [vmem:[%s8434_s3 + $0x5d0] sm:$0xff] }
  0x34   :  { %587 = vmatpush.msra.mxu0 %v220_v36  ;;  %501 = vmatpush.msrb.mxu1 %v201_v38  ;;  %v272_v33 = vld [vmem:[%s8434_s3 + $0x5d8] sm:$0xff]  ;;  %v254_v35 = vld [vmem:[%s8434_s3 + $0x548] sm:$0xff]  ;;  %v253_v36 = vld [vmem:[%s8434_s3 + $0x540] sm:$0xff] }
  0x35   :  { %530 = vmatpush.msrb.mxu2 %v202_v37  ;;  %559 = vmatpush.msrb.mxu3 %v203_v39  ;;  %v255_v37 = vld [vmem:[%s8434_s3 + $0x550] sm:$0xff]  ;;  %v256_v38 = vld [vmem:[%s8434_s3 + $0x558] sm:$0xff]  ;;  %v238_v39 = vld [vmem:[%s8434_s3 + $0x4c8] sm:$0xff] }
  0x36   :  { %588 = vmatpush.msra.mxu0 %v204_v40  ;;  %502 = vmatpush.msrb.mxu1 %v185_v42  ;;  %v237_v40 = vld [vmem:[%s8434_s3 + $0x4c0] sm:$0xff]  ;;  %v240_v42 = vld [vmem:[%s8434_s3 + $0x4d8] sm:$0xff] }
  0x37   :  { %531 = vmatpush.msrb.mxu2 %v186_v41  ;;  %560 = vmatpush.msrb.mxu3 %v187_v43  ;;  %v239_v41 = vld [vmem:[%s8434_s3 + $0x4d0] sm:$0xff] }
  0x38   :  { %589 = vmatpush.msra.mxu0 %v188_v44  ;;  %503 = vmatpush.msrb.mxu1 %v169_v46  ;;  %v222_v44 = vld [vmem:[%s8434_s3 + $0x448] sm:$0xff] }
  0x39   :  { %532 = vmatpush.msrb.mxu2 %v170_v45  ;;  %561 = vmatpush.msrb.mxu3 %v171_v47  ;;  %v221_v45 = vld [vmem:[%s8434_s3 + $0x440] sm:$0xff]  ;;  %v223_v47 = vld [vmem:[%s8434_s3 + $0x450] sm:$0xff] }
  0x3a   :  { %590 = vmatpush.msra.mxu0 %v172_v48  ;;  %504 = vmatpush.msrb.mxu1 %v153_v50  ;;  %v224_v48 = vld [vmem:[%s8434_s3 + $0x458] sm:$0xff]  ;;  %v206_v50 = vld [vmem:[%s8434_s3 + $0x3c8] sm:$0xff] }
  0x3b   :  { %533 = vmatpush.msrb.mxu2 %v154_v49  ;;  %562 = vmatpush.msrb.mxu3 %v155_v51  ;;  %v205_v51 = vld [vmem:[%s8434_s3 + $0x3c0] sm:$0xff] }
  0x3c   :  { %591 = vmatpush.msra.mxu0 %v156_v52  ;;  %505 = vmatpush.msrb.mxu1 %v137_v55  ;;  %v207_v52 = vld [vmem:[%s8434_s3 + $0x3d0] sm:$0xff]  ;;  %v189_v55 = vld [vmem:[%s8434_s3 + $0x340] sm:$0xff] }
  0x3d   :  { %534 = vmatpush.msrb.mxu2 %v138_v54  ;;  %563 = vmatpush.msrb.mxu3 %v139_v56  ;;  %v190_v54 = vld [vmem:[%s8434_s3 + $0x348] sm:$0xff]  ;;  %v191_v56 = vld [vmem:[%s8434_s3 + $0x350] sm:$0xff] }
  0x3e   :  { %592 = vmatpush.msra.mxu0 %v140_v57  ;;  %506 = vmatpush.msrb.mxu1 %v121_v59  ;;  %v192_v57 = vld [vmem:[%s8434_s3 + $0x358] sm:$0xff]  ;;  %v173_v59 = vld [vmem:[%s8434_s3 + $0x2c0] sm:$0xff] }
  0x3f   :  { %535 = vmatpush.msrb.mxu2 %v122_v58  ;;  %564 = vmatpush.msrb.mxu3 %v123_v61  ;;  %v174_v58 = vld [vmem:[%s8434_s3 + $0x2c8] sm:$0xff]  ;;  %v176_v61 = vld [vmem:[%s8434_s3 + $0x2d8] sm:$0xff] }
  0x40   :  { %593 = vmatpush.msra.mxu0 %v124_v62  ;;  %507 = vmatpush.msrb.mxu1 %v105_v1  ;;  %v158_v62 = vld [vmem:[%s8434_s3 + $0x248] sm:$0xff]  ;;  %v160_v1 = vld [vmem:[%s8434_s3 + $0x258] sm:$0xff] }
  0x41   :  { %536 = vmatpush.msrb.mxu2 %v106_v63  ;;  %565 = vmatpush.msrb.mxu3 %v107_v2  ;;  %v157_v63 = vld [vmem:[%s8434_s3 + $0x240] sm:$0xff]  ;;  %v142_v2 = vld [vmem:[%s8434_s3 + $0x1c8] sm:$0xff] }
  0x42   :  { %594 = vmatpush.msra.mxu0 %v108_v3  ;;  %508 = vmatpush.msrb.mxu1 %v89_v6  ;;  %v141_v3 = vld [vmem:[%s8434_s3 + $0x1c0] sm:$0xff]  ;;  %v144_v6 = vld [vmem:[%s8434_s3 + $0x1d8] sm:$0xff] }
  0x43   :  { %537 = vmatpush.msrb.mxu2 %v90_v5  ;;  %566 = vmatpush.msrb.mxu3 %v91_v7  ;;  %v143_v5 = vld [vmem:[%s8434_s3 + $0x1d0] sm:$0xff]  ;;  %v126_v7 = vld [vmem:[%s8434_s3 + $0x148] sm:$0xff] }
  0x44   :  { %595 = vmatpush.msra.mxu0 %v92_v8  ;;  %v125_v8 = vld [vmem:[%s8434_s3 + $0x140] sm:$0xff] }
  0x80   :  { %v69_v60 = vpop.f32.mrf.mxu0 }
  0x81   :  { %v70_v0 = vadd.f32 %v4241_v53, %v69_v60  ;;  %v175_v60 = vld [vmem:[%s8434_s3 + $0x2d0] sm:$0xff] }
  0x83   :  { %v4280_v4 = vmax.f32 %v70_v0, 0.0  ;;  %v159_v0 = vld [vmem:[%s8434_s3 + $0x250] sm:$0xff] }
  0x85   :  { %393 = vmatmul.f32.vlgmr.msra.gmra.mxu1 %v4280_v4  ;;  %422 = vmatmul.f32.vlgmr.msra.gmra.mxu2 %v4280_v4 }
  0x86   :  { %451 = vmatmul.f32.vlgmr.msra.gmra.mxu3 %v4280_v4  ;;  %480 = vmatmul.f32.vlgmr.msrb.gmra.mxu0 %v4280_v4 }
  0x87   :  { %638 = vmatpush.msra.mxu2 %v334_v9  ;;  %609 = vmatpush.msra.mxu1 %v333_v10  ;;  %v127_v9 = vld [vmem:[%s8434_s3 + $0x150] sm:$0xff]  ;;  %v128_v10 = vld [vmem:[%s8434_s3 + $0x158] sm:$0xff] }
  0x88   :  { %v72_v13 = vpop.f32.mrf.mxu0  ;;  %667 = vmatpush.msra.mxu3 %v335_v11  ;;  %696 = vmatpush.msrb.mxu0 %v336_v12  ;;  %v110_v11 = vld [vmem:[%s8434_s3 + $0xc8] sm:$0xff]  ;;  %v109_v12 = vld [vmem:[%s8434_s3 + $0xc0] sm:$0xff] }
  0x89   :  { %v73_v16 = vadd.f32 %v4241_v53, %v72_v13  ;;  %639 = vmatpush.msra.mxu2 %v318_v14  ;;  %610 = vmatpush.msra.mxu1 %v317_v15  ;;  %v111_v13 = vld [vmem:[%s8434_s3 + $0xd0] sm:$0xff]  ;;  %v112_v14 = vld [vmem:[%s8434_s3 + $0xd8] sm:$0xff]  ;;  %v94_v15 = vld [vmem:[%s8434_s3 + $0x48] sm:$0xff] }
  0x8a   :  { %668 = vmatpush.msra.mxu3 %v319_v17  ;;  %697 = vmatpush.msrb.mxu0 %v320_v18  ;;  %v95_v17 = vld [vmem:[%s8434_s3 + $0x50] sm:$0xff]  ;;  %v96_v18 = vld [vmem:[%s8434_s3 + $0x58] sm:$0xff] }
  0x8b   :  { %v4323_v19 = vmax.f32 %v73_v16, 0.0  ;;  %640 = vmatpush.msra.mxu2 %v302_v20  ;;  %611 = vmatpush.msra.mxu1 %v301_v21  ;;  %v93_v16 = vld [vmem:[%s8434_s3 + $0x40] sm:$0xff]  ;;  %v338_v20 = vld [vmem:[%s8434_s3 + $0x7e8] sm:$0xff] }
  0x8c   :  { %669 = vmatpush.msra.mxu3 %v303_v22  ;;  %698 = vmatpush.msrb.mxu0 %v304_v23  ;;  %v337_v21 = vld [vmem:[%s8434_s3 + $0x7e0] sm:$0xff]  ;;  %v339_v22 = vld [vmem:[%s8434_s3 + $0x7f0] sm:$0xff]  ;;  %v340_v23 = vld [vmem:[%s8434_s3 + $0x7f8] sm:$0xff] }
  0x8d   :  { %396 = vmatmul.f32.gmra.mxu1 %v4323_v19  ;;  %425 = vmatmul.f32.gmra.mxu2 %v4323_v19 }
  0x8e   :  { %454 = vmatmul.f32.gmra.mxu3 %v4323_v19  ;;  %483 = vmatmul.f32.gmra.mxu0 %v4323_v19 }
  0x8f   :  { %641 = vmatpush.msra.mxu2 %v286_v24  ;;  %612 = vmatpush.msra.mxu1 %v285_v25  ;;  %v322_v24 = vld [vmem:[%s8434_s3 + $0x768] sm:$0xff]  ;;  %v321_v25 = vld [vmem:[%s8434_s3 + $0x760] sm:$0xff] }
  0x90   :  { %v75_v28 = vpop.f32.mrf.mxu0  ;;  %670 = vmatpush.msra.mxu3 %v287_v26  ;;  %699 = vmatpush.msrb.mxu0 %v288_v27  ;;  %v323_v26 = vld [vmem:[%s8434_s3 + $0x770] sm:$0xff]  ;;  %v324_v27 = vld [vmem:[%s8434_s3 + $0x778] sm:$0xff] }
  0x91   :  { %v76_v31 = vadd.f32 %v4241_v53, %v75_v28  ;;  %642 = vmatpush.msra.mxu2 %v270_v29  ;;  %613 = vmatpush.msra.mxu1 %v269_v30  ;;  %v306_v28 = vld [vmem:[%s8434_s3 + $0x6e8] sm:$0xff]  ;;  %v305_v29 = vld [vmem:[%s8434_s3 + $0x6e0] sm:$0xff]  ;;  %v307_v30 = vld [vmem:[%s8434_s3 + $0x6f0] sm:$0xff] }
  0x92   :  { %671 = vmatpush.msra.mxu3 %v271_v32  ;;  %700 = vmatpush.msrb.mxu0 %v272_v33  ;;  %v290_v32 = vld [vmem:[%s8434_s3 + $0x668] sm:$0xff]  ;;  %v289_v33 = vld [vmem:[%s8434_s3 + $0x660] sm:$0xff] }
  0x93   :  { %v4366_v34 = vmax.f32 %v76_v31, 0.0  ;;  %643 = vmatpush.msra.mxu2 %v254_v35  ;;  %614 = vmatpush.msra.mxu1 %v253_v36  ;;  %v308_v31 = vld [vmem:[%s8434_s3 + $0x6f8] sm:$0xff]  ;;  %v291_v35 = vld [vmem:[%s8434_s3 + $0x670] sm:$0xff] }
  0x94   :  { %672 = vmatpush.msra.mxu3 %v255_v37  ;;  %701 = vmatpush.msrb.mxu0 %v256_v38  ;;  %v292_v36 = vld [vmem:[%s8434_s3 + $0x678] sm:$0xff]  ;;  %v274_v37 = vld [vmem:[%s8434_s3 + $0x5e8] sm:$0xff]  ;;  %v273_v38 = vld [vmem:[%s8434_s3 + $0x5e0] sm:$0xff] }
  0x95   :  { %399 = vmatmul.f32.gmra.mxu1 %v4366_v34  ;;  %428 = vmatmul.f32.gmra.mxu2 %v4366_v34 }
  0x96   :  { %457 = vmatmul.f32.gmra.mxu3 %v4366_v34  ;;  %486 = vmatmul.f32.gmra.mxu0 %v4366_v34 }
  0x97   :  { %644 = vmatpush.msra.mxu2 %v238_v39  ;;  %615 = vmatpush.msra.mxu1 %v237_v40  ;;  %v275_v39 = vld [vmem:[%s8434_s3 + $0x5f0] sm:$0xff]  ;;  %v276_v40 = vld [vmem:[%s8434_s3 + $0x5f8] sm:$0xff] }
  0x98   :  { %v78_v43 = vpop.f32.mrf.mxu0  ;;  %673 = vmatpush.msra.mxu3 %v239_v41  ;;  %702 = vmatpush.msrb.mxu0 %v240_v42  ;;  %v258_v41 = vld [vmem:[%s8434_s3 + $0x568] sm:$0xff]  ;;  %v257_v42 = vld [vmem:[%s8434_s3 + $0x560] sm:$0xff] }
  0x99   :  { %v79_v46 = vadd.f32 %v4241_v53, %v78_v43  ;;  %645 = vmatpush.msra.mxu2 %v222_v44  ;;  %616 = vmatpush.msra.mxu1 %v221_v45  ;;  %v208_v53 = vld [vmem:[%s8434_s3 + $0x3d8] sm:$0xff]  ;;  %v259_v43 = vld [vmem:[%s8434_s3 + $0x570] sm:$0xff]  ;;  %v242_v45 = vld [vmem:[%s8434_s3 + $0x4e8] sm:$0xff] }
  0x9a   :  { %674 = vmatpush.msra.mxu3 %v223_v47  ;;  %703 = vmatpush.msrb.mxu0 %v224_v48  ;;  %v260_v44 = vld [vmem:[%s8434_s3 + $0x578] sm:$0xff]  ;;  %v243_v47 = vld [vmem:[%s8434_s3 + $0x4f0] sm:$0xff] }
  0x9b   :  { %v4409_v49 = vmax.f32 %v79_v46, 0.0  ;;  %646 = vmatpush.msra.mxu2 %v206_v50  ;;  %617 = vmatpush.msra.mxu1 %v205_v51  ;;  %v241_v46 = vld [vmem:[%s8434_s3 + $0x4e0] sm:$0xff]  ;;  %v244_v48 = vld [vmem:[%s8434_s3 + $0x4f8] sm:$0xff]  ;;  %v226_v50 = vld [vmem:[%s8434_s3 + $0x468] sm:$0xff] }
  0x9c   :  { %675 = vmatpush.msra.mxu3 %v207_v52  ;;  %704 = vmatpush.msrb.mxu0 %v208_v53  ;;  %v225_v51 = vld [vmem:[%s8434_s3 + $0x460] sm:$0xff]  ;;  %v227_v52 = vld [vmem:[%s8434_s3 + $0x470] sm:$0xff]  ;;  %v228_v53 = vld [vmem:[%s8434_s3 + $0x478] sm:$0xff] }
  0x9d   :  { %402 = vmatmul.f32.gmra.mxu1 %v4409_v49  ;;  %431 = vmatmul.f32.gmra.mxu2 %v4409_v49 }
  0x9e   :  { %460 = vmatmul.f32.gmra.mxu3 %v4409_v49  ;;  %489 = vmatmul.f32.gmra.mxu0 %v4409_v49 }
  0x9f   :  { %647 = vmatpush.msra.mxu2 %v190_v54  ;;  %618 = vmatpush.msra.mxu1 %v189_v55  ;;  %v210_v54 = vld [vmem:[%s8434_s3 + $0x3e8] sm:$0xff]  ;;  %v209_v55 = vld [vmem:[%s8434_s3 + $0x3e0] sm:$0xff] }
  0xa0   :  { %676 = vmatpush.msra.mxu3 %v191_v56  ;;  %705 = vmatpush.msrb.mxu0 %v192_v57  ;;  %v211_v56 = vld [vmem:[%s8434_s3 + $0x3f0] sm:$0xff]  ;;  %v212_v57 = vld [vmem:[%s8434_s3 + $0x3f8] sm:$0xff] }
  0xa1   :  { %648 = vmatpush.msra.mxu2 %v174_v58  ;;  %619 = vmatpush.msra.mxu1 %v173_v59  ;;  %v194_v58 = vld [vmem:[%s8434_s3 + $0x368] sm:$0xff]  ;;  %v193_v59 = vld [vmem:[%s8434_s3 + $0x360] sm:$0xff] }
  0xa2   :  { %677 = vmatpush.msra.mxu3 %v175_v60  ;;  %706 = vmatpush.msrb.mxu0 %v176_v61  ;;  %v195_v60 = vld [vmem:[%s8434_s3 + $0x370] sm:$0xff]  ;;  %v196_v61 = vld [vmem:[%s8434_s3 + $0x378] sm:$0xff] }
  0xa3   :  { %649 = vmatpush.msra.mxu2 %v158_v62  ;;  %620 = vmatpush.msra.mxu1 %v157_v63  ;;  %v178_v62 = vld [vmem:[%s8434_s3 + $0x2e8] sm:$0xff]  ;;  %v177_v63 = vld [vmem:[%s8434_s3 + $0x2e0] sm:$0xff] }
  0xa4   :  { %678 = vmatpush.msra.mxu3 %v159_v0  ;;  %707 = vmatpush.msrb.mxu0 %v160_v1  ;;  %v179_v0 = vld [vmem:[%s8434_s3 + $0x2f0] sm:$0xff]  ;;  %v180_v1 = vld [vmem:[%s8434_s3 + $0x2f8] sm:$0xff] }
  0xa5   :  { %509 = vmatmul.f32.vlgmr.msrb.gmra.mxu1 %v4280_v4  ;;  %538 = vmatmul.f32.vlgmr.msrb.gmra.mxu2 %v4280_v4 }
  0xa6   :  { %567 = vmatmul.f32.vlgmr.msrb.gmra.mxu3 %v4280_v4  ;;  %596 = vmatmul.f32.vlgmr.msra.gmra.mxu0 %v4280_v4 }
  0xa7   :  { %650 = vmatpush.msra.mxu2 %v142_v2  ;;  %621 = vmatpush.msra.mxu1 %v141_v3  ;;  %v162_v2 = vld [vmem:[%s8434_s3 + $0x268] sm:$0xff]  ;;  %v161_v3 = vld [vmem:[%s8434_s3 + $0x260] sm:$0xff] }
  0xa8   :  { %679 = vmatpush.msra.mxu3 %v143_v5  ;;  %708 = vmatpush.msrb.mxu0 %v144_v6  ;;  %v163_v5 = vld [vmem:[%s8434_s3 + $0x270] sm:$0xff]  ;;  %v164_v6 = vld [vmem:[%s8434_s3 + $0x278] sm:$0xff] }
  0xa9   :  { %651 = vmatpush.msra.mxu2 %v126_v7  ;;  %622 = vmatpush.msra.mxu1 %v125_v8  ;;  %v146_v7 = vld [vmem:[%s8434_s3 + $0x1e8] sm:$0xff]  ;;  %v145_v8 = vld [vmem:[%s8434_s3 + $0x1e0] sm:$0xff] }
  0xaa   :  { %680 = vmatpush.msra.mxu3 %v127_v9  ;;  %709 = vmatpush.msrb.mxu0 %v128_v10  ;;  %v147_v9 = vld [vmem:[%s8434_s3 + $0x1f0] sm:$0xff]  ;;  %v148_v10 = vld [vmem:[%s8434_s3 + $0x1f8] sm:$0xff] }
  0xab   :  { %652 = vmatpush.msra.mxu2 %v110_v11  ;;  %623 = vmatpush.msra.mxu1 %v109_v12  ;;  %v130_v11 = vld [vmem:[%s8434_s3 + $0x168] sm:$0xff]  ;;  %v129_v12 = vld [vmem:[%s8434_s3 + $0x160] sm:$0xff] }
  0xac   :  { %681 = vmatpush.msra.mxu3 %v111_v13  ;;  %710 = vmatpush.msrb.mxu0 %v112_v14  ;;  %v131_v13 = vld [vmem:[%s8434_s3 + $0x170] sm:$0xff]  ;;  %v132_v14 = vld [vmem:[%s8434_s3 + $0x178] sm:$0xff] }
  0xad   :  { %512 = vmatmul.f32.gmra.mxu1 %v4323_v19  ;;  %541 = vmatmul.f32.gmra.mxu2 %v4323_v19 }
  0xae   :  { %570 = vmatmul.f32.gmra.mxu3 %v4323_v19  ;;  %599 = vmatmul.f32.gmra.mxu0 %v4323_v19 }
  0xaf   :  { %653 = vmatpush.msra.mxu2 %v94_v15  ;;  %624 = vmatpush.msra.mxu1 %v93_v16  ;;  %v114_v15 = vld [vmem:[%s8434_s3 + $0xe8] sm:$0xff]  ;;  %v113_v16 = vld [vmem:[%s8434_s3 + $0xe0] sm:$0xff] }
  0xb0   :  { %682 = vmatpush.msra.mxu3 %v95_v17  ;;  %711 = vmatpush.msrb.mxu0 %v96_v18  ;;  %v115_v17 = vld [vmem:[%s8434_s3 + $0xf0] sm:$0xff]  ;;  %v116_v18 = vld [vmem:[%s8434_s3 + $0xf8] sm:$0xff] }
  0xb1   :  { %754 = vmatpush.msrb.mxu2 %v338_v20  ;;  %725 = vmatpush.msrb.mxu1 %v337_v21  ;;  %v98_v20 = vld [vmem:[%s8434_s3 + $0x68] sm:$0xff]  ;;  %v97_v21 = vld [vmem:[%s8434_s3 + $0x60] sm:$0xff] }
  0xb2   :  { %783 = vmatpush.msrb.mxu3 %v339_v22  ;;  %812 = vmatpush.msra.mxu0 %v340_v23  ;;  %v99_v22 = vld [vmem:[%s8434_s3 + $0x70] sm:$0xff]  ;;  %v100_v23 = vld [vmem:[%s8434_s3 + $0x78] sm:$0xff] }
  0xb3   :  { %755 = vmatpush.msrb.mxu2 %v322_v24  ;;  %726 = vmatpush.msrb.mxu1 %v321_v25  ;;  %v2087_v24 = vld [vmem:[%s8436_s5 + $0xf0] sm:$0xff] }
  0xb4   :  { %784 = vmatpush.msrb.mxu3 %v323_v26  ;;  %813 = vmatpush.msra.mxu0 %v324_v27  ;;  %v2183_v25 = vld [vmem:[%s8436_s5 + $0x3f0] sm:$0xff]  ;;  %v2085_v26 = vld [vmem:[%s8436_s5 + $0xe0] sm:$0xff] }
  0xb5   :  { %515 = vmatmul.f32.gmra.mxu1 %v4366_v34  ;;  %544 = vmatmul.f32.gmra.mxu2 %v4366_v34  ;;  %v2181_v27 = vld [vmem:[%s8436_s5 + $0x3e0] sm:$0xff] }
  0xb6   :  { %573 = vmatmul.f32.gmra.mxu3 %v4366_v34  ;;  %602 = vmatmul.f32.gmra.mxu0 %v4366_v34 }
  0xb7   :  { %756 = vmatpush.msrb.mxu2 %v306_v28  ;;  %727 = vmatpush.msrb.mxu1 %v305_v29  ;;  %v2083_v28 = vld [vmem:[%s8436_s5 + $0xd0] sm:$0xff] }
  0xb8   :  { %785 = vmatpush.msrb.mxu3 %v307_v30  ;;  %814 = vmatpush.msra.mxu0 %v308_v31  ;;  %v2179_v29 = vld [vmem:[%s8436_s5 + $0x3d0] sm:$0xff]  ;;  %v2081_v31 = vld [vmem:[%s8436_s5 + $0xc0] sm:$0xff] }
  0xb9   :  { %757 = vmatpush.msrb.mxu2 %v290_v32  ;;  %728 = vmatpush.msrb.mxu1 %v289_v33  ;;  %v2119_v30 = vld [vmem:[%s8436_s5 + $0x1f0] sm:$0xff]  ;;  %v2177_v32 = vld [vmem:[%s8436_s5 + $0x3c0] sm:$0xff] }
  0xba   :  { %786 = vmatpush.msrb.mxu3 %v291_v35  ;;  %815 = vmatpush.msra.mxu0 %v292_v36  ;;  %v2117_v33 = vld [vmem:[%s8436_s5 + $0x1e0] sm:$0xff]  ;;  %v2079_v35 = vld [vmem:[%s8436_s5 + $0xb0] sm:$0xff] }
  0xbb   :  { %758 = vmatpush.msrb.mxu2 %v274_v37  ;;  %729 = vmatpush.msrb.mxu1 %v273_v38  ;;  %v2149_v36 = vld [vmem:[%s8436_s5 + $0x2e0] sm:$0xff]  ;;  %v2175_v37 = vld [vmem:[%s8436_s5 + $0x3b0] sm:$0xff] }
  0xbc   :  { %787 = vmatpush.msrb.mxu3 %v275_v39  ;;  %816 = vmatpush.msra.mxu0 %v276_v40  ;;  %v2115_v38 = vld [vmem:[%s8436_s5 + $0x1d0] sm:$0xff]  ;;  %v2077_v39 = vld [vmem:[%s8436_s5 + $0xa0] sm:$0xff] }
  0xbd   :  { %518 = vmatmul.f32.gmra.mxu1 %v4409_v49  ;;  %547 = vmatmul.f32.gmra.mxu2 %v4409_v49  ;;  %v2147_v40 = vld [vmem:[%s8436_s5 + $0x2d0] sm:$0xff] }
  0xbe   :  { %576 = vmatmul.f32.gmra.mxu3 %v4409_v49  ;;  %605 = vmatmul.f32.gmra.mxu0 %v4409_v49 }
  0xbf   :  { %759 = vmatpush.msrb.mxu2 %v258_v41  ;;  %730 = vmatpush.msrb.mxu1 %v257_v42  ;;  %v2173_v41 = vld [vmem:[%s8436_s5 + $0x3a0] sm:$0xff]  ;;  %v2075_v42 = vld [vmem:[%s8436_s5 + $0x90] sm:$0xff] }
  0xc0   :  { %788 = vmatpush.msrb.mxu3 %v259_v43  ;;  %817 = vmatpush.msra.mxu0 %v260_v44  ;;  %v2145_v43 = vld [vmem:[%s8436_s5 + $0x2c0] sm:$0xff]  ;;  %v2171_v44 = vld [vmem:[%s8436_s5 + $0x390] sm:$0xff] }
  0xc1   :  { %760 = vmatpush.msrb.mxu2 %v242_v45  ;;  %731 = vmatpush.msrb.mxu1 %v241_v46  ;;  %v2111_v45 = vld [vmem:[%s8436_s5 + $0x1b0] sm:$0xff]  ;;  %v2073_v46 = vld [vmem:[%s8436_s5 + $0x80] sm:$0xff] }
  0xc2   :  { %789 = vmatpush.msrb.mxu3 %v243_v47  ;;  %818 = vmatpush.msra.mxu0 %v244_v48  ;;  %v2143_v47 = vld [vmem:[%s8436_s5 + $0x2b0] sm:$0xff]  ;;  %v2169_v48 = vld [vmem:[%s8436_s5 + $0x380] sm:$0xff] }
  0xc3   :  { %761 = vmatpush.msrb.mxu2 %v226_v50  ;;  %732 = vmatpush.msrb.mxu1 %v225_v51  ;;  %v2109_v50 = vld [vmem:[%s8436_s5 + $0x1a0] sm:$0xff]  ;;  %v2071_v51 = vld [vmem:[%s8436_s5 + $0x70] sm:$0xff] }
  0xc4   :  { %790 = vmatpush.msrb.mxu3 %v227_v52  ;;  %819 = vmatpush.msra.mxu0 %v228_v53  ;;  %v2141_v52 = vld [vmem:[%s8436_s5 + $0x2a0] sm:$0xff]  ;;  %v2167_v53 = vld [vmem:[%s8436_s5 + $0x370] sm:$0xff] }
  0xc5   :  { %625 = vmatmul.f32.vlgmr.msra.gmra.mxu1 %v4280_v4  ;;  %654 = vmatmul.f32.vlgmr.msra.gmra.mxu2 %v4280_v4 }
  0xc6   :  { %683 = vmatmul.f32.vlgmr.msra.gmra.mxu3 %v4280_v4  ;;  %712 = vmatmul.f32.vlgmr.msrb.gmra.mxu0 %v4280_v4 }
  0xc7   :  { %762 = vmatpush.msrb.mxu2 %v210_v54  ;;  %733 = vmatpush.msrb.mxu1 %v209_v55  ;;  %v2069_v54 = vld [vmem:[%s8436_s5 + $0x60] sm:$0xff]  ;;  %v2139_v55 = vld [vmem:[%s8436_s5 + $0x290] sm:$0xff] }
  0xc8   :  { %791 = vmatpush.msrb.mxu3 %v211_v56  ;;  %820 = vmatpush.msra.mxu0 %v212_v57  ;;  %v2165_v56 = vld [vmem:[%s8436_s5 + $0x360] sm:$0xff] }
  0xc9   :  { %763 = vmatpush.msrb.mxu2 %v194_v58  ;;  %734 = vmatpush.msrb.mxu1 %v193_v59  ;;  %v2105_v57 = vld [vmem:[%s8436_s5 + $0x180] sm:$0xff]  ;;  %v2067_v59 = vld [vmem:[%s8436_s5 + $0x50] sm:$0xff] }
  0xca   :  { %792 = vmatpush.msrb.mxu3 %v195_v60  ;;  %821 = vmatpush.msra.mxu0 %v196_v61  ;;  %v4855_v58 = vld [vmem:[%s8437_s4] sm:$0xff]  ;;  %v2163_v61 = vld [vmem:[%s8436_s5 + $0x350] sm:$0xff] }
  0xcb   :  { %764 = vmatpush.msrb.mxu2 %v178_v62  ;;  %735 = vmatpush.msrb.mxu1 %v177_v63  ;;  %v2137_v60 = vld [vmem:[%s8436_s5 + $0x280] sm:$0xff]  ;;  %v2103_v62 = vld [vmem:[%s8436_s5 + $0x170] sm:$0xff] }
  0xcc   :  { %793 = vmatpush.msrb.mxu3 %v179_v0  ;;  %822 = vmatpush.msra.mxu0 %v180_v1  ;;  %v2065_v63 = vld [vmem:[%s8436_s5 + $0x40] sm:$0xff]  ;;  %v2135_v0 = vld [vmem:[%s8436_s5 + $0x270] sm:$0xff]  ;;  %v4880_v1 = vperm.slane %v4855_v58, 0 }
  0xcd   :  { %628 = vmatmul.f32.gmra.mxu1 %v4323_v19  ;;  %657 = vmatmul.f32.gmra.mxu2 %v4323_v19 }
  0xce   :  { %686 = vmatmul.f32.gmra.mxu3 %v4323_v19  ;;  %715 = vmatmul.f32.gmra.mxu0 %v4323_v19 }
  0xcf   :  { %765 = vmatpush.msrb.mxu2 %v162_v2  ;;  %736 = vmatpush.msrb.mxu1 %v161_v3  ;;  %v2161_v2 = vld [vmem:[%s8436_s5 + $0x340] sm:$0xff]  ;;  %v4889_v3 = vperm.slane %v4855_v58, 3 }
  0xd0   :  { %794 = vmatpush.msrb.mxu3 %v163_v5  ;;  %823 = vmatpush.msra.mxu0 %v164_v6  ;;  %v2063_v5 = vld [vmem:[%s8436_s5 + $0x30] sm:$0xff]  ;;  %v2133_v6 = vld [vmem:[%s8436_s5 + $0x260] sm:$0xff] }
  0xd1   :  { %766 = vmatpush.msrb.mxu2 %v146_v7  ;;  %737 = vmatpush.msrb.mxu1 %v145_v8  ;;  %v2159_v7 = vld [vmem:[%s8436_s5 + $0x330] sm:$0xff] }
  0xd2   :  { %795 = vmatpush.msrb.mxu3 %v147_v9  ;;  %824 = vmatpush.msra.mxu0 %v148_v10  ;;  %v2099_v8 = vld [vmem:[%s8436_s5 + $0x150] sm:$0xff]  ;;  %v2061_v10 = vld [vmem:[%s8436_s5 + $0x20] sm:$0xff] }
  0xd3   :  { %767 = vmatpush.msrb.mxu2 %v130_v11  ;;  %738 = vmatpush.msrb.mxu1 %v129_v12  ;;  %v2131_v11 = vld [vmem:[%s8436_s5 + $0x250] sm:$0xff] }
  0xd4   :  { %796 = vmatpush.msrb.mxu3 %v131_v13  ;;  %825 = vmatpush.msra.mxu0 %v132_v14  ;;  %v2157_v14 = vld [vmem:[%s8436_s5 + $0x320] sm:$0xff] }
  0xd5   :  { %631 = vmatmul.f32.gmra.mxu1 %v4366_v34  ;;  %660 = vmatmul.f32.gmra.mxu2 %v4366_v34 }
  0xd6   :  { %689 = vmatmul.f32.gmra.mxu3 %v4366_v34  ;;  %718 = vmatmul.f32.gmra.mxu0 %v4366_v34 }
  0xd7   :  { %768 = vmatpush.msrb.mxu2 %v114_v15  ;;  %739 = vmatpush.msrb.mxu1 %v113_v16  ;;  %v2097_v15 = vld [vmem:[%s8436_s5 + $0x140] sm:$0xff] }
  0xd8   :  { %797 = vmatpush.msrb.mxu3 %v115_v17  ;;  %826 = vmatpush.msra.mxu0 %v116_v18  ;;  %v2059_v17 = vld [vmem:[%s8436_s5 + $0x10] sm:$0xff]  ;;  %v2129_v18 = vld [vmem:[%s8436_s5 + $0x240] sm:$0xff] }
  0xd9   :  { %769 = vmatpush.msrb.mxu2 %v98_v20  ;;  %740 = vmatpush.msrb.mxu1 %v97_v21  ;;  %v4924_v21 = vperm.slane %v4855_v58, 1 }
  0xda   :  { %798 = vmatpush.msrb.mxu3 %v99_v22  ;;  %827 = vmatpush.msra.mxu0 %v100_v23  ;;  %v2155_v22 = vld [vmem:[%s8436_s5 + $0x310] sm:$0xff] }
  0xdb   :  { %2575 = vmatpush.msra.mxu1 %v2087_v24  ;;  %2604 = vmatpush.msra.mxu2 %v2119_v30  ;;  %v2095_v23 = vld [vmem:[%s8436_s5 + $0x130] sm:$0xff] }
  0xdc   :  { %2662 = vmatpush.msrb.mxu0 %v2183_v25  ;;  %v4933_v25 = vperm.slane %v4855_v58, 2 }
  0xdd   :  { %634 = vmatmul.f32.gmra.mxu1 %v4409_v49  ;;  %663 = vmatmul.f32.gmra.mxu2 %v4409_v49 }
  0xde   :  { %692 = vmatmul.f32.gmra.mxu3 %v4409_v49  ;;  %721 = vmatmul.f32.gmra.mxu0 %v4409_v49 }
  0xdf   :  { %2576 = vmatpush.msra.mxu1 %v2085_v26  ;;  %2663 = vmatpush.msrb.mxu0 %v2181_v27  ;;  %v2057_v26 = vld [vmem:[%s8436_s5] sm:$0xff]  ;;  %v2127_v27 = vld [vmem:[%s8436_s5 + $0x230] sm:$0xff] }
  0xe0   :  { %2605 = vmatpush.msra.mxu2 %v2117_v33 }
  0xe1   :  { %2577 = vmatpush.msra.mxu1 %v2083_v28  ;;  %2664 = vmatpush.msrb.mxu0 %v2179_v29  ;;  %v2153_v28 = vld [vmem:[%s8436_s5 + $0x300] sm:$0xff] }
  0xe2   :  { %2606 = vmatpush.msra.mxu2 %v2115_v38  ;;  %v2093_v29 = vld [vmem:[%s8436_s5 + $0x120] sm:$0xff] }
  0xe3   :  { %2578 = vmatpush.msra.mxu1 %v2081_v31  ;;  %2665 = vmatpush.msrb.mxu0 %v2177_v32  ;;  %v2125_v31 = vld [vmem:[%s8436_s5 + $0x220] sm:$0xff] }
  0xe5   :  { %741 = vmatmul.f32.vlgmr.msrb.gmra.mxu1 %v4280_v4  ;;  %770 = vmatmul.f32.vlgmr.msrb.gmra.mxu2 %v4280_v4 }
  0xe6   :  { %799 = vmatmul.f32.vlgmr.msrb.gmra.mxu3 %v4280_v4  ;;  %828 = vmatmul.f32.vlgmr.msra.gmra.mxu0 %v4280_v4  ;;  %v2151_v4 = vld [vmem:[%s8436_s5 + $0x2f0] sm:$0xff] }
  0xe7   :  { %2633 = vmatpush.msra.mxu3 %v2151_v4  ;;  %2579 = vmatpush.msra.mxu1 %v2079_v35  ;;  %v2215_v4 = vld [vmem:[%s8436_s5 + $0x4f0] sm:$0xff] }
  0xe8   :  { %2666 = vmatpush.msrb.mxu0 %v2175_v37  ;;  %v2311_v35 = vld [vmem:[%s8436_s5 + $0x7f0] sm:$0xff] }
  0xe9   :  { %2634 = vmatpush.msra.mxu3 %v2149_v36  ;;  %2580 = vmatpush.msra.mxu1 %v2077_v39  ;;  %v2091_v36 = vld [vmem:[%s8436_s5 + $0x110] sm:$0xff] }
  0xea   :  { %2667 = vmatpush.msrb.mxu0 %v2173_v41  ;;  %v2123_v39 = vld [vmem:[%s8436_s5 + $0x210] sm:$0xff] }
  0xeb   :  { %2635 = vmatpush.msra.mxu3 %v2147_v40  ;;  %2581 = vmatpush.msra.mxu1 %v2075_v42  ;;  %v2213_v40 = vld [vmem:[%s8436_s5 + $0x4e0] sm:$0xff] }
  0xec   :  { %2668 = vmatpush.msrb.mxu0 %v2171_v44  ;;  %v2089_v44 = vld [vmem:[%s8436_s5 + $0x100] sm:$0xff] }
  0xed   :  { %744 = vmatmul.f32.gmra.mxu1 %v4323_v19  ;;  %773 = vmatmul.f32.gmra.mxu2 %v4323_v19 }
  0xee   :  { %802 = vmatmul.f32.gmra.mxu3 %v4323_v19  ;;  %831 = vmatmul.f32.gmra.mxu0 %v4323_v19  ;;  %v2113_v19 = vld [vmem:[%s8436_s5 + $0x1c0] sm:$0xff] }
  0xef   :  { %2607 = vmatpush.msra.mxu2 %v2113_v19  ;;  %2636 = vmatpush.msra.mxu3 %v2145_v43  ;;  %v2309_v43 = vld [vmem:[%s8436_s5 + $0x7e0] sm:$0xff] }
  0xf0   :  { %2582 = vmatpush.msra.mxu1 %v2073_v46  ;;  %2669 = vmatpush.msrb.mxu0 %v2169_v48  ;;  %v2211_v48 = vld [vmem:[%s8436_s5 + $0x4d0] sm:$0xff] }
  0xf1   :  { %2608 = vmatpush.msra.mxu2 %v2111_v45  ;;  %2637 = vmatpush.msra.mxu3 %v2143_v47  ;;  %v2121_v47 = vld [vmem:[%s8436_s5 + $0x200] sm:$0xff] }
  0xf2   :  { %2583 = vmatpush.msra.mxu1 %v2071_v51  ;;  %2670 = vmatpush.msrb.mxu0 %v2167_v53 }
  0xf3   :  { %2609 = vmatpush.msra.mxu2 %v2109_v50  ;;  %2638 = vmatpush.msra.mxu3 %v2141_v52  ;;  %v2307_v52 = vld [vmem:[%s8436_s5 + $0x7d0] sm:$0xff] }
  0xf4   :  { %2584 = vmatpush.msra.mxu1 %v2069_v54  ;;  %2671 = vmatpush.msrb.mxu0 %v2165_v56 }
  0xf5   :  { %747 = vmatmul.f32.gmra.mxu1 %v4366_v34  ;;  %776 = vmatmul.f32.gmra.mxu2 %v4366_v34 }
  0xf6   :  { %805 = vmatmul.f32.gmra.mxu3 %v4366_v34  ;;  %834 = vmatmul.f32.gmra.mxu0 %v4366_v34  ;;  %v2107_v34 = vld [vmem:[%s8436_s5 + $0x190] sm:$0xff] }
  0xf7   :  { %2610 = vmatpush.msra.mxu2 %v2107_v34  ;;  %2639 = vmatpush.msra.mxu3 %v2139_v55 }
  0xf8   :  { %2585 = vmatpush.msra.mxu1 %v2067_v59  ;;  %2672 = vmatpush.msrb.mxu0 %v2163_v61 }
  0xf9   :  { %2611 = vmatpush.msra.mxu2 %v2105_v57  ;;  %2640 = vmatpush.msra.mxu3 %v2137_v60 }
  0xfa   :  { %2586 = vmatpush.msra.mxu1 %v2065_v63  ;;  %2673 = vmatpush.msrb.mxu0 %v2161_v2  ;;  %v4994_v63 = vperm.slane %v4855_v58, 4 }
  0xfb   :  { %2612 = vmatpush.msra.mxu2 %v2103_v62  ;;  %2641 = vmatpush.msra.mxu3 %v2135_v0 }
  0xfc   :  { %2587 = vmatpush.msra.mxu1 %v2063_v5  ;;  %2674 = vmatpush.msrb.mxu0 %v2159_v7 }
  0xfd   :  { %750 = vmatmul.f32.gmra.mxu1 %v4409_v49  ;;  %779 = vmatmul.f32.gmra.mxu2 %v4409_v49 }
  0xfe   :  { %808 = vmatmul.f32.gmra.mxu3 %v4409_v49  ;;  %837 = vmatmul.f32.gmra.mxu0 %v4409_v49  ;;  %v2101_v49 = vld [vmem:[%s8436_s5 + $0x160] sm:$0xff] }
  0xff   :  { %2613 = vmatpush.msra.mxu2 %v2101_v49  ;;  %2642 = vmatpush.msra.mxu3 %v2133_v6 }
 0x100   :  { %2588 = vmatpush.msra.mxu1 %v2061_v10  ;;  %2675 = vmatpush.msrb.mxu0 %v2157_v14 }
 0x101   :  { %2614 = vmatpush.msra.mxu2 %v2099_v8  ;;  %2643 = vmatpush.msra.mxu3 %v2131_v11 }
 0x102   :  { %v394_v9 = vpop.f32.mrf.mxu1  ;;  %2589 = vmatpush.msra.mxu1 %v2059_v17  ;;  %2676 = vmatpush.msrb.mxu0 %v2155_v22 }
 0x103   :  { %v395_v12 = vadd.f32 %v394_v9, %v4880_v1  ;;  %v481_v13 = vpop.f32.mrf.mxu0  ;;  %2615 = vmatpush.msra.mxu2 %v2097_v15  ;;  %2644 = vmatpush.msra.mxu3 %v2129_v18 }
 0x104   :  { %v482_v16 = vadd.f32 %v481_v13, %v4889_v3  ;;  %2590 = vmatpush.msra.mxu1 %v2057_v26  ;;  %2677 = vmatpush.msrb.mxu0 %v2153_v28 }
 0x105   :  { %v3521_v20 = vmul.f32 -1.442695, %v395_v12  ;;  %2616 = vmatpush.msra.mxu2 %v2095_v23  ;;  %2645 = vmatpush.msra.mxu3 %v2127_v27  ;;  %v5004_v12 = vperm.slane %v4855_v58, 7  ;;  %v2247_v23 = vld [vmem:[%s8436_s5 + $0x5f0] sm:$0xff] }
 0x106   :  { %v3524_v24 = vmul.f32 -1.442695, %v482_v16  ;;  %2691 = vmatpush.msrb.mxu1 %v2215_v4  ;;  %2778 = vmatpush.msra.mxu0 %v2311_v35 }
 0x107   :  { %3586 = vpow2.f32 %v3521_v20  ;;  %2617 = vmatpush.msra.mxu2 %v2093_v29  ;;  %2646 = vmatpush.msra.mxu3 %v2125_v31 }
 0x108   :  { %3588 = vpow2.f32 %v3524_v24  ;;  %v423_v30 = vpop.f32.mrf.mxu2  ;;  %2692 = vmatpush.msrb.mxu1 %v2213_v40  ;;  %2779 = vmatpush.msra.mxu0 %v2309_v43  ;;  %v2305_v43 = vld [vmem:[%s8436_s5 + $0x7c0] sm:$0xff] }
 0x109   :  { %v424_v32 = vadd.f32 %v423_v30, %v4924_v21  ;;  %v452_v33 = vpop.f32.mrf.mxu3  ;;  %2618 = vmatpush.msra.mxu2 %v2091_v36  ;;  %2647 = vmatpush.msra.mxu3 %v2123_v39 }
 0x10a   :  { %v453_v37 = vadd.f32 %v452_v33, %v4933_v25  ;;  %v397_v38 = vpop.f32.mrf.mxu1  ;;  %2693 = vmatpush.msrb.mxu1 %v2211_v48  ;;  %2780 = vmatpush.msra.mxu0 %v2307_v52 }
 0x10b   :  { %v3522_v41 = vmul.f32 -1.442695, %v424_v32  ;;  %v398_v19 = vadd.f32 %v397_v38, %v4880_v1  ;;  %v484_v42 = vpop.f32.mrf.mxu0  ;;  %2619 = vmatpush.msra.mxu2 %v2089_v44  ;;  %2648 = vmatpush.msra.mxu3 %v2121_v47 }
 0x10c   :  { %v3523_v45 = vmul.f32 -1.442695, %v453_v37  ;;  %v485_v46 = vadd.f32 %v484_v42, %v4889_v3  ;;  %v2279_v42 = vld [vmem:[%s8436_s5 + $0x6f0] sm:$0xff]  ;;  %2781 = vmatpush.msra.mxu0 %v2305_v43 }
 0x10d   :  { %v3587_v50 = vpop.eup %3586  ;;  %3590 = vpow2.f32 %v3522_v41  ;;  %v3537_v51 = vmul.f32 -1.442695, %v398_v19  ;;  %2720 = vmatpush.msrb.mxu2 %v2247_v23  ;;  %v2209_v19 = vld [vmem:[%s8436_s5 + $0x4c0] sm:$0xff]  ;;  %2749 = vmatpush.msrb.mxu3 %v2279_v42  ;;  %v2203_v42 = vld [vmem:[%s8436_s5 + $0x490] sm:$0xff] }
 0x10e   :  { %v3589_v53 = vpop.eup %3588  ;;  %v4984_v34 = vadd.f32 1.0, %v3587_v50  ;;  %3592 = vpow2.f32 %v3523_v45  ;;  %v3540_v54 = vmul.f32 -1.442695, %v485_v46  ;;  %2694 = vmatpush.msrb.mxu1 %v2209_v19  ;;  %v2245_v50 = vld [vmem:[%s8436_s5 + $0x5e0] sm:$0xff] }
 0x10f   :  { %v4986_v55 = vadd.f32 1.0, %v3589_v53  ;;  %3594 = vpow2.f32 %v3537_v51  ;;  %2721 = vmatpush.msrb.mxu2 %v2245_v50  ;;  %v2241_v19 = vld [vmem:[%s8436_s5 + $0x5c0] sm:$0xff] }
 0x110   :  { %3596 = vrcp.f32 %v4984_v34  ;;  %v426_v56 = vpop.f32.mrf.mxu2  ;;  %v1108_v60 = vand.u32 2147483648, %v4984_v34  ;;  %v1106_v6 = vand.u32 2147483647, %v4984_v34  ;;  %vm1102_vm2 = vweird.f32 %v4984_v34 }
 0x111   :  { %3598 = vrcp.f32 %v4986_v55  ;;  %v427_v57 = vadd.f32 %v426_v56, %v4924_v21  ;;  %v455_v59 = vpop.f32.mrf.mxu3  ;;  %v1153_v7 = vand.u32 2147483648, %v4986_v55  ;;  %v1151_v11 = vand.u32 2147483647, %v4986_v55 }
 0x112   :  { %3600 = vpow2.f32 %v3540_v54  ;;  %v456_v61 = vadd.f32 %v455_v59, %v4933_v25  ;;  %v400_v62 = vpop.f32.mrf.mxu1  ;;  %v5009_v16 = vor.u32 1.1754944e-38, %v1108_v60  ;;  %vm5027_vm4 = vcmp.eq.f32.partialorder %v1106_v6, 8.507059e+37 }
 0x113   :  { %v3591_v0 = vpop.eup %3590  ;;  %v3538_v2 = vmul.f32 -1.442695, %v427_v57  ;;  %v401_v49 = vadd.f32 %v400_v62, %v4880_v1  ;;  %v487_v5 = vpop.f32.mrf.mxu0  ;;  %v5016_v22 = vor.u32 1.1754944e-38, %v1153_v7  ;;  %vm1147_vm5 = vweird.f32 %v4986_v55 }
 0x114   :  { %v3593_v8 = vpop.eup %3592  ;;  %v4999_v9 = vadd.f32 1.0, %v3591_v0  ;;  %v488_v10 = vadd.f32 %v487_v5, %v4889_v3  ;;  %v3539_v15 = vmul.f32 -1.442695, %v456_v61  ;;  %vm5040_vm7 = vcmp.eq.f32.partialorder %v1151_v11, 8.507059e+37 }
 0x115   :  { %v3595_v13 = vpop.eup %3594  ;;  %v5006_v14 = vadd.f32 1.0, %v3593_v8  ;;  %3602 = vpow2.f32 %v3538_v2  ;;  %v3553_v20 = vmul.f32 -1.442695, %v401_v49 }
 0x116   :  { %v5011_v17 = vpop.eup %3596  ;;  %3604 = vrcp.f32 %v4999_v9  ;;  %v5014_v18 = vadd.f32 1.0, %v3595_v13  ;;  %v3556_v26 = vmul.f32 -1.442695, %v488_v10  ;;  %v1121_v4 = vand.u32 2147483647, %v4999_v9 }
 0x117   :  { %v5021_v24 = vpop.eup %3598  ;;  %3606 = vrcp.f32 %v5006_v14  ;;  %v1098_v27 = vmul.f32 %v5011_v17, %v4984_v34  ;;  %vm1103_vm3 = vweird.f32 %v5011_v17  ;;  %v1123_v41 = vand.u32 2147483648, %v4999_v9 }
 0x118   :  { %v3601_v29 = vpop.eup %3600  ;;  %3608 = vrcp.f32 %v5014_v18  ;;  %v429_v30 = vpop.f32.mrf.mxu2  ;;  %v1143_v31 = vmul.f32 %v5021_v24, %v4986_v55  ;;  %vm1148_vm6 = vweird.f32 %v5021_v24  ;;  %vm1117_vm8 = vweird.f32 %v4999_v9  ;;  %vm1104_vm9 = vmor %vm1102_vm2, %vm1103_vm3 }
 0x119   :  { %v5037_v32 = vadd.f32 1.0, %v3601_v29  ;;  %3610 = vpow2.f32 %v3539_v15  ;;  %v430_v33 = vadd.f32 %v429_v30, %v4924_v21  ;;  %v458_v35 = vpop.f32.mrf.mxu3  ;;  %v1099_v36 = vsub.f32 1.0, %v1098_v27  ;;  %vm1149_vm12 = vmor %vm1147_vm5, %vm1148_vm6 }
 0x11a   :  { %3612 = vpow2.f32 %v3553_v20  ;;  %v459_v38 = vadd.f32 %v458_v35, %v4933_v25  ;;  %v403_v39 = vpop.f32.mrf.mxu1  ;;  %v1144_v40 = vsub.f32 1.0, %v1143_v31  ;;  %vm5081_vm11 = vcmp.eq.f32.partialorder %v1121_v4, 8.507059e+37  ;;  %v2243_v4 = vld [vmem:[%s8436_s5 + $0x5d0] sm:$0xff] }
 0x11b   :  { %v3603_v44 = vpop.eup %3602  ;;  %3614 = vrcp.f32 %v5037_v32  ;;  %v3554_v45 = vmul.f32 -1.442695, %v430_v33  ;;  %v404_v46 = vadd.f32 %v403_v39, %v4880_v1  ;;  %v490_v47 = vpop.f32.mrf.mxu0  ;;  %v1100_v48 = vmul.f32 %v5011_v17, %v1099_v36  ;;  %v2205_v33 = vld [vmem:[%s8436_s5 + $0x4a0] sm:$0xff]  ;;  %v2275_v35 = vld [vmem:[%s8436_s5 + $0x6d0] sm:$0xff]  ;;  %2722 = vmatpush.msrb.mxu2 %v2243_v4 }
 0x11c   :  { %v5061_v51 = vpop.eup %3604  ;;  %v5063_v52 = vadd.f32 1.0, %v3603_v44  ;;  %3616 = vpow2.f32 %v3556_v26  ;;  %v3555_v53 = vmul.f32 -1.442695, %v459_v38  ;;  %v491_v54 = vadd.f32 %v490_v47, %v4889_v3  ;;  %v2273_v47 = vld [vmem:[%s8436_s5 + $0x6c0] sm:$0xff] }
 0x11d   :  { %v5067_v1 = vpop.eup %3606  ;;  %3618 = vpow2.f32 %v3554_v45  ;;  %v3569_v56 = vmul.f32 -1.442695, %v404_v46  ;;  %v1101_v57 = vadd.f32 %v5011_v17, %v1100_v48  ;;  %v1145_v59 = vmul.f32 %v5021_v24, %v1144_v40  ;;  %2723 = vmatpush.msrb.mxu2 %v2241_v19 }
 0x11e   :  { %v5071_v60 = vpop.eup %3608  ;;  %3620 = vrcp.f32 %v5063_v52  ;;  %v3572_v61 = vmul.f32 -1.442695, %v491_v54  ;;  %v1113_v3 = vmul.f32 %v5061_v51, %v4999_v9  ;;  %vm1118_vm10 = vweird.f32 %v5061_v51  ;;  %v2299_v54 = vld [vmem:[%s8436_s5 + $0x790] sm:$0xff] }
 0x11f   :  { %v3611_v0 = vpop.eup %3610  ;;  %3622 = vpow2.f32 %v3555_v53  ;;  %v1105_v2 = vsel %vm1104_vm9, %v5011_v17, %v1101_v57  ;;  %v1146_v49 = vadd.f32 %v5021_v24, %v1145_v59  ;;  %v5087_v5 = vor.u32 1.1754944e-38, %v1123_v41  ;;  %v2301_v41 = vld [vmem:[%s8436_s5 + $0x7a0] sm:$0xff]  ;;  %vm5158_vm13 = vmor %vm1117_vm8, %vm1118_vm10 }
 0x120   :  { %v3613_v6 = vpop.eup %3612  ;;  %v5089_v34 = vadd.f32 1.0, %v3611_v0  ;;  %3624 = vpow2.f32 %v3569_v56  ;;  %v432_v7 = vpop.f32.mrf.mxu2  ;;  %v5094_v8 = vsel %vm5027_vm4, %v5009_v16, %v1105_v2  ;;  %v1114_v10 = vsub.f32 1.0, %v1113_v3  ;;  %v2239_v56 = vld [vmem:[%s8436_s5 + $0x5b0] sm:$0xff] }
 0x121   :  { %v5100_v11 = vpop.eup %3614  ;;  %v5102_v13 = vadd.f32 1.0, %v3613_v6  ;;  %3626 = vpow2.f32 %v3572_v61  ;;  %v433_v15 = vadd.f32 %v432_v7, %v4924_v21  ;;  %v461_v17 = vpop.f32.mrf.mxu3  ;;  %2591 = vmatmul.f32.vlgmr.msra.gmra.mxu1 %v5094_v8  ;;  %v1150_v20 = vsel %vm1149_vm12, %v5021_v24, %v1146_v49  ;;  %v2207_v21 = vld [vmem:[%s8436_s5 + $0x4b0] sm:$0xff]  ;;  %v2277_v24 = vld [vmem:[%s8436_s5 + $0x6e0] sm:$0xff]  ;;  %2724 = vmatpush.msrb.mxu2 %v2239_v56 }
 0x122   :  { %v3617_v16 = vpop.eup %3616  ;;  %3628 = vrcp.f32 %v5089_v34  ;;  %v462_v23 = vadd.f32 %v461_v17, %v4933_v25  ;;  %v5112_v55 = vsel %vm5040_vm7, %v5016_v22, %v1150_v20  ;;  %v510_v26 = vpop.f32.mrf.mxu1  ;;  %v1115_v27 = vmul.f32 %v5061_v51, %v1114_v10  ;;  %v2303_v25 = vld [vmem:[%s8436_s5 + $0x7b0] sm:$0xff]  ;;  %2695 = vmatpush.msrb.mxu1 %v2207_v21  ;;  %2750 = vmatpush.msrb.mxu3 %v2277_v24 }
 0x123   :  { %v3619_v28 = vpop.eup %3618  ;;  %3630 = vrcp.f32 %v5102_v13  ;;  %v5125_v22 = vadd.f32 1.0, %v3617_v16  ;;  %v3570_v29 = vmul.f32 -1.442695, %v433_v15  ;;  %2678 = vmatmul.f32.vlgmr.msrb.gmra.mxu0 %v5112_v55  ;;  %v511_v30 = vadd.f32 %v510_v26, %v4994_v63  ;;  %v597_v31 = vpop.f32.mrf.mxu0  ;;  %v2295_v26 = vld [vmem:[%s8436_s5 + $0x770] sm:$0xff] }
 0x124   :  { %v5138_v36 = vpop.eup %3620  ;;  %v5140_v37 = vadd.f32 1.0, %v3619_v28  ;;  %v3571_v38 = vmul.f32 -1.442695, %v462_v23  ;;  %v598_v39 = vadd.f32 %v597_v31, %v5004_v12  ;;  %v1116_v40 = vadd.f32 %v5061_v51, %v1115_v27  ;;  %2782 = vmatpush.msra.mxu0 %v2303_v25  ;;  %2696 = vmatpush.msrb.mxu1 %v2205_v33  ;;  %v2201_v28 = vld [vmem:[%s8436_s5 + $0x480] sm:$0xff] }
 0x125   :  { %v3623_v43 = vpop.eup %3622  ;;  %3632 = vrcp.f32 %v5125_v22  ;;  %v3525_v44 = vmul.f32 -1.442695, %v511_v30  ;;  %v1128_v46 = vmul.f32 %v5067_v1, %v5006_v14  ;;  %vm1132_vm14 = vweird.f32 %v5006_v14  ;;  %2751 = vmatpush.msrb.mxu3 %v2275_v35  ;;  %v2237_v33 = vld [vmem:[%s8436_s5 + $0x5a0] sm:$0xff] }
 0x126   :  { %v3625_v48 = vpop.eup %3624  ;;  %3634 = vrcp.f32 %v5140_v37  ;;  %v5169_v50 = vadd.f32 1.0, %v3623_v43  ;;  %v3528_v9 = vmul.f32 -1.442695, %v598_v39  ;;  %v1120_v53 = vsel %vm5158_vm13, %v5061_v51, %v1116_v40  ;;  %2783 = vmatpush.msra.mxu0 %v2301_v41  ;;  %2697 = vmatpush.msrb.mxu1 %v2203_v42 }
 0x127   :  { %v3627_v57 = vpop.eup %3626  ;;  %v5180_v59 = vadd.f32 1.0, %v3625_v48  ;;  %3636 = vpow2.f32 %v3570_v29  ;;  %v5185_v61 = vsel %vm5081_vm11, %v5087_v5, %v1120_v53  ;;  %v1129_v51 = vsub.f32 1.0, %v1128_v46  ;;  %2752 = vmatpush.msrb.mxu3 %v2273_v47  ;;  %v2297_v29 = vld [vmem:[%s8436_s5 + $0x780] sm:$0xff]  ;;  %2725 = vmatpush.msrb.mxu2 %v2237_v33 }
 0x128   :  { %v5187_v3 = vpop.eup %3628  ;;  %3638 = vrcp.f32 %v5169_v50  ;;  %v5190_v0 = vadd.f32 1.0, %v3627_v57  ;;  %2620 = vmatmul.f32.vlgmr.msra.gmra.mxu2 %v5185_v61  ;;  %vm1133_vm15 = vweird.f32 %v5067_v1  ;;  %v1136_v2 = vand.u32 2147483647, %v5006_v14  ;;  %v539_v49 = vpop.f32.mrf.mxu2  ;;  %2784 = vmatpush.msra.mxu0 %v2299_v54 }
 0x129   :  { %v5195_v62 = vpop.eup %3630  ;;  %3640 = vrcp.f32 %v5180_v59  ;;  %v1130_v5 = vmul.f32 %v5067_v1, %v1129_v51  ;;  %v1138_v6 = vand.u32 2147483648, %v5006_v14  ;;  %v5201_v7 = vperm.slane %v4855_v58, 5  ;;  %v568_v10 = vpop.f32.mrf.mxu3  ;;  %vm5220_vm1 = vmor %vm1132_vm14, %vm1133_vm15  ;;  %v2271_v14 = vld [vmem:[%s8436_s5 + $0x6b0] sm:$0xff]  ;;  %2698 = vmatpush.msrb.mxu1 %v2201_v28 }
 0x12a   :  { %3642 = vrcp.f32 %v5190_v0  ;;  %vm5204_vm0 = vcmp.eq.f32.partialorder %v1136_v2, 8.507059e+37  ;;  %v5209_v17 = vperm.slane %v4855_v58, 6  ;;  %v1338_v20 = vmul.f32 %v5071_v60, %v5014_v18  ;;  %2753 = vmatpush.msrb.mxu3 %v2271_v14  ;;  %2785 = vmatpush.msra.mxu0 %v2297_v29  ;;  %v513_v46 = vpop.f32.mrf.mxu1  ;;  %v2235_v28 = vld [vmem:[%s8436_s5 + $0x590] sm:$0xff]  ;;  %v2197_v14 = vld [vmem:[%s8436_s5 + $0x460] sm:$0xff] }
 0x12b   :  { %v5213_v16 = vpop.eup %3632  ;;  %3644 = vpow2.f32 %v3571_v38  ;;  %v1131_v23 = vadd.f32 %v5067_v1, %v1130_v5  ;;  %v1139_v27 = vor.u32 1.1754944e-38, %v1138_v6  ;;  %v540_v58 = vadd.f32 %v539_v49, %v5201_v7  ;;  %v600_v2 = vpop.f32.mrf.mxu0  ;;  %v2267_v29 = vld [vmem:[%s8436_s5 + $0x690] sm:$0xff]  ;;  %2726 = vmatpush.msrb.mxu2 %v2235_v28  ;;  %v2193_v28 = vld [vmem:[%s8436_s5 + $0x440] sm:$0xff] }
 0x12c   :  { %v5225_v21 = vpop.eup %3634  ;;  %3646 = vpow2.f32 %v3525_v44  ;;  %v569_v24 = vadd.f32 %v568_v10, %v5209_v17  ;;  %v1339_v25 = vsub.f32 1.0, %v1338_v20  ;;  %vm1342_vm2 = vweird.f32 %v5014_v18  ;;  %2786 = vmatpush.msra.mxu0 %v2295_v26 }
 0x12d   :  { %v3637_v30 = vpop.eup %3636  ;;  %3648 = vpow2.f32 %v3528_v9  ;;  %v1135_v31 = vsel %vm5220_vm1, %v5067_v1, %v1131_v23  ;;  %v3526_v4 = vmul.f32 -1.442695, %v540_v58  ;;  %vm1343_vm3 = vweird.f32 %v5071_v60  ;;  %v2269_v23 = vld [vmem:[%s8436_s5 + $0x6a0] sm:$0xff] }
 0x12e   :  { %v5245_v35 = vpop.eup %3638  ;;  %v5247_v38 = vadd.f32 1.0, %v3637_v30  ;;  %v5251_v39 = vsel %vm5204_vm0, %v1139_v27, %v1135_v31  ;;  %v3527_v40 = vmul.f32 -1.442695, %v569_v24  ;;  %v1340_v1 = vmul.f32 %v5071_v60, %v1339_v25  ;;  %vm1344_vm6 = vmor %vm1342_vm2, %vm1343_vm3  ;;  %2754 = vmatpush.msrb.mxu3 %v2269_v23 }
 0x12f   :  { %v5254_v41 = vpop.eup %3640  ;;  %2649 = vmatmul.f32.vlgmr.msra.gmra.mxu3 %v5251_v39  ;;  %3650 = vpow2.f32 %v3526_v4  ;;  %v1346_v19 = vand.u32 2147483647, %v5014_v18  ;;  %v1348_v42 = vand.u32 2147483648, %v5014_v18  ;;  %v1383_v43 = vmul.f32 %v5100_v11, %v5037_v32 }
 0x130   :  { %v5261_v44 = vpop.eup %3642  ;;  %3652 = vrcp.f32 %v5247_v38  ;;  %v1341_v45 = vadd.f32 %v5071_v60, %v1340_v1  ;;  %vm1387_vm4 = vweird.f32 %v5037_v32  ;;  %vm1388_vm5 = vweird.f32 %v5100_v11  ;;  %v2233_v1 = vld [vmem:[%s8436_s5 + $0x580] sm:$0xff]  ;;  %2755 = vmatpush.msrb.mxu3 %v2267_v29 }
 0x131   :  { %v3645_v47 = vpop.eup %3644  ;;  %3654 = vpow2.f32 %v3527_v40  ;;  %vm1347_vm7 = vcmp.eq.f32.partialorder %v1346_v19, 8.507059e+37  ;;  %v1349_v48 = vor.u32 1.1754944e-38, %v1348_v42  ;;  %v1384_v9 = vsub.f32 1.0, %v1383_v43  ;;  %vm5285_vm8 = vmor %vm1387_vm4, %vm1388_vm5  ;;  %v2293_v40 = vld [vmem:[%s8436_s5 + $0x760] sm:$0xff]  ;;  %v2195_v19 = vld [vmem:[%s8436_s5 + $0x450] sm:$0xff]  ;;  %2727 = vmatpush.msrb.mxu2 %v2233_v1 }
 0x132   :  { %v3647_v53 = vpop.eup %3646  ;;  %v5271_v54 = vadd.f32 1.0, %v3645_v47  ;;  %v1345_v56 = vsel %vm1344_vm6, %v5071_v60, %v1341_v45  ;;  %v1391_v57 = vand.u32 2147483647, %v5037_v32  ;;  %v1393_v51 = vand.u32 2147483648, %v5037_v32  ;;  %v2199_v32 = vld [vmem:[%s8436_s5 + $0x470] sm:$0xff]  ;;  %2787 = vmatpush.msra.mxu0 %v2293_v40  ;;  %v2289_v29 = vld [vmem:[%s8436_s5 + $0x740] sm:$0xff] }
 0x133   :  { %v3649_v49 = vpop.eup %3648  ;;  %v5276_v5 = vadd.f32 1.0, %v3647_v53  ;;  %v5278_v6 = vsel %vm1347_vm7, %v1349_v48, %v1345_v56  ;;  %v1385_v18 = vmul.f32 %v5100_v11, %v1384_v9  ;;  %v514_v60 = vadd.f32 %v513_v46, %v4994_v63  ;;  %2699 = vmatpush.msrb.mxu1 %v2199_v32  ;;  %v2265_v46 = vld [vmem:[%s8436_s5 + $0x680] sm:$0xff]  ;;  %v2291_v47 = vld [vmem:[%s8436_s5 + $0x750] sm:$0xff] }
 0x134   :  { %3656 = vrcp.f32 %v5271_v54  ;;  %v5291_v15 = vadd.f32 1.0, %v3649_v49  ;;  %2594 = vmatmul.f32.gmra.mxu1 %v5278_v6  ;;  %vm5294_vm9 = vcmp.eq.f32.partialorder %v1391_v57, 8.507059e+37  ;;  %v601_v25 = vadd.f32 %v600_v2, %v5004_v12  ;;  %v2231_v53 = vld [vmem:[%s8436_s5 + $0x570] sm:$0xff]  ;;  %v542_v2 = vpop.f32.mrf.mxu2  ;;  %v571_v49 = vpop.f32.mrf.mxu3  ;;  %2756 = vmatpush.msrb.mxu3 %v2265_v46 }
 0x135   :  { %v3651_v27 = vpop.eup %3650  ;;  %3658 = vrcp.f32 %v5276_v5  ;;  %v1386_v58 = vadd.f32 %v5100_v11, %v1385_v18  ;;  %v3541_v24 = vmul.f32 -1.442695, %v514_v60  ;;  %v1394_v4 = vor.u32 1.1754944e-38, %v1393_v51  ;;  %2700 = vmatpush.msrb.mxu1 %v2197_v14  ;;  %2788 = vmatpush.msra.mxu0 %v2291_v47  ;;  %v2263_v14 = vld [vmem:[%s8436_s5 + $0x670] sm:$0xff] }
 0x136   :  { %v5319_v30 = vpop.eup %3652  ;;  %3660 = vrcp.f32 %v5291_v15  ;;  %v5322_v31 = vadd.f32 1.0, %v3651_v27  ;;  %v1353_v33 = vmul.f32 %v5138_v36, %v5063_v52  ;;  %v3544_v45 = vmul.f32 -1.442695, %v601_v25  ;;  %2728 = vmatpush.msrb.mxu2 %v2231_v53  ;;  %2757 = vmatpush.msrb.mxu3 %v2263_v14 }
 0x137   :  { %v3655_v42 = vpop.eup %3654  ;;  %v1390_v43 = vsel %vm5285_vm8, %v5100_v11, %v1386_v58  ;;  %3662 = vpow2.f32 %v3541_v24  ;;  %vm1357_vm10 = vweird.f32 %v5063_v52  ;;  %v1361_v56 = vand.u32 2147483647, %v5063_v52  ;;  %2701 = vmatpush.msrb.mxu1 %v2195_v19  ;;  %2789 = vmatpush.msra.mxu0 %v2289_v29 }
 0x138   :  { %3664 = vrcp.f32 %v5322_v31  ;;  %v5346_v48 = vadd.f32 1.0, %v3655_v42  ;;  %v5350_v11 = vsel %vm5294_vm9, %v1394_v4, %v1390_v43  ;;  %v1354_v9 = vsub.f32 1.0, %v1353_v33  ;;  %v2191_v33 = vld [vmem:[%s8436_s5 + $0x430] sm:$0xff] }
 0x139   :  { %2681 = vmatmul.f32.gmra.mxu0 %v5350_v11  ;;  %3666 = vpow2.f32 %v3544_v45  ;;  %v1363_v57 = vand.u32 2147483648, %v5063_v52  ;;  %v1368_v51 = vmul.f32 %v5187_v3, %v5089_v34  ;;  %vm1358_vm11 = vweird.f32 %v5138_v36  ;;  %2702 = vmatpush.msrb.mxu1 %v2193_v28 }
 0x13a   :  { %v5360_v18 = vpop.eup %3656  ;;  %3668 = vrcp.f32 %v5346_v48  ;;  %v1355_v10 = vmul.f32 %v5138_v36, %v1354_v9  ;;  %vm1372_vm12 = vweird.f32 %v5089_v34  ;;  %vm5368_vm13 = vcmp.eq.f32.partialorder %v1361_v56, 8.507059e+37  ;;  %vm5393_vm15 = vmor %vm1357_vm10, %vm1358_vm11  ;;  %v2229_v9 = vld [vmem:[%s8436_s5 + $0x560] sm:$0xff] }
 0x13b   :  { %v5366_v60 = vpop.eup %3658  ;;  %v1369_v32 = vsub.f32 1.0, %v1368_v51  ;;  %vm1373_vm14 = vweird.f32 %v5187_v3  ;;  %v1376_v23 = vand.u32 2147483647, %v5089_v34  ;;  %v1378_v58 = vand.u32 2147483648, %v5089_v34  ;;  %2729 = vmatpush.msrb.mxu2 %v2229_v9  ;;  %2703 = vmatpush.msrb.mxu1 %v2191_v33 }
 0x13c   :  { %v5374_v26 = vpop.eup %3660  ;;  %v1356_v27 = vadd.f32 %v5138_v36, %v1355_v10  ;;  %v543_v24 = vadd.f32 %v542_v2, %v5201_v7  ;;  %v572_v25 = vadd.f32 %v571_v49, %v5209_v17  ;;  %v1364_v40 = vor.u32 1.1754944e-38, %v1363_v57  ;;  %vm1374_vm1 = vmor %vm1372_vm12, %vm1373_vm14 }
 0x13d   :  { %v3663_v4 = vpop.eup %3662  ;;  %v1370_v1 = vmul.f32 %v5187_v3, %v1369_v32  ;;  %vm5398_vm0 = vcmp.eq.f32.partialorder %v1376_v23, 8.507059e+37  ;;  %v1578_v42 = vmul.f32 %v5195_v62, %v5102_v13  ;;  %v1379_v46 = vor.u32 1.1754944e-38, %v1378_v58  ;;  %v516_v58 = vpop.f32.mrf.mxu1 }
 0x13e   :  { %v5404_v43 = vpop.eup %3664  ;;  %v5406_v45 = vadd.f32 1.0, %v3663_v4  ;;  %v1360_v52 = vsel %vm5393_vm15, %v5138_v36, %v1356_v27  ;;  %v3542_v47 = vmul.f32 -1.442695, %v543_v24  ;;  %v3543_v51 = vmul.f32 -1.442695, %v572_v25  ;;  %v603_v24 = vpop.f32.mrf.mxu0 }
 0x13f   :  { %v3667_v53 = vpop.eup %3666  ;;  %v5416_v56 = vsel %vm5368_vm13, %v1364_v40, %v1360_v52  ;;  %v1371_v57 = vadd.f32 %v5187_v3, %v1370_v1  ;;  %v1579_v2 = vsub.f32 1.0, %v1578_v42  ;;  %vm1583_vm2 = vweird.f32 %v5195_v62  ;;  %v2261_v40 = vld [vmem:[%s8436_s5 + $0x660] sm:$0xff] }
 0x140   :  { %v5419_v49 = vpop.eup %3668  ;;  %3670 = vrcp.f32 %v5406_v45  ;;  %v5422_v36 = vadd.f32 1.0, %v3667_v53  ;;  %2623 = vmatmul.f32.gmra.mxu2 %v5416_v56  ;;  %v1586_v10 = vand.u32 2147483647, %v5102_v13  ;;  %v1588_v23 = vand.u32 2147483648, %v5102_v13  ;;  %2758 = vmatpush.msrb.mxu3 %v2261_v40  ;;  %v2221_v40 = vld [vmem:[%s8436_s5 + $0x520] sm:$0xff] }
 0x141   :  { %v1375_v20 = vsel %vm1374_vm1, %v5187_v3, %v1371_v57  ;;  %3672 = vpow2.f32 %v3542_v47  ;;  %v1580_v32 = vmul.f32 %v5195_v62, %v1579_v2  ;;  %vm1582_vm3 = vweird.f32 %v5102_v13  ;;  %v2227_v47 = vld [vmem:[%s8436_s5 + $0x550] sm:$0xff]  ;;  %v2189_v2 = vld [vmem:[%s8436_s5 + $0x420] sm:$0xff] }
 0x142   :  { %3674 = vrcp.f32 %v5422_v36  ;;  %v5437_v27 = vsel %vm5398_vm0, %v1379_v46, %v1375_v20  ;;  %v1623_v34 = vmul.f32 %v5213_v16, %v5125_v22  ;;  %vm5444_vm4 = vcmp.eq.f32.partialorder %v1586_v10, 8.507059e+37  ;;  %vm5450_vm5 = vmor %vm1582_vm3, %vm1583_vm2  ;;  %v2287_v46 = vld [vmem:[%s8436_s5 + $0x730] sm:$0xff]  ;;  %v2285_v20 = vld [vmem:[%s8436_s5 + $0x720] sm:$0xff]  ;;  %2730 = vmatpush.msrb.mxu2 %v2227_v47  ;;  %2704 = vmatpush.msrb.mxu1 %v2189_v2  ;;  %v545_v47 = vpop.f32.mrf.mxu2 }
 0x143   :  { %2652 = vmatmul.f32.gmra.mxu3 %v5437_v27  ;;  %3676 = vpow2.f32 %v3543_v51  ;;  %v1581_v3 = vadd.f32 %v5195_v62, %v1580_v32  ;;  %v1589_v28 = vor.u32 1.1754944e-38, %v1588_v23  ;;  %vm1628_vm6 = vweird.f32 %v5213_v16  ;;  %2790 = vmatpush.msra.mxu0 %v2287_v46  ;;  %v2259_v10 = vld [vmem:[%s8436_s5 + $0x650] sm:$0xff] }
 0x144   :  { %v1624_v13 = vsub.f32 1.0, %v1623_v34  ;;  %v1631_v29 = vand.u32 2147483647, %v5125_v22  ;;  %v1633_v4 = vand.u32 2147483648, %v5125_v22  ;;  %v517_v19 = vadd.f32 %v516_v58, %v4994_v63  ;;  %2759 = vmatpush.msrb.mxu3 %v2259_v10  ;;  %v574_v10 = vpop.f32.mrf.mxu3 }
 0x145   :  { %v1585_v1 = vsel %vm5450_vm5, %v5195_v62, %v1581_v3  ;;  %v604_v42 = vadd.f32 %v603_v24, %v5004_v12  ;;  %v1593_v52 = vmul.f32 %v5225_v21, %v5140_v37  ;;  %vm1627_vm8 = vweird.f32 %v5125_v22  ;;  %v2225_v24 = vld [vmem:[%s8436_s5 + $0x540] sm:$0xff]  ;;  %2791 = vmatpush.msra.mxu0 %v2285_v20 }
 0x146   :  { %v5476_v9 = vpop.eup %3670  ;;  %v5480_v62 = vsel %vm5444_vm4, %v1589_v28, %v1585_v1  ;;  %v1625_v53 = vmul.f32 %v5213_v16, %v1624_v13  ;;  %vm5483_vm7 = vcmp.eq.f32.partialorder %v1631_v29, 8.507059e+37  ;;  %v1634_v51 = vor.u32 1.1754944e-38, %v1633_v4  ;;  %v2187_v13 = vld [vmem:[%s8436_s5 + $0x410] sm:$0xff]  ;;  %v2257_v29 = vld [vmem:[%s8436_s5 + $0x640] sm:$0xff]  ;;  %vm5521_vm10 = vmor %vm1627_vm8, %vm1628_vm6  ;;  %2731 = vmatpush.msrb.mxu2 %v2225_v24 }
 0x147   :  { %v3673_v32 = vpop.eup %3672  ;;  %2597 = vmatmul.f32.gmra.mxu1 %v5480_v62  ;;  %v3557_v23 = vmul.f32 -1.442695, %v517_v19  ;;  %v3560_v34 = vmul.f32 -1.442695, %v604_v42  ;;  %v1594_v58 = vsub.f32 1.0, %v1593_v52  ;;  %vm1598_vm9 = vweird.f32 %v5225_v21  ;;  %v2283_v4 = vld [vmem:[%s8436_s5 + $0x710] sm:$0xff]  ;;  %2760 = vmatpush.msrb.mxu3 %v2257_v29 }
 0x148   :  { %v5501_v3 = vpop.eup %3674  ;;  %v5503_v25 = vadd.f32 1.0, %v3673_v32  ;;  %v1626_v28 = vadd.f32 %v5213_v16, %v1625_v53  ;;  %v1601_v14 = vand.u32 2147483647, %v5140_v37  ;;  %v1603_v19 = vand.u32 2147483648, %v5140_v37  ;;  %v2223_v52 = vld [vmem:[%s8436_s5 + $0x530] sm:$0xff]  ;;  %2705 = vmatpush.msrb.mxu1 %v2187_v13  ;;  %2792 = vmatpush.msra.mxu0 %v2283_v4 }
 0x149   :  { %v3677_v33 = vpop.eup %3676  ;;  %3678 = vpow2.f32 %v3557_v23  ;;  %v1595_v1 = vmul.f32 %v5225_v21, %v1594_v58  ;;  %v1608_v42 = vmul.f32 %v5245_v35, %v5169_v50  ;;  %vm1597_vm11 = vweird.f32 %v5140_v37  ;;  %2732 = vmatpush.msrb.mxu2 %v2223_v52 }
 0x14a   :  { %3680 = vrcp.f32 %v5503_v25  ;;  %v5533_v22 = vadd.f32 1.0, %v3677_v33  ;;  %v1630_v46 = vsel %vm5521_vm10, %v5213_v16, %v1626_v28  ;;  %vm1602_vm12 = vcmp.eq.f32.partialorder %v1601_v14, 8.507059e+37  ;;  %vm1599_vm13 = vmor %vm1597_vm11, %vm1598_vm9  ;;  %v2185_v28 = vld [vmem:[%s8436_s5 + $0x400] sm:$0xff] }
 0x14b   :  { %v5541_v53 = vsel %vm5483_vm7, %v1634_v51, %v1630_v46  ;;  %3682 = vpow2.f32 %v3560_v34  ;;  %v1596_v2 = vadd.f32 %v5225_v21, %v1595_v1  ;;  %v1604_v37 = vor.u32 1.1754944e-38, %v1603_v19  ;;  %v2281_v14 = vld [vmem:[%s8436_s5 + $0x700] sm:$0xff]  ;;  %2706 = vmatpush.msrb.mxu1 %v2185_v28  ;;  %2733 = vmatpush.msrb.mxu2 %v2221_v40 }
 0x14c   :  { %3684 = vrcp.f32 %v5533_v22  ;;  %2684 = vmatmul.f32.gmra.mxu0 %v5541_v53  ;;  %v1609_v16 = vsub.f32 1.0, %v1608_v42  ;;  %vm1613_vm14 = vweird.f32 %v5245_v35  ;;  %v1616_v51 = vand.u32 2147483647, %v5169_v50 }
 0x14d   :  { %v1600_v57 = vsel %vm1599_vm13, %v5225_v21, %v1596_v2  ;;  %v1618_v20 = vand.u32 2147483648, %v5169_v50  ;;  %v546_v32 = vadd.f32 %v545_v47, %v5201_v7  ;;  %v575_v58 = vadd.f32 %v574_v10, %v5209_v17  ;;  %v2255_v21 = vld [vmem:[%s8436_s5 + $0x630] sm:$0xff]  ;;  %2793 = vmatpush.msra.mxu0 %v2281_v14 }
 0x14e   :  { %v5553_v23 = vsel %vm1602_vm12, %v1604_v37, %v1600_v57  ;;  %v1610_v34 = vmul.f32 %v5245_v35, %v1609_v16  ;;  %v1818_v24 = vmul.f32 %v5254_v41, %v5180_v59  ;;  %vm1612_vm15 = vweird.f32 %v5169_v50  ;;  %2761 = vmatpush.msrb.mxu3 %v2255_v21 }
 0x14f   :  { %v3679_v13 = vpop.eup %3678  ;;  %2626 = vmatmul.f32.gmra.mxu2 %v5553_v23  ;;  %vm5570_vm0 = vcmp.eq.f32.partialorder %v1616_v51, 8.507059e+37  ;;  %v1619_v4 = vor.u32 1.1754944e-38, %v1618_v20  ;;  %v3558_v33 = vmul.f32 -1.442695, %v546_v32  ;;  %v3559_v52 = vmul.f32 -1.442695, %v575_v58  ;;  %vm1614_vm1 = vmor %vm1612_vm15, %vm1613_vm14  ;;  %v519_v51 = vpop.f32.mrf.mxu1 }
 0x150   :  { %v5577_v1 = vpop.eup %3680  ;;  %v5579_v19 = vadd.f32 1.0, %v3679_v13  ;;  %v1611_v42 = vadd.f32 %v5245_v35, %v1610_v34  ;;  %v1819_v46 = vsub.f32 1.0, %v1818_v24  ;;  %vm1823_vm2 = vweird.f32 %v5254_v41  ;;  %v606_v34 = vpop.f32.mrf.mxu0 }
 0x151   :  { %v3683_v50 = vpop.eup %3682  ;;  %3686 = vpow2.f32 %v3558_v33  ;;  %v1826_v47 = vand.u32 2147483647, %v5180_v59  ;;  %v1828_v2 = vand.u32 2147483648, %v5180_v59  ;;  %vm1822_vm3 = vweird.f32 %v5180_v59 }
 0x152   :  { %v5587_v10 = vpop.eup %3684  ;;  %3688 = vrcp.f32 %v5579_v19  ;;  %v5590_v37 = vadd.f32 1.0, %v3683_v50  ;;  %v1615_v16 = vsel %vm1614_vm1, %v5245_v35, %v1611_v42  ;;  %v1820_v57 = vmul.f32 %v5254_v41, %v1819_v46  ;;  %vm1824_vm5 = vmor %vm1822_vm3, %vm1823_vm2 }
 0x153   :  { %v5596_v20 = vsel %vm5570_vm0, %v1619_v4, %v1615_v16  ;;  %3690 = vpow2.f32 %v3559_v52  ;;  %vm5599_vm4 = vcmp.eq.f32.partialorder %v1826_v47, 8.507059e+37  ;;  %v1829_v58 = vor.u32 1.1754944e-38, %v1828_v2  ;;  %v2439_v16 = vld [vmem:[%s8436_s5 + $0xbf0] sm:$0xff] }
 0x154   :  { %8510 = vst [vmem:[#allocation2_spill] sm:$0xff] %v5596_v20  ;;  %3692 = vrcp.f32 %v5590_v37  ;;  %2655 = vmatmul.f32.gmra.mxu3 %v5596_v20  ;;  %v1821_v35 = vadd.f32 %v5254_v41, %v1820_v57  ;;  %v1863_v24 = vmul.f32 %v5261_v44, %v5190_v0  ;;  %vm1867_vm6 = vweird.f32 %v5190_v0  ;;  %v2219_v57 = vld [vmem:[%s8436_s5 + $0x510] sm:$0xff]  ;;  %2894 = vmatpush.msrb.mxu0 %v2439_v16 }
 0x155   :  { %v1871_v59 = vand.u32 2147483647, %v5190_v0  ;;  %v1873_v28 = vand.u32 2147483648, %v5190_v0  ;;  %v520_v21 = vadd.f32 %v519_v51, %v4994_v63  ;;  %v607_v29 = vadd.f32 %v606_v34, %v5004_v12  ;;  %v2343_v12 = vld [vmem:[%s8436_s5 + $0x8f0] sm:$0xff]  ;;  %2734 = vmatpush.msrb.mxu2 %v2219_v57  ;;  %v577_v57 = vpop.f32.mrf.mxu3 }
 0x156   :  { %v1825_v14 = vsel %vm1824_vm5, %v5254_v41, %v1821_v35  ;;  %v1864_v13 = vsub.f32 1.0, %v1863_v24  ;;  %v1833_v4 = vmul.f32 %v5319_v30, %v5247_v38  ;;  %vm1868_vm7 = vweird.f32 %v5261_v44  ;;  %v2253_v41 = vld [vmem:[%s8436_s5 + $0x620] sm:$0xff]  ;;  %2807 = vmatpush.msra.mxu1 %v2343_v12  ;;  %v2251_v35 = vld [vmem:[%s8436_s5 + $0x610] sm:$0xff] }
 0x157   :  { %v3687_v33 = vpop.eup %3686  ;;  %v5620_v40 = vsel %vm5599_vm4, %v1829_v58, %v1825_v14  ;;  %vm5623_vm8 = vcmp.eq.f32.partialorder %v1871_v59, 8.507059e+37  ;;  %v3573_v63 = vmul.f32 -1.442695, %v520_v21  ;;  %v3576_v47 = vmul.f32 -1.442695, %v607_v29  ;;  %2762 = vmatpush.msrb.mxu3 %v2253_v41  ;;  %v2341_v58 = vld [vmem:[%s8436_s5 + $0x8e0] sm:$0xff]  ;;  %vm5666_vm10 = vmor %vm1867_vm6, %vm1868_vm7 }
 0x158   :  { %v5633_v52 = vpop.eup %3688  ;;  %v5635_v46 = vadd.f32 1.0, %v3687_v33  ;;  %2600 = vmatmul.f32.gmra.mxu1 %v5620_v40  ;;  %v1865_v50 = vmul.f32 %v5261_v44, %v1864_v13  ;;  %v1834_v2 = vsub.f32 1.0, %v1833_v4  ;;  %v1874_v32 = vor.u32 1.1754944e-38, %v1873_v28  ;;  %v2437_v24 = vld [vmem:[%s8436_s5 + $0xbe0] sm:$0xff]  ;;  %v2339_v41 = vld [vmem:[%s8436_s5 + $0x8d0] sm:$0xff] }
 0x159   :  { %v3691_v51 = vpop.eup %3690  ;;  %3694 = vpow2.f32 %v3573_v63  ;;  %vm1838_vm9 = vweird.f32 %v5319_v30  ;;  %v1841_v34 = vand.u32 2147483647, %v5247_v38  ;;  %2763 = vmatpush.msrb.mxu3 %v2251_v35  ;;  %v2217_v29 = vld [vmem:[%s8436_s5 + $0x500] sm:$0xff]  ;;  %vm1837_vm11 = vweird.f32 %v5247_v38  ;;  %v548_v63 = vpop.f32.mrf.mxu2  ;;  %2808 = vmatpush.msra.mxu1 %v2341_v58  ;;  %v2435_v12 = vld [vmem:[%s8436_s5 + $0xbd0] sm:$0xff] }
 0x15a   :  { %v5656_v59 = vpop.eup %3692  ;;  %3696 = vrcp.f32 %v5635_v46  ;;  %v5659_v28 = vadd.f32 1.0, %v3691_v51  ;;  %v1866_v21 = vadd.f32 %v5261_v44, %v1865_v50  ;;  %v1835_v13 = vmul.f32 %v5319_v30, %v1834_v2  ;;  %v2249_v4 = vld [vmem:[%s8436_s5 + $0x600] sm:$0xff]  ;;  %2895 = vmatpush.msrb.mxu0 %v2437_v24  ;;  %v2375_v50 = vld [vmem:[%s8436_s5 + $0x9f0] sm:$0xff]  ;;  %2735 = vmatpush.msrb.mxu2 %v2217_v29  ;;  %vm1839_vm13 = vmor %vm1837_vm11, %vm1838_vm9 }
 0x15b   :  { %3698 = vpow2.f32 %v3576_v47  ;;  %v1843_v0 = vand.u32 2147483648, %v5247_v38  ;;  %v1848_v33 = vmul.f32 %v5360_v18, %v5271_v54  ;;  %vm5695_vm12 = vcmp.eq.f32.partialorder %v1841_v34, 8.507059e+37  ;;  %2764 = vmatpush.msrb.mxu3 %v2249_v4  ;;  %2809 = vmatpush.msra.mxu1 %v2339_v41 }
 0x15c   :  { %3700 = vrcp.f32 %v5659_v28  ;;  %v1870_v47 = vsel %vm5666_vm10, %v5261_v44, %v1866_v21  ;;  %v1836_v2 = vadd.f32 %v5319_v30, %v1835_v13  ;;  %vm1853_vm14 = vweird.f32 %v5360_v18  ;;  %2896 = vmatpush.msrb.mxu0 %v2435_v12  ;;  %2836 = vmatpush.msra.mxu2 %v2375_v50  ;;  %v2407_v50 = vld [vmem:[%s8436_s5 + $0xaf0] sm:$0xff] }
 0x15d   :  { %v5701_v51 = vsel %vm5623_vm8, %v1874_v32, %v1870_v47  ;;  %v1844_v35 = vor.u32 1.1754944e-38, %v1843_v0  ;;  %v1849_v44 = vsub.f32 1.0, %v1848_v33  ;;  %v1856_v58 = vand.u32 2147483647, %v5271_v54  ;;  %v2433_v47 = vld [vmem:[%s8436_s5 + $0xbc0] sm:$0xff]  ;;  %2865 = vmatpush.msra.mxu3 %v2407_v50 }
 0x15e   :  { %8519 = vst [vmem:[#allocation3_spill] sm:$0xff] %v5701_v51  ;;  %2687 = vmatmul.f32.gmra.mxu0 %v5701_v51  ;;  %v1840_v34 = vsel %vm1839_vm13, %v5319_v30, %v1836_v2  ;;  %v1858_v42 = vand.u32 2147483648, %v5271_v54  ;;  %v549_v32 = vadd.f32 %v548_v63, %v5201_v7  ;;  %v578_v14 = vadd.f32 %v577_v57, %v5209_v17  ;;  %v2337_v17 = vld [vmem:[%s8436_s5 + $0x8c0] sm:$0xff]  ;;  %v626_v7 = vpop.f32.mrf.mxu1 }
 0x15f   :  { %v3695_v24 = vpop.eup %3694  ;;  %v5715_v38 = vsel %vm5695_vm12, %v1844_v35, %v1840_v34  ;;  %v1850_v21 = vmul.f32 %v5360_v18, %v1849_v44  ;;  %v1158_v13 = vmul.f32 %v5366_v60, %v5276_v5  ;;  %vm1852_vm15 = vweird.f32 %v5271_v54  ;;  %2810 = vmatpush.msra.mxu1 %v2337_v17  ;;  %2897 = vmatpush.msrb.mxu0 %v2433_v47  ;;  %v2373_v35 = vld [vmem:[%s8436_s5 + $0x9e0] sm:$0xff] }
 0x160   :  { %8520 = vst [vmem:[#allocation4_spill] sm:$0xff] %v5715_v38  ;;  %v5721_v30 = vpop.eup %3696  ;;  %v5723_v29 = vadd.f32 1.0, %v3695_v24  ;;  %2629 = vmatmul.f32.gmra.mxu2 %v5715_v38  ;;  %vm5727_vm0 = vcmp.eq.f32.partialorder %v1856_v58, 8.507059e+37  ;;  %v3574_v4 = vmul.f32 -1.442695, %v549_v32  ;;  %v1859_v63 = vor.u32 1.1754944e-38, %v1858_v42  ;;  %vm1854_vm1 = vmor %vm1852_vm15, %vm1853_vm14 }
 0x161   :  { %v3699_v0 = vpop.eup %3698  ;;  %v1851_v33 = vadd.f32 %v5360_v18, %v1850_v21  ;;  %v3575_v41 = vmul.f32 -1.442695, %v578_v14  ;;  %v1159_v12 = vsub.f32 1.0, %v1158_v13  ;;  %vm1163_vm2 = vweird.f32 %v5366_v60  ;;  %2837 = vmatpush.msra.mxu2 %v2373_v35  ;;  %v2431_v35 = vld [vmem:[%s8436_s5 + $0xbb0] sm:$0xff] }
 0x162   :  { %v5741_v2 = vpop.eup %3700  ;;  %3702 = vrcp.f32 %v5723_v29  ;;  %v5744_v16 = vadd.f32 1.0, %v3699_v0  ;;  %v1166_v57 = vand.u32 2147483647, %v5276_v5  ;;  %v1168_v58 = vand.u32 2147483648, %v5276_v5  ;;  %2898 = vmatpush.msrb.mxu0 %v2431_v35  ;;  %v2427_v35 = vld [vmem:[%s8436_s5 + $0xb90] sm:$0xff] }
 0x163   :  { %v1855_v44 = vsel %vm1854_vm1, %v5360_v18, %v1851_v33  ;;  %3704 = vpow2.f32 %v3574_v4  ;;  %v1160_v34 = vmul.f32 %v5366_v60, %v1159_v12  ;;  %vm1162_vm3 = vweird.f32 %v5276_v5  ;;  %v5769_v18 = vld [vmem:[%s8437_s4 + $0x8] sm:$0xff]  ;;  %v713_v4 = vpop.f32.mrf.mxu0  ;;  %v2405_v12 = vld [vmem:[%s8436_s5 + $0xae0] sm:$0xff] }
 0x164   :  { %3706 = vrcp.f32 %v5744_v16  ;;  %v5761_v54 = vsel %vm5727_vm0, %v1859_v63, %v1855_v44  ;;  %v1203_v42 = vmul.f32 %v5374_v26, %v5291_v15  ;;  %vm5773_vm4 = vcmp.eq.f32.partialorder %v1166_v57, 8.507059e+37  ;;  %vm1164_vm5 = vmor %vm1162_vm3, %vm1163_vm2  ;;  %2866 = vmatpush.msra.mxu3 %v2405_v12  ;;  %v2371_v44 = vld [vmem:[%s8436_s5 + $0x9d0] sm:$0xff]  ;;  %v2401_v12 = vld [vmem:[%s8436_s5 + $0xac0] sm:$0xff] }
 0x165   :  { %8523 = vst [vmem:[#allocation5_spill] sm:$0xff] %v5761_v54  ;;  %2658 = vmatmul.f32.gmra.mxu3 %v5761_v54  ;;  %3708 = vpow2.f32 %v3575_v41  ;;  %v1161_v32 = vadd.f32 %v5366_v60, %v1160_v34  ;;  %v1169_v21 = vor.u32 1.1754944e-38, %v1168_v58  ;;  %vm1207_vm6 = vweird.f32 %v5291_v15  ;;  %v2335_v41 = vld [vmem:[%s8436_s5 + $0x8b0] sm:$0xff]  ;;  %v2333_v34 = vld [vmem:[%s8436_s5 + $0x8a0] sm:$0xff]  ;;  %2838 = vmatpush.msra.mxu2 %v2371_v44 }
 0x166   :  { %v1204_v5 = vsub.f32 1.0, %v1203_v42  ;;  %v1211_v14 = vand.u32 2147483647, %v5291_v15  ;;  %v1213_v13 = vand.u32 2147483648, %v5291_v15  ;;  %v5784_v0 = vperm.slane %v5769_v18, 0  ;;  %2811 = vmatpush.msra.mxu1 %v2335_v41 }
 0x167   :  { %v1165_v17 = vsel %vm1164_vm5, %v5366_v60, %v1161_v32  ;;  %v5787_v33 = vperm.slane %v5769_v18, 3  ;;  %v1173_v63 = vmul.f32 %v5404_v43, %v5322_v31  ;;  %vm1208_vm7 = vweird.f32 %v5374_v26 }
 0x168   :  { %v5797_v50 = vpop.eup %3702  ;;  %v5801_v60 = vsel %vm5773_vm4, %v1169_v21, %v1165_v17  ;;  %v1205_v47 = vmul.f32 %v5374_v26, %v1204_v5  ;;  %vm5805_vm8 = vcmp.eq.f32.partialorder %v1211_v14, 8.507059e+37  ;;  %v1214_v42 = vor.u32 1.1754944e-38, %v1213_v13  ;;  %v2403_v5 = vld [vmem:[%s8436_s5 + $0xad0] sm:$0xff]  ;;  %v2429_v14 = vld [vmem:[%s8436_s5 + $0xba0] sm:$0xff]  ;;  %2812 = vmatpush.msra.mxu1 %v2333_v34  ;;  %vm1209_vm10 = vmor %vm1207_vm6, %vm1208_vm7 }
 0x169   :  { %8526 = vst [vmem:[#allocation6_spill] sm:$0xff] %v5801_v60  ;;  %v3705_v58 = vpop.eup %3704  ;;  %2707 = vmatmul.f32.vlgmr.msrb.gmra.mxu1 %v5801_v60  ;;  %v627_v32 = vadd.f32 %v626_v7, %v5784_v0  ;;  %v714_v24 = vadd.f32 %v713_v4, %v5787_v33  ;;  %v1174_v21 = vsub.f32 1.0, %v1173_v63  ;;  %v2369_v17 = vld [vmem:[%s8436_s5 + $0x9c0] sm:$0xff]  ;;  %vm1178_vm9 = vweird.f32 %v5404_v43  ;;  %v2331_v63 = vld [vmem:[%s8436_s5 + $0x890] sm:$0xff]  ;;  %2867 = vmatpush.msra.mxu3 %v2403_v5  ;;  %v684_v5 = vpop.f32.mrf.mxu3 }
 0x16a   :  { %v5830_v41 = vpop.eup %3706  ;;  %v5832_v13 = vadd.f32 1.0, %v3705_v58  ;;  %v1206_v7 = vadd.f32 %v5374_v26, %v1205_v47  ;;  %v1181_v4 = vand.u32 2147483647, %v5322_v31  ;;  %v1183_v54 = vand.u32 2147483648, %v5322_v31  ;;  %2899 = vmatpush.msrb.mxu0 %v2429_v14  ;;  %v2367_v60 = vld [vmem:[%s8436_s5 + $0x9b0] sm:$0xff]  ;;  %2839 = vmatpush.msra.mxu2 %v2369_v17 }
 0x16b   :  { %v3709_v58 = vpop.eup %3708  ;;  %v3529_v47 = vmul.f32 -1.442695, %v627_v32  ;;  %v3532_v44 = vmul.f32 -1.442695, %v714_v24  ;;  %v1175_v34 = vmul.f32 %v5404_v43, %v1174_v21  ;;  %vm1177_vm11 = vweird.f32 %v5322_v31  ;;  %2813 = vmatpush.msra.mxu1 %v2331_v63  ;;  %2868 = vmatpush.msra.mxu3 %v2401_v12  ;;  %v655_v21 = vpop.f32.mrf.mxu2  ;;  %v2329_v63 = vld [vmem:[%s8436_s5 + $0x880] sm:$0xff]  ;;  %v2399_v12 = vld [vmem:[%s8436_s5 + $0xab0] sm:$0xff] }
 0x16c   :  { %3710 = vrcp.f32 %v5832_v13  ;;  %v5856_v38 = vadd.f32 1.0, %v3709_v58  ;;  %v1210_v51 = vsel %vm1209_vm10, %v5374_v26, %v1206_v7  ;;  %vm5865_vm12 = vcmp.eq.f32.partialorder %v1181_v4, 8.507059e+37  ;;  %2900 = vmatpush.msrb.mxu0 %v2427_v35  ;;  %vm1179_vm13 = vmor %vm1177_vm11, %vm1178_vm9  ;;  %2840 = vmatpush.msra.mxu2 %v2367_v60  ;;  %v2425_v35 = vld [vmem:[%s8436_s5 + $0xb80] sm:$0xff] }
 0x16d   :  { %v5862_v15 = vsel %vm5805_vm8, %v1214_v42, %v1210_v51  ;;  %3712 = vpow2.f32 %v3529_v47  ;;  %v1176_v32 = vadd.f32 %v5404_v43, %v1175_v34  ;;  %v1184_v31 = vor.u32 1.1754944e-38, %v1183_v54  ;;  %2814 = vmatpush.msra.mxu1 %v2329_v63  ;;  %2869 = vmatpush.msra.mxu3 %v2399_v12 }
 0x16e   :  { %8529 = vst [vmem:[#allocation7_spill] sm:$0xff] %v5862_v15  ;;  %3714 = vrcp.f32 %v5856_v38  ;;  %2794 = vmatmul.f32.vlgmr.msra.gmra.mxu0 %v5862_v15  ;;  %v1188_v26 = vmul.f32 %v5419_v49, %v5346_v48  ;;  %vm1192_vm14 = vweird.f32 %v5346_v48  ;;  %v1196_v57 = vand.u32 2147483647, %v5346_v48 }
 0x16f   :  { %3716 = vpow2.f32 %v3532_v44  ;;  %v1180_v51 = vsel %vm1179_vm13, %v5404_v43, %v1176_v32  ;;  %v1198_v42 = vand.u32 2147483648, %v5346_v48  ;;  %v5884_v17 = vperm.slane %v5769_v18, 1  ;;  %v2365_v32 = vld [vmem:[%s8436_s5 + $0x9a0] sm:$0xff]  ;;  %2901 = vmatpush.msrb.mxu0 %v2425_v35 }
 0x170   :  { %v5881_v14 = vsel %vm5865_vm12, %v1184_v31, %v1180_v51  ;;  %v1189_v54 = vsub.f32 1.0, %v1188_v26  ;;  %v5887_v7 = vperm.slane %v5769_v18, 2  ;;  %vm1193_vm15 = vweird.f32 %v5419_v49  ;;  %2841 = vmatpush.msra.mxu2 %v2365_v32 }
 0x171   :  { %8532 = vst [vmem:[#allocation8_spill] sm:$0xff] %v5881_v14  ;;  %2736 = vmatmul.f32.vlgmr.msrb.gmra.mxu2 %v5881_v14  ;;  %vm5891_vm0 = vcmp.eq.f32.partialorder %v1196_v57, 8.507059e+37  ;;  %v1199_v60 = vor.u32 1.1754944e-38, %v1198_v42  ;;  %v1398_v4 = vmul.f32 %v5476_v9, %v5406_v45  ;;  %v656_v44 = vadd.f32 %v655_v21, %v5884_v17  ;;  %vm1194_vm3 = vmor %vm1192_vm14, %vm1193_vm15  ;;  %v629_v14 = vpop.f32.mrf.mxu1 }
 0x172   :  { %v5906_v58 = vpop.eup %3710  ;;  %v1190_v47 = vmul.f32 %v5419_v49, %v1189_v54  ;;  %v685_v34 = vadd.f32 %v684_v5, %v5887_v7  ;;  %vm1402_vm1 = vweird.f32 %v5406_v45  ;;  %v1406_v26 = vand.u32 2147483647, %v5406_v45 }
 0x173   :  { %v3713_v24 = vpop.eup %3712  ;;  %v1399_v31 = vsub.f32 1.0, %v1398_v4  ;;  %v1408_v51 = vand.u32 2147483648, %v5406_v45  ;;  %v1443_v57 = vmul.f32 %v5501_v3, %v5422_v36  ;;  %v3530_v54 = vmul.f32 -1.442695, %v656_v44 }
 0x174   :  { %v5919_v42 = vpop.eup %3714  ;;  %v5921_v21 = vadd.f32 1.0, %v3713_v24  ;;  %v1191_v5 = vadd.f32 %v5419_v49, %v1190_v47  ;;  %vm1403_vm2 = vweird.f32 %v5476_v9  ;;  %v3531_v4 = vmul.f32 -1.442695, %v685_v34 }
 0x175   :  { %v3717_v63 = vpop.eup %3716  ;;  %v1400_v12 = vmul.f32 %v5476_v9, %v1399_v31  ;;  %vm5930_vm4 = vcmp.eq.f32.partialorder %v1406_v26, 8.507059e+37  ;;  %v1444_v32 = vsub.f32 1.0, %v1443_v57  ;;  %v1409_v24 = vor.u32 1.1754944e-38, %v1408_v51  ;;  %v716_v26 = vpop.f32.mrf.mxu0  ;;  %vm1404_vm5 = vmor %vm1402_vm1, %vm1403_vm2 }
 0x176   :  { %3718 = vrcp.f32 %v5921_v21  ;;  %v5935_v47 = vadd.f32 1.0, %v3717_v63  ;;  %v1195_v44 = vsel %vm1194_vm3, %v5419_v49, %v1191_v5  ;;  %vm1447_vm6 = vweird.f32 %v5422_v36  ;;  %v2327_v5 = vld [vmem:[%s8436_s5 + $0x870] sm:$0xff] }
 0x177   :  { %v5940_v48 = vsel %vm5891_vm0, %v1199_v60, %v1195_v44  ;;  %3720 = vpow2.f32 %v3530_v54  ;;  %v1401_v34 = vadd.f32 %v5476_v9, %v1400_v12  ;;  %v1445_v31 = vmul.f32 %v5501_v3, %v1444_v32  ;;  %v2397_v54 = vld [vmem:[%s8436_s5 + $0xaa0] sm:$0xff]  ;;  %2815 = vmatpush.msra.mxu1 %v2327_v5 }
 0x178   :  { %8537 = vst [vmem:[#allocation9_spill] sm:$0xff] %v5940_v48  ;;  %2765 = vmatmul.f32.vlgmr.msrb.gmra.mxu3 %v5940_v48  ;;  %vm1448_vm7 = vweird.f32 %v5501_v3  ;;  %v1451_v49 = vand.u32 2147483647, %v5422_v36  ;;  %v1453_v43 = vand.u32 2147483648, %v5422_v36  ;;  %3722 = vpow2.f32 %v3531_v4  ;;  %v2363_v4 = vld [vmem:[%s8436_s5 + $0x990] sm:$0xff]  ;;  %v2325_v12 = vld [vmem:[%s8436_s5 + $0x860] sm:$0xff] }
 0x179   :  { %v1405_v60 = vsel %vm1404_vm5, %v5476_v9, %v1401_v34  ;;  %v1446_v51 = vadd.f32 %v5501_v3, %v1445_v31  ;;  %vm5955_vm8 = vmor %vm1447_vm6, %vm1448_vm7  ;;  %v630_v45 = vadd.f32 %v629_v14, %v5784_v0  ;;  %3724 = vrcp.f32 %v5935_v47  ;;  %2870 = vmatpush.msra.mxu3 %v2397_v54  ;;  %v2423_v14 = vld [vmem:[%s8436_s5 + $0xb70] sm:$0xff]  ;;  %v2421_v34 = vld [vmem:[%s8436_s5 + $0xb60] sm:$0xff]  ;;  %2842 = vmatpush.msra.mxu2 %v2363_v4 }
 0x17a   :  { %v5969_v36 = vsel %vm5930_vm4, %v1409_v24, %v1405_v60  ;;  %v1454_v9 = vor.u32 1.1754944e-38, %v1453_v43  ;;  %v717_v63 = vadd.f32 %v716_v26, %v5787_v33  ;;  %vm1452_vm9 = vcmp.eq.f32.partialorder %v1451_v49, 8.507059e+37  ;;  %2902 = vmatpush.msrb.mxu0 %v2423_v14  ;;  %v2395_v24 = vld [vmem:[%s8436_s5 + $0xa90] sm:$0xff]  ;;  %v2361_v31 = vld [vmem:[%s8436_s5 + $0x980] sm:$0xff]  ;;  %2816 = vmatpush.msra.mxu1 %v2325_v12  ;;  %v658_v12 = vpop.f32.mrf.mxu2 }
 0x17b   :  { %8540 = vst [vmem:[#allocation10_spill] sm:$0xff] %v5969_v36  ;;  %2710 = vmatmul.f32.gmra.mxu1 %v5969_v36  ;;  %v1450_v35 = vsel %vm5955_vm8, %v5501_v3, %v1446_v51  ;;  %v3545_v32 = vmul.f32 -1.442695, %v630_v45  ;;  %v1413_v44 = vmul.f32 %v5577_v1, %v5503_v25  ;;  %vm1417_vm10 = vweird.f32 %v5503_v25  ;;  %v2323_v60 = vld [vmem:[%s8436_s5 + $0x850] sm:$0xff]  ;;  %v2393_v51 = vld [vmem:[%s8436_s5 + $0xa80] sm:$0xff]  ;;  %2871 = vmatpush.msra.mxu3 %v2395_v24 }
 0x17c   :  { %v5996_v26 = vpop.eup %3718  ;;  %v5998_v3 = vsel %vm1452_vm9, %v1454_v9, %v1450_v35  ;;  %v3548_v49 = vmul.f32 -1.442695, %v717_v63  ;;  %v1421_v43 = vand.u32 2147483647, %v5503_v25  ;;  %vm1418_vm11 = vweird.f32 %v5577_v1  ;;  %v2419_v54 = vld [vmem:[%s8436_s5 + $0xb50] sm:$0xff]  ;;  %v687_v35 = vpop.f32.mrf.mxu3  ;;  %2903 = vmatpush.msrb.mxu0 %v2421_v34  ;;  %2843 = vmatpush.msra.mxu2 %v2361_v31  ;;  %v2321_v31 = vld [vmem:[%s8436_s5 + $0x840] sm:$0xff] }
 0x17d   :  { %8541 = vst [vmem:[#allocation11_spill] sm:$0xff] %v5998_v3  ;;  %v3721_v57 = vpop.eup %3720  ;;  %2797 = vmatmul.f32.gmra.mxu0 %v5998_v3  ;;  %3726 = vpow2.f32 %v3545_v32  ;;  %v1414_v45 = vsub.f32 1.0, %v1413_v44  ;;  %v1428_v5 = vmul.f32 %v5587_v10, %v5533_v22  ;;  %v2359_v9 = vld [vmem:[%s8436_s5 + $0x970] sm:$0xff]  ;;  %v1423_v4 = vand.u32 2147483648, %v5503_v25  ;;  %2817 = vmatpush.msra.mxu1 %v2323_v60  ;;  %vm1419_vm15 = vmor %vm1417_vm10, %vm1418_vm11  ;;  %v2357_v25 = vld [vmem:[%s8436_s5 + $0x960] sm:$0xff] }
 0x17e   :  { %v6018_v63 = vadd.f32 1.0, %v3721_v57  ;;  %3728 = vpow2.f32 %v3548_v49  ;;  %vm6020_vm12 = vcmp.eq.f32.partialorder %v1421_v43, 8.507059e+37  ;;  %v3723_v32 = vpop.eup %3722  ;;  %vm1432_vm13 = vweird.f32 %v5533_v22  ;;  %2872 = vmatpush.msra.mxu3 %v2393_v51  ;;  %2904 = vmatpush.msrb.mxu0 %v2419_v54  ;;  %v2391_v60 = vld [vmem:[%s8436_s5 + $0xa70] sm:$0xff]  ;;  %v2417_v54 = vld [vmem:[%s8436_s5 + $0xb40] sm:$0xff] }
 0x17f   :  { %v1415_v44 = vmul.f32 %v5577_v1, %v1414_v45  ;;  %v1429_v24 = vsub.f32 1.0, %v1428_v5  ;;  %vm1433_vm14 = vweird.f32 %v5587_v10  ;;  %v6028_v49 = vpop.eup %3724  ;;  %v6031_v43 = vadd.f32 1.0, %v3723_v32  ;;  %2844 = vmatpush.msra.mxu2 %v2359_v9  ;;  %2818 = vmatpush.msra.mxu1 %v2321_v31 }
 0x180   :  { %3730 = vrcp.f32 %v6018_v63  ;;  %v1436_v57 = vand.u32 2147483647, %v5533_v22  ;;  %v1438_v34 = vand.u32 2147483648, %v5533_v22  ;;  %v659_v5 = vadd.f32 %v658_v12, %v5884_v17  ;;  %2873 = vmatpush.msra.mxu3 %v2391_v60  ;;  %2905 = vmatpush.msrb.mxu0 %v2417_v54  ;;  %vm1434_vm1 = vmor %vm1432_vm13, %vm1433_vm14  ;;  %v719_v54 = vpop.f32.mrf.mxu0 }
 0x181   :  { %v1416_v51 = vadd.f32 %v5577_v1, %v1415_v44  ;;  %v1430_v45 = vmul.f32 %v5587_v10, %v1429_v24  ;;  %v688_v32 = vadd.f32 %v687_v35, %v5887_v7  ;;  %3732 = vrcp.f32 %v6031_v43  ;;  %2845 = vmatpush.msra.mxu2 %v2357_v25 }
 0x182   :  { %v1424_v9 = vor.u32 1.1754944e-38, %v1423_v4  ;;  %vm6053_vm0 = vcmp.eq.f32.partialorder %v1436_v57, 8.507059e+37  ;;  %v1638_v12 = vmul.f32 %v5633_v52, %v5579_v19  ;;  %v1439_v3 = vor.u32 1.1754944e-38, %v1438_v34  ;;  %v661_v15 = vpop.f32.mrf.mxu2 }
 0x183   :  { %v3727_v35 = vpop.eup %3726  ;;  %v1420_v24 = vsel %vm1419_vm15, %v5577_v1, %v1416_v51  ;;  %v1431_v31 = vadd.f32 %v5587_v10, %v1430_v45  ;;  %v3546_v48 = vmul.f32 -1.442695, %v659_v5  ;;  %v3547_v1 = vmul.f32 -1.442695, %v688_v32  ;;  %v632_v32 = vpop.f32.mrf.mxu1 }
 0x184   :  { %v3729_v4 = vpop.eup %3728  ;;  %v6064_v57 = vadd.f32 1.0, %v3727_v35  ;;  %v6068_v36 = vsel %vm6020_vm12, %v1424_v9, %v1420_v24  ;;  %v1639_v60 = vsub.f32 1.0, %v1638_v12  ;;  %vm1643_vm2 = vweird.f32 %v5633_v52 }
 0x185   :  { %8546 = vst [vmem:[#allocation12_spill] sm:$0xff] %v6068_v36  ;;  %v6074_v34 = vadd.f32 1.0, %v3729_v4  ;;  %2739 = vmatmul.f32.gmra.mxu2 %v6068_v36  ;;  %v1435_v51 = vsel %vm1434_vm1, %v5587_v10, %v1431_v31  ;;  %3734 = vpow2.f32 %v3546_v48  ;;  %v1646_v5 = vand.u32 2147483647, %v5579_v19 }
 0x186   :  { %v6079_v14 = vpop.eup %3730  ;;  %3736 = vrcp.f32 %v6064_v57  ;;  %v6084_v22 = vsel %vm6053_vm0, %v1439_v3, %v1435_v51  ;;  %v1640_v45 = vmul.f32 %v5633_v52, %v1639_v60  ;;  %vm1642_vm3 = vweird.f32 %v5579_v19  ;;  %v2389_v60 = vld [vmem:[%s8436_s5 + $0xa60] sm:$0xff]  ;;  %v2415_v51 = vld [vmem:[%s8436_s5 + $0xb30] sm:$0xff] }
 0x187   :  { %8547 = vst [vmem:[#allocation13_spill] sm:$0xff] %v6084_v22  ;;  %3738 = vrcp.f32 %v6074_v34  ;;  %2768 = vmatmul.f32.gmra.mxu3 %v6084_v22  ;;  %v1648_v10 = vand.u32 2147483648, %v5579_v19  ;;  %v1683_v48 = vmul.f32 %v5656_v59, %v5590_v37  ;;  %v6094_v9 = vpop.eup %3732  ;;  %vm1647_vm4 = vcmp.eq.f32.partialorder %v1646_v5, 8.507059e+37  ;;  %vm1644_vm6 = vmor %vm1642_vm3, %vm1643_vm2  ;;  %2906 = vmatpush.msrb.mxu0 %v2415_v51 }
 0x188   :  { %3740 = vpow2.f32 %v3547_v1  ;;  %v1641_v3 = vadd.f32 %v5633_v52, %v1640_v45  ;;  %vm1687_vm5 = vweird.f32 %v5590_v37  ;;  %v1691_v19 = vand.u32 2147483647, %v5590_v37  ;;  %v2319_v1 = vld [vmem:[%s8436_s5 + $0x830] sm:$0xff]  ;;  %2874 = vmatpush.msra.mxu3 %v2389_v60 }
 0x189   :  { %v1649_v44 = vor.u32 1.1754944e-38, %v1648_v10  ;;  %v1684_v12 = vsub.f32 1.0, %v1683_v48  ;;  %v1693_v35 = vand.u32 2147483648, %v5590_v37  ;;  %v633_v31 = vadd.f32 %v632_v32, %v5784_v0  ;;  %2819 = vmatpush.msra.mxu1 %v2319_v1  ;;  %v2355_v48 = vld [vmem:[%s8436_s5 + $0x950] sm:$0xff]  ;;  %v2317_v32 = vld [vmem:[%s8436_s5 + $0x820] sm:$0xff] }
 0x18a   :  { %v1645_v24 = vsel %vm1644_vm6, %v5633_v52, %v1641_v3  ;;  %v720_v25 = vadd.f32 %v719_v54, %v5787_v33  ;;  %v1653_v4 = vmul.f32 %v5721_v30, %v5635_v46  ;;  %vm1688_vm7 = vweird.f32 %v5656_v59  ;;  %v2387_v54 = vld [vmem:[%s8436_s5 + $0xa50] sm:$0xff]  ;;  %2846 = vmatpush.msra.mxu2 %v2355_v48 }
 0x18b   :  { %v3735_v52 = vpop.eup %3734  ;;  %v6116_v45 = vsel %vm1647_vm4, %v1649_v44, %v1645_v24  ;;  %v1685_v5 = vmul.f32 %v5656_v59, %v1684_v12  ;;  %vm6120_vm8 = vcmp.eq.f32.partialorder %v1691_v19, 8.507059e+37  ;;  %v3561_v12 = vmul.f32 -1.442695, %v633_v31  ;;  %2820 = vmatpush.msra.mxu1 %v2317_v32  ;;  %v2353_v31 = vld [vmem:[%s8436_s5 + $0x940] sm:$0xff]  ;;  %vm6157_vm10 = vmor %vm1687_vm5, %vm1688_vm7  ;;  %2875 = vmatpush.msra.mxu3 %v2387_v54  ;;  %v2411_v37 = vld [vmem:[%s8436_s5 + $0xb10] sm:$0xff] }
 0x18c   :  { %8548 = vst [vmem:[#allocation14_spill] sm:$0xff] %v6116_v45  ;;  %v6133_v3 = vpop.eup %3736  ;;  %v6135_v44 = vadd.f32 1.0, %v3735_v52  ;;  %2713 = vmatmul.f32.gmra.mxu1 %v6116_v45  ;;  %v3564_v19 = vmul.f32 -1.442695, %v720_v25  ;;  %v1654_v24 = vsub.f32 1.0, %v1653_v4  ;;  %v1694_v22 = vor.u32 1.1754944e-38, %v1693_v35  ;;  %2847 = vmatpush.msra.mxu2 %v2353_v31 }
 0x18d   :  { %v6138_v1 = vpop.eup %3738  ;;  %v1686_v60 = vadd.f32 %v5656_v59, %v1685_v5  ;;  %vm1658_vm9 = vweird.f32 %v5721_v30  ;;  %v1661_v36 = vand.u32 2147483647, %v5635_v46  ;;  %v2413_v52 = vld [vmem:[%s8436_s5 + $0xb20] sm:$0xff]  ;;  %v2315_v25 = vld [vmem:[%s8436_s5 + $0x810] sm:$0xff]  ;;  %v1663_v5 = vand.u32 2147483648, %v5635_v46 }
 0x18e   :  { %v3741_v4 = vpop.eup %3740  ;;  %3742 = vrcp.f32 %v6135_v44  ;;  %v1655_v51 = vmul.f32 %v5721_v30, %v1654_v24  ;;  %v1668_v48 = vmul.f32 %v5741_v2, %v5659_v28  ;;  %2907 = vmatpush.msrb.mxu0 %v2413_v52  ;;  %v2385_v32 = vld [vmem:[%s8436_s5 + $0xa40] sm:$0xff]  ;;  %vm1657_vm11 = vweird.f32 %v5635_v46  ;;  %2821 = vmatpush.msra.mxu1 %v2315_v25  ;;  %v2351_v54 = vld [vmem:[%s8436_s5 + $0x930] sm:$0xff] }
 0x18f   :  { %v6171_v45 = vadd.f32 1.0, %v3741_v4  ;;  %v1690_v24 = vsel %vm6157_vm10, %v5656_v59, %v1686_v60  ;;  %3744 = vpow2.f32 %v3561_v12  ;;  %vm6185_vm12 = vcmp.eq.f32.partialorder %v1661_v36, 8.507059e+37  ;;  %v690_v59 = vpop.f32.mrf.mxu3  ;;  %2876 = vmatpush.msra.mxu3 %v2385_v32  ;;  %vm1659_vm13 = vmor %vm1657_vm11, %vm1658_vm9  ;;  %2848 = vmatpush.msra.mxu2 %v2351_v54  ;;  %v2313_v60 = vld [vmem:[%s8436_s5 + $0x800] sm:$0xff]  ;;  %v2383_v31 = vld [vmem:[%s8436_s5 + $0xa30] sm:$0xff] }
 0x190   :  { %v6182_v52 = vsel %vm6120_vm8, %v1694_v22, %v1690_v24  ;;  %3746 = vpow2.f32 %v3564_v19  ;;  %v1656_v4 = vadd.f32 %v5721_v30, %v1655_v51  ;;  %2908 = vmatpush.msrb.mxu0 %v2411_v37  ;;  %v1664_v46 = vor.u32 1.1754944e-38, %v1663_v5  ;;  %2822 = vmatpush.msra.mxu1 %v2313_v60 }
 0x191   :  { %8553 = vst [vmem:[#allocation15_spill] sm:$0xff] %v6182_v52  ;;  %3748 = vrcp.f32 %v6171_v45  ;;  %2800 = vmatmul.f32.gmra.mxu0 %v6182_v52  ;;  %v1669_v22 = vsub.f32 1.0, %v1668_v48  ;;  %vm1673_vm14 = vweird.f32 %v5741_v2  ;;  %v1676_v10 = vand.u32 2147483647, %v5659_v28  ;;  %v2349_v48 = vld [vmem:[%s8436_s5 + $0x920] sm:$0xff]  ;;  %2877 = vmatpush.msra.mxu3 %v2383_v31 }
 0x192   :  { %v1660_v36 = vsel %vm1659_vm13, %v5721_v30, %v1656_v4  ;;  %v1678_v12 = vand.u32 2147483648, %v5659_v28  ;;  %v662_v19 = vadd.f32 %v661_v15, %v5884_v17  ;;  %v691_v51 = vadd.f32 %v690_v59, %v5887_v7  ;;  %v2409_v15 = vld [vmem:[%s8436_s5 + $0xb00] sm:$0xff]  ;;  %2849 = vmatpush.msra.mxu2 %v2349_v48 }
 0x193   :  { %v6206_v25 = vsel %vm6185_vm12, %v1664_v46, %v1660_v36  ;;  %v1670_v30 = vmul.f32 %v5741_v2, %v1669_v22  ;;  %v1878_v5 = vmul.f32 %v5797_v50, %v5723_v29  ;;  %vm1672_vm15 = vweird.f32 %v5659_v28  ;;  %2909 = vmatpush.msrb.mxu0 %v2409_v15  ;;  %v722_v15 = vpop.f32.mrf.mxu0 }
 0x194   :  { %8556 = vst [vmem:[#allocation16_spill] sm:$0xff] %v6206_v25  ;;  %v6218_v32 = vpop.eup %3742  ;;  %2742 = vmatmul.f32.gmra.mxu2 %v6206_v25  ;;  %vm6222_vm0 = vcmp.eq.f32.partialorder %v1676_v10, 8.507059e+37  ;;  %v1679_v24 = vor.u32 1.1754944e-38, %v1678_v12  ;;  %v3562_v54 = vmul.f32 -1.442695, %v662_v19  ;;  %vm1883_vm1 = vweird.f32 %v5797_v50  ;;  %vm1674_vm2 = vmor %vm1672_vm15, %vm1673_vm14 }
 0x195   :  { %v3745_v4 = vpop.eup %3744  ;;  %v1671_v35 = vadd.f32 %v5741_v2, %v1670_v30  ;;  %v3563_v59 = vmul.f32 -1.442695, %v691_v51  ;;  %v1879_v46 = vsub.f32 1.0, %v1878_v5  ;;  %v1886_v28 = vand.u32 2147483647, %v5723_v29  ;;  %v635_v30 = vpop.f32.mrf.mxu1 }
 0x196   :  { %v3747_v22 = vpop.eup %3746  ;;  %v6228_v36 = vadd.f32 1.0, %v3745_v4  ;;  %3750 = vpow2.f32 %v3562_v54  ;;  %v1888_v10 = vand.u32 2147483648, %v5723_v29  ;;  %vm1882_vm3 = vweird.f32 %v5723_v29 }
 0x197   :  { %v6234_v12 = vpop.eup %3748  ;;  %v6236_v19 = vadd.f32 1.0, %v3747_v22  ;;  %v1675_v60 = vsel %vm1674_vm2, %v5741_v2, %v1671_v35  ;;  %3752 = vpow2.f32 %v3563_v59  ;;  %v1880_v31 = vmul.f32 %v5797_v50, %v1879_v46  ;;  %vm1884_vm5 = vmor %vm1882_vm3, %vm1883_vm1 }
 0x198   :  { %3754 = vrcp.f32 %v6228_v36  ;;  %v6243_v51 = vsel %vm6222_vm0, %v1679_v24, %v1675_v60  ;;  %vm6246_vm4 = vcmp.eq.f32.partialorder %v1886_v28, 8.507059e+37  ;;  %v1889_v48 = vor.u32 1.1754944e-38, %v1888_v10 }
 0x199   :  { %8559 = vst [vmem:[#allocation17_spill] sm:$0xff] %v6243_v51  ;;  %3756 = vrcp.f32 %v6236_v19  ;;  %2771 = vmatmul.f32.gmra.mxu3 %v6243_v51  ;;  %v1881_v2 = vadd.f32 %v5797_v50, %v1880_v31  ;;  %v1923_v54 = vmul.f32 %v5830_v41, %v5744_v16  ;;  %vm1927_vm6 = vweird.f32 %v5744_v16 }
 0x19a   :  { %v1931_v29 = vand.u32 2147483647, %v5744_v16  ;;  %v1933_v37 = vand.u32 2147483648, %v5744_v16  ;;  %v636_v24 = vadd.f32 %v635_v30, %v5784_v0  ;;  %v723_v59 = vadd.f32 %v722_v15, %v5787_v33  ;;  %v2471_v33 = vld [vmem:[%s8436_s5 + $0xcf0] sm:$0xff] }
 0x19b   :  { %v1885_v4 = vsel %vm1884_vm5, %v5797_v50, %v1881_v2  ;;  %v1924_v35 = vsub.f32 1.0, %v1923_v54  ;;  %v1893_v46 = vmul.f32 %v5906_v58, %v5832_v13  ;;  %vm1928_vm7 = vweird.f32 %v5830_v41  ;;  %v2381_v50 = vld [vmem:[%s8436_s5 + $0xa20] sm:$0xff]  ;;  %v2567_v2 = vld [vmem:[%s8436_s5 + $0xff0] sm:$0xff]  ;;  %2923 = vmatpush.msrb.mxu1 %v2471_v33 }
 0x19c   :  { %v3751_v22 = vpop.eup %3750  ;;  %v6267_v28 = vsel %vm6246_vm4, %v1889_v48, %v1885_v4  ;;  %vm6270_vm8 = vcmp.eq.f32.partialorder %v1931_v29, 8.507059e+37  ;;  %v3577_v0 = vmul.f32 -1.442695, %v636_v24  ;;  %v3580_v5 = vmul.f32 -1.442695, %v723_v59  ;;  %2878 = vmatpush.msra.mxu3 %v2381_v50  ;;  %v2347_v48 = vld [vmem:[%s8436_s5 + $0x910] sm:$0xff]  ;;  %3010 = vmatpush.msra.mxu0 %v2567_v2  ;;  %vm6312_vm10 = vmor %vm1927_vm6, %vm1928_vm7 }
 0x19d   :  { %8562 = vst [vmem:[#allocation18_spill] sm:$0xff] %v6267_v28  ;;  %v3753_v60 = vpop.eup %3752  ;;  %v6280_v31 = vadd.f32 1.0, %v3751_v22  ;;  %2716 = vmatmul.f32.gmra.mxu1 %v6267_v28  ;;  %v1925_v30 = vmul.f32 %v5830_v41, %v1924_v35  ;;  %v1894_v15 = vsub.f32 1.0, %v1893_v46  ;;  %v1934_v24 = vor.u32 1.1754944e-38, %v1933_v37  ;;  %v2379_v4 = vld [vmem:[%s8436_s5 + $0xa10] sm:$0xff]  ;;  %v2469_v35 = vld [vmem:[%s8436_s5 + $0xce0] sm:$0xff]  ;;  %2850 = vmatpush.msra.mxu2 %v2347_v48  ;;  %v693_v28 = vpop.f32.mrf.mxu3 }
 0x19e   :  { %v6290_v54 = vpop.eup %3754  ;;  %v6292_v29 = vadd.f32 1.0, %v3753_v60  ;;  %3758 = vpow2.f32 %v3577_v0  ;;  %vm1898_vm9 = vweird.f32 %v5906_v58  ;;  %v2565_v59 = vld [vmem:[%s8436_s5 + $0xfe0] sm:$0xff]  ;;  %v1901_v50 = vand.u32 2147483647, %v5832_v13  ;;  %2879 = vmatpush.msra.mxu3 %v2379_v4  ;;  %2924 = vmatpush.msrb.mxu1 %v2469_v35  ;;  %v2467_v2 = vld [vmem:[%s8436_s5 + $0xcd0] sm:$0xff] }
 0x19f   :  { %v6304_v46 = vpop.eup %3756  ;;  %3760 = vrcp.f32 %v6280_v31  ;;  %v1926_v37 = vadd.f32 %v5830_v41, %v1925_v30  ;;  %v1895_v0 = vmul.f32 %v5906_v58, %v1894_v15  ;;  %v2345_v33 = vld [vmem:[%s8436_s5 + $0x900] sm:$0xff]  ;;  %vm1897_vm11 = vweird.f32 %v5832_v13  ;;  %v664_v15 = vpop.f32.mrf.mxu2  ;;  %3011 = vmatpush.msra.mxu0 %v2565_v59  ;;  %v2563_v48 = vld [vmem:[%s8436_s5 + $0xfd0] sm:$0xff] }
 0x1a0   :  { %v2377_v60 = vld [vmem:[%s8436_s5 + $0xa00] sm:$0xff]  ;;  %3762 = vrcp.f32 %v6292_v29  ;;  %v1903_v16 = vand.u32 2147483648, %v5832_v13  ;;  %v1908_v30 = vmul.f32 %v5919_v42, %v5856_v38  ;;  %v2503_v4 = vld [vmem:[%s8436_s5 + $0xdf0] sm:$0xff]  ;;  %vm6342_vm12 = vcmp.eq.f32.partialorder %v1901_v50, 8.507059e+37  ;;  %2851 = vmatpush.msra.mxu2 %v2345_v33  ;;  %vm1899_vm13 = vmor %vm1897_vm11, %vm1898_vm9  ;;  %2925 = vmatpush.msrb.mxu1 %v2467_v2 }
 0x1a1   :  { %v1930_v51 = vsel %vm6312_vm10, %v5830_v41, %v1926_v37  ;;  %3764 = vpow2.f32 %v3580_v5  ;;  %v1896_v35 = vadd.f32 %v5906_v58, %v1895_v0  ;;  %2880 = vmatpush.msra.mxu3 %v2377_v60  ;;  %vm1913_vm14 = vweird.f32 %v5919_v42  ;;  %3012 = vmatpush.msra.mxu0 %v2563_v48  ;;  %v2465_v48 = vld [vmem:[%s8436_s5 + $0xcc0] sm:$0xff] }
 0x1a2   :  { %v6348_v25 = vsel %vm6270_vm8, %v1934_v24, %v1930_v51  ;;  %v1904_v41 = vor.u32 1.1754944e-38, %v1903_v16  ;;  %v1909_v5 = vsub.f32 1.0, %v1908_v30  ;;  %v1916_v22 = vand.u32 2147483647, %v5856_v38  ;;  %2952 = vmatpush.msrb.mxu2 %v2503_v4  ;;  %v2535_v4 = vld [vmem:[%s8436_s5 + $0xef0] sm:$0xff]  ;;  %2926 = vmatpush.msrb.mxu1 %v2465_v48 }
 0x1a3   :  { %8569 = vst [vmem:[#allocation19_spill] sm:$0xff] %v6348_v25  ;;  %2803 = vmatmul.f32.gmra.mxu0 %v6348_v25  ;;  %v1900_v37 = vsel %vm1899_vm13, %v5906_v58, %v1896_v35  ;;  %v1918_v51 = vand.u32 2147483648, %v5856_v38  ;;  %v665_v10 = vadd.f32 %v664_v15, %v5884_v17  ;;  %v694_v50 = vadd.f32 %v693_v28, %v5887_v7  ;;  %v2561_v35 = vld [vmem:[%s8436_s5 + $0xfc0] sm:$0xff] }
 0x1a4   :  { %v3759_v24 = vpop.eup %3758  ;;  %v6362_v13 = vsel %vm6342_vm12, %v1904_v41, %v1900_v37  ;;  %v1910_v0 = vmul.f32 %v5919_v42, %v1909_v5  ;;  %v1218_v33 = vmul.f32 %v5996_v26, %v5921_v21  ;;  %vm6373_vm15 = vcmp.eq.f32.partialorder %v1916_v22, 8.507059e+37  ;;  %2981 = vmatpush.msrb.mxu3 %v2535_v4  ;;  %v2501_v5 = vld [vmem:[%s8436_s5 + $0xde0] sm:$0xff]  ;;  %3013 = vmatpush.msra.mxu0 %v2561_v35 }
 0x1a5   :  { %8570 = vst [vmem:[#allocation20_spill] sm:$0xff] %v6362_v13  ;;  %v6368_v58 = vpop.eup %3760  ;;  %v6370_v60 = vadd.f32 1.0, %v3759_v24  ;;  %2745 = vmatmul.f32.gmra.mxu2 %v6362_v13  ;;  %v1919_v16 = vor.u32 1.1754944e-38, %v1918_v51  ;;  %v3578_v30 = vmul.f32 -1.442695, %v665_v10  ;;  %vm1912_vm0 = vweird.f32 %v5856_v38  ;;  %v2531_v24 = vld [vmem:[%s8436_s5 + $0xed0] sm:$0xff] }
 0x1a6   :  { %v6377_v15 = vpop.eup %3762  ;;  %v1911_v2 = vadd.f32 %v5919_v42, %v1910_v0  ;;  %v3579_v7 = vmul.f32 -1.442695, %v694_v50  ;;  %v1219_v28 = vsub.f32 1.0, %v1218_v33  ;;  %vm1914_vm1 = vmor %vm1912_vm0, %vm1913_vm14  ;;  %vm1223_vm2 = vweird.f32 %v5996_v26  ;;  %2953 = vmatpush.msrb.mxu2 %v2501_v5  ;;  %v742_v33 = vpop.f32.mrf.mxu1  ;;  %v2485_v13 = vld [vmem:[%s8436_s5 + $0xd60] sm:$0xff] }
 0x1a7   :  { %v3765_v59 = vpop.eup %3764  ;;  %3766 = vrcp.f32 %v6370_v60  ;;  %v1226_v38 = vand.u32 2147483647, %v5921_v21  ;;  %v1228_v41 = vand.u32 2147483648, %v5921_v21  ;;  %vm1222_vm3 = vweird.f32 %v5921_v21 }
 0x1a8   :  { %v6399_v37 = vadd.f32 1.0, %v3765_v59  ;;  %v1915_v22 = vsel %vm1914_vm1, %v5919_v42, %v1911_v2  ;;  %3768 = vpow2.f32 %v3578_v30  ;;  %v1220_v51 = vmul.f32 %v5996_v26, %v1219_v28  ;;  %vm6419_vm5 = vmor %vm1222_vm3, %vm1223_vm2  ;;  %v829_v2 = vpop.f32.mrf.mxu0  ;;  %v2533_v28 = vld [vmem:[%s8436_s5 + $0xee0] sm:$0xff] }
 0x1a9   :  { %v6405_v10 = vsel %vm6373_vm15, %v1919_v16, %v1915_v22  ;;  %3770 = vpow2.f32 %v3579_v7  ;;  %vm6408_vm4 = vcmp.eq.f32.partialorder %v1226_v38, 8.507059e+37  ;;  %v1229_v0 = vor.u32 1.1754944e-38, %v1228_v41  ;;  %v2463_v7 = vld [vmem:[%s8436_s5 + $0xcb0] sm:$0xff]  ;;  %2982 = vmatpush.msrb.mxu3 %v2533_v28 }
 0x1aa   :  { %8573 = vst [vmem:[#allocation21_spill] sm:$0xff] %v6405_v10  ;;  %3772 = vrcp.f32 %v6399_v37  ;;  %2774 = vmatmul.f32.gmra.mxu3 %v6405_v10  ;;  %v1221_v42 = vadd.f32 %v5996_v26, %v1220_v51  ;;  %v1263_v50 = vmul.f32 %v6028_v49, %v5935_v47  ;;  %vm1267_vm6 = vweird.f32 %v5935_v47  ;;  %2927 = vmatpush.msrb.mxu1 %v2463_v7  ;;  %v2559_v38 = vld [vmem:[%s8436_s5 + $0xfb0] sm:$0xff]  ;;  %v2461_v51 = vld [vmem:[%s8436_s5 + $0xca0] sm:$0xff] }
 0x1ab   :  { %v1271_v21 = vand.u32 2147483647, %v5935_v47  ;;  %v1273_v16 = vand.u32 2147483648, %v5935_v47  ;;  %v6427_v30 = vperm.slane %v5769_v18, 4  ;;  %v6439_v35 = vperm.slane %v5769_v18, 7  ;;  %v2499_v41 = vld [vmem:[%s8436_s5 + $0xdd0] sm:$0xff]  ;;  %3014 = vmatpush.msra.mxu0 %v2559_v38  ;;  %2983 = vmatpush.msrb.mxu3 %v2531_v24 }
 0x1ac   :  { %v1225_v48 = vsel %vm6419_vm5, %v5996_v26, %v1221_v42  ;;  %v1264_v4 = vsub.f32 1.0, %v1263_v50  ;;  %v1233_v59 = vmul.f32 %v6079_v14, %v6018_v63  ;;  %vm1268_vm7 = vweird.f32 %v6028_v49  ;;  %2954 = vmatpush.msrb.mxu2 %v2499_v41  ;;  %v2557_v42 = vld [vmem:[%s8436_s5 + $0xfa0] sm:$0xff]  ;;  %v2459_v28 = vld [vmem:[%s8436_s5 + $0xc90] sm:$0xff]  ;;  %2928 = vmatpush.msrb.mxu1 %v2461_v51 }
 0x1ad   :  { %v6449_v5 = vpop.eup %3766  ;;  %v6453_v26 = vsel %vm6408_vm4, %v1229_v0, %v1225_v48  ;;  %vm6456_vm8 = vcmp.eq.f32.partialorder %v1271_v21, 8.507059e+37  ;;  %v743_v22 = vadd.f32 %v742_v33, %v6427_v30  ;;  %v1274_v33 = vor.u32 1.1754944e-38, %v1273_v16  ;;  %v2497_v7 = vld [vmem:[%s8436_s5 + $0xdc0] sm:$0xff]  ;;  %3015 = vmatpush.msra.mxu0 %v2557_v42  ;;  %vm1269_vm10 = vmor %vm1267_vm6, %vm1268_vm7 }
 0x1ae   :  { %8578 = vst [vmem:[#allocation22_spill] sm:$0xff] %v6453_v26  ;;  %v3769_v0 = vpop.eup %3768  ;;  %2823 = vmatmul.f32.vlgmr.msra.gmra.mxu1 %v6453_v26  ;;  %v1265_v50 = vmul.f32 %v6028_v49, %v1264_v4  ;;  %v830_v17 = vadd.f32 %v829_v2, %v6439_v35  ;;  %v1234_v21 = vsub.f32 1.0, %v1233_v59  ;;  %v2529_v48 = vld [vmem:[%s8436_s5 + $0xec0] sm:$0xff]  ;;  %vm1238_vm9 = vweird.f32 %v6079_v14  ;;  %v2555_v4 = vld [vmem:[%s8436_s5 + $0xf90] sm:$0xff]  ;;  %2955 = vmatpush.msrb.mxu2 %v2497_v7 }
 0x1af   :  { %v3771_v38 = vpop.eup %3770  ;;  %v6482_v41 = vadd.f32 1.0, %v3769_v0  ;;  %v3533_v16 = vmul.f32 -1.442695, %v743_v22  ;;  %v1241_v2 = vand.u32 2147483647, %v6018_v63  ;;  %2984 = vmatpush.msrb.mxu3 %v2529_v48  ;;  %v2495_v22 = vld [vmem:[%s8436_s5 + $0xdb0] sm:$0xff]  ;;  %vm1237_vm11 = vweird.f32 %v6018_v63  ;;  %2929 = vmatpush.msrb.mxu1 %v2459_v28 }
 0x1b0   :  { %v6489_v59 = vpop.eup %3772  ;;  %v6491_v24 = vadd.f32 1.0, %v3771_v38  ;;  %v1266_v10 = vadd.f32 %v6028_v49, %v1265_v50  ;;  %v3536_v26 = vmul.f32 -1.442695, %v830_v17  ;;  %v1235_v0 = vmul.f32 %v6079_v14, %v1234_v21  ;;  %3016 = vmatpush.msra.mxu0 %v2555_v4  ;;  %2956 = vmatpush.msrb.mxu2 %v2495_v22  ;;  %vm1239_vm13 = vmor %vm1237_vm11, %vm1238_vm9  ;;  %v3842_v48 = vld [vmem:[%s8437_s4 + $0x8] sm:$0xff]  ;;  %v2457_v4 = vld [vmem:[%s8436_s5 + $0xc80] sm:$0xff] }
 0x1b1   :  { %3774 = vrcp.f32 %v6482_v41  ;;  %v1243_v51 = vand.u32 2147483648, %v6018_v63  ;;  %v1248_v42 = vmul.f32 %v6094_v9, %v6031_v43  ;;  %vm1242_vm12 = vcmp.eq.f32.partialorder %v1241_v2, 8.507059e+37  ;;  %v2553_v22 = vld [vmem:[%s8436_s5 + $0xf80] sm:$0xff]  ;;  %2930 = vmatpush.msrb.mxu1 %v2457_v4 }
 0x1b2   :  { %3776 = vrcp.f32 %v6491_v24  ;;  %v1270_v50 = vsel %vm1269_vm10, %v6028_v49, %v1266_v10  ;;  %v1236_v17 = vadd.f32 %v6079_v14, %v1235_v0  ;;  %vm1253_vm14 = vweird.f32 %v6094_v9  ;;  %v771_v10 = vpop.f32.mrf.mxu2  ;;  %v2527_v0 = vld [vmem:[%s8436_s5 + $0xeb0] sm:$0xff]  ;;  %3017 = vmatpush.msra.mxu0 %v2553_v22 }
 0x1b3   :  { %v6512_v47 = vsel %vm6456_vm8, %v1274_v33, %v1270_v50  ;;  %3778 = vpow2.f32 %v3533_v16  ;;  %v1244_v63 = vor.u32 1.1754944e-38, %v1243_v51  ;;  %v1249_v21 = vsub.f32 1.0, %v1248_v42  ;;  %2985 = vmatpush.msrb.mxu3 %v2527_v0 }
 0x1b4   :  { %8581 = vst [vmem:[#allocation23_spill] sm:$0xff] %v6512_v47  ;;  %2910 = vmatmul.f32.vlgmr.msrb.gmra.mxu0 %v6512_v47  ;;  %3780 = vpow2.f32 %v3536_v26  ;;  %v1240_v7 = vsel %vm1239_vm13, %v6079_v14, %v1236_v17  ;;  %v1256_v49 = vand.u32 2147483647, %v6031_v43  ;;  %v1258_v33 = vand.u32 2147483648, %v6031_v43  ;;  %v800_v26 = vpop.f32.mrf.mxu3 }
 0x1b5   :  { %v6520_v28 = vsel %vm1242_vm12, %v1244_v63, %v1240_v7  ;;  %v1250_v18 = vmul.f32 %v6094_v9, %v1249_v21  ;;  %v6527_v38 = vperm.slane %v3842_v48, 5  ;;  %vm1252_vm15 = vweird.f32 %v6031_v43  ;;  %v2493_v63 = vld [vmem:[%s8436_s5 + $0xda0] sm:$0xff] }
 0x1b6   :  { %8582 = vst [vmem:[#allocation24_spill] sm:$0xff] %v6520_v28  ;;  %2852 = vmatmul.f32.vlgmr.msra.gmra.mxu2 %v6520_v28  ;;  %vm6531_vm0 = vcmp.eq.f32.partialorder %v1256_v49, 8.507059e+37  ;;  %v6535_v16 = vperm.slane %v3842_v48, 6  ;;  %v1458_v2 = vmul.f32 %v6133_v3, %v6064_v57  ;;  %v1259_v50 = vor.u32 1.1754944e-38, %v1258_v33  ;;  %vm1254_vm2 = vmor %vm1252_vm15, %vm1253_vm14 }
 0x1b7   :  { %v6548_v51 = vpop.eup %3774  ;;  %v1251_v42 = vadd.f32 %v6094_v9, %v1250_v18  ;;  %v772_v17 = vadd.f32 %v771_v10, %v6527_v38  ;;  %vm1462_vm1 = vweird.f32 %v6064_v57  ;;  %v1466_v10 = vand.u32 2147483647, %v6064_v57  ;;  %2957 = vmatpush.msrb.mxu2 %v2493_v63  ;;  %v745_v63 = vpop.f32.mrf.mxu1 }
 0x1b8   :  { %v6556_v21 = vpop.eup %3776  ;;  %v801_v7 = vadd.f32 %v800_v26, %v6535_v16  ;;  %v1459_v49 = vsub.f32 1.0, %v1458_v2  ;;  %v1468_v18 = vand.u32 2147483648, %v6064_v57  ;;  %vm1463_vm3 = vweird.f32 %v6133_v3  ;;  %v2525_v57 = vld [vmem:[%s8436_s5 + $0xea0] sm:$0xff] }
 0x1b9   :  { %v3779_v33 = vpop.eup %3778  ;;  %v1255_v48 = vsel %vm1254_vm2, %v6094_v9, %v1251_v42  ;;  %v3534_v4 = vmul.f32 -1.442695, %v772_v17  ;;  %v1503_v0 = vmul.f32 %v6138_v1, %v6074_v34  ;;  %vm6579_vm4 = vcmp.eq.f32.partialorder %v1466_v10, 8.507059e+37  ;;  %v832_v42 = vpop.f32.mrf.mxu0  ;;  %vm6590_vm6 = vmor %vm1462_vm1, %vm1463_vm3  ;;  %2986 = vmatpush.msrb.mxu3 %v2525_v57  ;;  %v2521_v57 = vld [vmem:[%s8436_s5 + $0xe80] sm:$0xff] }
 0x1ba   :  { %v3781_v43 = vpop.eup %3780  ;;  %v6569_v28 = vadd.f32 1.0, %v3779_v33  ;;  %v6573_v26 = vsel %vm6531_vm0, %v1259_v50, %v1255_v48  ;;  %v3535_v2 = vmul.f32 -1.442695, %v801_v7  ;;  %v1460_v22 = vmul.f32 %v6133_v3, %v1459_v49 }
 0x1bb   :  { %8585 = vst [vmem:[#allocation25_spill] sm:$0xff] %v6573_v26  ;;  %v6576_v47 = vadd.f32 1.0, %v3781_v43  ;;  %2881 = vmatmul.f32.vlgmr.msra.gmra.mxu3 %v6573_v26  ;;  %3782 = vpow2.f32 %v3534_v4  ;;  %vm1507_vm5 = vweird.f32 %v6074_v34  ;;  %v1469_v50 = vor.u32 1.1754944e-38, %v1468_v18  ;;  %v2455_v18 = vld [vmem:[%s8436_s5 + $0xc70] sm:$0xff] }
 0x1bc   :  { %3784 = vrcp.f32 %v6569_v28  ;;  %v1461_v14 = vadd.f32 %v6133_v3, %v1460_v22  ;;  %v1504_v17 = vsub.f32 1.0, %v1503_v0  ;;  %vm1508_vm7 = vweird.f32 %v6138_v1  ;;  %2931 = vmatpush.msrb.mxu1 %v2455_v18  ;;  %v2551_v43 = vld [vmem:[%s8436_s5 + $0xf70] sm:$0xff] }
 0x1bd   :  { %v1511_v49 = vand.u32 2147483647, %v6074_v34  ;;  %v1513_v10 = vand.u32 2147483648, %v6074_v34  ;;  %v746_v33 = vadd.f32 %v745_v63, %v6427_v30  ;;  %3786 = vpow2.f32 %v3535_v2  ;;  %v2491_v22 = vld [vmem:[%s8436_s5 + $0xd90] sm:$0xff]  ;;  %v2453_v2 = vld [vmem:[%s8436_s5 + $0xc60] sm:$0xff]  ;;  %3018 = vmatpush.msra.mxu0 %v2551_v43  ;;  %vm6650_vm9 = vmor %vm1507_vm5, %vm1508_vm7 }
 0x1be   :  { %v1465_v48 = vsel %vm6590_vm6, %v6133_v3, %v1461_v14  ;;  %v1505_v4 = vmul.f32 %v6138_v1, %v1504_v17  ;;  %v833_v0 = vadd.f32 %v832_v42, %v6439_v35  ;;  %3788 = vrcp.f32 %v6576_v47  ;;  %2958 = vmatpush.msrb.mxu2 %v2491_v22  ;;  %v2523_v14 = vld [vmem:[%s8436_s5 + $0xe90] sm:$0xff]  ;;  %v2549_v17 = vld [vmem:[%s8436_s5 + $0xf60] sm:$0xff]  ;;  %2932 = vmatpush.msrb.mxu1 %v2453_v2 }
 0x1bf   :  { %v6621_v3 = vsel %vm6579_vm4, %v1469_v50, %v1465_v48  ;;  %vm6623_vm8 = vcmp.eq.f32.partialorder %v1511_v49, 8.507059e+37  ;;  %v3549_v42 = vmul.f32 -1.442695, %v746_v33  ;;  %v1514_v50 = vor.u32 1.1754944e-38, %v1513_v10  ;;  %2987 = vmatpush.msrb.mxu3 %v2523_v14  ;;  %v2489_v33 = vld [vmem:[%s8436_s5 + $0xd80] sm:$0xff]  ;;  %v2451_v18 = vld [vmem:[%s8436_s5 + $0xc50] sm:$0xff]  ;;  %3019 = vmatpush.msra.mxu0 %v2549_v17  ;;  %v803_v10 = vpop.f32.mrf.mxu3 }
 0x1c0   :  { %8590 = vst [vmem:[#allocation26_spill] sm:$0xff] %v6621_v3  ;;  %2826 = vmatmul.f32.gmra.mxu1 %v6621_v3  ;;  %v1506_v9 = vadd.f32 %v6138_v1, %v1505_v4  ;;  %v3552_v7 = vmul.f32 -1.442695, %v833_v0  ;;  %v1473_v49 = vmul.f32 %v6218_v32, %v6135_v44  ;;  %vm1477_vm10 = vweird.f32 %v6135_v44  ;;  %v2547_v43 = vld [vmem:[%s8436_s5 + $0xf50] sm:$0xff]  ;;  %2959 = vmatpush.msrb.mxu2 %v2489_v33  ;;  %v774_v3 = vpop.f32.mrf.mxu2 }
 0x1c1   :  { %v3783_v48 = vpop.eup %3782  ;;  %3790 = vpow2.f32 %v3549_v42  ;;  %v1481_v4 = vand.u32 2147483647, %v6135_v44  ;;  %v1483_v0 = vand.u32 2147483648, %v6135_v44  ;;  %v2487_v34 = vld [vmem:[%s8436_s5 + $0xd70] sm:$0xff]  ;;  %2988 = vmatpush.msrb.mxu3 %v2521_v57  ;;  %vm1478_vm11 = vweird.f32 %v6218_v32  ;;  %2933 = vmatpush.msrb.mxu1 %v2451_v18 }
 0x1c2   :  { %v6663_v22 = vpop.eup %3784  ;;  %v6665_v14 = vadd.f32 1.0, %v3783_v48  ;;  %v1510_v42 = vsel %vm6650_vm9, %v6138_v1, %v1506_v9  ;;  %3792 = vpow2.f32 %v3552_v7  ;;  %v1474_v26 = vsub.f32 1.0, %v1473_v49  ;;  %3020 = vmatpush.msra.mxu0 %v2547_v43  ;;  %2960 = vmatpush.msrb.mxu2 %v2487_v34  ;;  %vm6696_vm14 = vmor %vm1477_vm10, %vm1478_vm11 }
 0x1c3   :  { %v6672_v2 = vsel %vm6623_vm8, %v1514_v50, %v1510_v42  ;;  %vm6675_vm12 = vcmp.eq.f32.partialorder %v1481_v4, 8.507059e+37  ;;  %v1488_v48 = vmul.f32 %v6234_v12, %v6171_v45  ;;  %v3787_v1 = vpop.eup %3786  ;;  %v1484_v9 = vor.u32 1.1754944e-38, %v1483_v0 }
 0x1c4   :  { %8595 = vst [vmem:[#allocation27_spill] sm:$0xff] %v6672_v2  ;;  %3794 = vrcp.f32 %v6665_v14  ;;  %2913 = vmatmul.f32.gmra.mxu0 %v6672_v2  ;;  %v1475_v63 = vmul.f32 %v6218_v32, %v1474_v26  ;;  %vm1492_vm13 = vweird.f32 %v6171_v45  ;;  %v6685_v50 = vpop.eup %3788  ;;  %v6687_v7 = vadd.f32 1.0, %v3787_v1  ;;  %2961 = vmatpush.msrb.mxu2 %v2485_v13 }
 0x1c5   :  { %v1489_v49 = vsub.f32 1.0, %v1488_v48  ;;  %v1496_v33 = vand.u32 2147483647, %v6171_v45  ;;  %v1498_v18 = vand.u32 2147483648, %v6171_v45  ;;  %v775_v4 = vadd.f32 %v774_v3, %v6527_v38  ;;  %v2449_v3 = vld [vmem:[%s8436_s5 + $0xc40] sm:$0xff]  ;;  %v2519_v48 = vld [vmem:[%s8436_s5 + $0xe70] sm:$0xff] }
 0x1c6   :  { %v1476_v57 = vadd.f32 %v6218_v32, %v1475_v63  ;;  %v804_v0 = vadd.f32 %v803_v10, %v6535_v16  ;;  %v1698_v43 = vmul.f32 %v6290_v54, %v6228_v36  ;;  %3796 = vrcp.f32 %v6687_v7  ;;  %v2545_v10 = vld [vmem:[%s8436_s5 + $0xf40] sm:$0xff]  ;;  %2934 = vmatpush.msrb.mxu1 %v2449_v3  ;;  %2989 = vmatpush.msrb.mxu3 %v2519_v48 }
 0x1c7   :  { %v3791_v34 = vpop.eup %3790  ;;  %v1490_v42 = vmul.f32 %v6234_v12, %v1489_v49  ;;  %vm1493_vm15 = vweird.f32 %v6234_v12  ;;  %vm6707_vm0 = vcmp.eq.f32.partialorder %v1496_v33, 8.507059e+37  ;;  %v3550_v33 = vmul.f32 -1.442695, %v775_v4  ;;  %3021 = vmatpush.msra.mxu0 %v2545_v10 }
 0x1c8   :  { %v3793_v1 = vpop.eup %3792  ;;  %v6720_v63 = vadd.f32 1.0, %v3791_v34  ;;  %v1480_v49 = vsel %vm6696_vm14, %v6218_v32, %v1476_v57  ;;  %v3551_v2 = vmul.f32 -1.442695, %v804_v0  ;;  %v1699_v20 = vsub.f32 1.0, %v1698_v43  ;;  %vm1494_vm1 = vmor %vm1492_vm13, %vm1493_vm15  ;;  %v835_v0 = vpop.f32.mrf.mxu0 }
 0x1c9   :  { %v6728_v25 = vadd.f32 1.0, %v3793_v1  ;;  %v6732_v52 = vsel %vm6675_vm12, %v1484_v9, %v1480_v49  ;;  %v1491_v34 = vadd.f32 %v6234_v12, %v1490_v42  ;;  %v1499_v57 = vor.u32 1.1754944e-38, %v1498_v18  ;;  %v748_v18 = vpop.f32.mrf.mxu1  ;;  %v2517_v1 = vld [vmem:[%s8436_s5 + $0xe60] sm:$0xff] }
 0x1ca   :  { %v6735_v32 = vpop.eup %3794  ;;  %3798 = vrcp.f32 %v6720_v63  ;;  %2855 = vmatmul.f32.gmra.mxu2 %v6732_v52  ;;  %vm1703_vm2 = vweird.f32 %v6290_v54  ;;  %v1706_v17 = vand.u32 2147483647, %v6228_v36  ;;  %v1700_v9 = vmul.f32 %v6290_v54, %v1699_v20  ;;  %2990 = vmatpush.msrb.mxu3 %v2517_v1 }
 0x1cb   :  { %3800 = vrcp.f32 %v6728_v25  ;;  %v1495_v13 = vsel %vm1494_vm1, %v6234_v12, %v1491_v34  ;;  %v1708_v26 = vand.u32 2147483648, %v6228_v36  ;;  %v1743_v45 = vmul.f32 %v6304_v46, %v6236_v19 }
 0x1cc   :  { %v6751_v4 = vsel %vm6707_vm0, %v1499_v57, %v1495_v13  ;;  %3802 = vpow2.f32 %v3550_v33  ;;  %v6755_v43 = vpop.eup %3796  ;;  %v1701_v12 = vadd.f32 %v6290_v54, %v1700_v9  ;;  %vm1702_vm3 = vweird.f32 %v6228_v36  ;;  %v2447_v36 = vld [vmem:[%s8436_s5 + $0xc30] sm:$0xff]  ;;  %v2445_v9 = vld [vmem:[%s8436_s5 + $0xc20] sm:$0xff] }
 0x1cd   :  { %8602 = vst [vmem:[#allocation28_spill] sm:$0xff] %v6751_v4  ;;  %2884 = vmatmul.f32.gmra.mxu3 %v6751_v4  ;;  %3804 = vpow2.f32 %v3551_v2  ;;  %vm1707_vm4 = vcmp.eq.f32.partialorder %v1706_v17, 8.507059e+37  ;;  %vm1704_vm5 = vmor %vm1702_vm3, %vm1703_vm2  ;;  %v1709_v20 = vor.u32 1.1754944e-38, %v1708_v26  ;;  %v1744_v42 = vsub.f32 1.0, %v1743_v45  ;;  %2935 = vmatpush.msrb.mxu1 %v2447_v36  ;;  %v2543_v17 = vld [vmem:[%s8436_s5 + $0xf30] sm:$0xff] }
 0x1ce   :  { %vm1748_vm6 = vweird.f32 %v6304_v46  ;;  %v1753_v44 = vand.u32 2147483648, %v6236_v19  ;;  %v1705_v3 = vsel %vm1704_vm5, %v6290_v54, %v1701_v12  ;;  %v749_v48 = vadd.f32 %v748_v18, %v6427_v30  ;;  %v2483_v13 = vld [vmem:[%s8436_s5 + $0xd50] sm:$0xff]  ;;  %3022 = vmatpush.msra.mxu0 %v2543_v17 }
 0x1cf   :  { %v836_v2 = vadd.f32 %v835_v0, %v6439_v35  ;;  %v1713_v10 = vmul.f32 %v6368_v58, %v6280_v31  ;;  %v6777_v33 = vsel %vm1707_vm4, %v1709_v20, %v1705_v3  ;;  %v1745_v54 = vmul.f32 %v6304_v46, %v1744_v42  ;;  %v2515_v12 = vld [vmem:[%s8436_s5 + $0xe50] sm:$0xff]  ;;  %2962 = vmatpush.msrb.mxu2 %v2483_v13 }
 0x1d0   :  { %v6775_v49 = vpop.eup %3798  ;;  %v1751_v34 = vand.u32 2147483647, %v6236_v19  ;;  %v1754_v57 = vor.u32 1.1754944e-38, %v1753_v44  ;;  %2829 = vmatmul.f32.gmra.mxu1 %v6777_v33  ;;  %vm1747_vm7 = vweird.f32 %v6236_v19  ;;  %v3565_v45 = vmul.f32 -1.442695, %v749_v48  ;;  %v2541_v48 = vld [vmem:[%s8436_s5 + $0xf20] sm:$0xff]  ;;  %2991 = vmatpush.msrb.mxu3 %v2515_v12 }
 0x1d1   :  { %v6790_v26 = vpop.eup %3800  ;;  %v3568_v18 = vmul.f32 -1.442695, %v836_v2  ;;  %v1714_v0 = vsub.f32 1.0, %v1713_v10  ;;  %v1746_v42 = vadd.f32 %v6304_v46, %v1745_v54  ;;  %vm1718_vm8 = vweird.f32 %v6368_v58  ;;  %2936 = vmatpush.msrb.mxu1 %v2445_v9  ;;  %v2481_v2 = vld [vmem:[%s8436_s5 + $0xd40] sm:$0xff]  ;;  %v2443_v10 = vld [vmem:[%s8436_s5 + $0xc10] sm:$0xff]  ;;  %vm6816_vm9 = vmor %vm1747_vm7, %vm1748_vm6  ;;  %3023 = vmatpush.msra.mxu0 %v2541_v48 }
 0x1d2   :  { %v3803_v20 = vpop.eup %3802  ;;  %v1721_v44 = vand.u32 2147483647, %v6280_v31  ;;  %v1723_v3 = vand.u32 2147483648, %v6280_v31  ;;  %3806 = vpow2.f32 %v3565_v45  ;;  %v1728_v13 = vmul.f32 %v6377_v15, %v6292_v29  ;;  %v2513_v9 = vld [vmem:[%s8436_s5 + $0xe40] sm:$0xff]  ;;  %v2539_v19 = vld [vmem:[%s8436_s5 + $0xf10] sm:$0xff]  ;;  %v777_v45 = vpop.f32.mrf.mxu2  ;;  %2963 = vmatpush.msrb.mxu2 %v2481_v2 }
 0x1d3   :  { %v3805_v36 = vpop.eup %3804  ;;  %v6810_v1 = vadd.f32 1.0, %v3803_v20  ;;  %v1715_v17 = vmul.f32 %v6368_v58, %v1714_v0  ;;  %v1750_v20 = vsel %vm6816_vm9, %v6304_v46, %v1746_v42  ;;  %vm1752_vm10 = vcmp.eq.f32.partialorder %v1751_v34, 8.507059e+37  ;;  %2937 = vmatpush.msrb.mxu1 %v2443_v10  ;;  %v2479_v0 = vld [vmem:[%s8436_s5 + $0xd30] sm:$0xff]  ;;  %v806_v34 = vpop.f32.mrf.mxu3  ;;  %2992 = vmatpush.msrb.mxu3 %v2513_v9  ;;  %v2441_v42 = vld [vmem:[%s8436_s5 + $0xc00] sm:$0xff]  ;;  %v2088_v46 = vld [vmem:[%s8436_s5 + $0xf8] sm:$0xff] }
 0x1d4   :  { %3808 = vpow2.f32 %v3568_v18  ;;  %vm1717_vm11 = vweird.f32 %v6280_v31  ;;  %v6836_v12 = vadd.f32 1.0, %v3805_v36  ;;  %v6838_v48 = vsel %vm1752_vm10, %v1754_v57, %v1750_v20  ;;  %3024 = vmatpush.msra.mxu0 %v2539_v19  ;;  %2964 = vmatpush.msrb.mxu2 %v2479_v0  ;;  %v2537_v2 = vld [vmem:[%s8436_s5 + $0xf00] sm:$0xff] }
 0x1d5   :  { %v1716_v4 = vadd.f32 %v6368_v58, %v1715_v17  ;;  %vm6843_vm12 = vmor %vm1717_vm11, %vm1718_vm8  ;;  %vm6847_vm13 = vcmp.eq.f32.partialorder %v1721_v44, 8.507059e+37  ;;  %3810 = vrcp.f32 %v6810_v1  ;;  %2916 = vmatmul.f32.gmra.mxu0 %v6838_v48  ;;  %v1724_v57 = vor.u32 1.1754944e-38, %v1723_v3  ;;  %v2511_v44 = vld [vmem:[%s8436_s5 + $0xe30] sm:$0xff]  ;;  %2938 = vmatpush.msrb.mxu1 %v2441_v42  ;;  %v2477_v17 = vld [vmem:[%s8436_s5 + $0xd20] sm:$0xff] }
 0x1d6   :  { %v1729_v18 = vsub.f32 1.0, %v1728_v13  ;;  %vm1733_vm14 = vweird.f32 %v6377_v15  ;;  %v1736_v10 = vand.u32 2147483647, %v6292_v29  ;;  %v1738_v36 = vand.u32 2147483648, %v6292_v29  ;;  %2993 = vmatpush.msrb.mxu3 %v2511_v44  ;;  %3025 = vmatpush.msra.mxu0 %v2537_v2  ;;  %v2509_v0 = vld [vmem:[%s8436_s5 + $0xe20] sm:$0xff]  ;;  %v2184_v44 = vld [vmem:[%s8436_s5 + $0x3f8] sm:$0xff] }
 0x1d7   :  { %v1720_v3 = vsel %vm6843_vm12, %v6368_v58, %v1716_v4  ;;  %v778_v54 = vadd.f32 %v777_v45, %v6527_v38  ;;  %v807_v58 = vadd.f32 %v806_v34, %v6535_v16  ;;  %v1938_v4 = vmul.f32 %v6449_v5, %v6370_v60  ;;  %2965 = vmatpush.msrb.mxu2 %v2477_v17  ;;  %v2475_v2 = vld [vmem:[%s8436_s5 + $0xd10] sm:$0xff]  ;;  %v2086_v17 = vld [vmem:[%s8436_s5 + $0xe8] sm:$0xff] }
 0x1d8   :  { %v6874_v13 = vsel %vm6847_vm13, %v1724_v57, %v1720_v3  ;;  %v1730_v9 = vmul.f32 %v6377_v15, %v1729_v18  ;;  %v3807_v19 = vpop.eup %3806  ;;  %3812 = vrcp.f32 %v6836_v12  ;;  %vm1732_vm15 = vweird.f32 %v6292_v29  ;;  %2994 = vmatpush.msrb.mxu3 %v2509_v0  ;;  %3039 = vmatpush.msra.mxu1 %v2088_v46  ;;  %v2505_v0 = vld [vmem:[%s8436_s5 + $0xe00] sm:$0xff]  ;;  %v751_v29 = vpop.f32.mrf.mxu1 }
 0x1d9   :  { %8609 = vst [vmem:[#allocation29_spill] sm:$0xff] %v6874_v13  ;;  %2858 = vmatmul.f32.gmra.mxu2 %v6874_v13  ;;  %vm6883_vm0 = vcmp.eq.f32.partialorder %v1736_v10, 8.507059e+37  ;;  %v3566_v45 = vmul.f32 -1.442695, %v778_v54  ;;  %v6893_v34 = vadd.f32 1.0, %v3807_v19  ;;  %vm6898_vm1 = vmor %vm1732_vm15, %vm1733_vm14  ;;  %v1939_v42 = vsub.f32 1.0, %v1938_v4  ;;  %3126 = vmatpush.msrb.mxu0 %v2184_v44 }
 0x1da   :  { %v3809_v31 = vpop.eup %3808  ;;  %v1731_v57 = vadd.f32 %v6377_v15, %v1730_v9  ;;  %v3567_v18 = vmul.f32 -1.442695, %v807_v58  ;;  %v1739_v3 = vor.u32 1.1754944e-38, %v1738_v36  ;;  %v1946_v10 = vand.u32 2147483647, %v6370_v60  ;;  %v2507_v54 = vld [vmem:[%s8436_s5 + $0xe10] sm:$0xff]  ;;  %2966 = vmatpush.msrb.mxu2 %v2475_v2  ;;  %3040 = vmatpush.msra.mxu1 %v2086_v17 }
 0x1db   :  { %3814 = vpow2.f32 %v3566_v45  ;;  %v2182_v9 = vld [vmem:[%s8436_s5 + $0x3e8] sm:$0xff]  ;;  %v6918_v58 = vpop.eup %3810  ;;  %v1940_v4 = vmul.f32 %v6449_v5, %v1939_v42  ;;  %vm1943_vm2 = vweird.f32 %v6449_v5  ;;  %v1948_v19 = vand.u32 2147483648, %v6370_v60  ;;  %2995 = vmatpush.msrb.mxu3 %v2507_v54  ;;  %v2473_v45 = vld [vmem:[%s8436_s5 + $0xd00] sm:$0xff]  ;;  %v838_v42 = vpop.f32.mrf.mxu0  ;;  %v2084_v44 = vld [vmem:[%s8436_s5 + $0xd8] sm:$0xff] }
 0x1dc   :  { %v1735_v36 = vsel %vm6898_vm1, %v6377_v15, %v1731_v57  ;;  %3816 = vrcp.f32 %v6893_v34  ;;  %v6933_v46 = vadd.f32 1.0, %v3809_v31  ;;  %v1983_v57 = vmul.f32 %v6489_v59, %v6399_v37  ;;  %3127 = vmatpush.msrb.mxu0 %v2182_v9  ;;  %v2180_v31 = vld [vmem:[%s8436_s5 + $0x3d8] sm:$0xff]  ;;  %2967 = vmatpush.msrb.mxu2 %v2473_v45  ;;  %v2082_v54 = vld [vmem:[%s8436_s5 + $0xc8] sm:$0xff] }
 0x1dd   :  { %v6937_v15 = vsel %vm6883_vm0, %v1739_v3, %v1735_v36  ;;  %3818 = vpow2.f32 %v3567_v18  ;;  %v1941_v20 = vadd.f32 %v6449_v5, %v1940_v4  ;;  %vm1942_vm3 = vweird.f32 %v6370_v60  ;;  %v2120_v3 = vld [vmem:[%s8436_s5 + $0x1f8] sm:$0xff]  ;;  %2996 = vmatpush.msrb.mxu3 %v2505_v0  ;;  %3041 = vmatpush.msra.mxu1 %v2084_v44  ;;  %v2178_v0 = vld [vmem:[%s8436_s5 + $0x3c8] sm:$0xff] }
 0x1de   :  { %8614 = vst [vmem:[#allocation30_spill] sm:$0xff] %v6937_v15  ;;  %2887 = vmatmul.f32.gmra.mxu3 %v6937_v15  ;;  %vm6950_vm4 = vcmp.eq.f32.partialorder %v1946_v10, 8.507059e+37  ;;  %v6960_v17 = vpop.eup %3812  ;;  %vm6964_vm5 = vmor %vm1942_vm3, %vm1943_vm2  ;;  %v1949_v60 = vor.u32 1.1754944e-38, %v1948_v19  ;;  %v1984_v10 = vsub.f32 1.0, %v1983_v57  ;;  %v1991_v9 = vand.u32 2147483647, %v6399_v37  ;;  %3128 = vmatpush.msrb.mxu0 %v2180_v31 }
 0x1df   :  { %v1993_v36 = vand.u32 2147483648, %v6399_v37  ;;  %v2152_v4 = vld [vmem:[%s8436_s5 + $0x2f8] sm:$0xff]  ;;  %v1945_v45 = vsel %vm6964_vm5, %v6449_v5, %v1941_v20  ;;  %v752_v15 = vadd.f32 %v751_v29, %v6427_v30  ;;  %v839_v13 = vadd.f32 %v838_v42, %v6439_v35  ;;  %3068 = vmatpush.msra.mxu2 %v2120_v3  ;;  %3042 = vmatpush.msra.mxu1 %v2082_v54 }
 0x1e0   :  { %v1953_v19 = vmul.f32 %v6548_v51, %v6482_v41  ;;  %3820 = vrcp.f32 %v6933_v46  ;;  %v6986_v44 = vsel %vm6950_vm4, %v1949_v60, %v1945_v45  ;;  %v1985_v5 = vmul.f32 %v6489_v59, %v1984_v10  ;;  %3097 = vmatpush.msra.mxu3 %v2152_v4  ;;  %3129 = vmatpush.msrb.mxu0 %v2178_v0  ;;  %v780_v10 = vpop.f32.mrf.mxu2  ;;  %v2150_v4 = vld [vmem:[%s8436_s5 + $0x2e8] sm:$0xff]  ;;  %v809_v0 = vpop.f32.mrf.mxu3 }
 0x1e1   :  { %v3815_v57 = vpop.eup %3814  ;;  %vm1988_vm6 = vweird.f32 %v6489_v59  ;;  %2832 = vmatmul.f32.gmra.mxu1 %v6986_v44  ;;  %vm1987_vm7 = vweird.f32 %v6399_v37  ;;  %v3581_v30 = vmul.f32 -1.442695, %v752_v15  ;;  %v3584_v35 = vmul.f32 -1.442695, %v839_v13 }
 0x1e2   :  { %v1954_v29 = vsub.f32 1.0, %v1953_v19  ;;  %v6992_v42 = vpop.eup %3816  ;;  %v1986_v31 = vadd.f32 %v6489_v59, %v1985_v5  ;;  %vm6995_vm8 = vcmp.eq.f32.partialorder %v1991_v9, 8.507059e+37  ;;  %v1994_v2 = vor.u32 1.1754944e-38, %v1993_v36  ;;  %vm1989_vm9 = vmor %vm1987_vm7, %vm1988_vm6  ;;  %v2118_v9 = vld [vmem:[%s8436_s5 + $0x1e8] sm:$0xff]  ;;  %v2080_v36 = vld [vmem:[%s8436_s5 + $0xb8] sm:$0xff]  ;;  %3098 = vmatpush.msra.mxu3 %v2150_v4 }
 0x1e3   :  { %v1961_v3 = vand.u32 2147483647, %v6482_v41  ;;  %v3819_v54 = vpop.eup %3818  ;;  %vm1958_vm10 = vweird.f32 %v6548_v51  ;;  %v1963_v13 = vand.u32 2147483648, %v6482_v41  ;;  %v1968_v15 = vmul.f32 %v6556_v21, %v6491_v24  ;;  %3069 = vmatpush.msra.mxu2 %v2118_v9  ;;  %3043 = vmatpush.msra.mxu1 %v2080_v36  ;;  %v2116_v5 = vld [vmem:[%s8436_s5 + $0x1d8] sm:$0xff] }
 0x1e4   :  { %v1955_v37 = vmul.f32 %v6548_v51, %v1954_v29  ;;  %v7007_v18 = vadd.f32 1.0, %v3815_v57  ;;  %v1990_v60 = vsel %vm1989_vm9, %v6489_v59, %v1986_v31  ;;  %3822 = vpow2.f32 %v3581_v30  ;;  %v2176_v57 = vld [vmem:[%s8436_s5 + $0x3b8] sm:$0xff]  ;;  %v2078_v30 = vld [vmem:[%s8436_s5 + $0xa8] sm:$0xff] }
 0x1e5   :  { %vm1957_vm11 = vweird.f32 %v6482_v41  ;;  %v7020_v45 = vadd.f32 1.0, %v3819_v54  ;;  %v7024_v59 = vsel %vm6995_vm8, %v1994_v2, %v1990_v60  ;;  %3824 = vpow2.f32 %v3584_v35  ;;  %v2148_v2 = vld [vmem:[%s8436_s5 + $0x2d8] sm:$0xff]  ;;  %3130 = vmatpush.msrb.mxu0 %v2176_v57  ;;  %3070 = vmatpush.msra.mxu2 %v2116_v5 }
 0x1e6   :  { %v1956_v19 = vadd.f32 %v6548_v51, %v1955_v37  ;;  %v7036_v29 = vpop.eup %3820  ;;  %2919 = vmatmul.f32.gmra.mxu0 %v7024_v59  ;;  %vm7043_vm12 = vmor %vm1957_vm11, %vm1958_vm10  ;;  %vm1962_vm13 = vcmp.eq.f32.partialorder %v1961_v3, 8.507059e+37  ;;  %v1964_v31 = vor.u32 1.1754944e-38, %v1963_v13  ;;  %v1969_v20 = vsub.f32 1.0, %v1968_v15  ;;  %v2174_v3 = vld [vmem:[%s8436_s5 + $0x3a8] sm:$0xff]  ;;  %3044 = vmatpush.msra.mxu1 %v2078_v30  ;;  %v2112_v57 = vld [vmem:[%s8436_s5 + $0x1b8] sm:$0xff] }
 0x1e7   :  { %vm1973_vm14 = vweird.f32 %v6556_v21  ;;  %v1976_v41 = vand.u32 2147483647, %v6491_v24  ;;  %v1978_v37 = vand.u32 2147483648, %v6491_v24  ;;  %v781_v60 = vadd.f32 %v780_v10, %v6527_v38  ;;  %v2114_v13 = vld [vmem:[%s8436_s5 + $0x1c8] sm:$0xff]  ;;  %v2076_v38 = vld [vmem:[%s8436_s5 + $0x98] sm:$0xff]  ;;  %3099 = vmatpush.msra.mxu3 %v2148_v2  ;;  %3131 = vmatpush.msrb.mxu0 %v2174_v3 }
 0x1e8   :  { %v1960_v54 = vsel %vm7043_vm12, %v6548_v51, %v1956_v19  ;;  %v1970_v51 = vmul.f32 %v6556_v21, %v1969_v20  ;;  %v810_v9 = vadd.f32 %v809_v0, %v6535_v16  ;;  %v1278_v36 = vmul.f32 %v6663_v22, %v6569_v28  ;;  %v2146_v10 = vld [vmem:[%s8436_s5 + $0x2c8] sm:$0xff]  ;;  %v2172_v0 = vld [vmem:[%s8436_s5 + $0x398] sm:$0xff]  ;;  %3071 = vmatpush.msra.mxu2 %v2114_v13 }
 0x1e9   :  { %v7063_v15 = vsel %vm1962_vm13, %v1964_v31, %v1960_v54  ;;  %vm1972_vm15 = vweird.f32 %v6491_v24  ;;  %vm7077_vm0 = vcmp.eq.f32.partialorder %v1976_v41, 8.507059e+37  ;;  %v1979_v16 = vor.u32 1.1754944e-38, %v1978_v37  ;;  %v2074_v20 = vld [vmem:[%s8436_s5 + $0x88] sm:$0xff]  ;;  %v2144_v2 = vld [vmem:[%s8436_s5 + $0x2b8] sm:$0xff]  ;;  %3045 = vmatpush.msra.mxu1 %v2076_v38  ;;  %3100 = vmatpush.msra.mxu3 %v2146_v10 }
 0x1ea   :  { %2861 = vmatmul.f32.gmra.mxu2 %v7063_v15  ;;  %v3582_v19 = vmul.f32 -1.442695, %v781_v60  ;;  %v3823_v5 = vpop.eup %3822  ;;  %v1971_v30 = vadd.f32 %v6556_v21, %v1970_v51  ;;  %v3583_v35 = vmul.f32 -1.442695, %v810_v9  ;;  %v1279_v31 = vsub.f32 1.0, %v1278_v36  ;;  %vm1974_vm2 = vmor %vm1972_vm15, %vm1973_vm14  ;;  %v2170_v3 = vld [vmem:[%s8436_s5 + $0x388] sm:$0xff]  ;;  %3132 = vmatpush.msrb.mxu0 %v2172_v0 }
 0x1eb   :  { %vm1283_vm1 = vweird.f32 %v6663_v22  ;;  %v3825_v54 = vpop.eup %3824  ;;  %v7095_v41 = vadd.f32 1.0, %v3823_v5  ;;  %v1286_v37 = vand.u32 2147483647, %v6569_v28  ;;  %v1288_v60 = vand.u32 2147483648, %v6569_v28  ;;  %3072 = vmatpush.msra.mxu2 %v2112_v57  ;;  %3046 = vmatpush.msra.mxu1 %v2074_v20  ;;  %v2072_v0 = vld [vmem:[%s8436_s5 + $0x78] sm:$0xff]  ;;  %v2142_v57 = vld [vmem:[%s8436_s5 + $0x2a8] sm:$0xff] }
 0x1ec   :  { %3826 = vpow2.f32 %v3582_v19  ;;  %v7106_v13 = vadd.f32 1.0, %v3825_v54  ;;  %v1975_v51 = vsel %vm1974_vm2, %v6556_v21, %v1971_v30  ;;  %v1280_v9 = vmul.f32 %v6663_v22, %v1279_v31  ;;  %3101 = vmatpush.msra.mxu3 %v2144_v2  ;;  %3133 = vmatpush.msrb.mxu0 %v2170_v3  ;;  %v2110_v19 = vld [vmem:[%s8436_s5 + $0x1a8] sm:$0xff]  ;;  %v2168_v31 = vld [vmem:[%s8436_s5 + $0x378] sm:$0xff] }
 0x1ed   :  { %3828 = vpow2.f32 %v3583_v35  ;;  %v7113_v24 = vsel %vm7077_vm0, %v1979_v16, %v1975_v51  ;;  %vm1282_vm3 = vweird.f32 %v6569_v28  ;;  %vm7125_vm5 = vcmp.eq.f32.partialorder %v1286_v37, 8.507059e+37  ;;  %3073 = vmatpush.msra.mxu2 %v2110_v19  ;;  %3047 = vmatpush.msra.mxu1 %v2072_v0  ;;  %v2108_v20 = vld [vmem:[%s8436_s5 + $0x198] sm:$0xff]  ;;  %v2070_v37 = vld [vmem:[%s8436_s5 + $0x68] sm:$0xff] }
 0x1ee   :  { %3830 = vrcp.f32 %v7007_v18  ;;  %2890 = vmatmul.f32.gmra.mxu3 %v7113_v24  ;;  %v1281_v21 = vadd.f32 %v6663_v22, %v1280_v9  ;;  %vm7121_vm4 = vmor %vm1282_vm3, %vm1283_vm1  ;;  %v1323_v28 = vmul.f32 %v6685_v50, %v6576_v47  ;;  %v1289_v10 = vor.u32 1.1754944e-38, %v1288_v60  ;;  %3134 = vmatpush.msrb.mxu0 %v2168_v31  ;;  %v2140_v60 = vld [vmem:[%s8436_s5 + $0x298] sm:$0xff]  ;;  %v2166_v36 = vld [vmem:[%s8436_s5 + $0x368] sm:$0xff] }
 0x1ef   :  { %3832 = vrcp.f32 %v7020_v45  ;;  %v1331_v4 = vand.u32 2147483647, %v6576_v47  ;;  %v1293_v16 = vmul.f32 %v6735_v32, %v6665_v14  ;;  %v1333_v35 = vand.u32 2147483648, %v6576_v47  ;;  %3102 = vmatpush.msra.mxu3 %v2142_v57  ;;  %3074 = vmatpush.msra.mxu2 %v2108_v20  ;;  %v2106_v38 = vld [vmem:[%s8436_s5 + $0x188] sm:$0xff]  ;;  %v2068_v0 = vld [vmem:[%s8436_s5 + $0x58] sm:$0xff] }
 0x1f0   :  { %3834 = vrcp.f32 %v7095_v41  ;;  %v1285_v5 = vsel %vm7121_vm4, %v6663_v22, %v1281_v21  ;;  %v1324_v30 = vsub.f32 1.0, %v1323_v28  ;;  %vm1327_vm6 = vweird.f32 %v6576_v47  ;;  %3048 = vmatpush.msra.mxu1 %v2070_v37  ;;  %v2164_v57 = vld [vmem:[%s8436_s5 + $0x358] sm:$0xff]  ;;  %3135 = vmatpush.msrb.mxu0 %v2166_v36 }
 0x1f1   :  { %3836 = vrcp.f32 %v7106_v13  ;;  %v7157_v54 = vsel %vm7125_vm5, %v1289_v10, %v1285_v5  ;;  %vm1328_vm7 = vweird.f32 %v6685_v50  ;;  %v1294_v22 = vsub.f32 1.0, %v1293_v16  ;;  %3103 = vmatpush.msra.mxu3 %v2140_v60  ;;  %3075 = vmatpush.msra.mxu2 %v2106_v38  ;;  %v2162_v10 = vld [vmem:[%s8436_s5 + $0x348] sm:$0xff] }
 0x1f2   :  { %v3827_v2 = vpop.eup %3826  ;;  %2939 = vmatmul.f32.vlgmr.msrb.gmra.mxu1 %v7157_v54  ;;  %v1325_v51 = vmul.f32 %v6685_v50, %v1324_v30  ;;  %vm1297_vm8 = vweird.f32 %v6665_v14  ;;  %v1301_v9 = vand.u32 2147483647, %v6665_v14  ;;  %v1303_v21 = vand.u32 2147483648, %v6665_v14  ;;  %vm7210_vm11 = vmor %vm1327_vm6, %vm1328_vm7  ;;  %3136 = vmatpush.msrb.mxu0 %v2164_v57  ;;  %v2066_v14 = vld [vmem:[%s8436_s5 + $0x48] sm:$0xff]  ;;  %v2136_v57 = vld [vmem:[%s8436_s5 + $0x278] sm:$0xff] }
 0x1f3   :  { %v3829_v3 = vpop.eup %3828  ;;  %vm7180_vm9 = vcmp.eq.f32.partialorder %v1331_v4, 8.507059e+37  ;;  %v1295_v16 = vmul.f32 %v6735_v32, %v1294_v22  ;;  %vm1298_vm10 = vweird.f32 %v6735_v32  ;;  %v1308_v19 = vmul.f32 %v6755_v43, %v6687_v7  ;;  %v2138_v4 = vld [vmem:[%s8436_s5 + $0x288] sm:$0xff]  ;;  %3049 = vmatpush.msra.mxu1 %v2068_v0 }
 0x1f4   :  { %v7178_v28 = vpop.eup %3830  ;;  %v7199_v30 = vadd.f32 1.0, %v3827_v2  ;;  %v7201_v31 = vadd.f32 1.0, %v3829_v3  ;;  %v1326_v20 = vadd.f32 %v6685_v50, %v1325_v51  ;;  %v1334_v22 = vor.u32 1.1754944e-38, %v1333_v35  ;;  %3104 = vmatpush.msra.mxu3 %v2138_v4  ;;  %vm7228_vm13 = vmor %vm1297_vm8, %vm1298_vm10  ;;  %3137 = vmatpush.msrb.mxu0 %v2162_v10 }
 0x1f5   :  { %v7197_v5 = vpop.eup %3832  ;;  %v1296_v2 = vadd.f32 %v6735_v32, %v1295_v16  ;;  %vm7215_vm12 = vcmp.eq.f32.partialorder %v1301_v9, 8.507059e+37  ;;  %v1304_v51 = vor.u32 1.1754944e-38, %v1303_v21  ;;  %v1309_v35 = vsub.f32 1.0, %v1308_v19  ;;  %3050 = vmatpush.msra.mxu1 %v2066_v14  ;;  %v2134_v14 = vld [vmem:[%s8436_s5 + $0x268] sm:$0xff] }
 0x1f6   :  { %v7204_v37 = vpop.eup %3834  ;;  %v1330_v47 = vsel %vm7210_vm11, %v6685_v50, %v1326_v20  ;;  %vm1313_vm14 = vweird.f32 %v6755_v43  ;;  %v1318_v9 = vand.u32 2147483648, %v6687_v7  ;;  %v1518_v21 = vmul.f32 %v6775_v49, %v6720_v63  ;;  %v2104_v50 = vld [vmem:[%s8436_s5 + $0x178] sm:$0xff]  ;;  %3105 = vmatpush.msra.mxu3 %v2136_v57 }
 0x1f7   :  { %v7219_v36 = vpop.eup %3836  ;;  %v7244_v16 = vsel %vm7180_vm9, %v1334_v22, %v1330_v47  ;;  %v1300_v19 = vsel %vm7228_vm13, %v6735_v32, %v1296_v2  ;;  %v1310_v0 = vmul.f32 %v6755_v43, %v1309_v35  ;;  %v1316_v4 = vand.u32 2147483647, %v6687_v7  ;;  %3076 = vmatpush.msra.mxu2 %v2104_v50  ;;  %v2060_v47 = vld [vmem:[%s8436_s5 + $0x18] sm:$0xff] }
 0x1f8   :  { %3838 = vrcp.f32 %v7199_v30  ;;  %3026 = vmatmul.f32.vlgmr.msra.gmra.mxu0 %v7244_v16  ;;  %v7261_v32 = vsel %vm7215_vm12, %v1304_v51, %v1300_v19  ;;  %vm1312_vm15 = vweird.f32 %v6687_v7  ;;  %v1519_v20 = vsub.f32 1.0, %v1518_v21  ;;  %v2160_v19 = vld [vmem:[%s8436_s5 + $0x338] sm:$0xff]  ;;  %3106 = vmatpush.msra.mxu3 %v2134_v14 }
 0x1f9   :  { %2968 = vmatmul.f32.vlgmr.msrb.gmra.mxu2 %v7261_v32  ;;  %v1311_v22 = vadd.f32 %v6755_v43, %v1310_v0  ;;  %vm1522_vm0 = vweird.f32 %v6720_v63  ;;  %vm1523_vm1 = vweird.f32 %v6775_v49  ;;  %v1528_v60 = vand.u32 2147483648, %v6720_v63  ;;  %vm1314_vm2 = vmor %vm1312_vm15, %vm1313_vm14  ;;  %v2100_v0 = vld [vmem:[%s8436_s5 + $0x158] sm:$0xff]  ;;  %3138 = vmatpush.msrb.mxu0 %v2160_v19 }
 0x1fa   :  { %v1319_v2 = vor.u32 1.1754944e-38, %v1318_v9  ;;  %v1520_v3 = vmul.f32 %v6775_v49, %v1519_v20  ;;  %v1526_v7 = vand.u32 2147483647, %v6720_v63  ;;  %v1563_v51 = vmul.f32 %v6790_v26, %v6728_v25  ;;  %vm7277_vm4 = vmor %vm1522_vm0, %vm1523_vm1  ;;  %v2102_v9 = vld [vmem:[%s8436_s5 + $0x168] sm:$0xff]  ;;  %v2064_v63 = vld [vmem:[%s8436_s5 + $0x38] sm:$0xff] }
 0x1fb   :  { %3840 = vrcp.f32 %v7201_v31  ;;  %v1315_v35 = vsel %vm1314_vm2, %v6755_v43, %v1311_v22  ;;  %vm1317_vm3 = vcmp.eq.f32.partialorder %v1316_v4, 8.507059e+37  ;;  %v1571_v38 = vand.u32 2147483647, %v6728_v25  ;;  %3077 = vmatpush.msra.mxu2 %v2102_v9  ;;  %3051 = vmatpush.msra.mxu1 %v2064_v63  ;;  %v2062_v20 = vld [vmem:[%s8436_s5 + $0x28] sm:$0xff]  ;;  %v2132_v22 = vld [vmem:[%s8436_s5 + $0x258] sm:$0xff]  ;;  %v7325_v63 = vpop.f32.mrf.mxu1 }
 0x1fc   :  { %v7288_v21 = vsel %vm1317_vm3, %v1319_v2, %v1315_v35  ;;  %v1521_v50 = vadd.f32 %v6775_v49, %v1520_v3  ;;  %v1564_v43 = vsub.f32 1.0, %v1563_v51  ;;  %vm1567_vm5 = vweird.f32 %v6728_v25  ;;  %v2098_v9 = vld [vmem:[%s8436_s5 + $0x148] sm:$0xff]  ;;  %3107 = vmatpush.msra.mxu3 %v2132_v22 }
 0x1fd   :  { %8639 = vst [vmem:[#allocation31_spill] sm:$0xff] %v7288_v21  ;;  %2997 = vmatmul.f32.vlgmr.msrb.gmra.mxu3 %v7288_v21  ;;  %v1529_v4 = vor.u32 1.1754944e-38, %v1528_v60  ;;  %vm1568_vm6 = vweird.f32 %v6790_v26  ;;  %v1573_v57 = vand.u32 2147483648, %v6728_v25  ;;  %v1533_v10 = vmul.f32 %v6918_v58, %v6810_v1  ;;  %v2158_v60 = vld [vmem:[%s8436_s5 + $0x328] sm:$0xff]  ;;  %3078 = vmatpush.msra.mxu2 %v2100_v0 }
 0x1fe   :  { %v7315_v2 = vpop.eup %3838  ;;  %v1525_v3 = vsel %vm7277_vm4, %v6775_v49, %v1521_v50  ;;  %vm1527_vm7 = vcmp.eq.f32.partialorder %v1526_v7, 8.507059e+37  ;;  %v1565_v51 = vmul.f32 %v6790_v26, %v1564_v43  ;;  %v1541_v35 = vand.u32 2147483647, %v6810_v1  ;;  %3052 = vmatpush.msra.mxu1 %v2062_v20  ;;  %3139 = vmatpush.msrb.mxu0 %v2158_v60  ;;  %v2130_v50 = vld [vmem:[%s8436_s5 + $0x248] sm:$0xff]  ;;  %vm7355_vm11 = vmor %vm1567_vm5, %vm1568_vm6 }
 0x1ff   :  { %v7327_v19 = vsel %vm1527_vm7, %v1529_v4, %v1525_v3  ;;  %vm7329_vm8 = vcmp.eq.f32.partialorder %v1571_v38, 8.507059e+37  ;;  %v1534_v49 = vsub.f32 1.0, %v1533_v10  ;;  %v1548_v7 = vmul.f32 %v6960_v17, %v6836_v12  ;;  %v2156_v38 = vld [vmem:[%s8436_s5 + $0x318] sm:$0xff]  ;;  %3079 = vmatpush.msra.mxu2 %v2098_v9  ;;  %3108 = vmatpush.msra.mxu3 %v2130_v50  ;;  %v2058_v9 = vld [vmem:[%s8436_s5 + $0x8] sm:$0xff] }
 0x200   :  { %2942 = vmatmul.f32.gmra.mxu1 %v7327_v19  ;;  %v1566_v43 = vadd.f32 %v6790_v26, %v1565_v51  ;;  %vm1537_vm9 = vweird.f32 %v6810_v1  ;;  %vm1538_vm10 = vweird.f32 %v6918_v58  ;;  %v1543_v14 = vand.u32 2147483648, %v6810_v1  ;;  %v7371_v51 = vpop.f32.mrf.mxu0  ;;  %3140 = vmatpush.msrb.mxu0 %v2156_v38  ;;  %v2154_v38 = vld [vmem:[%s8436_s5 + $0x308] sm:$0xff] }
 0x201   :  { %v7349_v0 = vpop.eup %3840  ;;  %v1574_v10 = vor.u32 1.1754944e-38, %v1573_v57  ;;  %v1535_v20 = vmul.f32 %v6918_v58, %v1534_v49  ;;  %vm7360_vm12 = vcmp.eq.f32.partialorder %v1541_v35, 8.507059e+37  ;;  %v1549_v3 = vsub.f32 1.0, %v1548_v7  ;;  %3053 = vmatpush.msra.mxu1 %v2060_v47  ;;  %v2096_v35 = vld [vmem:[%s8436_s5 + $0x138] sm:$0xff]  ;;  %v2126_v21 = vld [vmem:[%s8436_s5 + $0x228] sm:$0xff]  ;;  %vm7403_vm14 = vmor %vm1537_vm9, %vm1538_vm10 }
 0x202   :  { %v1570_v22 = vsel %vm7355_vm11, %v6790_v26, %v1566_v43  ;;  %vm1553_vm13 = vweird.f32 %v6960_v17  ;;  %v1558_v25 = vand.u32 2147483648, %v6836_v12  ;;  %v1758_v57 = vmul.f32 %v6992_v42, %v6893_v34  ;;  %v2128_v26 = vld [vmem:[%s8436_s5 + $0x238] sm:$0xff]  ;;  %3080 = vmatpush.msra.mxu2 %v2096_v35  ;;  %v2094_v43 = vld [vmem:[%s8436_s5 + $0x128] sm:$0xff]  ;;  %3141 = vmatpush.msrb.mxu0 %v2154_v38 }
 0x203   :  { %v7384_v49 = vsel %vm7329_vm8, %v1574_v10, %v1570_v22  ;;  %v1536_v7 = vadd.f32 %v6918_v58, %v1535_v20  ;;  %v1550_v47 = vmul.f32 %v6960_v17, %v1549_v3  ;;  %v1556_v50 = vand.u32 2147483647, %v6836_v12  ;;  %3054 = vmatpush.msra.mxu1 %v2058_v9  ;;  %3109 = vmatpush.msra.mxu3 %v2128_v26  ;;  %v2216_v22 = vld [vmem:[%s8436_s5 + $0x4f8] sm:$0xff]  ;;  %v2214_v60 = vld [vmem:[%s8436_s5 + $0x4e8] sm:$0xff] }
 0x204   :  { %3029 = vmatmul.f32.gmra.mxu0 %v7384_v49  ;;  %v1544_v10 = vor.u32 1.1754944e-38, %v1543_v14  ;;  %vm1552_vm15 = vweird.f32 %v6836_v12  ;;  %v1559_v20 = vor.u32 1.1754944e-38, %v1558_v25  ;;  %v1759_v3 = vsub.f32 1.0, %v1758_v57  ;;  %v2312_v35 = vld [vmem:[%s8436_s5 + $0x7f8] sm:$0xff]  ;;  %3081 = vmatpush.msra.mxu2 %v2094_v43  ;;  %v2090_v4 = vld [vmem:[%s8436_s5 + $0x108] sm:$0xff] }
 0x205   :  { %v1540_v1 = vsel %vm7403_vm14, %v6918_v58, %v1536_v7  ;;  %v1551_v9 = vadd.f32 %v6960_v17, %v1550_v47  ;;  %v1768_v14 = vand.u32 2147483648, %v6893_v34  ;;  %v1803_v25 = vmul.f32 %v7036_v29, %v6933_v46  ;;  %v2092_v57 = vld [vmem:[%s8436_s5 + $0x118] sm:$0xff]  ;;  %vm7435_vm0 = vmor %vm1552_vm15, %vm1553_vm13  ;;  %3110 = vmatpush.msra.mxu3 %v2126_v21  ;;  %3155 = vmatpush.msrb.mxu1 %v2216_v22  ;;  %v2310_v21 = vld [vmem:[%s8436_s5 + $0x7e8] sm:$0xff] }
 0x206   :  { %v2124_v26 = vld [vmem:[%s8436_s5 + $0x218] sm:$0xff]  ;;  %v7429_v58 = vsel %vm7360_vm12, %v1544_v10, %v1540_v1  ;;  %v1760_v47 = vmul.f32 %v6992_v42, %v1759_v3  ;;  %vm1763_vm1 = vweird.f32 %v6992_v42  ;;  %v1766_v38 = vand.u32 2147483647, %v6893_v34  ;;  %3242 = vmatpush.msra.mxu0 %v2312_v35  ;;  %3082 = vmatpush.msra.mxu2 %v2092_v57  ;;  %v2122_v35 = vld [vmem:[%s8436_s5 + $0x208] sm:$0xff] }
 0x207   :  { %2971 = vmatmul.f32.gmra.mxu2 %v7429_v58  ;;  %v1555_v12 = vsel %vm7435_vm0, %v6960_v17, %v1551_v9  ;;  %vm1557_vm2 = vcmp.eq.f32.partialorder %v1556_v50, 8.507059e+37  ;;  %vm1762_vm3 = vweird.f32 %v6893_v34  ;;  %v1804_v43 = vsub.f32 1.0, %v1803_v25  ;;  %3111 = vmatpush.msra.mxu3 %v2124_v26  ;;  %v7460_v50 = vpop.f32.mrf.mxu1  ;;  %v2212_v1 = vld [vmem:[%s8436_s5 + $0x4d8] sm:$0xff] }
 0x208   :  { %v7456_v10 = vsel %vm1557_vm2, %v1559_v20, %v1555_v12  ;;  %v1761_v3 = vadd.f32 %v6992_v42, %v1760_v47  ;;  %v1769_v22 = vor.u32 1.1754944e-38, %v1768_v14  ;;  %v1813_v17 = vand.u32 2147483648, %v6933_v46  ;;  %vm7473_vm4 = vmor %vm1762_vm3, %vm1763_vm1  ;;  %3156 = vmatpush.msrb.mxu1 %v2214_v60  ;;  %v2308_v57 = vld [vmem:[%s8436_s5 + $0x7d8] sm:$0xff]  ;;  %3243 = vmatpush.msra.mxu0 %v2310_v21  ;;  %v2210_v47 = vld [vmem:[%s8436_s5 + $0x4c8] sm:$0xff]  ;;  %v7506_v21 = vpop.f32.mrf.mxu2  ;;  %v7523_v20 = vpop.f32.mrf.mxu0 }
 0x209   :  { %3000 = vmatmul.f32.gmra.mxu3 %v7456_v10  ;;  %v1805_v9 = vmul.f32 %v7036_v29, %v1804_v43  ;;  %vm1808_vm5 = vweird.f32 %v7036_v29  ;;  %v1811_v14 = vand.u32 2147483647, %v6933_v46  ;;  %v1773_v25 = vmul.f32 %v7178_v28, %v7007_v18  ;;  %3083 = vmatpush.msra.mxu2 %v2090_v4  ;;  %v2248_v7 = vld [vmem:[%s8436_s5 + $0x5f8] sm:$0xff]  ;;  %v2306_v43 = vld [vmem:[%s8436_s5 + $0x7c8] sm:$0xff]  ;;  %v7508_v4 = vpop.f32.mrf.mxu3 }
 0x20a   :  { %v1765_v34 = vsel %vm7473_vm4, %v6992_v42, %v1761_v3  ;;  %vm1767_vm6 = vcmp.eq.f32.partialorder %v1766_v38, 8.507059e+37  ;;  %vm1807_vm7 = vweird.f32 %v6933_v46  ;;  %v1781_v26 = vand.u32 2147483647, %v7007_v18  ;;  %3112 = vmatpush.msra.mxu3 %v2122_v35  ;;  %3157 = vmatpush.msrb.mxu1 %v2212_v1  ;;  %v2280_v38 = vld [vmem:[%s8436_s5 + $0x6f8] sm:$0xff] }
 0x20b   :  { %v7496_v60 = vsel %vm1767_vm6, %v1769_v22, %v1765_v34  ;;  %v1806_v12 = vadd.f32 %v7036_v29, %v1805_v9  ;;  %v1774_v42 = vsub.f32 1.0, %v1773_v25  ;;  %vm1777_vm8 = vweird.f32 %v7007_v18  ;;  %vm7515_vm9 = vmor %vm1807_vm7, %vm1808_vm5  ;;  %3244 = vmatpush.msra.mxu0 %v2308_v57  ;;  %v2246_v9 = vld [vmem:[%s8436_s5 + $0x5e8] sm:$0xff]  ;;  %3184 = vmatpush.msrb.mxu2 %v2248_v7  ;;  %v2208_v34 = vld [vmem:[%s8436_s5 + $0x4b8] sm:$0xff] }
 0x20c   :  { %8652 = vst [vmem:[#allocation32_spill] sm:$0xff] %v7496_v60  ;;  %2945 = vmatmul.f32.gmra.mxu1 %v7496_v60  ;;  %v1814_v22 = vor.u32 1.1754944e-38, %v1813_v17  ;;  %vm1778_vm10 = vweird.f32 %v7178_v28  ;;  %v1783_v35 = vand.u32 2147483648, %v7007_v18  ;;  %v1788_v1 = vmul.f32 %v7197_v5, %v7020_v45  ;;  %v2278_v57 = vld [vmem:[%s8436_s5 + $0x6e8] sm:$0xff]  ;;  %3213 = vmatpush.msrb.mxu3 %v2280_v38  ;;  %v2304_v7 = vld [vmem:[%s8436_s5 + $0x7b8] sm:$0xff] }
 0x20d   :  { %v1810_v46 = vsel %vm7515_vm9, %v7036_v29, %v1806_v12  ;;  %vm1812_vm11 = vcmp.eq.f32.partialorder %v1811_v14, 8.507059e+37  ;;  %v1775_v17 = vmul.f32 %v7178_v28, %v1774_v42  ;;  %v1796_v25 = vand.u32 2147483647, %v7020_v45  ;;  %3158 = vmatpush.msrb.mxu1 %v2210_v47  ;;  %3245 = vmatpush.msra.mxu0 %v2306_v43  ;;  %v2244_v47 = vld [vmem:[%s8436_s5 + $0x5d8] sm:$0xff]  ;;  %v2206_v42 = vld [vmem:[%s8436_s5 + $0x4a8] sm:$0xff]  ;;  %vm7568_vm15 = vmor %vm1777_vm8, %vm1778_vm10 }
 0x20e   :  { %v7539_v60 = vsel %vm1812_vm11, %v1814_v22, %v1810_v46  ;;  %vm7541_vm12 = vcmp.eq.f32.partialorder %v1781_v26, 8.507059e+37  ;;  %v1789_v29 = vsub.f32 1.0, %v1788_v1  ;;  %v1998_v14 = vmul.f32 %v7204_v37, %v7095_v41  ;;  %3185 = vmatpush.msrb.mxu2 %v2246_v9  ;;  %v2276_v38 = vld [vmem:[%s8436_s5 + $0x6d8] sm:$0xff]  ;;  %3214 = vmatpush.msrb.mxu3 %v2278_v57  ;;  %v2298_v9 = vld [vmem:[%s8436_s5 + $0x788] sm:$0xff] }
 0x20f   :  { %3032 = vmatmul.f32.gmra.mxu0 %v7539_v60  ;;  %v1776_v26 = vadd.f32 %v7178_v28, %v1775_v17  ;;  %vm1792_vm13 = vweird.f32 %v7020_v45  ;;  %vm1793_vm14 = vweird.f32 %v7197_v5  ;;  %v1798_v12 = vand.u32 2147483648, %v7020_v45  ;;  %3159 = vmatpush.msrb.mxu1 %v2208_v34  ;;  %v2302_v17 = vld [vmem:[%s8436_s5 + $0x7a8] sm:$0xff]  ;;  %v2204_v57 = vld [vmem:[%s8436_s5 + $0x498] sm:$0xff] }
 0x210   :  { %v1784_v22 = vor.u32 1.1754944e-38, %v1783_v35  ;;  %v1790_v1 = vmul.f32 %v7197_v5, %v1789_v29  ;;  %vm7573_vm0 = vcmp.eq.f32.partialorder %v1796_v25, 8.507059e+37  ;;  %v1999_v46 = vsub.f32 1.0, %v1998_v14  ;;  %3246 = vmatpush.msra.mxu0 %v2304_v7  ;;  %3186 = vmatpush.msrb.mxu2 %v2244_v47  ;;  %v2242_v34 = vld [vmem:[%s8436_s5 + $0x5c8] sm:$0xff]  ;;  %v7600_v7 = vpop.f32.mrf.mxu1  ;;  %v2300_v3 = vld [vmem:[%s8436_s5 + $0x798] sm:$0xff]  ;;  %vm7613_vm2 = vmor %vm1792_vm13, %vm1793_vm14 }
 0x211   :  { %v1780_v18 = vsel %vm7568_vm15, %v7178_v28, %v1776_v26  ;;  %vm2003_vm1 = vweird.f32 %v7204_v37  ;;  %v2008_v35 = vand.u32 2147483648, %v7095_v41  ;;  %v2043_v25 = vmul.f32 %v7219_v36, %v7106_v13  ;;  %3160 = vmatpush.msrb.mxu1 %v2206_v42  ;;  %3215 = vmatpush.msrb.mxu3 %v2276_v38  ;;  %v2274_v47 = vld [vmem:[%s8436_s5 + $0x6c8] sm:$0xff] }
 0x212   :  { %v7595_v28 = vsel %vm7541_vm12, %v1784_v22, %v1780_v18  ;;  %v1791_v29 = vadd.f32 %v7197_v5, %v1790_v1  ;;  %v2000_v14 = vmul.f32 %v7204_v37, %v1999_v46  ;;  %v2006_v26 = vand.u32 2147483647, %v7095_v41  ;;  %3247 = vmatpush.msra.mxu0 %v2302_v17  ;;  %v2240_v1 = vld [vmem:[%s8436_s5 + $0x5b8] sm:$0xff]  ;;  %v7621_v46 = vpop.f32.mrf.mxu2  ;;  %v7623_v18 = vpop.f32.mrf.mxu3  ;;  %3187 = vmatpush.msrb.mxu2 %v2242_v34  ;;  %v2202_v17 = vld [vmem:[%s8436_s5 + $0x488] sm:$0xff] }
 0x213   :  { %8661 = vst [vmem:[#allocation33_spill] sm:$0xff] %v7595_v28  ;;  %2974 = vmatmul.f32.gmra.mxu2 %v7595_v28  ;;  %v1799_v42 = vor.u32 1.1754944e-38, %v1798_v12  ;;  %vm2002_vm3 = vweird.f32 %v7095_v41  ;;  %v2009_v38 = vor.u32 1.1754944e-38, %v2008_v35  ;;  %v2044_v22 = vsub.f32 1.0, %v2043_v25  ;;  %3161 = vmatpush.msrb.mxu1 %v2204_v57  ;;  %v2272_v25 = vld [vmem:[%s8436_s5 + $0x6b8] sm:$0xff]  ;;  %v7654_v41 = vpop.f32.mrf.mxu0 }
 0x214   :  { %v1795_v45 = vsel %vm7613_vm2, %v7197_v5, %v1791_v29  ;;  %v2001_v28 = vadd.f32 %v7204_v37, %v2000_v14  ;;  %v2051_v12 = vand.u32 2147483647, %v7106_v13  ;;  %v2053_v35 = vand.u32 2147483648, %v7106_v13  ;;  %vm2004_vm4 = vmor %vm2002_vm3, %vm2003_vm1  ;;  %3216 = vmatpush.msrb.mxu3 %v2274_v47  ;;  %3248 = vmatpush.msra.mxu0 %v2300_v3  ;;  %v2238_v29 = vld [vmem:[%s8436_s5 + $0x5a8] sm:$0xff]  ;;  %v2200_v14 = vld [vmem:[%s8436_s5 + $0x478] sm:$0xff] }
 0x215   :  { %v7639_v43 = vsel %vm7573_vm0, %v1799_v42, %v1795_v45  ;;  %v2045_v5 = vmul.f32 %v7219_v36, %v2044_v22  ;;  %vm2048_vm5 = vweird.f32 %v7219_v36  ;;  %v2013_v34 = vmul.f32 %v7315_v2, %v7199_v30  ;;  %3188 = vmatpush.msrb.mxu2 %v2240_v1  ;;  %3162 = vmatpush.msrb.mxu1 %v2202_v17  ;;  %v2236_v1 = vld [vmem:[%s8436_s5 + $0x598] sm:$0xff] }
 0x216   :  { %8664 = vst [vmem:[#allocation34_spill] sm:$0xff] %v7639_v43  ;;  %3003 = vmatmul.f32.gmra.mxu3 %v7639_v43  ;;  %v2005_v57 = vsel %vm2004_vm4, %v7204_v37, %v2001_v28  ;;  %vm2007_vm6 = vcmp.eq.f32.partialorder %v2006_v26, 8.507059e+37  ;;  %vm2047_vm7 = vweird.f32 %v7106_v13  ;;  %v2270_v37 = vld [vmem:[%s8436_s5 + $0x6a8] sm:$0xff]  ;;  %v2296_v28 = vld [vmem:[%s8436_s5 + $0x778] sm:$0xff]  ;;  %vm2052_vm9 = vcmp.eq.f32.partialorder %v2051_v12, 8.507059e+37  ;;  %3249 = vmatpush.msra.mxu0 %v2298_v9  ;;  %v8692_v43 = vld [vmem:[#allocation20_spill] sm:$0xff] }
 0x217   :  { %v7662_v47 = vsel %vm2007_vm6, %v2009_v38, %v2005_v57  ;;  %v2046_v3 = vadd.f32 %v7219_v36, %v2045_v5  ;;  %v2014_v42 = vsub.f32 1.0, %v2013_v34  ;;  %3217 = vmatpush.msrb.mxu3 %v2272_v25  ;;  %vm7675_vm8 = vmor %vm2047_vm7, %vm2048_vm5  ;;  %v2054_v13 = vor.u32 1.1754944e-38, %v2053_v35  ;;  %3189 = vmatpush.msrb.mxu2 %v2238_v29  ;;  %v2198_v35 = vld [vmem:[%s8436_s5 + $0x468] sm:$0xff]  ;;  %v2268_v25 = vld [vmem:[%s8436_s5 + $0x698] sm:$0xff] }
 0x218   :  { %8665 = vst [vmem:[#allocation35_spill] sm:$0xff] %v7662_v47  ;;  %2948 = vmatmul.f32.gmra.mxu1 %v7662_v47  ;;  %v2023_v38 = vand.u32 2147483648, %v7199_v30  ;;  %v2028_v22 = vmul.f32 %v7349_v0, %v7201_v31  ;;  %vm2018_vm10 = vweird.f32 %v7315_v2  ;;  %v2021_v12 = vand.u32 2147483647, %v7199_v30  ;;  %3250 = vmatpush.msra.mxu0 %v2296_v28  ;;  %v2234_v9 = vld [vmem:[%s8436_s5 + $0x588] sm:$0xff] }
 0x219   :  { %v2050_v45 = vsel %vm7675_vm8, %v7219_v36, %v2046_v3  ;;  %v2015_v17 = vmul.f32 %v7315_v2, %v2014_v42  ;;  %3163 = vmatpush.msrb.mxu1 %v2200_v14  ;;  %3218 = vmatpush.msrb.mxu3 %v2270_v37  ;;  %v2294_v36 = vld [vmem:[%s8436_s5 + $0x768] sm:$0xff]  ;;  %vm2017_vm11 = vweird.f32 %v7199_v30  ;;  %v2038_v29 = vand.u32 2147483648, %v7201_v31  ;;  %v2196_v14 = vld [vmem:[%s8436_s5 + $0x458] sm:$0xff] }
 0x21a   :  { %v7697_v5 = vsel %vm2052_vm9, %v2054_v13, %v2050_v45  ;;  %v2029_v34 = vsub.f32 1.0, %v2028_v22  ;;  %3190 = vmatpush.msrb.mxu2 %v2236_v1  ;;  %v2266_v3 = vld [vmem:[%s8436_s5 + $0x688] sm:$0xff]  ;;  %v7715_v42 = vpop.f32.mrf.mxu2  ;;  %vm7719_vm12 = vmor %vm2017_vm11, %vm2018_vm10  ;;  %v2024_v30 = vor.u32 1.1754944e-38, %v2023_v38  ;;  %vm2033_vm13 = vweird.f32 %v7349_v0  ;;  %v2292_v13 = vld [vmem:[%s8436_s5 + $0x758] sm:$0xff]  ;;  %v7729_v22 = vpop.f32.mrf.mxu3  ;;  %3251 = vmatpush.msra.mxu0 %v2294_v36 }
 0x21b   :  { %8668 = vst [vmem:[#allocation36_spill] sm:$0xff] %v7697_v5  ;;  %3035 = vmatmul.f32.gmra.mxu0 %v7697_v5  ;;  %v2016_v57 = vadd.f32 %v7315_v2, %v2015_v17  ;;  %v2036_v26 = vand.u32 2147483647, %v7201_v31  ;;  %3164 = vmatpush.msrb.mxu1 %v2198_v35  ;;  %vm2022_vm14 = vcmp.eq.f32.partialorder %v2021_v12, 8.507059e+37  ;;  %v7734_v38 = vpop.f32.mrf.mxu1  ;;  %v2232_v45 = vld [vmem:[%s8436_s5 + $0x578] sm:$0xff]  ;;  %vm2032_vm15 = vweird.f32 %v7201_v31  ;;  %v2290_v31 = vld [vmem:[%s8436_s5 + $0x748] sm:$0xff]  ;;  %v7757_v36 = vpop.f32.mrf.mxu0 }
 0x21c   :  { %v2030_v28 = vmul.f32 %v7349_v0, %v2029_v34  ;;  %3219 = vmatpush.msrb.mxu3 %v2268_v25  ;;  %3191 = vmatpush.msrb.mxu2 %v2234_v9  ;;  %v2264_v12 = vld [vmem:[%s8436_s5 + $0x678] sm:$0xff]  ;;  %vm2034_vm0 = vmor %vm2032_vm15, %vm2033_vm13  ;;  %v2039_v25 = vor.u32 1.1754944e-38, %v2038_v29  ;;  %v2230_v9 = vld [vmem:[%s8436_s5 + $0x568] sm:$0xff]  ;;  %vm3504_vm2 = vcmask 523264  }
 0x21d   :  { %v2020_v1 = vsel %vm7719_vm12, %v7315_v2, %v2016_v57  ;;  %3165 = vmatpush.msrb.mxu1 %v2196_v14  ;;  %v2194_v2 = vld [vmem:[%s8436_s5 + $0x448] sm:$0xff]  ;;  %3252 = vmatpush.msra.mxu0 %v2292_v13  ;;  %vm2037_vm1 = vcmp.eq.f32.partialorder %v2036_v26, 8.507059e+37  ;;  %v2192_v29 = vld [vmem:[%s8436_s5 + $0x438] sm:$0xff] }
 0x21e   :  { %v7739_v17 = vsel %vm2022_vm14, %v2024_v30, %v2020_v1  ;;  %v2031_v35 = vadd.f32 %v7349_v0, %v2030_v28  ;;  %3220 = vmatpush.msrb.mxu3 %v2266_v3  ;;  %3192 = vmatpush.msrb.mxu2 %v2232_v45  ;;  %v2228_v14 = vld [vmem:[%s8436_s5 + $0x558] sm:$0xff]  ;;  %v2190_v3 = vld [vmem:[%s8436_s5 + $0x428] sm:$0xff] }
 0x21f   :  { %8671 = vst [vmem:[#allocation37_spill] sm:$0xff] %v7739_v17  ;;  %2977 = vmatmul.f32.gmra.mxu2 %v7739_v17  ;;  %3166 = vmatpush.msrb.mxu1 %v2194_v2  ;;  %v2260_v37 = vld [vmem:[%s8436_s5 + $0x658] sm:$0xff]  ;;  %v2286_v28 = vld [vmem:[%s8436_s5 + $0x728] sm:$0xff] }
 0x220   :  { %v2035_v34 = vsel %vm2034_vm0, %v7349_v0, %v2031_v35  ;;  %3055 = vmatmul.f32.vlgmr.msra.gmra.mxu1 %v5094_v8  ;;  %3221 = vmatpush.msrb.mxu3 %v2264_v12  ;;  %v2262_v0 = vld [vmem:[%s8436_s5 + $0x668] sm:$0xff]  ;;  %v2288_v8 = vld [vmem:[%s8436_s5 + $0x738] sm:$0xff] }
 0x221   :  { %v7762_v57 = vsel %vm2037_vm1, %v2039_v25, %v2035_v34  ;;  %3253 = vmatpush.msra.mxu0 %v2290_v31  ;;  %3193 = vmatpush.msrb.mxu2 %v2230_v9  ;;  %v2188_v26 = vld [vmem:[%s8436_s5 + $0x418] sm:$0xff]  ;;  %v2258_v13 = vld [vmem:[%s8436_s5 + $0x648] sm:$0xff] }
 0x222   :  { %8672 = vst [vmem:[#allocation38_spill] sm:$0xff] %v7762_v57  ;;  %3006 = vmatmul.f32.gmra.mxu3 %v7762_v57  ;;  %v7784_v30 = vpop.f32.mrf.mxu2  ;;  %3167 = vmatpush.msrb.mxu1 %v2192_v29  ;;  %v7798_v1 = vpop.f32.mrf.mxu3  ;;  %v2284_v35 = vld [vmem:[%s8436_s5 + $0x718] sm:$0xff]  ;;  %v2222_v31 = vld [vmem:[%s8436_s5 + $0x528] sm:$0xff] }
 0x223   :  { %3142 = vmatmul.f32.vlgmr.msrb.gmra.mxu0 %v5112_v55  ;;  %3222 = vmatpush.msrb.mxu3 %v2262_v0  ;;  %v2226_v55 = vld [vmem:[%s8436_s5 + $0x548] sm:$0xff]  ;;  %v7801_v45 = vpop.f32.mrf.mxu1  ;;  %v2224_v2 = vld [vmem:[%s8436_s5 + $0x538] sm:$0xff]  ;;  %v7817_v25 = vpop.f32.mrf.mxu0 }
 0x224   :  { %3254 = vmatpush.msra.mxu0 %v2288_v8  ;;  %3194 = vmatpush.msrb.mxu2 %v2228_v14  ;;  %v2256_v12 = vld [vmem:[%s8436_s5 + $0x638] sm:$0xff]  ;;  %v2254_v34 = vld [vmem:[%s8436_s5 + $0x628] sm:$0xff] }
 0x225   :  { %3168 = vmatpush.msrb.mxu1 %v2190_v3  ;;  %3223 = vmatpush.msrb.mxu3 %v2260_v37  ;;  %v2440_v9 = vld [vmem:[%s8436_s5 + $0xbf8] sm:$0xff]  ;;  %v2342_v8 = vld [vmem:[%s8436_s5 + $0x8e8] sm:$0xff] }
 0x226   :  { %3255 = vmatpush.msra.mxu0 %v2286_v28  ;;  %3195 = vmatpush.msrb.mxu2 %v2226_v55  ;;  %v2252_v0 = vld [vmem:[%s8436_s5 + $0x618] sm:$0xff]  ;;  %v2438_v14 = vld [vmem:[%s8436_s5 + $0xbe8] sm:$0xff] }
 0x227   :  { %3084 = vmatmul.f32.vlgmr.msra.gmra.mxu2 %v5185_v61  ;;  %3169 = vmatpush.msrb.mxu1 %v2188_v26  ;;  %v2186_v61 = vld [vmem:[%s8436_s5 + $0x408] sm:$0xff]  ;;  %v2340_v55 = vld [vmem:[%s8436_s5 + $0x8d8] sm:$0xff] }
 0x228   :  { %3058 = vmatmul.f32.gmra.mxu1 %v5278_v6  ;;  %3224 = vmatpush.msrb.mxu3 %v2258_v13  ;;  %v2282_v6 = vld [vmem:[%s8436_s5 + $0x708] sm:$0xff]  ;;  %v2376_v26 = vld [vmem:[%s8436_s5 + $0x9f8] sm:$0xff] }
 0x229   :  { %3256 = vmatpush.msra.mxu0 %v2284_v35  ;;  %3196 = vmatpush.msrb.mxu2 %v2224_v2  ;;  %v2218_v3 = vld [vmem:[%s8436_s5 + $0x508] sm:$0xff] }
 0x22a   :  { %3113 = vmatmul.f32.vlgmr.msra.gmra.mxu3 %v5251_v39  ;;  %v2344_v39 = vld [vmem:[%s8436_s5 + $0x8f8] sm:$0xff]  ;;  %3170 = vmatpush.msrb.mxu1 %v2186_v61  ;;  %v7835_v29 = vpop.f32.mrf.mxu2  ;;  %v7854_v37 = vpop.f32.mrf.mxu3  ;;  %v2338_v13 = vld [vmem:[%s8436_s5 + $0x8c8] sm:$0xff] }
 0x22b   :  { %3145 = vmatmul.f32.gmra.mxu0 %v5350_v11  ;;  %3225 = vmatpush.msrb.mxu3 %v2256_v12  ;;  %v2220_v11 = vld [vmem:[%s8436_s5 + $0x518] sm:$0xff]  ;;  %v7856_v28 = vpop.f32.mrf.mxu1  ;;  %v7878_v35 = vpop.f32.mrf.mxu0  ;;  %v2434_v2 = vld [vmem:[%s8436_s5 + $0xbc8] sm:$0xff] }
 0x22c   :  { %3257 = vmatpush.msra.mxu0 %v2282_v6  ;;  %3197 = vmatpush.msrb.mxu2 %v2222_v31  ;;  %v2336_v61 = vld [vmem:[%s8436_s5 + $0x8b8] sm:$0xff]  ;;  %v2406_v12 = vld [vmem:[%s8436_s5 + $0xae8] sm:$0xff] }
 0x22d   :  { %3226 = vmatpush.msrb.mxu3 %v2254_v34  ;;  %3271 = vmatpush.msra.mxu1 %v2344_v39  ;;  %v2432_v31 = vld [vmem:[%s8436_s5 + $0xbb8] sm:$0xff]  ;;  %v2334_v39 = vld [vmem:[%s8436_s5 + $0x8a8] sm:$0xff] }
 0x22e   :  { %3358 = vmatpush.msrb.mxu0 %v2440_v9  ;;  %3198 = vmatpush.msrb.mxu2 %v2220_v11  ;;  %v2372_v34 = vld [vmem:[%s8436_s5 + $0x9d8] sm:$0xff]  ;;  %v8673_v9 = vld [vmem:[#allocation2_spill] sm:$0xff]  ;;  %v2370_v11 = vld [vmem:[%s8436_s5 + $0x9c8] sm:$0xff] }
 0x22f   :  { %3087 = vmatmul.f32.gmra.mxu2 %v5416_v56  ;;  %3227 = vmatpush.msrb.mxu3 %v2252_v0  ;;  %v2250_v56 = vld [vmem:[%s8436_s5 + $0x608] sm:$0xff] }
 0x230   :  { %3061 = vmatmul.f32.gmra.mxu1 %v5480_v62  ;;  %3359 = vmatpush.msrb.mxu0 %v2438_v14  ;;  %v2436_v62 = vld [vmem:[%s8436_s5 + $0xbd8] sm:$0xff]  ;;  %v2410_v57 = vld [vmem:[%s8436_s5 + $0xb08] sm:$0xff] }
 0x231   :  { %3272 = vmatpush.msra.mxu1 %v2342_v8  ;;  %3199 = vmatpush.msrb.mxu2 %v2218_v3  ;;  %v8674_v8 = vld [vmem:[#allocation3_spill] sm:$0xff]  ;;  %v2332_v3 = vld [vmem:[%s8436_s5 + $0x898] sm:$0xff] }
 0x232   :  { %3116 = vmatmul.f32.gmra.mxu3 %v5437_v27  ;;  %v2408_v27 = vld [vmem:[%s8436_s5 + $0xaf8] sm:$0xff]  ;;  %3360 = vmatpush.msrb.mxu0 %v2436_v62  ;;  %v7892_v6 = vpop.f32.mrf.mxu2  ;;  %v7915_v0 = vpop.f32.mrf.mxu3 }
 0x233   :  { %3148 = vmatmul.f32.gmra.mxu0 %v5541_v53  ;;  %3228 = vmatpush.msrb.mxu3 %v2250_v56  ;;  %v2374_v53 = vld [vmem:[%s8436_s5 + $0x9e8] sm:$0xff]  ;;  %v7918_v14 = vpop.f32.mrf.mxu1  ;;  %v2368_v62 = vld [vmem:[%s8436_s5 + $0x9b8] sm:$0xff] }
 0x234   :  { %3273 = vmatpush.msra.mxu1 %v2340_v55  ;;  %3300 = vmatpush.msra.mxu2 %v2376_v26  ;;  %v2402_v56 = vld [vmem:[%s8436_s5 + $0xac8] sm:$0xff]  ;;  %v2428_v55 = vld [vmem:[%s8436_s5 + $0xb98] sm:$0xff]  ;;  %v7932_v26 = vpop.f32.mrf.mxu0 }
 0x235   :  { %3329 = vmatpush.msra.mxu3 %v2408_v27  ;;  %3361 = vmatpush.msrb.mxu0 %v2434_v2  ;;  %v2400_v27 = vld [vmem:[%s8436_s5 + $0xab8] sm:$0xff]  ;;  %v8675_v2 = vld [vmem:[#allocation4_spill] sm:$0xff] }
 0x236   :  { %3274 = vmatpush.msra.mxu1 %v2338_v13  ;;  %3301 = vmatpush.msra.mxu2 %v2374_v53  ;;  %v2330_v13 = vld [vmem:[%s8436_s5 + $0x888] sm:$0xff] }
 0x237   :  { %3090 = vmatmul.f32.gmra.mxu2 %v5553_v23  ;;  %3330 = vmatpush.msra.mxu3 %v2406_v12  ;;  %v2404_v23 = vld [vmem:[%s8436_s5 + $0xad8] sm:$0xff]  ;;  %v2426_v53 = vld [vmem:[%s8436_s5 + $0xb88] sm:$0xff] }
 0x238   :  { %3064 = vmatmul.f32.gmra.mxu1 %v5620_v40  ;;  %3362 = vmatpush.msrb.mxu0 %v2432_v31  ;;  %v2430_v40 = vld [vmem:[%s8436_s5 + $0xba8] sm:$0xff] }
 0x239   :  { %3275 = vmatpush.msra.mxu1 %v2336_v61  ;;  %3302 = vmatpush.msra.mxu2 %v2372_v34  ;;  %v8676_v61 = vld [vmem:[#allocation6_spill] sm:$0xff]  ;;  %v2366_v12 = vld [vmem:[%s8436_s5 + $0x9a8] sm:$0xff]  ;;  %v2328_v34 = vld [vmem:[%s8436_s5 + $0x878] sm:$0xff] }
 0x23a   :  { %3119 = vmatmul.f32.gmra.mxu3 %v8673_v9  ;;  %3363 = vmatpush.msrb.mxu0 %v2430_v40  ;;  %v7948_v31 = vpop.f32.mrf.mxu2  ;;  %v2424_v9 = vld [vmem:[%s8436_s5 + $0xb78] sm:$0xff] }
 0x23b   :  { %3151 = vmatmul.f32.gmra.mxu0 %v8674_v8  ;;  %3276 = vmatpush.msra.mxu1 %v2334_v39  ;;  %v2398_v39 = vld [vmem:[%s8436_s5 + $0xaa8] sm:$0xff]  ;;  %v2364_v40 = vld [vmem:[%s8436_s5 + $0x998] sm:$0xff] }
 0x23c   :  { %3331 = vmatpush.msra.mxu3 %v2404_v23  ;;  %3303 = vmatpush.msra.mxu2 %v2370_v11  ;;  %v8677_v23 = vld [vmem:[#allocation5_spill] sm:$0xff]  ;;  %v8678_v11 = vld [vmem:[#allocation7_spill] sm:$0xff] }
 0x23d   :  { %3277 = vmatpush.msra.mxu1 %v2332_v3  ;;  %3364 = vmatpush.msrb.mxu0 %v2428_v55  ;;  %v2326_v8 = vld [vmem:[%s8436_s5 + $0x868] sm:$0xff]  ;;  %v2396_v3 = vld [vmem:[%s8436_s5 + $0xa98] sm:$0xff]  ;;  %v7973_v55 = vpop.f32.mrf.mxu3 }
 0x23e   :  { %3332 = vmatpush.msra.mxu3 %v2402_v56  ;;  %3304 = vmatpush.msra.mxu2 %v2368_v62  ;;  %v2422_v56 = vld [vmem:[%s8436_s5 + $0xb68] sm:$0xff] }
 0x23f   :  { %3093 = vmatmul.f32.gmra.mxu2 %v8675_v2  ;;  %3278 = vmatpush.msra.mxu1 %v2330_v13  ;;  %v2362_v62 = vld [vmem:[%s8436_s5 + $0x988] sm:$0xff]  ;;  %v7978_v13 = vpop.f32.mrf.mxu1 }
 0x240   :  { %3171 = vmatmul.f32.vlgmr.msrb.gmra.mxu1 %v8676_v61  ;;  %3333 = vmatpush.msra.mxu3 %v2400_v27  ;;  %v2324_v27 = vld [vmem:[%s8436_s5 + $0x858] sm:$0xff]  ;;  %v2394_v2 = vld [vmem:[%s8436_s5 + $0xa88] sm:$0xff] }
 0x241   :  { %3365 = vmatpush.msrb.mxu0 %v2426_v53  ;;  %3305 = vmatpush.msra.mxu2 %v2366_v12  ;;  %v8679_v53 = vld [vmem:[#allocation8_spill] sm:$0xff]  ;;  %v2420_v61 = vld [vmem:[%s8436_s5 + $0xb58] sm:$0xff]  ;;  %v8680_v12 = vld [vmem:[#allocation10_spill] sm:$0xff] }
 0x242   :  { %3122 = vmatmul.f32.gmra.mxu3 %v8677_v23  ;;  %3279 = vmatpush.msra.mxu1 %v2328_v34  ;;  %v7991_v34 = vpop.f32.mrf.mxu0  ;;  %v2322_v23 = vld [vmem:[%s8436_s5 + $0x848] sm:$0xff] }
 0x243   :  { %3258 = vmatmul.f32.vlgmr.msra.gmra.mxu0 %v8678_v11  ;;  %3334 = vmatpush.msra.mxu3 %v2398_v39  ;;  %v2360_v39 = vld [vmem:[%s8436_s5 + $0x978] sm:$0xff]  ;;  %v2418_v11 = vld [vmem:[%s8436_s5 + $0xb48] sm:$0xff] }
 0x244   :  { %3366 = vmatpush.msrb.mxu0 %v2424_v9  ;;  %3306 = vmatpush.msra.mxu2 %v2364_v40  ;;  %v2392_v9 = vld [vmem:[%s8436_s5 + $0xa78] sm:$0xff] }
 0x245   :  { %3280 = vmatpush.msra.mxu1 %v2326_v8  ;;  %3335 = vmatpush.msra.mxu3 %v2396_v3  ;;  %v8681_v40 = vld [vmem:[#allocation9_spill] sm:$0xff]  ;;  %v2358_v8 = vld [vmem:[%s8436_s5 + $0x968] sm:$0xff]  ;;  %v8009_v3 = vpop.f32.mrf.mxu2 }
 0x246   :  { %3367 = vmatpush.msrb.mxu0 %v2422_v56  ;;  %3307 = vmatpush.msra.mxu2 %v2362_v62  ;;  %v8682_v56 = vld [vmem:[#allocation11_spill] sm:$0xff]  ;;  %v2320_v62 = vld [vmem:[%s8436_s5 + $0x838] sm:$0xff] }
 0x247   :  { %3200 = vmatmul.f32.vlgmr.msrb.gmra.mxu2 %v8679_v53  ;;  %3281 = vmatpush.msra.mxu1 %v2324_v27  ;;  %v2390_v27 = vld [vmem:[%s8436_s5 + $0xa68] sm:$0xff]  ;;  %v2356_v53 = vld [vmem:[%s8436_s5 + $0x958] sm:$0xff] }
 0x248   :  { %3174 = vmatmul.f32.gmra.mxu1 %v8680_v12  ;;  %3336 = vmatpush.msra.mxu3 %v2394_v2  ;;  %v2416_v2 = vld [vmem:[%s8436_s5 + $0xb38] sm:$0xff] }
 0x249   :  { %3368 = vmatpush.msrb.mxu0 %v2420_v61  ;;  %3308 = vmatpush.msra.mxu2 %v2360_v39  ;;  %v2318_v61 = vld [vmem:[%s8436_s5 + $0x828] sm:$0xff]  ;;  %v2388_v12 = vld [vmem:[%s8436_s5 + $0xa58] sm:$0xff]  ;;  %v8030_v39 = vpop.f32.mrf.mxu3 }
 0x24a   :  { %3229 = vmatmul.f32.vlgmr.msrb.gmra.mxu3 %v8681_v40  ;;  %3282 = vmatpush.msra.mxu1 %v2322_v23  ;;  %v8683_v23 = vld [vmem:[#allocation12_spill] sm:$0xff]  ;;  %v8036_v40 = vpop.f32.mrf.mxu1 }
 0x24b   :  { %3261 = vmatmul.f32.gmra.mxu0 %v8682_v56  ;;  %3337 = vmatpush.msra.mxu3 %v2392_v9  ;;  %v2414_v9 = vld [vmem:[%s8436_s5 + $0xb28] sm:$0xff] }
 0x24c   :  { %3369 = vmatpush.msrb.mxu0 %v2418_v11  ;;  %3309 = vmatpush.msra.mxu2 %v2358_v8  ;;  %v8041_v11 = vld [vmem:[%s8438_s6] sm:$0x3]  ;;  %v2354_v56 = vld [vmem:[%s8436_s5 + $0x948] sm:$0xff] }
 0x24d   :  { %3283 = vmatpush.msra.mxu1 %v2320_v62  ;;  %3338 = vmatpush.msra.mxu3 %v2390_v27  ;;  %8684 = vst [vmem:[#allocation2_spill] sm:$0xff] %v8041_v11  ;;  %v8685_v8 = vld [vmem:[#allocation14_spill] sm:$0xff]  ;;  %v2316_v62 = vld [vmem:[%s8436_s5 + $0x818] sm:$0xff]  ;;  %v2386_v27 = vld [vmem:[%s8436_s5 + $0xa48] sm:$0xff]  ;;  %v8075_v17 = vpop.f32.mrf.mxu2 }
 0x24e   :  { %3370 = vmatpush.msrb.mxu0 %v2416_v2  ;;  %3310 = vmatpush.msra.mxu2 %v2356_v53  ;;  %v8686_v2 = vld [vmem:[#allocation13_spill] sm:$0xff] }
 0x24f   :  { %3203 = vmatmul.f32.gmra.mxu2 %v8683_v23  ;;  %3284 = vmatpush.msra.mxu1 %v2318_v61  ;;  %v8054_v23 = vpop.f32.mrf.mxu0  ;;  %v2412_v53 = vld [vmem:[%s8436_s5 + $0xb18] sm:$0xff] }
 0x250   :  { %3177 = vmatmul.f32.gmra.mxu1 %v8685_v8  ;;  %3339 = vmatpush.msra.mxu3 %v2388_v12  ;;  %v2352_v61 = vld [vmem:[%s8436_s5 + $0x938] sm:$0xff]  ;;  %v8063_v12 = vperm.slane %v8041_v11, 0  ;;  %v8687_v8 = vld [vmem:[#allocation15_spill] sm:$0xff]  ;;  %v8688_v11 = vld [vmem:[#allocation16_spill] sm:$0xff] }
 0x251   :  { %3371 = vmatpush.msrb.mxu0 %v2414_v9  ;;  %3311 = vmatpush.msra.mxu2 %v2354_v56  ;;  %v2314_v9 = vld [vmem:[%s8436_s5 + $0x808] sm:$0xff] }
 0x252   :  { %3232 = vmatmul.f32.gmra.mxu3 %v8686_v2  ;;  %v2384_v2 = vld [vmem:[%s8436_s5 + $0xa38] sm:$0xff]  ;;  %3285 = vmatpush.msra.mxu1 %v2316_v62  ;;  %v2350_v56 = vld [vmem:[%s8436_s5 + $0x928] sm:$0xff] }
 0x253   :  { %3264 = vmatmul.f32.gmra.mxu0 %v8687_v8  ;;  %3340 = vmatpush.msra.mxu3 %v2386_v27  ;;  %v2382_v8 = vld [vmem:[%s8436_s5 + $0xa28] sm:$0xff]  ;;  %v2472_v62 = vld [vmem:[%s8436_s5 + $0xcf8] sm:$0xff]  ;;  %v2593_v27 = vadd.f32 %v7325_v63, %v8063_v12 }
 0x254   :  { %3372 = vmatpush.msrb.mxu0 %v2412_v53  ;;  %3312 = vmatpush.msra.mxu2 %v2352_v61  ;;  %v2568_v53 = vld [vmem:[%s8436_s5 + $0xff8] sm:$0xff]  ;;  %v8689_v61 = vld [vmem:[#allocation18_spill] sm:$0xff] }
 0x255   :  { %3286 = vmatpush.msra.mxu1 %v2314_v9  ;;  %3341 = vmatpush.msra.mxu3 %v2384_v2  ;;  %v2348_v9 = vld [vmem:[%s8436_s5 + $0x918] sm:$0xff]  ;;  %v8096_v2 = vpop.f32.mrf.mxu3  ;;  %v2622_v5 = vadd.f32 %v7506_v21, %v2593_v27  ;;  %v2346_v21 = vld [vmem:[%s8436_s5 + $0x908] sm:$0xff] }
 0x256   :  { %3373 = vmatpush.msrb.mxu0 %v2410_v57  ;;  %3313 = vmatpush.msra.mxu2 %v2350_v56  ;;  %v2380_v63 = vld [vmem:[%s8436_s5 + $0xa18] sm:$0xff]  ;;  %v2470_v57 = vld [vmem:[%s8436_s5 + $0xce8] sm:$0xff] }
 0x257   :  { %3206 = vmatmul.f32.gmra.mxu2 %v8688_v11  ;;  %3342 = vmatpush.msra.mxu3 %v2382_v8  ;;  %v8105_v11 = vpop.f32.mrf.mxu1  ;;  %v8690_v56 = vld [vmem:[#allocation17_spill] sm:$0xff]  ;;  %v8691_v8 = vld [vmem:[#allocation19_spill] sm:$0xff]  ;;  %v2651_v47 = vadd.f32 %v7508_v4, %v2622_v5  ;;  %v8693_v5 = vld [vmem:[#allocation22_spill] sm:$0xff] }
 0x258   :  { %3180 = vmatmul.f32.gmra.mxu1 %v8689_v61  ;;  %3474 = vmatpush.msra.mxu0 %v2568_v53  ;;  %v2566_v61 = vld [vmem:[%s8436_s5 + $0xfe8] sm:$0xff]  ;;  %v2468_v27 = vld [vmem:[%s8436_s5 + $0xcd8] sm:$0xff]  ;;  %v8121_v53 = vpop.f32.mrf.mxu0 }
 0x259   :  { %3387 = vmatpush.msrb.mxu1 %v2472_v62  ;;  %3314 = vmatpush.msra.mxu2 %v2348_v9  ;;  %v2378_v62 = vld [vmem:[%s8436_s5 + $0xa08] sm:$0xff]  ;;  %v2504_v9 = vld [vmem:[%s8436_s5 + $0xdf8] sm:$0xff] }
 0x25a   :  { %3235 = vmatmul.f32.gmra.mxu3 %v8690_v56  ;;  %v2564_v56 = vld [vmem:[%s8436_s5 + $0xfd8] sm:$0xff]  ;;  %3475 = vmatpush.msra.mxu0 %v2566_v61  ;;  %v2562_v4 = vld [vmem:[%s8436_s5 + $0xfc8] sm:$0xff] }
 0x25b   :  { %3267 = vmatmul.f32.gmra.mxu0 %v8691_v8  ;;  %3343 = vmatpush.msra.mxu3 %v2380_v63  ;;  %v2466_v63 = vld [vmem:[%s8436_s5 + $0xcc8] sm:$0xff]  ;;  %v8136_v8 = vpop.f32.mrf.mxu2 }
 0x25c   :  { %3388 = vmatpush.msrb.mxu1 %v2470_v57  ;;  %3315 = vmatpush.msra.mxu2 %v2346_v21  ;;  %v2536_v57 = vld [vmem:[%s8436_s5 + $0xef8] sm:$0xff]  ;;  %v2502_v61 = vld [vmem:[%s8436_s5 + $0xde8] sm:$0xff]  ;;  %v2680_v21 = vadd.f32 %v7371_v51, %v2651_v47 }
 0x25d   :  { %3344 = vmatpush.msra.mxu3 %v2378_v62  ;;  %3476 = vmatpush.msra.mxu0 %v2564_v56  ;;  %v2534_v62 = vld [vmem:[%s8436_s5 + $0xee8] sm:$0xff]  ;;  %v2560_v56 = vld [vmem:[%s8436_s5 + $0xfb8] sm:$0xff]  ;;  %v8160_v47 = vpop.f32.mrf.mxu3 }
 0x25e   :  { %3389 = vmatpush.msrb.mxu1 %v2468_v27  ;;  %3416 = vmatpush.msrb.mxu2 %v2504_v9  ;;  %v8694_v27 = vld [vmem:[#allocation21_spill] sm:$0xff]  ;;  %v2709_v9 = vadd.f32 %v7801_v45, %v2680_v21  ;;  %v2596_v45 = vadd.f32 %v7460_v50, %v8063_v12  ;;  %v2498_v21 = vld [vmem:[%s8436_s5 + $0xdc8] sm:$0xff] }
 0x25f   :  { %3209 = vmatmul.f32.gmra.mxu2 %v8692_v43  ;;  %3445 = vmatpush.msrb.mxu3 %v2536_v57  ;;  %v2464_v43 = vld [vmem:[%s8436_s5 + $0xcb8] sm:$0xff]  ;;  %v2462_v57 = vld [vmem:[%s8436_s5 + $0xca8] sm:$0xff] }
 0x260   :  { %3287 = vmatmul.f32.vlgmr.msra.gmra.mxu1 %v8693_v5  ;;  %3477 = vmatpush.msra.mxu0 %v2562_v4  ;;  %v2500_v51 = vld [vmem:[%s8436_s5 + $0xdd8] sm:$0xff]  ;;  %v8170_v5 = vpop.f32.mrf.mxu1  ;;  %v2530_v50 = vld [vmem:[%s8436_s5 + $0xec8] sm:$0xff] }
 0x261   :  { %3390 = vmatpush.msrb.mxu1 %v2466_v63  ;;  %v8695_v63 = vld [vmem:[#allocation23_spill] sm:$0xff]  ;;  %3417 = vmatpush.msrb.mxu2 %v2502_v61  ;;  %v2532_v4 = vld [vmem:[%s8436_s5 + $0xed8] sm:$0xff]  ;;  %v2738_v61 = vadd.f32 %v7835_v29, %v2709_v9  ;;  %v2625_v29 = vadd.f32 %v7621_v46, %v2596_v45 }
 0x262   :  { %3238 = vmatmul.f32.gmra.mxu3 %v8694_v27  ;;  %v2558_v27 = vld [vmem:[%s8436_s5 + $0xfa8] sm:$0xff]  ;;  %3478 = vmatpush.msra.mxu0 %v2560_v56  ;;  %v2556_v56 = vld [vmem:[%s8436_s5 + $0xf98] sm:$0xff] }
 0x263   :  { %3374 = vmatmul.f32.vlgmr.msrb.gmra.mxu0 %v8695_v63  ;;  %3391 = vmatpush.msrb.mxu1 %v2464_v43  ;;  %v8181_v63 = vpop.f32.mrf.mxu0  ;;  %v2460_v43 = vld [vmem:[%s8436_s5 + $0xc98] sm:$0xff]  ;;  %v2458_v46 = vld [vmem:[%s8436_s5 + $0xc88] sm:$0xff] }
 0x264   :  { %3446 = vmatpush.msrb.mxu3 %v2534_v62  ;;  %3418 = vmatpush.msrb.mxu2 %v2500_v51  ;;  %v8696_v62 = vld [vmem:[#allocation24_spill] sm:$0xff]  ;;  %v8697_v51 = vld [vmem:[#allocation26_spill] sm:$0xff]  ;;  %v2496_v9 = vld [vmem:[%s8436_s5 + $0xdb8] sm:$0xff] }
 0x265   :  { %3392 = vmatpush.msrb.mxu1 %v2462_v57  ;;  %3479 = vmatpush.msra.mxu0 %v2558_v27  ;;  %v8198_v57 = vpop.f32.mrf.mxu2  ;;  %v2528_v27 = vld [vmem:[%s8436_s5 + $0xeb8] sm:$0xff] }
 0x266   :  { %3447 = vmatpush.msrb.mxu3 %v2532_v4  ;;  %3419 = vmatpush.msrb.mxu2 %v2498_v21  ;;  %v2767_v4 = vadd.f32 %v7854_v37, %v2738_v61  ;;  %v8698_v45 = vld [vmem:[#allocation25_spill] sm:$0xff]  ;;  %v2554_v21 = vld [vmem:[%s8436_s5 + $0xf88] sm:$0xff]  ;;  %v2654_v61 = vadd.f32 %v7623_v18, %v2625_v29 }
 0x267   :  { %3316 = vmatmul.f32.vlgmr.msra.gmra.mxu2 %v8696_v62  ;;  %3393 = vmatpush.msrb.mxu1 %v2460_v43  ;;  %v2494_v37 = vld [vmem:[%s8436_s5 + $0xda8] sm:$0xff]  ;;  %v2492_v29 = vld [vmem:[%s8436_s5 + $0xd98] sm:$0xff] }
 0x268   :  { %3290 = vmatmul.f32.gmra.mxu1 %v8697_v51  ;;  %3448 = vmatpush.msrb.mxu3 %v2530_v50  ;;  %v8699_v43 = vld [vmem:[#allocation27_spill] sm:$0xff]  ;;  %v2456_v50 = vld [vmem:[%s8436_s5 + $0xc78] sm:$0xff]  ;;  %v8225_v51 = vpop.f32.mrf.mxu3  ;;  %v2796_v18 = vadd.f32 %v7817_v25, %v2767_v4  ;;  %v2683_v25 = vadd.f32 %v7523_v20, %v2654_v61  ;;  %v2599_v20 = vadd.f32 %v7600_v7, %v8063_v12 }
 0x269   :  { %3480 = vmatpush.msra.mxu0 %v2556_v56  ;;  %3420 = vmatpush.msrb.mxu2 %v2496_v9  ;;  %v2526_v62 = vld [vmem:[%s8436_s5 + $0xea8] sm:$0xff]  ;;  %v2552_v56 = vld [vmem:[%s8436_s5 + $0xf78] sm:$0xff]  ;;  %v8231_v9 = vpop.f32.mrf.mxu1 }
 0x26a   :  { %3345 = vmatmul.f32.vlgmr.msra.gmra.mxu3 %v8698_v45  ;;  %3394 = vmatpush.msrb.mxu1 %v2458_v46  ;;  %v2454_v46 = vld [vmem:[%s8436_s5 + $0xc68] sm:$0xff]  ;;  %v2825_v4 = vadd.f32 %v8036_v40, %v2796_v18  ;;  %v2712_v40 = vadd.f32 %v7856_v28, %v2683_v25  ;;  %v2548_v7 = vld [vmem:[%s8436_s5 + $0xf58] sm:$0xff] }
 0x26b   :  { %3377 = vmatmul.f32.gmra.mxu0 %v8699_v43  ;;  %3449 = vmatpush.msrb.mxu3 %v2528_v27  ;;  %v2524_v27 = vld [vmem:[%s8436_s5 + $0xe98] sm:$0xff]  ;;  %v2550_v45 = vld [vmem:[%s8436_s5 + $0xf68] sm:$0xff]  ;;  %v8700_v43 = vld [vmem:[#allocation28_spill] sm:$0xff] }
 0x26c   :  { %3481 = vmatpush.msra.mxu0 %v2554_v21  ;;  %3421 = vmatpush.msrb.mxu2 %v2494_v37  ;;  %v2490_v21 = vld [vmem:[%s8436_s5 + $0xd88] sm:$0xff]  ;;  %v8249_v37 = vpop.f32.mrf.mxu0  ;;  %v2520_v18 = vld [vmem:[%s8436_s5 + $0xe78] sm:$0xff] }
 0x26d   :  { %3395 = vmatpush.msrb.mxu1 %v2456_v50  ;;  %3450 = vmatpush.msrb.mxu3 %v2526_v62  ;;  %v2522_v61 = vld [vmem:[%s8436_s5 + $0xe88] sm:$0xff]  ;;  %v8268_v28 = vpop.f32.mrf.mxu2  ;;  %v2628_v50 = vadd.f32 %v7715_v42, %v2599_v20  ;;  %v2741_v62 = vadd.f32 %v7892_v6, %v2712_v40  ;;  %v2448_v6 = vld [vmem:[%s8436_s5 + $0xc38] sm:$0xff] }
 0x26e   :  { %3482 = vmatpush.msra.mxu0 %v2552_v56  ;;  %3422 = vmatpush.msrb.mxu2 %v2492_v29  ;;  %v2450_v56 = vld [vmem:[%s8436_s5 + $0xc48] sm:$0xff]  ;;  %v2484_v20 = vld [vmem:[%s8436_s5 + $0xd58] sm:$0xff] }
 0x26f   :  { %3319 = vmatmul.f32.gmra.mxu2 %v6732_v52  ;;  %v2854_v52 = vadd.f32 %v8075_v17, %v2825_v4  ;;  %3396 = vmatpush.msrb.mxu1 %v2454_v46  ;;  %v2488_v17 = vld [vmem:[%s8436_s5 + $0xd78] sm:$0xff]  ;;  %v2546_v29 = vld [vmem:[%s8436_s5 + $0xf48] sm:$0xff]  ;;  %v2770_v25 = vadd.f32 %v7915_v0, %v2741_v62  ;;  %v2602_v62 = vadd.f32 %v7734_v38, %v8063_v12 }
 0x270   :  { %3293 = vmatmul.f32.gmra.mxu1 %v6777_v33  ;;  %3451 = vmatpush.msrb.mxu3 %v2524_v27  ;;  %v2452_v33 = vld [vmem:[%s8436_s5 + $0xc58] sm:$0xff]  ;;  %v2518_v46 = vld [vmem:[%s8436_s5 + $0xe68] sm:$0xff] }
 0x271   :  { %3483 = vmatpush.msra.mxu0 %v2550_v45  ;;  %3423 = vmatpush.msrb.mxu2 %v2490_v21  ;;  %v2883_v42 = vadd.f32 %v8096_v2, %v2854_v52  ;;  %v8292_v27 = vpop.f32.mrf.mxu3  ;;  %v2657_v2 = vadd.f32 %v7729_v22, %v2628_v50  ;;  %v8701_v4 = vld [vmem:[#allocation29_spill] sm:$0xff]  ;;  %v2940_v21 = vpop.f32.mrf.mxu1  ;;  %v2446_v22 = vld [vmem:[%s8436_s5 + $0xc28] sm:$0xff]  ;;  %v8702_v52 = vld [vmem:[#allocation30_spill] sm:$0xff] }
 0x272   :  { %3348 = vmatmul.f32.gmra.mxu3 %v8700_v43  ;;  %3397 = vmatpush.msrb.mxu1 %v2452_v33  ;;  %v2544_v45 = vld [vmem:[%s8436_s5 + $0xf38] sm:$0xff]  ;;  %v2482_v33 = vld [vmem:[%s8436_s5 + $0xd48] sm:$0xff] }
 0x273   :  { %3380 = vmatmul.f32.gmra.mxu0 %v6838_v48  ;;  %3452 = vmatpush.msrb.mxu3 %v2522_v61  ;;  %v2486_v48 = vld [vmem:[%s8436_s5 + $0xd68] sm:$0xff]  ;;  %v2516_v0 = vld [vmem:[%s8436_s5 + $0xe58] sm:$0xff]  ;;  %v2912_v40 = vadd.f32 %v8054_v23, %v2883_v42  ;;  %v2686_v43 = vadd.f32 %v7654_v41, %v2657_v2 }
 0x274   :  { %3484 = vmatpush.msra.mxu0 %v2548_v7  ;;  %3424 = vmatpush.msrb.mxu2 %v2488_v17  ;;  %v2799_v7 = vadd.f32 %v7878_v35, %v2770_v25  ;;  %v2444_v17 = vld [vmem:[%s8436_s5 + $0xc18] sm:$0xff]  ;;  %v2514_v50 = vld [vmem:[%s8436_s5 + $0xe48] sm:$0xff] }
 0x275   :  { %3398 = vmatpush.msrb.mxu1 %v2450_v56  ;;  %3453 = vmatpush.msrb.mxu3 %v2520_v18  ;;  %v3027_v61 = vpop.f32.mrf.mxu0  ;;  %v2941_v23 = vadd.f32 %v2940_v21, %v2912_v40  ;;  %v2540_v41 = vld [vmem:[%s8436_s5 + $0xf18] sm:$0xff]  ;;  %v2715_v35 = vadd.f32 %v7918_v14, %v2686_v43  ;;  %v2442_v38 = vld [vmem:[%s8436_s5 + $0xc08] sm:$0xff] }
 0x276   :  { %3485 = vmatpush.msra.mxu0 %v2546_v29  ;;  %3425 = vmatpush.msrb.mxu2 %v2486_v48  ;;  %v2828_v56 = vadd.f32 %v8105_v11, %v2799_v7  ;;  %v2480_v18 = vld [vmem:[%s8436_s5 + $0xd38] sm:$0xff]  ;;  %v2631_v29 = vadd.f32 %v7784_v30, %v2602_v62  ;;  %v2538_v11 = vld [vmem:[%s8436_s5 + $0xf08] sm:$0xff]  ;;  %v8706_v62 = vld [vmem:[#allocation34_spill] sm:$0xff] }
 0x277   :  { %3322 = vmatmul.f32.gmra.mxu2 %v8701_v4  ;;  %3399 = vmatpush.msrb.mxu1 %v2448_v6  ;;  %v2512_v14 = vld [vmem:[%s8436_s5 + $0xe38] sm:$0xff]  ;;  %v2744_v42 = vadd.f32 %v7948_v31, %v2715_v35  ;;  %v2478_v30 = vld [vmem:[%s8436_s5 + $0xd28] sm:$0xff] }
 0x278   :  { %3296 = vmatmul.f32.gmra.mxu1 %v6986_v44  ;;  %3454 = vmatpush.msrb.mxu3 %v2518_v46  ;;  %v2542_v44 = vld [vmem:[%s8436_s5 + $0xf28] sm:$0xff]  ;;  %v2857_v48 = vadd.f32 %v8136_v8, %v2828_v56  ;;  %v2660_v8 = vadd.f32 %v7798_v1, %v2631_v29  ;;  %v8709_v56 = vld [vmem:[#allocation37_spill] sm:$0xff] }
 0x279   :  { %3486 = vmatpush.msra.mxu0 %v2544_v45  ;;  %3426 = vmatpush.msrb.mxu2 %v2484_v20  ;;  %v2510_v46 = vld [vmem:[%s8436_s5 + $0xe28] sm:$0xff]  ;;  %v2773_v25 = vadd.f32 %v7973_v55, %v2744_v42  ;;  %v2508_v45 = vld [vmem:[%s8436_s5 + $0xe18] sm:$0xff] }
 0x27a   :  { %3351 = vmatmul.f32.gmra.mxu3 %v8702_v52  ;;  %3400 = vmatpush.msrb.mxu1 %v2446_v22  ;;  %v2886_v4 = vadd.f32 %v8160_v47, %v2857_v48  ;;  %v2506_v55 = vld [vmem:[%s8436_s5 + $0xe08] sm:$0xff] }
 0x27b   :  { %3383 = vmatmul.f32.gmra.mxu0 %v7024_v59  ;;  %3455 = vmatpush.msrb.mxu3 %v2516_v0  ;;  %v2802_v47 = vadd.f32 %v7932_v26, %v2773_v25  ;;  %v8703_v40 = vld [vmem:[#allocation31_spill] sm:$0xff] }
 0x27c   :  { %v2969_v59 = vpop.f32.mrf.mxu2  ;;  %3487 = vmatpush.msra.mxu0 %v2542_v44  ;;  %3427 = vmatpush.msrb.mxu2 %v2482_v33  ;;  %v2915_v21 = vadd.f32 %v8121_v53, %v2886_v4 }
 0x27d   :  { %v2970_v12 = vadd.f32 %v2969_v59, %v2941_v23  ;;  %3401 = vmatpush.msrb.mxu1 %v2444_v17  ;;  %3456 = vmatpush.msrb.mxu3 %v2514_v50  ;;  %v2943_v2 = vpop.f32.mrf.mxu1  ;;  %v2831_v22 = vadd.f32 %v8170_v5, %v2802_v47  ;;  %v8705_v50 = vld [vmem:[#allocation33_spill] sm:$0xff] }
 0x27e   :  { %3488 = vmatpush.msra.mxu0 %v2540_v41  ;;  %3428 = vmatpush.msrb.mxu2 %v2480_v18  ;;  %v2944_v0 = vadd.f32 %v2943_v2, %v2915_v21  ;;  %v8707_v41 = vld [vmem:[#allocation35_spill] sm:$0xff] }
 0x27f   :  { %3325 = vmatmul.f32.gmra.mxu2 %v7063_v15  ;;  %3402 = vmatpush.msrb.mxu1 %v2442_v38  ;;  %v2476_v15 = vld [vmem:[%s8436_s5 + $0xd18] sm:$0xff]  ;;  %v2860_v26 = vadd.f32 %v8198_v57, %v2831_v22  ;;  %v8710_v38 = vld [vmem:[#allocation38_spill] sm:$0xff] }
 0x280   :  { %v2998_v6 = vpop.f32.mrf.mxu3  ;;  %3457 = vmatpush.msrb.mxu3 %v2512_v14  ;;  %3489 = vmatpush.msra.mxu0 %v2538_v11  ;;  %v8711_v14 = vld [vmem:[#allocation2_spill] sm:$0xff] }
 0x281   :  { %v2999_v31 = vadd.f32 %v2998_v6, %v2970_v12  ;;  %3403 = vmatmul.f32.vlgmr.msrb.gmra.mxu1 %v7157_v54  ;;  %3429 = vmatpush.msrb.mxu2 %v2478_v30  ;;  %v3030_v54 = vpop.f32.mrf.mxu0  ;;  %v2889_v5 = vadd.f32 %v8225_v51, %v2860_v26 }
 0x282   :  { %3354 = vmatmul.f32.gmra.mxu3 %v7113_v24  ;;  %v2474_v24 = vld [vmem:[%s8436_s5 + $0xd08] sm:$0xff] }
 0x283   :  { %3490 = vmatmul.f32.vlgmr.msra.gmra.mxu0 %v7244_v16  ;;  %v3028_v1 = vadd.f32 %v3027_v61, %v2999_v31  ;;  %3458 = vmatpush.msrb.mxu3 %v2510_v46  ;;  %v2689_v16 = vadd.f32 %v7757_v36, %v2660_v8 }
 0x284   :  { %3430 = vmatpush.msrb.mxu2 %v2476_v15 }
 0x285   :  { %3503 = vst [vmem:[%s8439_s7] sm:$0xff] %v3028_v1  ;;  %3459 = vmatpush.msrb.mxu3 %v2508_v45  ;;  %v2718_v20 = vadd.f32 %v7978_v13, %v2689_v16 }
 0x286   :  { %3431 = vmatpush.msrb.mxu2 %v2474_v24 }
 0x287   :  { %3460 = vmatpush.msrb.mxu3 %v2506_v55  ;;  %3432 = vmatmul.f32.vlgmr.msrb.gmra.mxu2 %v7261_v32  ;;  %v2747_v36 = vadd.f32 %v8009_v3, %v2718_v20  ;;  %v2918_v3 = vadd.f32 %v8181_v63, %v2889_v5 }
 0x289   :  { %3406 = vmatmul.f32.gmra.mxu1 %v7327_v19  ;;  %v2946_v53 = vpop.f32.mrf.mxu1  ;;  %v2776_v13 = vadd.f32 %v8030_v39, %v2747_v36  ;;  %v8704_v19 = vld [vmem:[#allocation32_spill] sm:$0xff] }
 0x28a   :  { %3461 = vmatmul.f32.vlgmr.msrb.gmra.mxu3 %v8703_v40  ;;  %v2972_v52 = vpop.f32.mrf.mxu2  ;;  %v2947_v57 = vadd.f32 %v2946_v53, %v2918_v3 }
 0x28b   :  { %3493 = vmatmul.f32.gmra.mxu0 %v7384_v49  ;;  %v2973_v44 = vadd.f32 %v2972_v52, %v2944_v0  ;;  %v2805_v49 = vadd.f32 %v7991_v34, %v2776_v13 }
 0x28c   :  { %v3001_v33 = vpop.f32.mrf.mxu3  ;;  %v3033_v61 = vpop.f32.mrf.mxu0 }
 0x28d   :  { %v3002_v32 = vadd.f32 %v3001_v33, %v2973_v44  ;;  %v2834_v39 = vadd.f32 %v8231_v9, %v2805_v49 }
 0x28f   :  { %v3031_v43 = vadd.f32 %v3030_v54, %v3002_v32  ;;  %3435 = vmatmul.f32.gmra.mxu2 %v7429_v58  ;;  %v2863_v58 = vadd.f32 %v8268_v28, %v2834_v39 }
 0x291   :  { %3506 = vst [vmem:[%s8439_s7 + $0x10] sm:$0xff] %v3031_v43  ;;  %3409 = vmatmul.f32.gmra.mxu1 %v8704_v19  ;;  %v2892_v63 = vadd.f32 %v8292_v27, %v2863_v58  ;;  %v2572_v27 = vperm.slane %v8711_v14, 1 }
 0x292   :  { %3464 = vmatmul.f32.gmra.mxu3 %v7456_v10 }
 0x293   :  { %3496 = vmatmul.f32.gmra.mxu0 %v7539_v60  ;;  %v8708_v60 = vld [vmem:[#allocation36_spill] sm:$0xff]  ;;  %v2921_v28 = vadd.f32 %v8249_v37, %v2892_v63 }
 0x295   :  { %v2949_v51 = vpop.f32.mrf.mxu1 }
 0x296   :  { %v2975_v7 = vpop.f32.mrf.mxu2  ;;  %v2950_v18 = vadd.f32 %v2949_v51, %v2921_v28 }
 0x297   :  { %v2976_v23 = vadd.f32 %v2975_v7, %v2947_v57  ;;  %3438 = vmatmul.f32.gmra.mxu2 %v8705_v50 }
 0x298   :  { %v3036_v17 = vpop.f32.mrf.mxu0 }
 0x299   :  { %v3004_v10 = vpop.f32.mrf.mxu3  ;;  %3412 = vmatmul.f32.gmra.mxu1 %v8707_v41 }
 0x29a   :  { %3467 = vmatmul.f32.gmra.mxu3 %v8706_v62  ;;  %v3005_v34 = vadd.f32 %v3004_v10, %v2976_v23 }
 0x29b   :  { %3499 = vmatmul.f32.gmra.mxu0 %v8708_v60 }
 0x29c   :  { %v3034_v9 = vadd.f32 %v3033_v61, %v3005_v34 }
 0x29d   :  { %v3056_v59 = vpop.f32.mrf.mxu1 }
 0x29e   :  { %3508 = vst [vmem:[%s8439_s7 + $0x20] sm:$0xff] %v3034_v9  ;;  %v3057_v46 = vadd.f32 %v3056_v59, %v2572_v27 }
 0x29f   :  { %3441 = vmatmul.f32.gmra.mxu2 %v8709_v56 }
 0x2a0   :  { %v3143_v35 = vpop.f32.mrf.mxu0 }
 0x2a2   :  { %3470 = vmatmul.f32.gmra.mxu3 %v8710_v38  ;;  %v2978_v12 = vpop.f32.mrf.mxu2 }
 0x2a3   :  { %v2979_v29 = vadd.f32 %v2978_v12, %v2950_v18 }
 0x2a5   :  { %v3007_v11 = vpop.f32.mrf.mxu3  ;;  %v3059_v42 = vpop.f32.mrf.mxu1 }
 0x2a6   :  { %v3008_v48 = vadd.f32 %v3007_v11, %v2979_v29  ;;  %v3060_v45 = vadd.f32 %v3059_v42, %v2572_v27 }
 0x2a8   :  { %v3037_v30 = vadd.f32 %v3036_v17, %v3008_v48  ;;  %v3146_v6 = vpop.f32.mrf.mxu0 }
 0x2aa   :  { %3510 = vst [vmem:[%s8439_s7 + $0x30] sm:$0xff] %v3037_v30  ;;  %v3085_v37 = vpop.f32.mrf.mxu2 }
 0x2ab   :  { %v3086_v2 = vadd.f32 %v3085_v37, %v3057_v46 }
 0x2ad   :  { %v3114_v31 = vpop.f32.mrf.mxu3  ;;  %v3062_v8 = vpop.f32.mrf.mxu1 }
 0x2ae   :  { %v3115_v15 = vadd.f32 %v3114_v31, %v3086_v2  ;;  %v3063_v20 = vadd.f32 %v3062_v8, %v2572_v27 }
 0x2b0   :  { %v3149_v25 = vpop.f32.mrf.mxu0  ;;  %v3144_v4 = vadd.f32 %v3143_v35, %v3115_v15 }
 0x2b2   :  { %v3088_v1 = vpop.f32.mrf.mxu2 }
 0x2b3   :  { %v3089_v24 = vadd.f32 %v3088_v1, %v3060_v45 }
 0x2b5   :  { %v3117_v54 = vpop.f32.mrf.mxu3  ;;  %v3065_v55 = vpop.f32.mrf.mxu1 }
 0x2b6   :  { %v3118_v16 = vadd.f32 %v3117_v54, %v3089_v24  ;;  %v3066_v44 = vadd.f32 %v3065_v55, %v2572_v27 }
 0x2b8   :  { %v3152_v47 = vpop.f32.mrf.mxu0  ;;  %v3147_v21 = vadd.f32 %v3146_v6, %v3118_v16 }
 0x2ba   :  { %v3091_v22 = vpop.f32.mrf.mxu2 }
 0x2bb   :  { %v3092_v0 = vadd.f32 %v3091_v22, %v3063_v20 }
 0x2bd   :  { %v3120_v40 = vpop.f32.mrf.mxu3  ;;  %v3172_v52 = vpop.f32.mrf.mxu1 }
 0x2be   :  { %v3121_v36 = vadd.f32 %v3120_v40, %v3092_v0  ;;  %v3173_v35 = vadd.f32 %v3172_v52, %v3144_v4 }
 0x2c0   :  { %v3259_v26 = vpop.f32.mrf.mxu0  ;;  %v3150_v53 = vadd.f32 %v3149_v25, %v3121_v36 }
 0x2c2   :  { %v3094_v33 = vpop.f32.mrf.mxu2 }
 0x2c3   :  { %v3095_v32 = vadd.f32 %v3094_v33, %v3066_v44 }
 0x2c5   :  { %v3123_v61 = vpop.f32.mrf.mxu3  ;;  %v3175_v13 = vpop.f32.mrf.mxu1 }
 0x2c6   :  { %v3124_v5 = vadd.f32 %v3123_v61, %v3095_v32  ;;  %v3176_v27 = vadd.f32 %v3175_v13, %v3147_v21 }
 0x2c8   :  { %v3262_v43 = vpop.f32.mrf.mxu0  ;;  %v3153_v19 = vadd.f32 %v3152_v47, %v3124_v5 }
 0x2ca   :  { %v3201_v49 = vpop.f32.mrf.mxu2 }
 0x2cb   :  { %v3202_v18 = vadd.f32 %v3201_v49, %v3173_v35 }
 0x2cd   :  { %v3230_v3 = vpop.f32.mrf.mxu3  ;;  %v3178_v39 = vpop.f32.mrf.mxu1 }
 0x2ce   :  { %v3231_v14 = vadd.f32 %v3230_v3, %v3202_v18  ;;  %v3179_v8 = vadd.f32 %v3178_v39, %v3150_v53 }
 0x2d0   :  { %v3265_v57 = vpop.f32.mrf.mxu0  ;;  %v3260_v48 = vadd.f32 %v3259_v26, %v3231_v14 }
 0x2d2   :  { %v3204_v51 = vpop.f32.mrf.mxu2 }
 0x2d3   :  { %v3205_v42 = vadd.f32 %v3204_v51, %v3176_v27 }
 0x2d5   :  { %v3233_v7 = vpop.f32.mrf.mxu3  ;;  %v3181_v58 = vpop.f32.mrf.mxu1 }
 0x2d6   :  { %v3234_v37 = vadd.f32 %v3233_v7, %v3205_v42  ;;  %v3182_v21 = vadd.f32 %v3181_v58, %v3153_v19 }
 0x2d8   :  { %v3268_v23 = vpop.f32.mrf.mxu0  ;;  %v3263_v4 = vadd.f32 %v3262_v43, %v3234_v37 }
 0x2da   :  { %v3207_v17 = vpop.f32.mrf.mxu2 }
 0x2db   :  { %v3208_v25 = vadd.f32 %v3207_v17, %v3179_v8 }
 0x2dd   :  { %v3236_v50 = vpop.f32.mrf.mxu3  ;;  %v3288_v10 = vpop.f32.mrf.mxu1 }
 0x2de   :  { %v3289_v6 = vadd.f32 %v3288_v10, %v3260_v48  ;;  %v3237_v54 = vadd.f32 %v3236_v50, %v3208_v25 }
 0x2e0   :  { %v3375_v62 = vpop.f32.mrf.mxu0  ;;  %v3266_v52 = vadd.f32 %v3265_v57, %v3237_v54 }
 0x2e2   :  { %v3210_v41 = vpop.f32.mrf.mxu2 }
 0x2e3   :  { %v3211_v40 = vadd.f32 %v3210_v41, %v3182_v21 }
 0x2e5   :  { %v3239_v34 = vpop.f32.mrf.mxu3  ;;  %v3291_v63 = vpop.f32.mrf.mxu1 }
 0x2e6   :  { %v3292_v24 = vadd.f32 %v3291_v63, %v3263_v4  ;;  %v3240_v32 = vadd.f32 %v3239_v34, %v3211_v40 }
 0x2e8   :  { %v3378_v9 = vpop.f32.mrf.mxu0  ;;  %v3269_v3 = vadd.f32 %v3268_v23, %v3240_v32 }
 0x2ea   :  { %v3317_v60 = vpop.f32.mrf.mxu2 }
 0x2eb   :  { %v3318_v2 = vadd.f32 %v3317_v60, %v3289_v6 }
 0x2ed   :  { %v3346_v59 = vpop.f32.mrf.mxu3  ;;  %v3294_v28 = vpop.f32.mrf.mxu1 }
 0x2ee   :  { %v3347_v45 = vadd.f32 %v3346_v59, %v3318_v2  ;;  %v3295_v53 = vadd.f32 %v3294_v28, %v3266_v52 }
 0x2f0   :  { %v3381_v38 = vpop.f32.mrf.mxu0  ;;  %v3376_v16 = vadd.f32 %v3375_v62, %v3347_v45 }
 0x2f2   :  { %v3320_v56 = vpop.f32.mrf.mxu2 }
 0x2f3   :  { %v3321_v55 = vadd.f32 %v3320_v56, %v3292_v24 }
 0x2f5   :  { %v3349_v12 = vpop.f32.mrf.mxu3  ;;  %v3297_v29 = vpop.f32.mrf.mxu1 }
 0x2f6   :  { %v3350_v36 = vadd.f32 %v3349_v12, %v3321_v55  ;;  %v3298_v58 = vadd.f32 %v3297_v29, %v3269_v3 }
 0x2f8   :  { %v3384_v46 = vpop.f32.mrf.mxu0  ;;  %v3379_v13 = vadd.f32 %v3378_v9, %v3350_v36 }
 0x2fa   :  { %v3323_v11 = vpop.f32.mrf.mxu2 }
 0x2fb   :  { %v3324_v61 = vadd.f32 %v3323_v11, %v3295_v53 }
 0x2fd   :  { %v3352_v30 = vpop.f32.mrf.mxu3 }
 0x2fe   :  { %v3404_v31 = vpop.f32.mrf.mxu1  ;;  %v3353_v39 = vadd.f32 %v3352_v30, %v3324_v61 }
 0x2ff   :  { %v3405_v20 = vadd.f32 %v3404_v31, %v3376_v16 }
 0x300   :  { %v3491_v47 = vpop.f32.mrf.mxu0  ;;  %v3382_v10 = vadd.f32 %v3381_v38, %v3353_v39 }
 0x302   :  { %v3326_v15 = vpop.f32.mrf.mxu2 }
 0x303   :  { %v3327_v50 = vadd.f32 %v3326_v15, %v3298_v58 }
 0x305   :  { %v3355_v1 = vpop.f32.mrf.mxu3 }
 0x306   :  { %v3407_v22 = vpop.f32.mrf.mxu1  ;;  %v3356_v63 = vadd.f32 %v3355_v1, %v3327_v50 }
 0x307   :  { %v3408_v43 = vadd.f32 %v3407_v22, %v3379_v13 }
 0x308   :  { %v3494_v19 = vpop.f32.mrf.mxu0  ;;  %v3385_v35 = vadd.f32 %v3384_v46, %v3356_v63 }
 0x30a   :  { %v3433_v0 = vpop.f32.mrf.mxu2 }
 0x30b   :  { %v3434_v26 = vadd.f32 %v3433_v0, %v3405_v20 }
 0x30d   :  { %v3462_v44 = vpop.f32.mrf.mxu3 }
 0x30e   :  { %v3463_v33 = vadd.f32 %v3462_v44, %v3434_v26  ;;  %v3410_v51 = vpop.f32.mrf.mxu1 }
 0x30f   :  { %v3411_v41 = vadd.f32 %v3410_v51, %v3382_v10 }
 0x310   :  { %v3492_v5 = vadd.f32 %v3491_v47, %v3463_v33  ;;  %v3497_v9 = vpop.f32.mrf.mxu0 }
 0x312   :  { %3505 = vst.msk [vmem:[%s8439_s7 + $0x8] sm:$0xff] %vm3504_vm2, %v3492_v5  ;;  %v3436_v49 = vpop.f32.mrf.mxu2 }
 0x313   :  { %v3437_v57 = vadd.f32 %v3436_v49, %v3408_v43 }
 0x315   :  { %v3465_v7 = vpop.f32.mrf.mxu3 }
 0x316   :  { %v3466_v17 = vadd.f32 %v3465_v7, %v3437_v57  ;;  %v3413_v28 = vpop.f32.mrf.mxu1 }
 0x317   :  { %v3414_v18 = vadd.f32 %v3413_v28, %v3385_v35 }
 0x318   :  { %v3495_v62 = vadd.f32 %v3494_v19, %v3466_v17  ;;  %v3500_v27 = vpop.f32.mrf.mxu0 }
 0x31a   :  { %3507 = vst.msk [vmem:[%s8439_s7 + $0x18] sm:$0xff] %vm3504_vm2, %v3495_v62  ;;  %v3439_v34 = vpop.f32.mrf.mxu2 }
 0x31b   :  { %v3440_v60 = vadd.f32 %v3439_v34, %v3411_v41 }
 0x31d   :  { %v3468_v23 = vpop.f32.mrf.mxu3 }
 0x31e   :  { %v3469_v59 = vadd.f32 %v3468_v23, %v3440_v60 }
 0x320   :  { %v3498_v56 = vadd.f32 %v3497_v9, %v3469_v59 }
 0x322   :  { %3509 = vst.msk [vmem:[%s8439_s7 + $0x28] sm:$0xff] %vm3504_vm2, %v3498_v56  ;;  %v3442_v38 = vpop.f32.mrf.mxu2 }
 0x323   :  { %v3443_v12 = vadd.f32 %v3442_v38, %v3414_v18 }
 0x325   :  { %v3471_v29 = vpop.f32.mrf.mxu3 }
 0x326   :  { %v3472_v14 = vadd.f32 %v3471_v29, %v3443_v12 }
 0x328   :  { %v3501_v11 = vadd.f32 %v3500_v27, %v3472_v14 }
 0x32a   :  { %3511 = vst.msk [vmem:[%s8439_s7 + $0x38] sm:$0xff] %vm3504_vm2, %v3501_v11 }

</bundles_post_ra>
